<compile_context>
chip_gen: v7x
topology: tpu7x:2x2x1
jax: 0.10.0
libtpu: 0.0.40
codegen_flags: <defaults>
</compile_context>

<pallas_src>
import functools

import numpy as np
import jax
import jax.numpy as jnp
from jax.experimental import pallas as pl
from jax.experimental.pallas import tpu as pltpu


_LANE = 128
_SUBLANE = 8
# Frames-per-tile cap.  With bf16 frame tiles (2 signals x 2 pipeline buffers
# x 512 x 640 x 2B = 2.5 MiB), the resident bf16 (640, 768) DFT matrix, two
# (512, 384) f32 accumulators and the f32 intermediates, live VMEM stays well
# under ~25 MiB, comfortably inside v7x's 64 MiB (v5e/v6e have 128 MiB).
_TILE_F_MAX = 512


def _round_up(x, m):
    return (x + m - 1) // m * m


def _spec_loss_kernel(ft_ref, fp_ref, dft_ref, out_ref, acc_mag, acc_cplx,
                      *, gamma, nb_pad):
    """Accumulates [sum_mag_sq_err, sum_complex_sq_err] over frame tiles.

      ft_ref  : (tile_f, n_fft)  bf16  y_true frames of this tile (zero-padded
                                       rows allowed)
      fp_ref  : (tile_f, n_fft)  bf16  y_pred frames of this tile
      dft_ref : (n_fft, 2*nb_pad) bf16 [window*cos | -window*sin], bin axis
                                       zero-padded to a multiple of 128
      out_ref : (2,) SMEM f32         written once, on the last grid step
      acc_mag, acc_cplx : (tile_f, nb_pad) f32 VMEM scratch accumulators
    """
    i = pl.program_id(0)

    @pl.when(i == 0)
    def _init():
        acc_mag[...] = jnp.zeros_like(acc_mag)
        acc_cplx[...] = jnp.zeros_like(acc_cplx)

    # bf16 MXU matmuls with f32 accumulation: real+imag one-sided rDFT.
    spec_t = jnp.dot(ft_ref[...], dft_ref[...],
                     preferred_element_type=jnp.float32)  # (tile_f, 2*nb_pad)
    spec_p = jnp.dot(fp_ref[...], dft_ref[...],
                     preferred_element_type=jnp.float32)

    # nb_pad is a multiple of 128, so these slices are lane-group aligned.
    tr = spec_t[:, :nb_pad]
    ti = spec_t[:, nb_pad:]
    pr = spec_p[:, :nb_pad]
    pi = spec_p[:, nb_pad:]

    # Gamma compression in shared-log form:
    #   |X|_c = max(|X|, eps)**gamma        = exp(0.5*gamma*log(max(|X|^2, eps^2)))
    #   scale = |X|_c / max(|X|, eps)       = exp((0.5*gamma - 0.5)*log(max(|X|^2, eps^2)))
    # One log + two exps per spectrum; no sqrt, no divide.  Zero-padded bins
    # and zero-padded frame rows contribute exactly 0 to both sums (both the
    # true and pred sides see identical zeros, even in bf16).
    eps_sq = 1e-24  # (1e-12)**2
    sq_t = tr * tr + ti * ti
    sq_p = pr * pr + pi * pi
    lg_t = jnp.log(jnp.maximum(sq_t, eps_sq))
    lg_p = jnp.log(jnp.maximum(sq_p, eps_sq))

    t_abs_c = jnp.exp((0.5 * gamma) * lg_t)
    p_abs_c = jnp.exp((0.5 * gamma) * lg_p)
    mag_err = (t_abs_c - p_abs_c) ** 2

    t_scale = jnp.exp((0.5 * gamma - 0.5) * lg_t)
    p_scale = jnp.exp((0.5 * gamma - 0.5) * lg_p)
    cr = t_scale * tr - p_scale * pr
    ci = t_scale * ti - p_scale * pi

    # Elementwise accumulation only (VPU); no per-step XLU reduce or SMEM RMW.
    acc_mag[...] = acc_mag[...] + mag_err
    acc_cplx[...] = acc_cplx[...] + cr * cr + ci * ci

    @pl.when(i == pl.num_programs(0) - 1)
    def _finalize():
        out_ref[0] = jnp.sum(acc_mag[...])
        out_ref[1] = jnp.sum(acc_cplx[...])


@functools.lru_cache(maxsize=None)
def _windowed_dft_np(n_fft):
    """Periodic-Hann-windowed one-sided rDFT matrix, fused [real | imag] layout
    with the bin axis zero-padded up to a multiple of 128 lanes."""
    n_bins = n_fft // 2 + 1
    nb_pad = _round_up(n_bins, _LANE)
    n = np.arange(n_fft)[:, None].astype(np.float64)
    k = np.arange(n_bins)[None, :].astype(np.float64)
    ang = 2.0 * np.pi * n * k / n_fft
    # periodic Hann == torch.hann_window(n_fft) (periodic=True default)
    win = 0.5 - 0.5 * np.cos(2.0 * np.pi * np.arange(n_fft) / n_fft)
    dft = np.zeros((n_fft, 2 * nb_pad), np.float32)
    dft[:, :n_bins] = (win[:, None] * np.cos(ang)).astype(np.float32)
    dft[:, nb_pad:nb_pad + n_bins] = (win[:, None] * -np.sin(ang)).astype(np.float32)
    return dft, n_bins, nb_pad


def _frame(x, n_fft, hop):
    """(B, N) -> (B*F, n_fft) overlapping frames (no centering / padding),
    built from non-overlapping hop-chunks + concat (no XLA gather).  The Hann
    window is folded into the DFT matrices, not applied here."""
    # TODO(synk): exact Stft framing convention (centering/padding/normalization)
    # of the reference implementation is unavailable; using no-center, no-norm.
    B, N = x.shape
    r = n_fft // hop
    assert r * hop == n_fft
    n_chunks = N // hop
    n_frames = n_chunks - r + 1
    chunks = x[:, :n_chunks * hop].reshape(B, n_chunks, hop)
    frames = jnp.concatenate(
        [chunks[:, j:j + n_frames, :] for j in range(r)], axis=-1)  # (B, F, n_fft)
    return frames.reshape(B * n_frames, n_fft)


def _spec_err_sums(y_true_bf16, y_pred_bf16, n_fft, hop, gamma):
    """Returns (sum_mag_sq_err, sum_complex_sq_err, n_true_bins_total)."""
    dft_np, n_bins, nb_pad = _windowed_dft_np(n_fft)
    dft = jnp.asarray(dft_np, dtype=jnp.bfloat16)

    # Frames are built (and DMA'd to the kernel) in bf16: halves frame HBM
    # traffic; the matmul accumulates in f32.
    ft = _frame(y_true_bf16, n_fft, hop)   # (M, n_fft) bf16
    fp = _frame(y_pred_bf16, n_fft, hop)
    m = ft.shape[0]

    tile_f = min(_TILE_F_MAX, _round_up(m, _SUBLANE))
    m_pad = _round_up(m, tile_f)
    num_tiles = m_pad // tile_f

    if m_pad != m:
        ft = jnp.pad(ft, ((0, m_pad - m), (0, 0)))
        fp = jnp.pad(fp, ((0, m_pad - m), (0, 0)))

    # TODO(synk): for long audio, decompose frames@D into hop-chunk matmuls to
    # remove the 2-4x duplicated frame HBM traffic from overlapping frames
    # (most valuable on v5e's ~0.82 TB/s HBM).
    # TODO(synk): on v7x, split the frame grid axis over both TensorCores
    # (parallel axis + per-core partial sums) instead of the serial scratch
    # accumulator; neutral on single-TC v5e/v6e.
    # TODO(synk): merge the 5 pallas_calls (CCMSE + 4 MRS resolutions) into a
    # single launch via scalar-prefetched per-resolution offsets; mainly a
    # latency win for short clips.

    flops = int(2 * (2 * m_pad) * n_fft * (2 * nb_pad))
    transcendentals = int(6 * m_pad * nb_pad)
    bytes_accessed = int((ft.size + fp.size + dft.size) * 2 + 8)

    kernel = functools.partial(_spec_loss_kernel, gamma=gamma, nb_pad=nb_pad)
    sums = pl.pallas_call(
        kernel,
        out_shape=jax.ShapeDtypeStruct((2,), jnp.float32),
        grid_spec=pltpu.PrefetchScalarGridSpec(
            num_scalar_prefetch=0,
            grid=(num_tiles,),
            in_specs=[
                pl.BlockSpec((tile_f, n_fft), lambda i: (i, 0)),     # true frames
                pl.BlockSpec((tile_f, n_fft), lambda i: (i, 0)),     # pred frames
                pl.BlockSpec((n_fft, 2 * nb_pad), lambda i: (0, 0)),  # resident DFT
            ],
            out_specs=pl.BlockSpec(memory_space=pltpu.MemorySpace.SMEM),
            scratch_shapes=[
                pltpu.VMEM((tile_f, nb_pad), jnp.float32),   # acc_mag
                pltpu.VMEM((tile_f, nb_pad), jnp.float32),   # acc_cplx
            ],
        ),
        compiler_params=pltpu.CompilerParams(
            dimension_semantics=("arbitrary",),   # accumulation across tiles
            vmem_limit_bytes=48 * 1024 * 1024,    # headroom under v7x's 64 MiB
        ),
        cost_estimate=pl.CostEstimate(
            flops=flops, transcendentals=transcendentals,
            bytes_accessed=bytes_accessed),
    )(ft, fp, dft)

    count = m * n_bins  # true (unpadded) element count for normalization
    return sums[0], sums[1], count


def combined_loss(y_true, y_pred, *, winlen, fs, f_fade_low, f_fade_high,
                  lf_complex_loss_weight, n_ffts=(80, 160, 320, 640),
                  gamma=0.3, mrspec_lambda=1000.0, ccmse_lambda=500.0):
    # bf16 audio -> bf16 frames for the MXU matmuls; all accumulation is f32.
    yt = y_true.astype(jnp.bfloat16)
    yp = y_pred.astype(jnp.bfloat16)

    # --- ComplexCompressedSpecMSE -------------------------------------------
    # STFT(winlen, hop=winlen//2, hann(winlen)), then
    # SpectralLoss(gamma=0.3, f_mag=1-w, f_complex=w, f_under=1).
    # fs / f_fade_low / f_fade_high are stored but unused in the forward pass.
    s_mag, s_cplx, cnt = _spec_err_sums(yt, yp, winlen, winlen // 2, 0.3)
    f_m = 1.0 - lf_complex_loss_weight
    f_c = lf_complex_loss_weight
    loss1 = f_m * (s_mag / cnt) + f_c * (s_cplx / (2.0 * cnt))

    # --- MultiResSpecLoss(n_ffts, gamma, factor=mrspec_lambda,
    #                      f_complex=mrspec_lambda) ---------------------------
    loss2 = jnp.float32(0.0)
    for n_fft in n_ffts:
        s_mag_r, s_cplx_r, cnt_r = _spec_err_sums(yt, yp, n_fft, n_fft // 4, gamma)
        loss2 = loss2 + mrspec_lambda * (s_mag_r / cnt_r) \
                      + mrspec_lambda * (s_cplx_r / (2.0 * cnt_r))

    return ccmse_lambda * loss1 + loss2


if __name__ == "__main__":
    key = jax.random.PRNGKey(0)
    k1, k2 = jax.random.split(key)
    B, N = 2, 1280                      # small batch of short audio clips
    y_true = jax.random.normal(k1, (B, N), dtype=jnp.float32)
    y_pred = jax.random.normal(k2, (B, N), dtype=jnp.float32)

    loss_fn = jax.jit(functools.partial(
        combined_loss,
        winlen=320, fs=16000, f_fade_low=0, f_fade_high=8000,
        lf_complex_loss_weight=0.3))
    loss = loss_fn(y_true, y_pred)
    jax.block_until_ready(loss)
    print("KERNEL_OK")
</pallas_src>

<mosaic_0001>
module attributes {stable_mosaic.version = 11 : i64} {
  func.func @_spec_loss_kernel(%arg0: i32, %arg1: memref<64x160xbf16, #tpu.memory_space<vmem>>, %arg2: memref<64x160xbf16, #tpu.memory_space<vmem>>, %arg3: memref<160x256xbf16, #tpu.memory_space<vmem>>, %arg4: memref<2xf32, #tpu.memory_space<smem>>, %arg5: memref<64x128xf32, #tpu.memory_space<vmem>>, %arg6: memref<64x128xf32, #tpu.memory_space<vmem>>) attributes {dimension_semantics = [#tpu.dimension_semantics<arbitrary>], iteration_bounds = array<i64: 1>, scalar_prefetch = 0 : i64, scratch_operands = 2 : i64, tpu.core_type = #tpu.core_type<tc>, window_params = [{transform_indices = @transform_0, window_bounds = array<i64: 64, 160>}, {transform_indices = @transform_1, window_bounds = array<i64: 64, 160>}, {pipeline_mode = #tpu.pipeline_mode<synchronous>, transform_indices = @transform_2, window_bounds = array<i64: 160, 256>}, {transform_indices = @transform_3, window_bounds = array<i64: 2>}]} {
    %c0_i32 = arith.constant 0 : i32
    %0 = arith.cmpi eq, %arg0, %c0_i32 : i32
    %1 = arith.extui %0 : i1 to i32
    %c0_i32_0 = arith.constant 0 : i32
    %2 = arith.cmpi ne, %1, %c0_i32_0 : i32
    scf.if %2 {
      %cst_25 = arith.constant 0.000000e+00 : f32
      %57 = vector.broadcast %cst_25 : f32 to vector<64x128xf32>
      %c0_26 = arith.constant 0 : index
      %c0_27 = arith.constant 0 : index
      %58 = vector.load %arg5[%c0_26, %c0_27] : memref<64x128xf32, #tpu.memory_space<vmem>>, vector<64x128xf32>
      tpu.vector_store %arg5[%c0_26, %c0_27], %57 {strides = array<i32>} : memref<64x128xf32, #tpu.memory_space<vmem>>, vector<64x128xf32>,
      %cst_28 = arith.constant 0.000000e+00 : f32
      %59 = vector.broadcast %cst_28 : f32 to vector<64x128xf32>
      %c0_29 = arith.constant 0 : index
      %c0_30 = arith.constant 0 : index
      %60 = vector.load %arg6[%c0_29, %c0_30] : memref<64x128xf32, #tpu.memory_space<vmem>>, vector<64x128xf32>
      tpu.vector_store %arg6[%c0_29, %c0_30], %59 {strides = array<i32>} : memref<64x128xf32, #tpu.memory_space<vmem>>, vector<64x128xf32>,
    } else {
    }
    %c0 = arith.constant 0 : index
    %c0_1 = arith.constant 0 : index
    %3 = vector.load %arg1[%c0, %c0_1] : memref<64x160xbf16, #tpu.memory_space<vmem>>, vector<64x160xbf16>
    %c0_2 = arith.constant 0 : index
    %c0_3 = arith.constant 0 : index
    %4 = vector.load %arg3[%c0_2, %c0_3] : memref<160x256xbf16, #tpu.memory_space<vmem>>, vector<160x256xbf16>
    %cst = arith.constant dense<0.000000e+00> : vector<64x256xf32>
    %5 = tpu.matmul %3, %4, %cst {dimension_numbers = #tpu.dot_dimension_numbers<[1], [0], [0], [1], [0, 0, 1, 1], [], []>} : vector<64x160xbf16>, vector<160x256xbf16>, vector<64x256xf32> -> vector<64x256xf32>
    %c0_4 = arith.constant 0 : index
    %c0_5 = arith.constant 0 : index
    %6 = vector.load %arg2[%c0_4, %c0_5] : memref<64x160xbf16, #tpu.memory_space<vmem>>, vector<64x160xbf16>
    %c0_6 = arith.constant 0 : index
    %c0_7 = arith.constant 0 : index
    %7 = vector.load %arg3[%c0_6, %c0_7] : memref<160x256xbf16, #tpu.memory_space<vmem>>, vector<160x256xbf16>
    %cst_8 = arith.constant dense<0.000000e+00> : vector<64x256xf32>
    %8 = tpu.matmul %6, %7, %cst_8 {dimension_numbers = #tpu.dot_dimension_numbers<[1], [0], [0], [1], [0, 0, 1, 1], [], []>} : vector<64x160xbf16>, vector<160x256xbf16>, vector<64x256xf32> -> vector<64x256xf32>
    %9 = vector.extract_strided_slice %5 {offsets = [0, 0], sizes = [64, 128], strides = [1, 1]} : vector<64x256xf32> to vector<64x128xf32>
    %10 = vector.extract_strided_slice %5 {offsets = [0, 128], sizes = [64, 128], strides = [1, 1]} : vector<64x256xf32> to vector<64x128xf32>
    %11 = vector.extract_strided_slice %8 {offsets = [0, 0], sizes = [64, 128], strides = [1, 1]} : vector<64x256xf32> to vector<64x128xf32>
    %12 = vector.extract_strided_slice %8 {offsets = [0, 128], sizes = [64, 128], strides = [1, 1]} : vector<64x256xf32> to vector<64x128xf32>
    %13 = arith.mulf %9, %9 : vector<64x128xf32>
    %14 = arith.mulf %10, %10 : vector<64x128xf32>
    %15 = arith.addf %13, %14 : vector<64x128xf32>
    %16 = arith.mulf %11, %11 : vector<64x128xf32>
    %17 = arith.mulf %12, %12 : vector<64x128xf32>
    %18 = arith.addf %16, %17 : vector<64x128xf32>
    %cst_9 = arith.constant 1.000000e-24 : f32
    %19 = vector.broadcast %cst_9 : f32 to vector<64x128xf32>
    %20 = arith.maximumf %15, %19 : vector<64x128xf32>
    %21 = math.log %20 : vector<64x128xf32>
    %cst_10 = arith.constant 1.000000e-24 : f32
    %22 = vector.broadcast %cst_10 : f32 to vector<64x128xf32>
    %23 = arith.maximumf %18, %22 : vector<64x128xf32>
    %24 = math.log %23 : vector<64x128xf32>
    %cst_11 = arith.constant 1.500000e-01 : f32
    %25 = vector.broadcast %cst_11 : f32 to vector<64x128xf32>
    %26 = arith.mulf %25, %21 : vector<64x128xf32>
    %27 = math.exp %26 : vector<64x128xf32>
    %cst_12 = arith.constant 1.500000e-01 : f32
    %28 = vector.broadcast %cst_12 : f32 to vector<64x128xf32>
    %29 = arith.mulf %28, %24 : vector<64x128xf32>
    %30 = math.exp %29 : vector<64x128xf32>
    %31 = arith.subf %27, %30 : vector<64x128xf32>
    %32 = arith.mulf %31, %31 : vector<64x128xf32>
    %cst_13 = arith.constant -3.500000e-01 : f32
    %33 = vector.broadcast %cst_13 : f32 to vector<64x128xf32>
    %34 = arith.mulf %33, %21 : vector<64x128xf32>
    %35 = math.exp %34 : vector<64x128xf32>
    %cst_14 = arith.constant -3.500000e-01 : f32
    %36 = vector.broadcast %cst_14 : f32 to vector<64x128xf32>
    %37 = arith.mulf %36, %24 : vector<64x128xf32>
    %38 = math.exp %37 : vector<64x128xf32>
    %39 = arith.mulf %35, %9 : vector<64x128xf32>
    %40 = arith.mulf %38, %11 : vector<64x128xf32>
    %41 = arith.subf %39, %40 : vector<64x128xf32>
    %42 = arith.mulf %35, %10 : vector<64x128xf32>
    %43 = arith.mulf %38, %12 : vector<64x128xf32>
    %44 = arith.subf %42, %43 : vector<64x128xf32>
    %c0_15 = arith.constant 0 : index
    %c0_16 = arith.constant 0 : index
    %45 = vector.load %arg5[%c0_15, %c0_16] : memref<64x128xf32, #tpu.memory_space<vmem>>, vector<64x128xf32>
    %46 = arith.addf %45, %32 : vector<64x128xf32>
    %c0_17 = arith.constant 0 : index
    %c0_18 = arith.constant 0 : index
    %47 = vector.load %arg5[%c0_17, %c0_18] : memref<64x128xf32, #tpu.memory_space<vmem>>, vector<64x128xf32>
    tpu.vector_store %arg5[%c0_17, %c0_18], %46 {strides = array<i32>} : memref<64x128xf32, #tpu.memory_space<vmem>>, vector<64x128xf32>,
    %c0_19 = arith.constant 0 : index
    %c0_20 = arith.constant 0 : index
    %48 = vector.load %arg6[%c0_19, %c0_20] : memref<64x128xf32, #tpu.memory_space<vmem>>, vector<64x128xf32>
    %49 = arith.mulf %41, %41 : vector<64x128xf32>
    %50 = arith.addf %48, %49 : vector<64x128xf32>
    %51 = arith.mulf %44, %44 : vector<64x128xf32>
    %52 = arith.addf %50, %51 : vector<64x128xf32>
    %c0_21 = arith.constant 0 : index
    %c0_22 = arith.constant 0 : index
    %53 = vector.load %arg6[%c0_21, %c0_22] : memref<64x128xf32, #tpu.memory_space<vmem>>, vector<64x128xf32>
    tpu.vector_store %arg6[%c0_21, %c0_22], %52 {strides = array<i32>} : memref<64x128xf32, #tpu.memory_space<vmem>>, vector<64x128xf32>,
    %c0_i32_23 = arith.constant 0 : i32
    %54 = arith.cmpi eq, %arg0, %c0_i32_23 : i32
    %55 = arith.extui %54 : i1 to i32
    %c0_i32_24 = arith.constant 0 : i32
    %56 = arith.cmpi ne, %55, %c0_i32_24 : i32
    scf.if %56 {
      %c0_25 = arith.constant 0 : index
      %c0_26 = arith.constant 0 : index
      %57 = vector.load %arg5[%c0_25, %c0_26] : memref<64x128xf32, #tpu.memory_space<vmem>>, vector<64x128xf32>
      %58 = vector.shape_cast %57 : vector<64x128xf32> to vector<1x64x128xf32>
      %cst_27 = arith.constant dense<0.000000e+00> : vector<1xf32>
      %59 = vector.multi_reduction <add>, %58, %cst_27 [1, 2] : vector<1x64x128xf32> to vector<1xf32>
      %60 = vector.shape_cast %59 : vector<1xf32> to vector<1x1x1xf32>
      %61 = vector.extract %60[0, 0, 0] : f32 from vector<1x1x1xf32>
      %c0_28 = arith.constant 0 : index
      %62 = memref.load %arg4[%c0_28] : memref<2xf32, #tpu.memory_space<smem>>
      memref.store %61, %arg4[%c0_28] : memref<2xf32, #tpu.memory_space<smem>>
      %c0_29 = arith.constant 0 : index
      %c0_30 = arith.constant 0 : index
      %63 = vector.load %arg6[%c0_29, %c0_30] : memref<64x128xf32, #tpu.memory_space<vmem>>, vector<64x128xf32>
      %64 = vector.shape_cast %63 : vector<64x128xf32> to vector<1x64x128xf32>
      %cst_31 = arith.constant dense<0.000000e+00> : vector<1xf32>
      %65 = vector.multi_reduction <add>, %64, %cst_31 [1, 2] : vector<1x64x128xf32> to vector<1xf32>
      %66 = vector.shape_cast %65 : vector<1xf32> to vector<1x1x1xf32>
      %67 = vector.extract %66[0, 0, 0] : f32 from vector<1x1x1xf32>
      %c1 = arith.constant 1 : index
      %68 = memref.load %arg4[%c1] : memref<2xf32, #tpu.memory_space<smem>>
      memref.store %67, %arg4[%c1] : memref<2xf32, #tpu.memory_space<smem>>
    } else {
    }
    return
  }
  func.func @transform_0(%arg0: i32) -> (i32, i32) {
    %c0_i32 = arith.constant 0 : i32
    %c0_i32_0 = arith.constant 0 : i32
    return %arg0, %c0_i32 : i32, i32
  }
  func.func @transform_1(%arg0: i32) -> (i32, i32) {
    %c0_i32 = arith.constant 0 : i32
    %c0_i32_0 = arith.constant 0 : i32
    return %arg0, %c0_i32 : i32, i32
  }
  func.func @transform_2(%arg0: i32) -> (i32, i32) {
    %c0_i32 = arith.constant 0 : i32
    %c0_i32_0 = arith.constant 0 : i32
    %c0_i32_1 = arith.constant 0 : i32
    return %c0_i32, %c0_i32_0 : i32, i32
  }
  func.func @transform_3(%arg0: i32) -> i32 {
    %c0_i32 = arith.constant 0 : i32
    %c0_i32_0 = arith.constant 0 : i32
    return %c0_i32 : i32
  }
}

module attributes {stable_mosaic.version = 11 : i64} {
  func.func @_spec_loss_kernel(%arg0: i32, %arg1: memref<32x320xbf16, #tpu.memory_space<vmem>>, %arg2: memref<32x320xbf16, #tpu.memory_space<vmem>>, %arg3: memref<320x512xbf16, #tpu.memory_space<vmem>>, %arg4: memref<2xf32, #tpu.memory_space<smem>>, %arg5: memref<32x256xf32, #tpu.memory_space<vmem>>, %arg6: memref<32x256xf32, #tpu.memory_space<vmem>>) attributes {dimension_semantics = [#tpu.dimension_semantics<arbitrary>], iteration_bounds = array<i64: 1>, scalar_prefetch = 0 : i64, scratch_operands = 2 : i64, tpu.core_type = #tpu.core_type<tc>, window_params = [{transform_indices = @transform_0, window_bounds = array<i64: 32, 320>}, {transform_indices = @transform_1, window_bounds = array<i64: 32, 320>}, {pipeline_mode = #tpu.pipeline_mode<synchronous>, transform_indices = @transform_2, window_bounds = array<i64: 320, 512>}, {transform_indices = @transform_3, window_bounds = array<i64: 2>}]} {
    %c0_i32 = arith.constant 0 : i32
    %0 = arith.cmpi eq, %arg0, %c0_i32 : i32
    %1 = arith.extui %0 : i1 to i32
    %c0_i32_0 = arith.constant 0 : i32
    %2 = arith.cmpi ne, %1, %c0_i32_0 : i32
    scf.if %2 {
      %cst_25 = arith.constant 0.000000e+00 : f32
      %57 = vector.broadcast %cst_25 : f32 to vector<32x256xf32>
      %c0_26 = arith.constant 0 : index
      %c0_27 = arith.constant 0 : index
      %58 = vector.load %arg5[%c0_26, %c0_27] : memref<32x256xf32, #tpu.memory_space<vmem>>, vector<32x256xf32>
      tpu.vector_store %arg5[%c0_26, %c0_27], %57 {strides = array<i32>} : memref<32x256xf32, #tpu.memory_space<vmem>>, vector<32x256xf32>,
      %cst_28 = arith.constant 0.000000e+00 : f32
      %59 = vector.broadcast %cst_28 : f32 to vector<32x256xf32>
      %c0_29 = arith.constant 0 : index
      %c0_30 = arith.constant 0 : index
      %60 = vector.load %arg6[%c0_29, %c0_30] : memref<32x256xf32, #tpu.memory_space<vmem>>, vector<32x256xf32>
      tpu.vector_store %arg6[%c0_29, %c0_30], %59 {strides = array<i32>} : memref<32x256xf32, #tpu.memory_space<vmem>>, vector<32x256xf32>,
    } else {
    }
    %c0 = arith.constant 0 : index
    %c0_1 = arith.constant 0 : index
    %3 = vector.load %arg1[%c0, %c0_1] : memref<32x320xbf16, #tpu.memory_space<vmem>>, vector<32x320xbf16>
    %c0_2 = arith.constant 0 : index
    %c0_3 = arith.constant 0 : index
    %4 = vector.load %arg3[%c0_2, %c0_3] : memref<320x512xbf16, #tpu.memory_space<vmem>>, vector<320x512xbf16>
    %cst = arith.constant dense<0.000000e+00> : vector<32x512xf32>
    %5 = tpu.matmul %3, %4, %cst {dimension_numbers = #tpu.dot_dimension_numbers<[1], [0], [0], [1], [0, 0, 1, 1], [], []>} : vector<32x320xbf16>, vector<320x512xbf16>, vector<32x512xf32> -> vector<32x512xf32>
    %c0_4 = arith.constant 0 : index
    %c0_5 = arith.constant 0 : index
    %6 = vector.load %arg2[%c0_4, %c0_5] : memref<32x320xbf16, #tpu.memory_space<vmem>>, vector<32x320xbf16>
    %c0_6 = arith.constant 0 : index
    %c0_7 = arith.constant 0 : index
    %7 = vector.load %arg3[%c0_6, %c0_7] : memref<320x512xbf16, #tpu.memory_space<vmem>>, vector<320x512xbf16>
    %cst_8 = arith.constant dense<0.000000e+00> : vector<32x512xf32>
    %8 = tpu.matmul %6, %7, %cst_8 {dimension_numbers = #tpu.dot_dimension_numbers<[1], [0], [0], [1], [0, 0, 1, 1], [], []>} : vector<32x320xbf16>, vector<320x512xbf16>, vector<32x512xf32> -> vector<32x512xf32>
    %9 = vector.extract_strided_slice %5 {offsets = [0, 0], sizes = [32, 256], strides = [1, 1]} : vector<32x512xf32> to vector<32x256xf32>
    %10 = vector.extract_strided_slice %5 {offsets = [0, 256], sizes = [32, 256], strides = [1, 1]} : vector<32x512xf32> to vector<32x256xf32>
    %11 = vector.extract_strided_slice %8 {offsets = [0, 0], sizes = [32, 256], strides = [1, 1]} : vector<32x512xf32> to vector<32x256xf32>
    %12 = vector.extract_strided_slice %8 {offsets = [0, 256], sizes = [32, 256], strides = [1, 1]} : vector<32x512xf32> to vector<32x256xf32>
    %13 = arith.mulf %9, %9 : vector<32x256xf32>
    %14 = arith.mulf %10, %10 : vector<32x256xf32>
    %15 = arith.addf %13, %14 : vector<32x256xf32>
    %16 = arith.mulf %11, %11 : vector<32x256xf32>
    %17 = arith.mulf %12, %12 : vector<32x256xf32>
    %18 = arith.addf %16, %17 : vector<32x256xf32>
    %cst_9 = arith.constant 1.000000e-24 : f32
    %19 = vector.broadcast %cst_9 : f32 to vector<32x256xf32>
    %20 = arith.maximumf %15, %19 : vector<32x256xf32>
    %21 = math.log %20 : vector<32x256xf32>
    %cst_10 = arith.constant 1.000000e-24 : f32
    %22 = vector.broadcast %cst_10 : f32 to vector<32x256xf32>
    %23 = arith.maximumf %18, %22 : vector<32x256xf32>
    %24 = math.log %23 : vector<32x256xf32>
    %cst_11 = arith.constant 1.500000e-01 : f32
    %25 = vector.broadcast %cst_11 : f32 to vector<32x256xf32>
    %26 = arith.mulf %25, %21 : vector<32x256xf32>
    %27 = math.exp %26 : vector<32x256xf32>
    %cst_12 = arith.constant 1.500000e-01 : f32
    %28 = vector.broadcast %cst_12 : f32 to vector<32x256xf32>
    %29 = arith.mulf %28, %24 : vector<32x256xf32>
    %30 = math.exp %29 : vector<32x256xf32>
    %31 = arith.subf %27, %30 : vector<32x256xf32>
    %32 = arith.mulf %31, %31 : vector<32x256xf32>
    %cst_13 = arith.constant -3.500000e-01 : f32
    %33 = vector.broadcast %cst_13 : f32 to vector<32x256xf32>
    %34 = arith.mulf %33, %21 : vector<32x256xf32>
    %35 = math.exp %34 : vector<32x256xf32>
    %cst_14 = arith.constant -3.500000e-01 : f32
    %36 = vector.broadcast %cst_14 : f32 to vector<32x256xf32>
    %37 = arith.mulf %36, %24 : vector<32x256xf32>
    %38 = math.exp %37 : vector<32x256xf32>
    %39 = arith.mulf %35, %9 : vector<32x256xf32>
    %40 = arith.mulf %38, %11 : vector<32x256xf32>
    %41 = arith.subf %39, %40 : vector<32x256xf32>
    %42 = arith.mulf %35, %10 : vector<32x256xf32>
    %43 = arith.mulf %38, %12 : vector<32x256xf32>
    %44 = arith.subf %42, %43 : vector<32x256xf32>
    %c0_15 = arith.constant 0 : index
    %c0_16 = arith.constant 0 : index
    %45 = vector.load %arg5[%c0_15, %c0_16] : memref<32x256xf32, #tpu.memory_space<vmem>>, vector<32x256xf32>
    %46 = arith.addf %45, %32 : vector<32x256xf32>
    %c0_17 = arith.constant 0 : index
    %c0_18 = arith.constant 0 : index
    %47 = vector.load %arg5[%c0_17, %c0_18] : memref<32x256xf32, #tpu.memory_space<vmem>>, vector<32x256xf32>
    tpu.vector_store %arg5[%c0_17, %c0_18], %46 {strides = array<i32>} : memref<32x256xf32, #tpu.memory_space<vmem>>, vector<32x256xf32>,
    %c0_19 = arith.constant 0 : index
    %c0_20 = arith.constant 0 : index
    %48 = vector.load %arg6[%c0_19, %c0_20] : memref<32x256xf32, #tpu.memory_space<vmem>>, vector<32x256xf32>
    %49 = arith.mulf %41, %41 : vector<32x256xf32>
    %50 = arith.addf %48, %49 : vector<32x256xf32>
    %51 = arith.mulf %44, %44 : vector<32x256xf32>
    %52 = arith.addf %50, %51 : vector<32x256xf32>
    %c0_21 = arith.constant 0 : index
    %c0_22 = arith.constant 0 : index
    %53 = vector.load %arg6[%c0_21, %c0_22] : memref<32x256xf32, #tpu.memory_space<vmem>>, vector<32x256xf32>
    tpu.vector_store %arg6[%c0_21, %c0_22], %52 {strides = array<i32>} : memref<32x256xf32, #tpu.memory_space<vmem>>, vector<32x256xf32>,
    %c0_i32_23 = arith.constant 0 : i32
    %54 = arith.cmpi eq, %arg0, %c0_i32_23 : i32
    %55 = arith.extui %54 : i1 to i32
    %c0_i32_24 = arith.constant 0 : i32
    %56 = arith.cmpi ne, %55, %c0_i32_24 : i32
    scf.if %56 {
      %c0_25 = arith.constant 0 : index
      %c0_26 = arith.constant 0 : index
      %57 = vector.load %arg5[%c0_25, %c0_26] : memref<32x256xf32, #tpu.memory_space<vmem>>, vector<32x256xf32>
      %58 = vector.shape_cast %57 : vector<32x256xf32> to vector<1x32x256xf32>
      %cst_27 = arith.constant dense<0.000000e+00> : vector<1xf32>
      %59 = vector.multi_reduction <add>, %58, %cst_27 [1, 2] : vector<1x32x256xf32> to vector<1xf32>
      %60 = vector.shape_cast %59 : vector<1xf32> to vector<1x1x1xf32>
      %61 = vector.extract %60[0, 0, 0] : f32 from vector<1x1x1xf32>
      %c0_28 = arith.constant 0 : index
      %62 = memref.load %arg4[%c0_28] : memref<2xf32, #tpu.memory_space<smem>>
      memref.store %61, %arg4[%c0_28] : memref<2xf32, #tpu.memory_space<smem>>
      %c0_29 = arith.constant 0 : index
      %c0_30 = arith.constant 0 : index
      %63 = vector.load %arg6[%c0_29, %c0_30] : memref<32x256xf32, #tpu.memory_space<vmem>>, vector<32x256xf32>
      %64 = vector.shape_cast %63 : vector<32x256xf32> to vector<1x32x256xf32>
      %cst_31 = arith.constant dense<0.000000e+00> : vector<1xf32>
      %65 = vector.multi_reduction <add>, %64, %cst_31 [1, 2] : vector<1x32x256xf32> to vector<1xf32>
      %66 = vector.shape_cast %65 : vector<1xf32> to vector<1x1x1xf32>
      %67 = vector.extract %66[0, 0, 0] : f32 from vector<1x1x1xf32>
      %c1 = arith.constant 1 : index
      %68 = memref.load %arg4[%c1] : memref<2xf32, #tpu.memory_space<smem>>
      memref.store %67, %arg4[%c1] : memref<2xf32, #tpu.memory_space<smem>>
    } else {
    }
    return
  }
  func.func @transform_0(%arg0: i32) -> (i32, i32) {
    %c0_i32 = arith.constant 0 : i32
    %c0_i32_0 = arith.constant 0 : i32
    return %arg0, %c0_i32 : i32, i32
  }
  func.func @transform_1(%arg0: i32) -> (i32, i32) {
    %c0_i32 = arith.constant 0 : i32
    %c0_i32_0 = arith.constant 0 : i32
    return %arg0, %c0_i32 : i32, i32
  }
  func.func @transform_2(%arg0: i32) -> (i32, i32) {
    %c0_i32 = arith.constant 0 : i32
    %c0_i32_0 = arith.constant 0 : i32
    %c0_i32_1 = arith.constant 0 : i32
    return %c0_i32, %c0_i32_0 : i32, i32
  }
  func.func @transform_3(%arg0: i32) -> i32 {
    %c0_i32 = arith.constant 0 : i32
    %c0_i32_0 = arith.constant 0 : i32
    return %c0_i32 : i32
  }
}

module attributes {stable_mosaic.version = 11 : i64} {
  func.func @_spec_loss_kernel(%arg0: i32, %arg1: memref<128x80xbf16, #tpu.memory_space<vmem>>, %arg2: memref<128x80xbf16, #tpu.memory_space<vmem>>, %arg3: memref<80x256xbf16, #tpu.memory_space<vmem>>, %arg4: memref<2xf32, #tpu.memory_space<smem>>, %arg5: memref<128x128xf32, #tpu.memory_space<vmem>>, %arg6: memref<128x128xf32, #tpu.memory_space<vmem>>) attributes {dimension_semantics = [#tpu.dimension_semantics<arbitrary>], iteration_bounds = array<i64: 1>, scalar_prefetch = 0 : i64, scratch_operands = 2 : i64, tpu.core_type = #tpu.core_type<tc>, window_params = [{transform_indices = @transform_0, window_bounds = array<i64: 128, 80>}, {transform_indices = @transform_1, window_bounds = array<i64: 128, 80>}, {pipeline_mode = #tpu.pipeline_mode<synchronous>, transform_indices = @transform_2, window_bounds = array<i64: 80, 256>}, {transform_indices = @transform_3, window_bounds = array<i64: 2>}]} {
    %c0_i32 = arith.constant 0 : i32
    %0 = arith.cmpi eq, %arg0, %c0_i32 : i32
    %1 = arith.extui %0 : i1 to i32
    %c0_i32_0 = arith.constant 0 : i32
    %2 = arith.cmpi ne, %1, %c0_i32_0 : i32
    scf.if %2 {
      %cst_25 = arith.constant 0.000000e+00 : f32
      %57 = vector.broadcast %cst_25 : f32 to vector<128x128xf32>
      %c0_26 = arith.constant 0 : index
      %c0_27 = arith.constant 0 : index
      %58 = vector.load %arg5[%c0_26, %c0_27] : memref<128x128xf32, #tpu.memory_space<vmem>>, vector<128x128xf32>
      tpu.vector_store %arg5[%c0_26, %c0_27], %57 {strides = array<i32>} : memref<128x128xf32, #tpu.memory_space<vmem>>, vector<128x128xf32>,
      %cst_28 = arith.constant 0.000000e+00 : f32
      %59 = vector.broadcast %cst_28 : f32 to vector<128x128xf32>
      %c0_29 = arith.constant 0 : index
      %c0_30 = arith.constant 0 : index
      %60 = vector.load %arg6[%c0_29, %c0_30] : memref<128x128xf32, #tpu.memory_space<vmem>>, vector<128x128xf32>
      tpu.vector_store %arg6[%c0_29, %c0_30], %59 {strides = array<i32>} : memref<128x128xf32, #tpu.memory_space<vmem>>, vector<128x128xf32>,
    } else {
    }
    %c0 = arith.constant 0 : index
    %c0_1 = arith.constant 0 : index
    %3 = vector.load %arg1[%c0, %c0_1] : memref<128x80xbf16, #tpu.memory_space<vmem>>, vector<128x80xbf16>
    %c0_2 = arith.constant 0 : index
    %c0_3 = arith.constant 0 : index
    %4 = vector.load %arg3[%c0_2, %c0_3] : memref<80x256xbf16, #tpu.memory_space<vmem>>, vector<80x256xbf16>
    %cst = arith.constant dense<0.000000e+00> : vector<128x256xf32>
    %5 = tpu.matmul %3, %4, %cst {dimension_numbers = #tpu.dot_dimension_numbers<[1], [0], [0], [1], [0, 0, 1, 1], [], []>} : vector<128x80xbf16>, vector<80x256xbf16>, vector<128x256xf32> -> vector<128x256xf32>
    %c0_4 = arith.constant 0 : index
    %c0_5 = arith.constant 0 : index
    %6 = vector.load %arg2[%c0_4, %c0_5] : memref<128x80xbf16, #tpu.memory_space<vmem>>, vector<128x80xbf16>
    %c0_6 = arith.constant 0 : index
    %c0_7 = arith.constant 0 : index
    %7 = vector.load %arg3[%c0_6, %c0_7] : memref<80x256xbf16, #tpu.memory_space<vmem>>, vector<80x256xbf16>
    %cst_8 = arith.constant dense<0.000000e+00> : vector<128x256xf32>
    %8 = tpu.matmul %6, %7, %cst_8 {dimension_numbers = #tpu.dot_dimension_numbers<[1], [0], [0], [1], [0, 0, 1, 1], [], []>} : vector<128x80xbf16>, vector<80x256xbf16>, vector<128x256xf32> -> vector<128x256xf32>
    %9 = vector.extract_strided_slice %5 {offsets = [0, 0], sizes = [128, 128], strides = [1, 1]} : vector<128x256xf32> to vector<128x128xf32>
    %10 = vector.extract_strided_slice %5 {offsets = [0, 128], sizes = [128, 128], strides = [1, 1]} : vector<128x256xf32> to vector<128x128xf32>
    %11 = vector.extract_strided_slice %8 {offsets = [0, 0], sizes = [128, 128], strides = [1, 1]} : vector<128x256xf32> to vector<128x128xf32>
    %12 = vector.extract_strided_slice %8 {offsets = [0, 128], sizes = [128, 128], strides = [1, 1]} : vector<128x256xf32> to vector<128x128xf32>
    %13 = arith.mulf %9, %9 : vector<128x128xf32>
    %14 = arith.mulf %10, %10 : vector<128x128xf32>
    %15 = arith.addf %13, %14 : vector<128x128xf32>
    %16 = arith.mulf %11, %11 : vector<128x128xf32>
    %17 = arith.mulf %12, %12 : vector<128x128xf32>
    %18 = arith.addf %16, %17 : vector<128x128xf32>
    %cst_9 = arith.constant 1.000000e-24 : f32
    %19 = vector.broadcast %cst_9 : f32 to vector<128x128xf32>
    %20 = arith.maximumf %15, %19 : vector<128x128xf32>
    %21 = math.log %20 : vector<128x128xf32>
    %cst_10 = arith.constant 1.000000e-24 : f32
    %22 = vector.broadcast %cst_10 : f32 to vector<128x128xf32>
    %23 = arith.maximumf %18, %22 : vector<128x128xf32>
    %24 = math.log %23 : vector<128x128xf32>
    %cst_11 = arith.constant 1.500000e-01 : f32
    %25 = vector.broadcast %cst_11 : f32 to vector<128x128xf32>
    %26 = arith.mulf %25, %21 : vector<128x128xf32>
    %27 = math.exp %26 : vector<128x128xf32>
    %cst_12 = arith.constant 1.500000e-01 : f32
    %28 = vector.broadcast %cst_12 : f32 to vector<128x128xf32>
    %29 = arith.mulf %28, %24 : vector<128x128xf32>
    %30 = math.exp %29 : vector<128x128xf32>
    %31 = arith.subf %27, %30 : vector<128x128xf32>
    %32 = arith.mulf %31, %31 : vector<128x128xf32>
    %cst_13 = arith.constant -3.500000e-01 : f32
    %33 = vector.broadcast %cst_13 : f32 to vector<128x128xf32>
    %34 = arith.mulf %33, %21 : vector<128x128xf32>
    %35 = math.exp %34 : vector<128x128xf32>
    %cst_14 = arith.constant -3.500000e-01 : f32
    %36 = vector.broadcast %cst_14 : f32 to vector<128x128xf32>
    %37 = arith.mulf %36, %24 : vector<128x128xf32>
    %38 = math.exp %37 : vector<128x128xf32>
    %39 = arith.mulf %35, %9 : vector<128x128xf32>
    %40 = arith.mulf %38, %11 : vector<128x128xf32>
    %41 = arith.subf %39, %40 : vector<128x128xf32>
    %42 = arith.mulf %35, %10 : vector<128x128xf32>
    %43 = arith.mulf %38, %12 : vector<128x128xf32>
    %44 = arith.subf %42, %43 : vector<128x128xf32>
    %c0_15 = arith.constant 0 : index
    %c0_16 = arith.constant 0 : index
    %45 = vector.load %arg5[%c0_15, %c0_16] : memref<128x128xf32, #tpu.memory_space<vmem>>, vector<128x128xf32>
    %46 = arith.addf %45, %32 : vector<128x128xf32>
    %c0_17 = arith.constant 0 : index
    %c0_18 = arith.constant 0 : index
    %47 = vector.load %arg5[%c0_17, %c0_18] : memref<128x128xf32, #tpu.memory_space<vmem>>, vector<128x128xf32>
    tpu.vector_store %arg5[%c0_17, %c0_18], %46 {strides = array<i32>} : memref<128x128xf32, #tpu.memory_space<vmem>>, vector<128x128xf32>,
    %c0_19 = arith.constant 0 : index
    %c0_20 = arith.constant 0 : index
    %48 = vector.load %arg6[%c0_19, %c0_20] : memref<128x128xf32, #tpu.memory_space<vmem>>, vector<128x128xf32>
    %49 = arith.mulf %41, %41 : vector<128x128xf32>
    %50 = arith.addf %48, %49 : vector<128x128xf32>
    %51 = arith.mulf %44, %44 : vector<128x128xf32>
    %52 = arith.addf %50, %51 : vector<128x128xf32>
    %c0_21 = arith.constant 0 : index
    %c0_22 = arith.constant 0 : index
    %53 = vector.load %arg6[%c0_21, %c0_22] : memref<128x128xf32, #tpu.memory_space<vmem>>, vector<128x128xf32>
    tpu.vector_store %arg6[%c0_21, %c0_22], %52 {strides = array<i32>} : memref<128x128xf32, #tpu.memory_space<vmem>>, vector<128x128xf32>,
    %c0_i32_23 = arith.constant 0 : i32
    %54 = arith.cmpi eq, %arg0, %c0_i32_23 : i32
    %55 = arith.extui %54 : i1 to i32
    %c0_i32_24 = arith.constant 0 : i32
    %56 = arith.cmpi ne, %55, %c0_i32_24 : i32
    scf.if %56 {
      %c0_25 = arith.constant 0 : index
      %c0_26 = arith.constant 0 : index
      %57 = vector.load %arg5[%c0_25, %c0_26] : memref<128x128xf32, #tpu.memory_space<vmem>>, vector<128x128xf32>
      %58 = vector.shape_cast %57 : vector<128x128xf32> to vector<1x128x128xf32>
      %cst_27 = arith.constant dense<0.000000e+00> : vector<1xf32>
      %59 = vector.multi_reduction <add>, %58, %cst_27 [1, 2] : vector<1x128x128xf32> to vector<1xf32>
      %60 = vector.shape_cast %59 : vector<1xf32> to vector<1x1x1xf32>
      %61 = vector.extract %60[0, 0, 0] : f32 from vector<1x1x1xf32>
      %c0_28 = arith.constant 0 : index
      %62 = memref.load %arg4[%c0_28] : memref<2xf32, #tpu.memory_space<smem>>
      memref.store %61, %arg4[%c0_28] : memref<2xf32, #tpu.memory_space<smem>>
      %c0_29 = arith.constant 0 : index
      %c0_30 = arith.constant 0 : index
      %63 = vector.load %arg6[%c0_29, %c0_30] : memref<128x128xf32, #tpu.memory_space<vmem>>, vector<128x128xf32>
      %64 = vector.shape_cast %63 : vector<128x128xf32> to vector<1x128x128xf32>
      %cst_31 = arith.constant dense<0.000000e+00> : vector<1xf32>
      %65 = vector.multi_reduction <add>, %64, %cst_31 [1, 2] : vector<1x128x128xf32> to vector<1xf32>
      %66 = vector.shape_cast %65 : vector<1xf32> to vector<1x1x1xf32>
      %67 = vector.extract %66[0, 0, 0] : f32 from vector<1x1x1xf32>
      %c1 = arith.constant 1 : index
      %68 = memref.load %arg4[%c1] : memref<2xf32, #tpu.memory_space<smem>>
      memref.store %67, %arg4[%c1] : memref<2xf32, #tpu.memory_space<smem>>
    } else {
    }
    return
  }
  func.func @transform_0(%arg0: i32) -> (i32, i32) {
    %c0_i32 = arith.constant 0 : i32
    %c0_i32_0 = arith.constant 0 : i32
    return %arg0, %c0_i32 : i32, i32
  }
  func.func @transform_1(%arg0: i32) -> (i32, i32) {
    %c0_i32 = arith.constant 0 : i32
    %c0_i32_0 = arith.constant 0 : i32
    return %arg0, %c0_i32 : i32, i32
  }
  func.func @transform_2(%arg0: i32) -> (i32, i32) {
    %c0_i32 = arith.constant 0 : i32
    %c0_i32_0 = arith.constant 0 : i32
    %c0_i32_1 = arith.constant 0 : i32
    return %c0_i32, %c0_i32_0 : i32, i32
  }
  func.func @transform_3(%arg0: i32) -> i32 {
    %c0_i32 = arith.constant 0 : i32
    %c0_i32_0 = arith.constant 0 : i32
    return %c0_i32 : i32
  }
}

module attributes {stable_mosaic.version = 11 : i64} {
  func.func @_spec_loss_kernel(%arg0: i32, %arg1: memref<16x320xbf16, #tpu.memory_space<vmem>>, %arg2: memref<16x320xbf16, #tpu.memory_space<vmem>>, %arg3: memref<320x512xbf16, #tpu.memory_space<vmem>>, %arg4: memref<2xf32, #tpu.memory_space<smem>>, %arg5: memref<16x256xf32, #tpu.memory_space<vmem>>, %arg6: memref<16x256xf32, #tpu.memory_space<vmem>>) attributes {dimension_semantics = [#tpu.dimension_semantics<arbitrary>], iteration_bounds = array<i64: 1>, scalar_prefetch = 0 : i64, scratch_operands = 2 : i64, tpu.core_type = #tpu.core_type<tc>, window_params = [{transform_indices = @transform_0, window_bounds = array<i64: 16, 320>}, {transform_indices = @transform_1, window_bounds = array<i64: 16, 320>}, {pipeline_mode = #tpu.pipeline_mode<synchronous>, transform_indices = @transform_2, window_bounds = array<i64: 320, 512>}, {transform_indices = @transform_3, window_bounds = array<i64: 2>}]} {
    %c0_i32 = arith.constant 0 : i32
    %0 = arith.cmpi eq, %arg0, %c0_i32 : i32
    %1 = arith.extui %0 : i1 to i32
    %c0_i32_0 = arith.constant 0 : i32
    %2 = arith.cmpi ne, %1, %c0_i32_0 : i32
    scf.if %2 {
      %cst_25 = arith.constant 0.000000e+00 : f32
      %57 = vector.broadcast %cst_25 : f32 to vector<16x256xf32>
      %c0_26 = arith.constant 0 : index
      %c0_27 = arith.constant 0 : index
      %58 = vector.load %arg5[%c0_26, %c0_27] : memref<16x256xf32, #tpu.memory_space<vmem>>, vector<16x256xf32>
      tpu.vector_store %arg5[%c0_26, %c0_27], %57 {strides = array<i32>} : memref<16x256xf32, #tpu.memory_space<vmem>>, vector<16x256xf32>,
      %cst_28 = arith.constant 0.000000e+00 : f32
      %59 = vector.broadcast %cst_28 : f32 to vector<16x256xf32>
      %c0_29 = arith.constant 0 : index
      %c0_30 = arith.constant 0 : index
      %60 = vector.load %arg6[%c0_29, %c0_30] : memref<16x256xf32, #tpu.memory_space<vmem>>, vector<16x256xf32>
      tpu.vector_store %arg6[%c0_29, %c0_30], %59 {strides = array<i32>} : memref<16x256xf32, #tpu.memory_space<vmem>>, vector<16x256xf32>,
    } else {
    }
    %c0 = arith.constant 0 : index
    %c0_1 = arith.constant 0 : index
    %3 = vector.load %arg1[%c0, %c0_1] : memref<16x320xbf16, #tpu.memory_space<vmem>>, vector<16x320xbf16>
    %c0_2 = arith.constant 0 : index
    %c0_3 = arith.constant 0 : index
    %4 = vector.load %arg3[%c0_2, %c0_3] : memref<320x512xbf16, #tpu.memory_space<vmem>>, vector<320x512xbf16>
    %cst = arith.constant dense<0.000000e+00> : vector<16x512xf32>
    %5 = tpu.matmul %3, %4, %cst {dimension_numbers = #tpu.dot_dimension_numbers<[1], [0], [0], [1], [0, 0, 1, 1], [], []>} : vector<16x320xbf16>, vector<320x512xbf16>, vector<16x512xf32> -> vector<16x512xf32>
    %c0_4 = arith.constant 0 : index
    %c0_5 = arith.constant 0 : index
    %6 = vector.load %arg2[%c0_4, %c0_5] : memref<16x320xbf16, #tpu.memory_space<vmem>>, vector<16x320xbf16>
    %c0_6 = arith.constant 0 : index
    %c0_7 = arith.constant 0 : index
    %7 = vector.load %arg3[%c0_6, %c0_7] : memref<320x512xbf16, #tpu.memory_space<vmem>>, vector<320x512xbf16>
    %cst_8 = arith.constant dense<0.000000e+00> : vector<16x512xf32>
    %8 = tpu.matmul %6, %7, %cst_8 {dimension_numbers = #tpu.dot_dimension_numbers<[1], [0], [0], [1], [0, 0, 1, 1], [], []>} : vector<16x320xbf16>, vector<320x512xbf16>, vector<16x512xf32> -> vector<16x512xf32>
    %9 = vector.extract_strided_slice %5 {offsets = [0, 0], sizes = [16, 256], strides = [1, 1]} : vector<16x512xf32> to vector<16x256xf32>
    %10 = vector.extract_strided_slice %5 {offsets = [0, 256], sizes = [16, 256], strides = [1, 1]} : vector<16x512xf32> to vector<16x256xf32>
    %11 = vector.extract_strided_slice %8 {offsets = [0, 0], sizes = [16, 256], strides = [1, 1]} : vector<16x512xf32> to vector<16x256xf32>
    %12 = vector.extract_strided_slice %8 {offsets = [0, 256], sizes = [16, 256], strides = [1, 1]} : vector<16x512xf32> to vector<16x256xf32>
    %13 = arith.mulf %9, %9 : vector<16x256xf32>
    %14 = arith.mulf %10, %10 : vector<16x256xf32>
    %15 = arith.addf %13, %14 : vector<16x256xf32>
    %16 = arith.mulf %11, %11 : vector<16x256xf32>
    %17 = arith.mulf %12, %12 : vector<16x256xf32>
    %18 = arith.addf %16, %17 : vector<16x256xf32>
    %cst_9 = arith.constant 1.000000e-24 : f32
    %19 = vector.broadcast %cst_9 : f32 to vector<16x256xf32>
    %20 = arith.maximumf %15, %19 : vector<16x256xf32>
    %21 = math.log %20 : vector<16x256xf32>
    %cst_10 = arith.constant 1.000000e-24 : f32
    %22 = vector.broadcast %cst_10 : f32 to vector<16x256xf32>
    %23 = arith.maximumf %18, %22 : vector<16x256xf32>
    %24 = math.log %23 : vector<16x256xf32>
    %cst_11 = arith.constant 1.500000e-01 : f32
    %25 = vector.broadcast %cst_11 : f32 to vector<16x256xf32>
    %26 = arith.mulf %25, %21 : vector<16x256xf32>
    %27 = math.exp %26 : vector<16x256xf32>
    %cst_12 = arith.constant 1.500000e-01 : f32
    %28 = vector.broadcast %cst_12 : f32 to vector<16x256xf32>
    %29 = arith.mulf %28, %24 : vector<16x256xf32>
    %30 = math.exp %29 : vector<16x256xf32>
    %31 = arith.subf %27, %30 : vector<16x256xf32>
    %32 = arith.mulf %31, %31 : vector<16x256xf32>
    %cst_13 = arith.constant -3.500000e-01 : f32
    %33 = vector.broadcast %cst_13 : f32 to vector<16x256xf32>
    %34 = arith.mulf %33, %21 : vector<16x256xf32>
    %35 = math.exp %34 : vector<16x256xf32>
    %cst_14 = arith.constant -3.500000e-01 : f32
    %36 = vector.broadcast %cst_14 : f32 to vector<16x256xf32>
    %37 = arith.mulf %36, %24 : vector<16x256xf32>
    %38 = math.exp %37 : vector<16x256xf32>
    %39 = arith.mulf %35, %9 : vector<16x256xf32>
    %40 = arith.mulf %38, %11 : vector<16x256xf32>
    %41 = arith.subf %39, %40 : vector<16x256xf32>
    %42 = arith.mulf %35, %10 : vector<16x256xf32>
    %43 = arith.mulf %38, %12 : vector<16x256xf32>
    %44 = arith.subf %42, %43 : vector<16x256xf32>
    %c0_15 = arith.constant 0 : index
    %c0_16 = arith.constant 0 : index
    %45 = vector.load %arg5[%c0_15, %c0_16] : memref<16x256xf32, #tpu.memory_space<vmem>>, vector<16x256xf32>
    %46 = arith.addf %45, %32 : vector<16x256xf32>
    %c0_17 = arith.constant 0 : index
    %c0_18 = arith.constant 0 : index
    %47 = vector.load %arg5[%c0_17, %c0_18] : memref<16x256xf32, #tpu.memory_space<vmem>>, vector<16x256xf32>
    tpu.vector_store %arg5[%c0_17, %c0_18], %46 {strides = array<i32>} : memref<16x256xf32, #tpu.memory_space<vmem>>, vector<16x256xf32>,
    %c0_19 = arith.constant 0 : index
    %c0_20 = arith.constant 0 : index
    %48 = vector.load %arg6[%c0_19, %c0_20] : memref<16x256xf32, #tpu.memory_space<vmem>>, vector<16x256xf32>
    %49 = arith.mulf %41, %41 : vector<16x256xf32>
    %50 = arith.addf %48, %49 : vector<16x256xf32>
    %51 = arith.mulf %44, %44 : vector<16x256xf32>
    %52 = arith.addf %50, %51 : vector<16x256xf32>
    %c0_21 = arith.constant 0 : index
    %c0_22 = arith.constant 0 : index
    %53 = vector.load %arg6[%c0_21, %c0_22] : memref<16x256xf32, #tpu.memory_space<vmem>>, vector<16x256xf32>
    tpu.vector_store %arg6[%c0_21, %c0_22], %52 {strides = array<i32>} : memref<16x256xf32, #tpu.memory_space<vmem>>, vector<16x256xf32>,
    %c0_i32_23 = arith.constant 0 : i32
    %54 = arith.cmpi eq, %arg0, %c0_i32_23 : i32
    %55 = arith.extui %54 : i1 to i32
    %c0_i32_24 = arith.constant 0 : i32
    %56 = arith.cmpi ne, %55, %c0_i32_24 : i32
    scf.if %56 {
      %c0_25 = arith.constant 0 : index
      %c0_26 = arith.constant 0 : index
      %57 = vector.load %arg5[%c0_25, %c0_26] : memref<16x256xf32, #tpu.memory_space<vmem>>, vector<16x256xf32>
      %58 = vector.shape_cast %57 : vector<16x256xf32> to vector<1x16x256xf32>
      %cst_27 = arith.constant dense<0.000000e+00> : vector<1xf32>
      %59 = vector.multi_reduction <add>, %58, %cst_27 [1, 2] : vector<1x16x256xf32> to vector<1xf32>
      %60 = vector.shape_cast %59 : vector<1xf32> to vector<1x1x1xf32>
      %61 = vector.extract %60[0, 0, 0] : f32 from vector<1x1x1xf32>
      %c0_28 = arith.constant 0 : index
      %62 = memref.load %arg4[%c0_28] : memref<2xf32, #tpu.memory_space<smem>>
      memref.store %61, %arg4[%c0_28] : memref<2xf32, #tpu.memory_space<smem>>
      %c0_29 = arith.constant 0 : index
      %c0_30 = arith.constant 0 : index
      %63 = vector.load %arg6[%c0_29, %c0_30] : memref<16x256xf32, #tpu.memory_space<vmem>>, vector<16x256xf32>
      %64 = vector.shape_cast %63 : vector<16x256xf32> to vector<1x16x256xf32>
      %cst_31 = arith.constant dense<0.000000e+00> : vector<1xf32>
      %65 = vector.multi_reduction <add>, %64, %cst_31 [1, 2] : vector<1x16x256xf32> to vector<1xf32>
      %66 = vector.shape_cast %65 : vector<1xf32> to vector<1x1x1xf32>
      %67 = vector.extract %66[0, 0, 0] : f32 from vector<1x1x1xf32>
      %c1 = arith.constant 1 : index
      %68 = memref.load %arg4[%c1] : memref<2xf32, #tpu.memory_space<smem>>
      memref.store %67, %arg4[%c1] : memref<2xf32, #tpu.memory_space<smem>>
    } else {
    }
    return
  }
  func.func @transform_0(%arg0: i32) -> (i32, i32) {
    %c0_i32 = arith.constant 0 : i32
    %c0_i32_0 = arith.constant 0 : i32
    return %arg0, %c0_i32 : i32, i32
  }
  func.func @transform_1(%arg0: i32) -> (i32, i32) {
    %c0_i32 = arith.constant 0 : i32
    %c0_i32_0 = arith.constant 0 : i32
    return %arg0, %c0_i32 : i32, i32
  }
  func.func @transform_2(%arg0: i32) -> (i32, i32) {
    %c0_i32 = arith.constant 0 : i32
    %c0_i32_0 = arith.constant 0 : i32
    %c0_i32_1 = arith.constant 0 : i32
    return %c0_i32, %c0_i32_0 : i32, i32
  }
  func.func @transform_3(%arg0: i32) -> i32 {
    %c0_i32 = arith.constant 0 : i32
    %c0_i32_0 = arith.constant 0 : i32
    return %c0_i32 : i32
  }
}

module attributes {stable_mosaic.version = 11 : i64} {
  func.func @_spec_loss_kernel(%arg0: i32, %arg1: memref<16x640xbf16, #tpu.memory_space<vmem>>, %arg2: memref<16x640xbf16, #tpu.memory_space<vmem>>, %arg3: memref<640x768xbf16, #tpu.memory_space<vmem>>, %arg4: memref<2xf32, #tpu.memory_space<smem>>, %arg5: memref<16x384xf32, #tpu.memory_space<vmem>>, %arg6: memref<16x384xf32, #tpu.memory_space<vmem>>) attributes {dimension_semantics = [#tpu.dimension_semantics<arbitrary>], iteration_bounds = array<i64: 1>, scalar_prefetch = 0 : i64, scratch_operands = 2 : i64, tpu.core_type = #tpu.core_type<tc>, window_params = [{transform_indices = @transform_0, window_bounds = array<i64: 16, 640>}, {transform_indices = @transform_1, window_bounds = array<i64: 16, 640>}, {pipeline_mode = #tpu.pipeline_mode<synchronous>, transform_indices = @transform_2, window_bounds = array<i64: 640, 768>}, {transform_indices = @transform_3, window_bounds = array<i64: 2>}]} {
    %c0_i32 = arith.constant 0 : i32
    %0 = arith.cmpi eq, %arg0, %c0_i32 : i32
    %1 = arith.extui %0 : i1 to i32
    %c0_i32_0 = arith.constant 0 : i32
    %2 = arith.cmpi ne, %1, %c0_i32_0 : i32
    scf.if %2 {
      %cst_25 = arith.constant 0.000000e+00 : f32
      %57 = vector.broadcast %cst_25 : f32 to vector<16x384xf32>
      %c0_26 = arith.constant 0 : index
      %c0_27 = arith.constant 0 : index
      %58 = vector.load %arg5[%c0_26, %c0_27] : memref<16x384xf32, #tpu.memory_space<vmem>>, vector<16x384xf32>
      tpu.vector_store %arg5[%c0_26, %c0_27], %57 {strides = array<i32>} : memref<16x384xf32, #tpu.memory_space<vmem>>, vector<16x384xf32>,
      %cst_28 = arith.constant 0.000000e+00 : f32
      %59 = vector.broadcast %cst_28 : f32 to vector<16x384xf32>
      %c0_29 = arith.constant 0 : index
      %c0_30 = arith.constant 0 : index
      %60 = vector.load %arg6[%c0_29, %c0_30] : memref<16x384xf32, #tpu.memory_space<vmem>>, vector<16x384xf32>
      tpu.vector_store %arg6[%c0_29, %c0_30], %59 {strides = array<i32>} : memref<16x384xf32, #tpu.memory_space<vmem>>, vector<16x384xf32>,
    } else {
    }
    %c0 = arith.constant 0 : index
    %c0_1 = arith.constant 0 : index
    %3 = vector.load %arg1[%c0, %c0_1] : memref<16x640xbf16, #tpu.memory_space<vmem>>, vector<16x640xbf16>
    %c0_2 = arith.constant 0 : index
    %c0_3 = arith.constant 0 : index
    %4 = vector.load %arg3[%c0_2, %c0_3] : memref<640x768xbf16, #tpu.memory_space<vmem>>, vector<640x768xbf16>
    %cst = arith.constant dense<0.000000e+00> : vector<16x768xf32>
    %5 = tpu.matmul %3, %4, %cst {dimension_numbers = #tpu.dot_dimension_numbers<[1], [0], [0], [1], [0, 0, 1, 1], [], []>} : vector<16x640xbf16>, vector<640x768xbf16>, vector<16x768xf32> -> vector<16x768xf32>
    %c0_4 = arith.constant 0 : index
    %c0_5 = arith.constant 0 : index
    %6 = vector.load %arg2[%c0_4, %c0_5] : memref<16x640xbf16, #tpu.memory_space<vmem>>, vector<16x640xbf16>
    %c0_6 = arith.constant 0 : index
    %c0_7 = arith.constant 0 : index
    %7 = vector.load %arg3[%c0_6, %c0_7] : memref<640x768xbf16, #tpu.memory_space<vmem>>, vector<640x768xbf16>
    %cst_8 = arith.constant dense<0.000000e+00> : vector<16x768xf32>
    %8 = tpu.matmul %6, %7, %cst_8 {dimension_numbers = #tpu.dot_dimension_numbers<[1], [0], [0], [1], [0, 0, 1, 1], [], []>} : vector<16x640xbf16>, vector<640x768xbf16>, vector<16x768xf32> -> vector<16x768xf32>
    %9 = vector.extract_strided_slice %5 {offsets = [0, 0], sizes = [16, 384], strides = [1, 1]} : vector<16x768xf32> to vector<16x384xf32>
    %10 = vector.extract_strided_slice %5 {offsets = [0, 384], sizes = [16, 384], strides = [1, 1]} : vector<16x768xf32> to vector<16x384xf32>
    %11 = vector.extract_strided_slice %8 {offsets = [0, 0], sizes = [16, 384], strides = [1, 1]} : vector<16x768xf32> to vector<16x384xf32>
    %12 = vector.extract_strided_slice %8 {offsets = [0, 384], sizes = [16, 384], strides = [1, 1]} : vector<16x768xf32> to vector<16x384xf32>
    %13 = arith.mulf %9, %9 : vector<16x384xf32>
    %14 = arith.mulf %10, %10 : vector<16x384xf32>
    %15 = arith.addf %13, %14 : vector<16x384xf32>
    %16 = arith.mulf %11, %11 : vector<16x384xf32>
    %17 = arith.mulf %12, %12 : vector<16x384xf32>
    %18 = arith.addf %16, %17 : vector<16x384xf32>
    %cst_9 = arith.constant 1.000000e-24 : f32
    %19 = vector.broadcast %cst_9 : f32 to vector<16x384xf32>
    %20 = arith.maximumf %15, %19 : vector<16x384xf32>
    %21 = math.log %20 : vector<16x384xf32>
    %cst_10 = arith.constant 1.000000e-24 : f32
    %22 = vector.broadcast %cst_10 : f32 to vector<16x384xf32>
    %23 = arith.maximumf %18, %22 : vector<16x384xf32>
    %24 = math.log %23 : vector<16x384xf32>
    %cst_11 = arith.constant 1.500000e-01 : f32
    %25 = vector.broadcast %cst_11 : f32 to vector<16x384xf32>
    %26 = arith.mulf %25, %21 : vector<16x384xf32>
    %27 = math.exp %26 : vector<16x384xf32>
    %cst_12 = arith.constant 1.500000e-01 : f32
    %28 = vector.broadcast %cst_12 : f32 to vector<16x384xf32>
    %29 = arith.mulf %28, %24 : vector<16x384xf32>
    %30 = math.exp %29 : vector<16x384xf32>
    %31 = arith.subf %27, %30 : vector<16x384xf32>
    %32 = arith.mulf %31, %31 : vector<16x384xf32>
    %cst_13 = arith.constant -3.500000e-01 : f32
    %33 = vector.broadcast %cst_13 : f32 to vector<16x384xf32>
    %34 = arith.mulf %33, %21 : vector<16x384xf32>
    %35 = math.exp %34 : vector<16x384xf32>
    %cst_14 = arith.constant -3.500000e-01 : f32
    %36 = vector.broadcast %cst_14 : f32 to vector<16x384xf32>
    %37 = arith.mulf %36, %24 : vector<16x384xf32>
    %38 = math.exp %37 : vector<16x384xf32>
    %39 = arith.mulf %35, %9 : vector<16x384xf32>
    %40 = arith.mulf %38, %11 : vector<16x384xf32>
    %41 = arith.subf %39, %40 : vector<16x384xf32>
    %42 = arith.mulf %35, %10 : vector<16x384xf32>
    %43 = arith.mulf %38, %12 : vector<16x384xf32>
    %44 = arith.subf %42, %43 : vector<16x384xf32>
    %c0_15 = arith.constant 0 : index
    %c0_16 = arith.constant 0 : index
    %45 = vector.load %arg5[%c0_15, %c0_16] : memref<16x384xf32, #tpu.memory_space<vmem>>, vector<16x384xf32>
    %46 = arith.addf %45, %32 : vector<16x384xf32>
    %c0_17 = arith.constant 0 : index
    %c0_18 = arith.constant 0 : index
    %47 = vector.load %arg5[%c0_17, %c0_18] : memref<16x384xf32, #tpu.memory_space<vmem>>, vector<16x384xf32>
    tpu.vector_store %arg5[%c0_17, %c0_18], %46 {strides = array<i32>} : memref<16x384xf32, #tpu.memory_space<vmem>>, vector<16x384xf32>,
    %c0_19 = arith.constant 0 : index
    %c0_20 = arith.constant 0 : index
    %48 = vector.load %arg6[%c0_19, %c0_20] : memref<16x384xf32, #tpu.memory_space<vmem>>, vector<16x384xf32>
    %49 = arith.mulf %41, %41 : vector<16x384xf32>
    %50 = arith.addf %48, %49 : vector<16x384xf32>
    %51 = arith.mulf %44, %44 : vector<16x384xf32>
    %52 = arith.addf %50, %51 : vector<16x384xf32>
    %c0_21 = arith.constant 0 : index
    %c0_22 = arith.constant 0 : index
    %53 = vector.load %arg6[%c0_21, %c0_22] : memref<16x384xf32, #tpu.memory_space<vmem>>, vector<16x384xf32>
    tpu.vector_store %arg6[%c0_21, %c0_22], %52 {strides = array<i32>} : memref<16x384xf32, #tpu.memory_space<vmem>>, vector<16x384xf32>,
    %c0_i32_23 = arith.constant 0 : i32
    %54 = arith.cmpi eq, %arg0, %c0_i32_23 : i32
    %55 = arith.extui %54 : i1 to i32
    %c0_i32_24 = arith.constant 0 : i32
    %56 = arith.cmpi ne, %55, %c0_i32_24 : i32
    scf.if %56 {
      %c0_25 = arith.constant 0 : index
      %c0_26 = arith.constant 0 : index
      %57 = vector.load %arg5[%c0_25, %c0_26] : memref<16x384xf32, #tpu.memory_space<vmem>>, vector<16x384xf32>
      %58 = vector.shape_cast %57 : vector<16x384xf32> to vector<1x16x384xf32>
      %cst_27 = arith.constant dense<0.000000e+00> : vector<1xf32>
      %59 = vector.multi_reduction <add>, %58, %cst_27 [1, 2] : vector<1x16x384xf32> to vector<1xf32>
      %60 = vector.shape_cast %59 : vector<1xf32> to vector<1x1x1xf32>
      %61 = vector.extract %60[0, 0, 0] : f32 from vector<1x1x1xf32>
      %c0_28 = arith.constant 0 : index
      %62 = memref.load %arg4[%c0_28] : memref<2xf32, #tpu.memory_space<smem>>
      memref.store %61, %arg4[%c0_28] : memref<2xf32, #tpu.memory_space<smem>>
      %c0_29 = arith.constant 0 : index
      %c0_30 = arith.constant 0 : index
      %63 = vector.load %arg6[%c0_29, %c0_30] : memref<16x384xf32, #tpu.memory_space<vmem>>, vector<16x384xf32>
      %64 = vector.shape_cast %63 : vector<16x384xf32> to vector<1x16x384xf32>
      %cst_31 = arith.constant dense<0.000000e+00> : vector<1xf32>
      %65 = vector.multi_reduction <add>, %64, %cst_31 [1, 2] : vector<1x16x384xf32> to vector<1xf32>
      %66 = vector.shape_cast %65 : vector<1xf32> to vector<1x1x1xf32>
      %67 = vector.extract %66[0, 0, 0] : f32 from vector<1x1x1xf32>
      %c1 = arith.constant 1 : index
      %68 = memref.load %arg4[%c1] : memref<2xf32, #tpu.memory_space<smem>>
      memref.store %67, %arg4[%c1] : memref<2xf32, #tpu.memory_space<smem>>
    } else {
    }
    return
  }
  func.func @transform_0(%arg0: i32) -> (i32, i32) {
    %c0_i32 = arith.constant 0 : i32
    %c0_i32_0 = arith.constant 0 : i32
    return %arg0, %c0_i32 : i32, i32
  }
  func.func @transform_1(%arg0: i32) -> (i32, i32) {
    %c0_i32 = arith.constant 0 : i32
    %c0_i32_0 = arith.constant 0 : i32
    return %arg0, %c0_i32 : i32, i32
  }
  func.func @transform_2(%arg0: i32) -> (i32, i32) {
    %c0_i32 = arith.constant 0 : i32
    %c0_i32_0 = arith.constant 0 : i32
    %c0_i32_1 = arith.constant 0 : i32
    return %c0_i32, %c0_i32_0 : i32, i32
  }
  func.func @transform_3(%arg0: i32) -> i32 {
    %c0_i32 = arith.constant 0 : i32
    %c0_i32_0 = arith.constant 0 : i32
    return %c0_i32 : i32
  }
}

</mosaic_0001>

<bundles_post_ra>
// kernel: combined_loss.7
= control target key start
LH: loop header
LB: loop body
LE: loop exit
PB: predicated region body
PF: predicated region fallthrough
CT: control target
= control target key end

     0   :  { %vm200_vm0 = vcmask 261120   ;;  %s1353_s0 = inlined_call_operand.vmem [shape: bf16[64,160], index: 0, kind: input, shape index: {}]   ;;  %s1354_s1 = inlined_call_operand.vmem [shape: bf16[64,160], index: 1, kind: input, shape index: {}]   ;;  %s1355_s2 = inlined_call_operand.vmem [shape: bf16[160,256], index: 2, kind: input, shape index: {}]   ;;  %s1356_s3 = inlined_call_operand.vmem [shape: f32[2], index: 3, kind: output, shape index: {}]  }
   0x1   :  { %v862_v0 = vld [vmem:[%s1355_s2 + $0x4] ss:$8 sps:$4 sm:$0xff]   ;;  %v864_v1 = vld [vmem:[%s1355_s2] ss:$8 sps:$4 sm:$0xff]   ;;  %v865_v2 = vld [vmem:[%s1355_s2 + $0x14] ss:$8 sps:$4 sm:$0xff]  }
   0x2   :  { %213 = vmatprep.subr.bf16.mxu0 %v862_v0  ;;  %342 = vmatprep.subr.bf16.mxu1 %v862_v0  ;;  %v867_v3 = vld [vmem:[%s1355_s2 + $0x10] ss:$8 sps:$4 sm:$0xff]   ;;  %v868_v4 = vld [vmem:[%s1355_s2 + $0x24] ss:$8 sps:$4 sm:$0xff]   ;;  %v870_v5 = vld [vmem:[%s1355_s2 + $0x20] ss:$8 sps:$4 sm:$0xff]  }
   0x3   :  { %214 = vmatpush1.bf16.msra.mxu0 %v864_v1  ;;  %343 = vmatpush1.bf16.msra.mxu1 %v864_v1  ;;  %v871_v6 = vld [vmem:[%s1355_s2 + $0x34] ss:$8 sps:$4 sm:$0xff]   ;;  %v873_v7 = vld [vmem:[%s1355_s2 + $0x30] ss:$8 sps:$4 sm:$0xff]   ;;  %v874_v8 = vld [vmem:[%s1355_s2 + $0x44] ss:$8 sps:$4 sm:$0xff]  }
   0x4   :  { %215 = vmatprep.subr.bf16.mxu0 %v865_v2  ;;  %344 = vmatprep.subr.bf16.mxu1 %v865_v2  ;;  %v894_v9 = vld [vmem:[%s1353_s0 + $0x4] ss:$8 sps:$4 sm:$0xff]   ;;  %v876_v10 = vld [vmem:[%s1355_s2 + $0x40] ss:$8 sps:$4 sm:$0xff]   ;;  %v877_v12 = vld [vmem:[%s1355_s2 + $0x54] ss:$8 sps:$4 sm:$0xff]  }
   0x5   :  { %v897_v11 = vld [vmem:[%s1354_s1 + $0x4] ss:$8 sps:$4 sm:$0xff]   ;;  %841 = vmatprep.mubr.msk.bf16.mxu0 %vm200_vm0, %v894_v9  ;;  %v879_v13 = vld [vmem:[%s1355_s2 + $0x50] ss:$8 sps:$4 sm:$0xff]   ;;  %v882_v15 = vld [vmem:[%s1355_s2 + $0x60] ss:$8 sps:$4 sm:$0xff]  }
   0x6   :  { %853 = vmatprep.mubr.msk.bf16.mxu1 %vm200_vm0, %v897_v11  ;;  %v880_v14 = vld [vmem:[%s1355_s2 + $0x64] ss:$8 sps:$4 sm:$0xff]   ;;  %v883_v16 = vld [vmem:[%s1355_s2 + $0x74] ss:$8 sps:$4 sm:$0xff]  }
   0x7   :  { %216 = vmatpush1.bf16.msra.mxu0 %v867_v3  ;;  %345 = vmatpush1.bf16.msra.mxu1 %v867_v3 }
   0x8   :  { %217 = vmatprep.subr.bf16.mxu0 %v868_v4  ;;  %346 = vmatprep.subr.bf16.mxu1 %v868_v4 }
   0xb   :  { %218 = vmatpush1.bf16.msra.mxu0 %v870_v5  ;;  %347 = vmatpush1.bf16.msra.mxu1 %v870_v5 }
   0xc   :  { %219 = vmatprep.subr.bf16.mxu0 %v871_v6  ;;  %348 = vmatprep.subr.bf16.mxu1 %v871_v6 }
   0xf   :  { %220 = vmatpush1.bf16.msra.mxu0 %v873_v7  ;;  %349 = vmatpush1.bf16.msra.mxu1 %v873_v7 }
  0x10   :  { %221 = vmatprep.subr.bf16.mxu0 %v874_v8  ;;  %350 = vmatprep.subr.bf16.mxu1 %v874_v8 }
  0x13   :  { %222 = vmatpush1.bf16.msra.mxu0 %v876_v10  ;;  %351 = vmatpush1.bf16.msra.mxu1 %v876_v10 }
  0x14   :  { %223 = vmatprep.subr.bf16.mxu0 %v877_v12  ;;  %352 = vmatprep.subr.bf16.mxu1 %v877_v12 }
  0x17   :  { %224 = vmatpush1.bf16.msra.mxu0 %v879_v13  ;;  %353 = vmatpush1.bf16.msra.mxu1 %v879_v13 }
  0x18   :  { %225 = vmatprep.subr.bf16.mxu0 %v880_v14  ;;  %354 = vmatprep.subr.bf16.mxu1 %v880_v14 }
  0x19   :  { %8 = vsyncpa [#allocation5], 0  ;;  %v885_v17 = vld [vmem:[%s1355_s2 + $0x70] ss:$8 sps:$4 sm:$0xff]   ;;  %v886_v18 = vld [vmem:[%s1355_s2 + $0x84] ss:$8 sps:$4 sm:$0xff]  }
  0x1a   :  { %v888_v19 = vld [vmem:[%s1355_s2 + $0x80] ss:$8 sps:$4 sm:$0xff]   ;;  %v889_v20 = vld [vmem:[%s1355_s2 + $0x94] ss:$8 sps:$4 sm:$0xff]   ;;  %v891_v21 = vld [vmem:[%s1355_s2 + $0x90] ss:$8 sps:$4 sm:$0xff]  }
  0x1b   :  { %226 = vmatpush1.bf16.msra.mxu0 %v882_v15  ;;  %355 = vmatpush1.bf16.msra.mxu1 %v882_v15  ;;  %v892_v22 = vld [vmem:[%s1353_s0] ss:$8 sps:$4 sm:$0xff]   ;;  %v898_v24 = vld [vmem:[%s1353_s0 + $0x14] ss:$8 sps:$4 sm:$0xff]   ;;  %v902_v26 = vld [vmem:[%s1353_s0 + $0x10] ss:$8 sps:$4 sm:$0xff]  }
  0x1c   :  { %227 = vmatprep.subr.bf16.mxu0 %v883_v16  ;;  %356 = vmatprep.subr.bf16.mxu1 %v883_v16  ;;  %v895_v23 = vld [vmem:[%s1354_s1] ss:$8 sps:$4 sm:$0xff]   ;;  %v900_v25 = vld [vmem:[%s1354_s1 + $0x14] ss:$8 sps:$4 sm:$0xff]   ;;  %v903_v27 = vld [vmem:[%s1354_s1 + $0x10] ss:$8 sps:$4 sm:$0xff]  }
  0x1d   :  { %v904_v28 = vld [vmem:[%s1353_s0 + $0x24] ss:$8 sps:$4 sm:$0xff]   ;;  %v908_v30 = vld [vmem:[%s1353_s0 + $0x20] ss:$8 sps:$4 sm:$0xff]   ;;  %v910_v32 = vld [vmem:[%s1353_s0 + $0x34] ss:$8 sps:$4 sm:$0xff]  }
  0x1e   :  { %v906_v29 = vld [vmem:[%s1354_s1 + $0x24] ss:$8 sps:$4 sm:$0xff]   ;;  %v909_v31 = vld [vmem:[%s1354_s1 + $0x20] ss:$8 sps:$4 sm:$0xff]   ;;  %v912_v33 = vld [vmem:[%s1354_s1 + $0x34] ss:$8 sps:$4 sm:$0xff]  }
  0x1f   :  { %228 = vmatpush1.bf16.msra.mxu0 %v885_v17  ;;  %357 = vmatpush1.bf16.msra.mxu1 %v885_v17  ;;  %v914_v34 = vld [vmem:[%s1353_s0 + $0x30] ss:$8 sps:$4 sm:$0xff]   ;;  %s804_s30 = sshll.u32 %s1356_s3, 4  ;;  %s805_s30 = int_to_ptr.vmem [resolvable:$true] %s804_s30 }
  0x20   :  { %229 = vmatprep.subr.bf16.mxu0 %v886_v18  ;;  %358 = vmatprep.subr.bf16.mxu1 %v886_v18  ;;  %v915_v35 = vld [vmem:[%s1354_s1 + $0x30] ss:$8 sps:$4 sm:$0xff]   ;;  %s1012_s5 = scalar_lea.vmem %s805_s30, 16  ;;  %p1017_p1 = scmp.lt.s32.totalorder %s805_s30, %s805_s30 }
  0x21   :  { %p1013_p0 = scmp.ne.s32.totalorder %s805_s30, %s1012_s5  ;;  %p1018_p2 = scmp.lt.s32.totalorder %s1012_s5, %s1012_s5 }
  0x23   :  { %230 = vmatpush1.bf16.msra.mxu0 %v888_v19  ;;  %359 = vmatpush1.bf16.msra.mxu1 %v888_v19  ;;  %p1019_p3 = por %p1018_p2, %p1017_p1 }
  0x24   :  { %231 = vmatprep.subr.bf16.mxu0 %v889_v20  ;;  %360 = vmatprep.subr.bf16.mxu1 %v889_v20 }
  0x25   :  { %p1020_p4 = pnand %p1019_p3, %p1013_p0 }
  0x27   :  { %232 = vmatpush1.bf16.msra.mxu0 %v891_v21  ;;  %361 = vmatpush1.bf16.msra.mxu1 %v891_v21 }
  0x2a   :  { %246 = vmatmul.mubr.bf16.vlgmr.msra.gmra.mrb[0].mxu0 %v892_v22  ;;  %375 = vmatmul.mubr.bf16.vlgmr.msra.gmra.mrb[0].mxu1 %v895_v23 }
  0x2b   :  { %842 = vmatprep.mubr.msk.bf16.mxu0 %vm200_vm0, %v898_v24  ;;  %854 = vmatprep.mubr.msk.bf16.mxu1 %vm200_vm0, %v900_v25 }
  0x32   :  { %256 = vmatmul.mubr.bf16.gmra.mrb[4].mxu0 %v902_v26  ;;  %385 = vmatmul.mubr.bf16.gmra.mrb[4].mxu1 %v903_v27 }
  0x33   :  { %843 = vmatprep.mubr.msk.bf16.mxu0 %vm200_vm0, %v904_v28  ;;  %855 = vmatprep.mubr.msk.bf16.mxu1 %vm200_vm0, %v906_v29 }
  0x3a   :  { %266 = vmatmul.mubr.bf16.gmra.mrb[8].mxu0 %v908_v30  ;;  %395 = vmatmul.mubr.bf16.gmra.mrb[8].mxu1 %v909_v31 }
  0x3b   :  { %844 = vmatprep.mubr.msk.bf16.mxu0 %vm200_vm0, %v910_v32  ;;  %856 = vmatprep.mubr.msk.bf16.mxu1 %vm200_vm0, %v912_v33 }
  0x42   :  { %276 = vmatmul.mubr.bf16.gmra.mrb[12].mxu0 %v914_v34  ;;  %405 = vmatmul.mubr.bf16.gmra.mrb[12].mxu1 %v915_v35 }
  0xfd   :  { %v1163_v36 = vpop.f32.mrb[0].mxu0  ;;  %v1165_v37 = vpop.f32.mrb[0].mxu1 }
  0xfe   :  { %v415_v38 = vmul.f32 %v1163_v36, %v1163_v36  ;;  %v439_v39 = vmul.f32 %v1165_v37, %v1165_v37  ;;  %v1171_v40 = vpop.f32.mrb[1].mxu0  ;;  %v1173_v41 = vpop.f32.mrb[1].mxu1 }
  0xff   :  { %v423_v42 = vmul.f32 %v1171_v40, %v1171_v40  ;;  %v447_v43 = vmul.f32 %v1173_v41, %v1173_v41  ;;  %v1179_v44 = vpop.f32.mrb[2].mxu0  ;;  %v1181_v45 = vpop.f32.mrb[2].mxu1 }
 0x100   :  { %v416_v46 = vmul.f32 %v1179_v44, %v1179_v44  ;;  %v440_v47 = vmul.f32 %v1181_v45, %v1181_v45  ;;  %v1187_v48 = vpop.f32.mrb[3].mxu0  ;;  %v1189_v49 = vpop.f32.mrb[3].mxu1 }
 0x101   :  { %v431_v50 = vadd.f32 %v423_v42, %v415_v38  ;;  %v455_v51 = vadd.f32 %v447_v43, %v439_v39  ;;  %v424_v52 = vmul.f32 %v1187_v48, %v1187_v48  ;;  %v448_v53 = vmul.f32 %v1189_v49, %v1189_v49 }
 0x103   :  { %v463_v54 = vmax.f32 %v431_v50, 1e-24  ;;  %v487_v55 = vmax.f32 %v455_v51, 1e-24  ;;  %v432_v56 = vadd.f32 %v424_v52, %v416_v46  ;;  %v456_v57 = vadd.f32 %v448_v53, %v440_v47 }
 0x105   :  { %916 = vlog2.f32 %v463_v54  ;;  %v464_v58 = vmax.f32 %v432_v56, 1e-24  ;;  %v488_v59 = vmax.f32 %v456_v57, 1e-24  ;;  %v1195_v60 = vpop.f32.mrb[4].mxu0  ;;  %v1197_v61 = vpop.f32.mrb[4].mxu1 }
 0x106   :  { %918 = vlog2.f32 %v487_v55  ;;  %v417_v62 = vmul.f32 %v1195_v60, %v1195_v60  ;;  %v441_v63 = vmul.f32 %v1197_v61, %v1197_v61  ;;  %v1203_v0 = vpop.f32.mrb[5].mxu0  ;;  %v1205_v1 = vpop.f32.mrb[5].mxu1 }
 0x107   :  { %920 = vlog2.f32 %v464_v58  ;;  %v425_v2 = vmul.f32 %v1203_v0, %v1203_v0  ;;  %v449_v3 = vmul.f32 %v1205_v1, %v1205_v1  ;;  %v1211_v4 = vpop.f32.mrb[6].mxu0  ;;  %v1213_v5 = vpop.f32.mrb[6].mxu1 }
 0x108   :  { %922 = vlog2.f32 %v488_v59  ;;  %v418_v6 = vmul.f32 %v1211_v4, %v1211_v4  ;;  %v442_v7 = vmul.f32 %v1213_v5, %v1213_v5  ;;  %v1219_v8 = vpop.f32.mrb[7].mxu0  ;;  %v1221_v9 = vpop.f32.mrb[7].mxu1 }
 0x109   :  { %v433_v10 = vadd.f32 %v425_v2, %v417_v62  ;;  %v457_v11 = vadd.f32 %v449_v3, %v441_v63  ;;  %v426_v12 = vmul.f32 %v1219_v8, %v1219_v8  ;;  %v450_v13 = vmul.f32 %v1221_v9, %v1221_v9 }
 0x10b   :  { %v465_v14 = vmax.f32 %v433_v10, 1e-24  ;;  %v489_v15 = vmax.f32 %v457_v11, 1e-24  ;;  %v434_v16 = vadd.f32 %v426_v12, %v418_v6  ;;  %v458_v17 = vadd.f32 %v450_v13, %v442_v7 }
 0x10d   :  { %924 = vlog2.f32 %v465_v14  ;;  %v466_v18 = vmax.f32 %v434_v16, 1e-24  ;;  %v490_v19 = vmax.f32 %v458_v17, 1e-24  ;;  %v1227_v20 = vpop.f32.mrb[8].mxu0  ;;  %v1229_v21 = vpop.f32.mrb[8].mxu1 }
 0x10e   :  { %926 = vlog2.f32 %v489_v15  ;;  %v419_v22 = vmul.f32 %v1227_v20, %v1227_v20  ;;  %v443_v23 = vmul.f32 %v1229_v21, %v1229_v21  ;;  %v1235_v24 = vpop.f32.mrb[9].mxu0  ;;  %v1237_v25 = vpop.f32.mrb[9].mxu1 }
 0x10f   :  { %v917_v26 = vpop.eup %916  ;;  %928 = vlog2.f32 %v466_v18  ;;  %v427_v27 = vmul.f32 %v1235_v24, %v1235_v24  ;;  %v451_v28 = vmul.f32 %v1237_v25, %v1237_v25  ;;  %v1243_v29 = vpop.f32.mrb[10].mxu0 }
 0x110   :  { %v1245_v30 = vpop.f32.mrb[10].mxu1  ;;  %v919_v31 = vpop.eup %918  ;;  %v472_v32 = vmul.f32 0.6931472, %v917_v26  ;;  %930 = vlog2.f32 %v490_v19  ;;  %v420_v33 = vmul.f32 %v1243_v29, %v1243_v29 }
 0x111   :  { %v444_v34 = vmul.f32 %v1245_v30, %v1245_v30  ;;  %v1251_v35 = vpop.f32.mrb[11].mxu0  ;;  %v1253_v38 = vpop.f32.mrb[11].mxu1  ;;  %v496_v42 = vmul.f32 0.6931472, %v919_v31  ;;  %v1255_v43 = vadd.f32 %v427_v27, %v419_v22  ;;  %v1257_v46 = vadd.f32 %v451_v28, %v443_v23 }
 0x112   :  { %v921_v39 = vpop.eup %920  ;;  %v428_v47 = vmul.f32 %v1251_v35, %v1251_v35  ;;  %v511_v51 = vmul.f32 0.15, %v472_v32  ;;  %v575_v52 = vmul.f32 -0.35, %v472_v32  ;;  %v452_v54 = vmul.f32 %v1253_v38, %v1253_v38 }
 0x113   :  { %v923_v50 = vpop.eup %922  ;;  %v474_v53 = vmul.f32 0.6931472, %v921_v39  ;;  %v535_v55 = vmul.f32 0.15, %v496_v42  ;;  %v599_v56 = vmul.f32 -0.35, %v496_v42 }
 0x114   :  { %v498_v57 = vmul.f32 0.6931472, %v923_v50  ;;  %v1263_v58 = vadd.f32 %v428_v47, %v420_v33  ;;  %v519_v59 = vmul.f32 1.442695, %v511_v51  ;;  %v583_v62 = vmul.f32 1.442695, %v575_v52 }
 0x115   :  { %v512_v63 = vmul.f32 0.15, %v474_v53  ;;  %v1265_v2 = vadd.f32 %v452_v54, %v444_v34  ;;  %v543_v3 = vmul.f32 1.442695, %v535_v55  ;;  %v607_v6 = vmul.f32 1.442695, %v599_v56 }
 0x116   :  { %v576_v7 = vmul.f32 -0.35, %v474_v53  ;;  %932 = vpow2.f32 %v519_v59  ;;  %v536_v11 = vmul.f32 0.15, %v498_v57  ;;  %v600_v12 = vmul.f32 -0.35, %v498_v57 }
 0x117   :  { %v521_v10 = vmul.f32 1.442695, %v512_v63  ;;  %v925_v13 = vpop.eup %924  ;;  %934 = vpow2.f32 %v583_v62  ;;  %v467_v18 = vmax.f32 %v1255_v43, 1e-24  ;;  %v491_v26 = vmax.f32 %v1257_v46, 1e-24 }
 0x118   :  { %v585_v14 = vmul.f32 1.442695, %v576_v7  ;;  %v927_v15 = vpop.eup %926  ;;  %936 = vpow2.f32 %v543_v3  ;;  %v545_v16 = vmul.f32 1.442695, %v536_v11  ;;  %v476_v17 = vmul.f32 0.6931472, %v925_v13 }
 0x119   :  { %v929_v19 = vpop.eup %928  ;;  %938 = vpow2.f32 %v607_v6  ;;  %v609_v22 = vmul.f32 1.442695, %v600_v12  ;;  %v500_v23 = vmul.f32 0.6931472, %v927_v15  ;;  %v468_v59 = vmax.f32 %v1263_v58, 1e-24 }
 0x11a   :  { %v931_v27 = vpop.eup %930  ;;  %940 = vpow2.f32 %v521_v10  ;;  %v513_v28 = vmul.f32 0.15, %v476_v17  ;;  %v577_v31 = vmul.f32 -0.35, %v476_v17  ;;  %v478_v32 = vmul.f32 0.6931472, %v929_v19 }
 0x11b   :  { %942 = vpow2.f32 %v585_v14  ;;  %v537_v33 = vmul.f32 0.15, %v500_v23  ;;  %v601_v34 = vmul.f32 -0.35, %v500_v23  ;;  %v502_v39 = vmul.f32 0.6931472, %v931_v27 }
 0x11c   :  { %944 = vpow2.f32 %v545_v16  ;;  %v523_v42 = vmul.f32 1.442695, %v513_v28  ;;  %v587_v47 = vmul.f32 1.442695, %v577_v31  ;;  %v514_v50 = vmul.f32 0.15, %v478_v32 }
 0x11d   :  { %946 = vpow2.f32 %v609_v22  ;;  %v547_v51 = vmul.f32 1.442695, %v537_v33  ;;  %v611_v52 = vmul.f32 1.442695, %v601_v34  ;;  %v578_v53 = vmul.f32 -0.35, %v478_v32 }
 0x11e   :  { %948 = vpow2.f32 %v523_v42  ;;  %v525_v54 = vmul.f32 1.442695, %v514_v50  ;;  %v538_v55 = vmul.f32 0.15, %v502_v39  ;;  %v602_v56 = vmul.f32 -0.35, %v502_v39 }
 0x11f   :  { %950 = vpow2.f32 %v587_v47  ;;  %v589_v57 = vmul.f32 1.442695, %v578_v53  ;;  %v1270_v62 = vpop.f32.mrb[12].mxu0  ;;  %v1272_v63 = vpop.f32.mrb[12].mxu1 }
 0x120   :  { %v933_v3 = vpop.eup %932  ;;  %952 = vpow2.f32 %v547_v51  ;;  %v549_v6 = vmul.f32 1.442695, %v538_v55  ;;  %v613_v7 = vmul.f32 1.442695, %v602_v56  ;;  %v421_v10 = vmul.f32 %v1270_v62, %v1270_v62  ;;  %v1276_v11 = vpop.f32.mrb[13].mxu0 }
 0x121   :  { %v1278_v12 = vpop.f32.mrb[13].mxu1  ;;  %v935_v13 = vpop.eup %934  ;;  %954 = vpow2.f32 %v611_v52  ;;  %v445_v14 = vmul.f32 %v1272_v63, %v1272_v63  ;;  %v429_v15 = vmul.f32 %v1276_v11, %v1276_v11  ;;  %v492_v52 = vmax.f32 %v1265_v2, 1e-24 }
 0x122   :  { %v453_v16 = vmul.f32 %v1278_v12, %v1278_v12  ;;  %v1286_v17 = vpop.f32.mrb[14].mxu0  ;;  %v1288_v19 = vpop.f32.mrb[14].mxu1  ;;  %v647_v23 = vmul.f32 %v935_v13, %v1171_v40  ;;  %v623_v27 = vmul.f32 %v935_v13, %v1163_v36  ;;  %956 = vpow2.f32 %v525_v54 }
 0x123   :  { %v937_v22 = vpop.eup %936  ;;  %v422_v28 = vmul.f32 %v1286_v17, %v1286_v17  ;;  %v1294_v31 = vpop.f32.mrb[15].mxu0  ;;  %958 = vpow2.f32 %v589_v57  ;;  %v437_v34 = vadd.f32 %v429_v15, %v421_v10  ;;  %v446_v42 = vmul.f32 %v1288_v19, %v1288_v19 }
 0x124   :  { %v1296_v32 = vpop.f32.mrb[15].mxu1  ;;  %v939_v33 = vpop.eup %938  ;;  %v1298_v39 = vadd.f32 %v453_v16, %v445_v14  ;;  %960 = vpow2.f32 %v549_v6  ;;  %v430_v50 = vmul.f32 %v1294_v31, %v1294_v31 }
 0x125   :  { %v941_v47 = vpop.eup %940  ;;  %v631_v40 = vmul.f32 %v939_v33, %v1165_v37  ;;  %v655_v36 = vmul.f32 %v939_v33, %v1173_v41  ;;  %962 = vpow2.f32 %v613_v7  ;;  %v469_v53 = vmax.f32 %v437_v34, 1e-24 }
 0x126   :  { %v943_v51 = vpop.eup %942  ;;  %v454_v54 = vmul.f32 %v1296_v32, %v1296_v32  ;;  %964 = vlog2.f32 %v467_v18  ;;  %v438_v6 = vadd.f32 %v430_v50, %v422_v28  ;;  %v559_v7 = vsub.f32 %v933_v3, %v937_v22 }
 0x127   :  { %v945_v55 = vpop.eup %944  ;;  %v639_v56 = vsub.f32 %v623_v27, %v631_v40  ;;  %v663_v57 = vsub.f32 %v647_v23, %v655_v36  ;;  %v648_v10 = vmul.f32 %v943_v51, %v1187_v48  ;;  %v624_v37 = vmul.f32 %v943_v51, %v1179_v44 }
 0x128   :  { %v947_v41 = vpop.eup %946  ;;  %v462_v13 = vadd.f32 %v454_v54, %v446_v42  ;;  %966 = vlog2.f32 %v491_v26  ;;  %v493_v44 = vmax.f32 %v1298_v39, 1e-24  ;;  %v470_v48 = vmax.f32 %v438_v6, 1e-24 }
 0x129   :  { %v949_v14 = vpop.eup %948  ;;  %v703_v2 = vmul.f32 %v639_v56, %v639_v56  ;;  %v719_v15 = vmul.f32 %v663_v57, %v663_v57  ;;  %v632_v16 = vmul.f32 %v947_v41, %v1181_v45  ;;  %v656_v33 = vmul.f32 %v947_v41, %v1189_v49 }
 0x12a   :  { %v951_v27 = vpop.eup %950  ;;  %v560_v23 = vsub.f32 %v941_v47, %v945_v55  ;;  %968 = vlog2.f32 %v468_v59  ;;  %v494_v45 = vmax.f32 %v462_v13, 1e-24  ;;  %v567_v50 = vmul.f32 %v559_v7, %v559_v7 }
 0x12b   :  { %v953_v43 = vpop.eup %952  ;;  %v727_v18 = vadd.f32 %v719_v15, %v703_v2  ;;  %v640_v28 = vsub.f32 %v624_v37, %v632_v16  ;;  %v664_v34 = vsub.f32 %v648_v10, %v656_v33  ;;  %v649_v3 = vmul.f32 %v951_v27, %v1203_v0 }
 0x12c   :  { %v955_v22 = vpop.eup %954  ;;  %v625_v42 = vmul.f32 %v951_v27, %v1195_v60  ;;  %v561_v49 = vsub.f32 %v949_v14, %v953_v43  ;;  %970 = vlog2.f32 %v492_v52  ;;  %v568_v51 = vmul.f32 %v560_v23, %v560_v23 }
 0x12d   :  { %v957_v46 = vpop.eup %956  ;;  %v704_v26 = vmul.f32 %v640_v28, %v640_v28  ;;  %v720_v40 = vmul.f32 %v664_v34, %v664_v34  ;;  %v633_v39 = vmul.f32 %v955_v22, %v1197_v61  ;;  %v657_v47 = vmul.f32 %v955_v22, %v1205_v1 }
 0x12e   :  { %v959_v36 = vpop.eup %958  ;;  %v569_v0 = vmul.f32 %v561_v49, %v561_v49  ;;  %972 = vlog2.f32 %v469_v53  ;;  %v754_v37 = vadd.f32 %v568_v51, %v567_v50 }
 0x12f   :  { %v961_v54 = vpop.eup %960  ;;  %v728_v55 = vadd.f32 %v720_v40, %v704_v26  ;;  %v641_v60 = vsub.f32 %v625_v42, %v633_v39  ;;  %v665_v56 = vsub.f32 %v649_v3, %v657_v47  ;;  %v650_v58 = vmul.f32 %v959_v36, %v1219_v8 }
 0x130   :  { %v963_v59 = vpop.eup %962  ;;  %v626_v57 = vmul.f32 %v959_v36, %v1211_v4  ;;  %v562_v10 = vsub.f32 %v957_v46, %v961_v54  ;;  %974 = vlog2.f32 %v493_v44  ;;  %v755_v14 = vadd.f32 %v754_v37, %v569_v0 }
 0x131   :  { %v780_v61 = vadd.f32 %v728_v55, %v727_v18  ;;  %v705_v41 = vmul.f32 %v641_v60, %v641_v60  ;;  %v721_v1 = vmul.f32 %v665_v56, %v665_v56  ;;  %v634_v52 = vmul.f32 %v963_v59, %v1213_v5  ;;  %v965_v6 = vpop.eup %964 }
 0x132   :  { %v658_v13 = vmul.f32 %v963_v59, %v1221_v9  ;;  %v570_v7 = vmul.f32 %v562_v10, %v562_v10  ;;  %v480_v8 = vmul.f32 0.6931472, %v965_v6  ;;  %976 = vlog2.f32 %v470_v48  ;;  %v967_v16 = vpop.eup %966 }
 0x133   :  { %v729_v2 = vadd.f32 %v721_v1, %v705_v41  ;;  %v642_v15 = vsub.f32 %v626_v57, %v634_v52  ;;  %978 = vlog2.f32 %v494_v45  ;;  %v504_v28 = vmul.f32 0.6931472, %v967_v16 }
 0x134   :  { %v666_v4 = vsub.f32 %v650_v58, %v658_v13  ;;  %v1328_v53 = vadd.f32 %v755_v14, %v570_v7  ;;  %v515_v23 = vmul.f32 0.15, %v480_v8  ;;  %v579_v43 = vmul.f32 -0.35, %v480_v8  ;;  %v969_v5 = vpop.eup %968 }
 0x135   :  { %v781_v33 = vadd.f32 %v780_v61, %v729_v2  ;;  %v706_v27 = vmul.f32 %v642_v15, %v642_v15  ;;  %v482_v34 = vmul.f32 0.6931472, %v969_v5  ;;  %v539_v42 = vmul.f32 0.15, %v504_v28 }
 0x136   :  { %v722_v18 = vmul.f32 %v666_v4, %v666_v4  ;;  %v527_v9 = vmul.f32 1.442695, %v515_v23  ;;  %v591_v44 = vmul.f32 1.442695, %v579_v43  ;;  %v971_v3 = vpop.eup %970  ;;  %v603_v49 = vmul.f32 -0.35, %v504_v28 }
 0x137   :  { %v516_v48 = vmul.f32 0.15, %v482_v34  ;;  %v580_v46 = vmul.f32 -0.35, %v482_v34  ;;  %v506_v45 = vmul.f32 0.6931472, %v971_v3 }
 0x138   :  { %v730_v22 = vadd.f32 %v722_v18, %v706_v27  ;;  %980 = vpow2.f32 %v527_v9  ;;  %v973_v26 = vpop.eup %972  ;;  %v551_v39 = vmul.f32 1.442695, %v539_v42  ;;  %v615_v47 = vmul.f32 1.442695, %v603_v49 }
 0x139   :  { %982 = vpow2.f32 %v591_v44  ;;  %v529_v36 = vmul.f32 1.442695, %v516_v48  ;;  %v593_v50 = vmul.f32 1.442695, %v580_v46  ;;  %v540_v51 = vmul.f32 0.15, %v506_v45 }
 0x13a   :  { %v1330_v40 = vadd.f32 %v781_v33, %v730_v22  ;;  %v975_v0 = vpop.eup %974  ;;  %984 = vpow2.f32 %v551_v39  ;;  %v604_v54 = vmul.f32 -0.35, %v506_v45  ;;  %v484_v55 = vmul.f32 0.6931472, %v973_v26 }
 0x13b   :  { %986 = vpow2.f32 %v615_v47  ;;  %v553_v56 = vmul.f32 1.442695, %v540_v51  ;;  %v508_v58 = vmul.f32 0.6931472, %v975_v0 }
 0x13c   :  { %v977_v60 = vpop.eup %976  ;;  %988 = vpow2.f32 %v529_v36  ;;  %v617_v57 = vmul.f32 1.442695, %v604_v54  ;;  %v517_v10 = vmul.f32 0.15, %v484_v55  ;;  %v581_v37 = vmul.f32 -0.35, %v484_v55 }
 0x13d   :  { %v979_v59 = vpop.eup %978  ;;  %990 = vpow2.f32 %v593_v50  ;;  %v541_v61 = vmul.f32 0.15, %v508_v58  ;;  %v605_v41 = vmul.f32 -0.35, %v508_v58  ;;  %v486_v1 = vmul.f32 0.6931472, %v977_v60 }
 0x13e   :  { %992 = vpow2.f32 %v553_v56  ;;  %v531_v52 = vmul.f32 1.442695, %v517_v10  ;;  %v595_v6 = vmul.f32 1.442695, %v581_v37  ;;  %v510_v13 = vmul.f32 0.6931472, %v979_v59 }
 0x13f   :  { %994 = vpow2.f32 %v617_v57  ;;  %v555_v7 = vmul.f32 1.442695, %v541_v61  ;;  %v619_v14 = vmul.f32 1.442695, %v605_v41  ;;  %v518_v2 = vmul.f32 0.15, %v486_v1 }
 0x140   :  { %996 = vpow2.f32 %v531_v52  ;;  %v582_v15 = vmul.f32 -0.35, %v486_v1  ;;  %v542_v8 = vmul.f32 0.15, %v510_v13  ;;  %v606_v16 = vmul.f32 -0.35, %v510_v13 }
 0x141   :  { %998 = vpow2.f32 %v595_v6  ;;  %v533_v33 = vmul.f32 1.442695, %v518_v2 }
 0x142   :  { %v981_v4 = vpop.eup %980  ;;  %1000 = vpow2.f32 %v555_v7  ;;  %v597_v23 = vmul.f32 1.442695, %v582_v15  ;;  %v557_v43 = vmul.f32 1.442695, %v542_v8  ;;  %v621_v28 = vmul.f32 1.442695, %v606_v16 }
 0x143   :  { %v983_v27 = vpop.eup %982  ;;  %1002 = vpow2.f32 %v619_v14 }
 0x144   :  { %v651_v5 = vmul.f32 %v983_v27, %v1235_v24  ;;  %v627_v18 = vmul.f32 %v983_v27, %v1227_v20  ;;  %v985_v9 = vpop.eup %984  ;;  %1004 = vpow2.f32 %v533_v33 }
 0x145   :  { %v987_v44 = vpop.eup %986  ;;  %1006 = vpow2.f32 %v597_v23  ;;  %v563_v34 = vsub.f32 %v981_v4, %v985_v9 }
 0x146   :  { %v989_v3 = vpop.eup %988  ;;  %v635_v22 = vmul.f32 %v987_v44, %v1229_v21  ;;  %v659_v42 = vmul.f32 %v987_v44, %v1237_v25  ;;  %1008 = vpow2.f32 %v557_v43 }
 0x147   :  { %v991_v49 = vpop.eup %990  ;;  %1010 = vpow2.f32 %v621_v28  ;;  %v571_v48 = vmul.f32 %v563_v34, %v563_v34 }
 0x148   :  { %v993_v46 = vpop.eup %992  ;;  %v643_v24 = vsub.f32 %v627_v18, %v635_v22  ;;  %v667_v45 = vsub.f32 %v651_v5, %v659_v42  ;;  %v652_v20 = vmul.f32 %v991_v49, %v1251_v35  ;;  %v628_v26 = vmul.f32 %v991_v49, %v1243_v29 }
 0x149   :  { %v995_v39 = vpop.eup %994  ;;  %v564_v47 = vsub.f32 %v989_v3, %v993_v46  ;;  %v757_v36 = vadd.f32 %v1328_v53, %v571_v48 }
 0x14a   :  { %v997_v50 = vpop.eup %996  ;;  %v707_v51 = vmul.f32 %v643_v24, %v643_v24  ;;  %v723_v21 = vmul.f32 %v667_v45, %v667_v45  ;;  %v636_v25 = vmul.f32 %v995_v39, %v1245_v30  ;;  %v660_v0 = vmul.f32 %v995_v39, %v1253_v38 }
 0x14b   :  { %v999_v54 = vpop.eup %998  ;;  %v572_v55 = vmul.f32 %v564_v47, %v564_v47 }
 0x14c   :  { %v1001_v60 = vpop.eup %1000  ;;  %v731_v56 = vadd.f32 %v723_v21, %v707_v51  ;;  %v644_v58 = vsub.f32 %v628_v26, %v636_v25  ;;  %v668_v59 = vsub.f32 %v652_v20, %v660_v0  ;;  %v653_v35 = vmul.f32 %v999_v54, %v1276_v11 }
 0x14d   :  { %v1003_v29 = vpop.eup %1002  ;;  %v565_v57 = vsub.f32 %v997_v50, %v1001_v60  ;;  %v758_v10 = vadd.f32 %v757_v36, %v572_v55  ;;  %v629_v53 = vmul.f32 %v999_v54, %v1270_v62 }
 0x14e   :  { %v1005_v37 = vpop.eup %1004  ;;  %v708_v61 = vmul.f32 %v644_v58, %v644_v58  ;;  %v724_v41 = vmul.f32 %v668_v59, %v668_v59  ;;  %v661_v30 = vmul.f32 %v1003_v29, %v1278_v12  ;;  %v637_v38 = vmul.f32 %v1003_v29, %v1272_v63 }
 0x14f   :  { %v1007_v1 = vpop.eup %1006  ;;  %v573_v52 = vmul.f32 %v565_v57, %v565_v57  ;;  %v783_v6 = vadd.f32 %v1330_v40, %v731_v56 }
 0x150   :  { %v1009_v13 = vpop.eup %1008  ;;  %v732_v7 = vadd.f32 %v724_v41, %v708_v61  ;;  %v669_v14 = vsub.f32 %v653_v35, %v661_v30  ;;  %v654_v11 = vmul.f32 %v1007_v1, %v1294_v31  ;;  %v630_v2 = vmul.f32 %v1007_v1, %v1286_v17 }
 0x151   :  { %v1011_v15 = vpop.eup %1010  ;;  %v566_v62 = vsub.f32 %v1005_v37, %v1009_v13  ;;  %v759_v8 = vadd.f32 %v758_v10, %v573_v52  ;;  %v645_v16 = vsub.f32 %v629_v53, %v637_v38 }
 0x152   :  { %v725_v4 = vmul.f32 %v669_v14, %v669_v14  ;;  %v662_v12 = vmul.f32 %v1011_v15, %v1296_v32  ;;  %v638_v63 = vmul.f32 %v1011_v15, %v1288_v19  ;;  %v784_v33 = vadd.f32 %v783_v6, %v732_v7 }
 0x153   :  { %v574_v27 = vmul.f32 %v566_v62, %v566_v62  ;;  %v709_v23 = vmul.f32 %v645_v16, %v645_v16 }
 0x154   :  { %v670_v40 = vsub.f32 %v654_v11, %v662_v12  ;;  %v646_v43 = vsub.f32 %v630_v2, %v638_v63 }
 0x155   :  { %v760_v5 = vadd.f32 %v759_v8, %v574_v27  ;;  %v733_v18 = vadd.f32 %v725_v4, %v709_v23 }
 0x156   :  { %v726_v28 = vmul.f32 %v670_v40, %v670_v40  ;;  %v710_v31 = vmul.f32 %v646_v43, %v646_v43 }
 0x157   :  { %761 = vadd.xlane.f32.xlu0 %v760_v5  ;;  %v785_v17 = vadd.f32 %v784_v33, %v733_v18 }
 0x158   :  { %v734_v9 = vadd.f32 %v726_v28, %v710_v31 }
 0x15a   :  { %v786_v44 = vadd.f32 %v785_v17, %v734_v9 }
 0x15c   :  { %787 = vadd.xlane.f32.xlu0 %v786_v44 }
 0x1e4   :  { %v762_v34 = vpop.xlane.xlu0 %761 }
 0x1e5   :  { %v763_v3 = vrot.slane %v762_v34, 4 }
 0x1e7   :  { %v764_v22 = vadd.f32 %v763_v3, %v762_v34 }
 0x1e9   :  { %v765_v32 = vrot.slane %v764_v22, 2  ;;  %v788_v42 = vpop.xlane.xlu0 %787 }
 0x1ea   :  { %v789_v19 = vrot.slane %v788_v42, 4 }
 0x1eb   :  { %v766_v49 = vadd.f32 %v765_v32, %v764_v22 }
 0x1ec   :  { %v790_v48 = vadd.f32 %v789_v19, %v788_v42 }
 0x1ed   :  { %v767_v46 = vrot.slane %v766_v49, 1 }
 0x1ee   :  { %v791_v24 = vrot.slane %v790_v48, 2 }
 0x1ef   :  { %v768_v45 = vadd.f32 %v767_v46, %v766_v49 }
 0x1f0   :  { %v792_v20 = vadd.f32 %v791_v24, %v790_v48 }
 0x1f1   :  { %857 = vpush %v768_v45 }
 0x1f2   :  { %v793_v26 = vrot.slane %v792_v20, 1 }
 0x1f4   :  { %v794_v39 = vadd.f32 %v793_v26, %v792_v20 }
 0x1f6   :  { %859 = vpush %v794_v39 }
 0x222   :  { %s858_s0 = spop %857 }
 0x223   :  { %771 = sst [smem:[#allocation4]] %s858_s0 }
 0x227   :  { %s860_s4 = spop %859 }
 0x228   :  { %797 = sst [smem:[#allocation4 + $0x1]] %s860_s4 }
 0x229   :  { %1023 = shalt.err (!%p1020_p4)
}
 0x22a   :  { %s1026_s6 = smov [#allocation4]  }
 0x22b   :  { %807 = dma.smem_to_vmem %s1026_s6, 16, %s805_s30, [#allocation5]  }
 0x22c   :  { %1024 = dma.done.wait [#allocation5], 16  }
 0x22d   :  { %1025 = vsyncadd [#allocation5], 4294967280 }
 0x22e   :  { %811 = sfence }
 0x22f   :  { %812 = vsyncpa [#allocation5], 1 }

// kernel: combined_loss.6
= control target key start
LH: loop header
LB: loop body
LE: loop exit
PB: predicated region body
PF: predicated region fallthrough
CT: control target
= control target key end

     0   :  { %v1542_v2 = vmov 0   ;;  %vm168_vm0 = vcmask 654336   ;;  %s2112_s0 = inlined_call_operand.vmem [shape: bf16[128,80], index: 0, kind: input, shape index: {}]   ;;  %s2113_s1 = inlined_call_operand.vmem [shape: bf16[128,80], index: 1, kind: input, shape index: {}]   ;;  %s2114_s2 = inlined_call_operand.vmem [shape: bf16[80,256], index: 2, kind: input, shape index: {}]   ;;  %s2115_s3 = inlined_call_operand.vmem [shape: f32[2], index: 3, kind: output, shape index: {}]  }
   0x1   :  { %v1305_v0 = vld [vmem:[%s2114_s2 + $0x4] ss:$8 sps:$4 sm:$0xff]   ;;  %v1307_v1 = vld [vmem:[%s2114_s2] ss:$8 sps:$4 sm:$0xff]   ;;  %225 = vmatprep.mubr.bf16.mxu0 %v1542_v2  ;;  %418 = vmatprep.mubr.bf16.mxu1 %v1542_v2  ;;  %v1308_v3 = vld [vmem:[%s2114_s2 + $0x14] ss:$8 sps:$4 sm:$0xff]  }
   0x2   :  { %193 = vmatprep.subr.bf16.mxu0 %v1305_v0  ;;  %386 = vmatprep.subr.bf16.mxu1 %v1305_v0  ;;  %v1310_v4 = vld [vmem:[%s2114_s2 + $0x10] ss:$8 sps:$4 sm:$0xff]   ;;  %v1311_v5 = vld [vmem:[%s2114_s2 + $0x24] ss:$8 sps:$4 sm:$0xff]   ;;  %v1313_v6 = vld [vmem:[%s2114_s2 + $0x20] ss:$8 sps:$4 sm:$0xff]  }
   0x3   :  { %194 = vmatpush1.bf16.msra.mxu0 %v1307_v1  ;;  %387 = vmatpush1.bf16.msra.mxu1 %v1307_v1  ;;  %v1314_v7 = vld [vmem:[%s2114_s2 + $0x34] ss:$8 sps:$4 sm:$0xff]   ;;  %v1316_v8 = vld [vmem:[%s2114_s2 + $0x30] ss:$8 sps:$4 sm:$0xff]   ;;  %v1317_v9 = vld [vmem:[%s2114_s2 + $0x44] ss:$8 sps:$4 sm:$0xff]  }
   0x4   :  { %195 = vmatprep.subr.bf16.mxu0 %v1308_v3  ;;  %388 = vmatprep.subr.bf16.mxu1 %v1308_v3  ;;  %v1319_v10 = vld [vmem:[%s2114_s2 + $0x40] ss:$8 sps:$4 sm:$0xff]  }
   0x5   :  { %v1320_v11 = vld [vmem:[%s2112_s0] sm:$0xff]  }
   0x6   :  { %v1321_v12 = vld [vmem:[%s2113_s1] sm:$0xff]  }
   0x7   :  { %196 = vmatpush1.bf16.msra.mxu0 %v1310_v4  ;;  %389 = vmatpush1.bf16.msra.mxu1 %v1310_v4 }
   0x8   :  { %197 = vmatprep.subr.bf16.mxu0 %v1311_v5  ;;  %390 = vmatprep.subr.bf16.mxu1 %v1311_v5 }
   0xb   :  { %198 = vmatpush1.bf16.msra.mxu0 %v1313_v6  ;;  %391 = vmatpush1.bf16.msra.mxu1 %v1313_v6 }
   0xc   :  { %199 = vmatprep.subr.bf16.mxu0 %v1314_v7  ;;  %392 = vmatprep.subr.bf16.mxu1 %v1314_v7 }
   0xf   :  { %200 = vmatpush1.bf16.msra.mxu0 %v1316_v8  ;;  %393 = vmatpush1.bf16.msra.mxu1 %v1316_v8 }
  0x10   :  { %201 = vmatprep.subr.bf16.mxu0 %v1317_v9  ;;  %394 = vmatprep.subr.bf16.mxu1 %v1317_v9 }
  0x13   :  { %202 = vmatpush1.bf16.msra.mxu0 %v1319_v10  ;;  %395 = vmatpush1.bf16.msra.mxu1 %v1319_v10 }
  0x16   :  { %1275 = vmatmul.mubr.msk.bf16.vlgmr.msra.gmra.mrb[0].mxu0 %vm168_vm0, %v1320_v11  ;;  %1291 = vmatmul.mubr.msk.bf16.vlgmr.msra.gmra.mrb[0].mxu1 %vm168_vm0, %v1321_v12 }
  0x17   :  { %8 = vsyncpa [#allocation5], 0  ;;  %235 = vmatprep.mubr.bf16.mxu0 %v1542_v2  ;;  %428 = vmatprep.mubr.bf16.mxu1 %v1542_v2  ;;  %v1322_v13 = vld [vmem:[%s2112_s0 + $0x8] sm:$0xff]   ;;  %v1324_v15 = vld [vmem:[%s2112_s0 + $0x10] sm:$0xff]   ;;  %s1248_s9 = sshll.u32 %s2115_s3, 4  ;;  %s1249_s9 = int_to_ptr.vmem [resolvable:$true] %s1248_s9 }
  0x18   :  { %v1323_v14 = vld [vmem:[%s2113_s1 + $0x8] sm:$0xff]   ;;  %v1325_v16 = vld [vmem:[%s2113_s1 + $0x10] sm:$0xff]   ;;  %v1326_v17 = vld [vmem:[%s2112_s0 + $0x18] sm:$0xff]   ;;  %s1528_s11 = scalar_lea.vmem %s1249_s9, 16  ;;  %p1533_p1 = scmp.lt.s32.totalorder %s1249_s9, %s1249_s9 }
  0x19   :  { %v1327_v18 = vld [vmem:[%s2113_s1 + $0x18] sm:$0xff]   ;;  %v1328_v19 = vld [vmem:[%s2112_s0 + $0x20] sm:$0xff]   ;;  %v1330_v21 = vld [vmem:[%s2112_s0 + $0x28] sm:$0xff]   ;;  %p1529_p0 = scmp.ne.s32.totalorder %s1249_s9, %s1528_s11  ;;  %p1534_p2 = scmp.lt.s32.totalorder %s1528_s11, %s1528_s11 }
  0x1a   :  { %v1329_v20 = vld [vmem:[%s2113_s1 + $0x20] sm:$0xff]   ;;  %v1331_v22 = vld [vmem:[%s2113_s1 + $0x28] sm:$0xff]   ;;  %v1332_v23 = vld [vmem:[%s2112_s0 + $0x30] sm:$0xff]  }
  0x1b   :  { %v1333_v24 = vld [vmem:[%s2113_s1 + $0x30] sm:$0xff]   ;;  %v1334_v25 = vld [vmem:[%s2112_s0 + $0x38] sm:$0xff]   ;;  %p1535_p3 = por %p1534_p2, %p1533_p1 }
  0x1c   :  { %v1335_v26 = vld [vmem:[%s2113_s1 + $0x38] sm:$0xff]  }
  0x1d   :  { %p1536_p4 = pnand %p1535_p3, %p1529_p0 }
  0x1e   :  { %1276 = vmatmul.mubr.msk.bf16.gmra.mrb[4].mxu0 %vm168_vm0, %v1322_v13  ;;  %1292 = vmatmul.mubr.msk.bf16.gmra.mrb[4].mxu1 %vm168_vm0, %v1323_v14 }
  0x1f   :  { %245 = vmatprep.mubr.bf16.mxu0 %v1542_v2  ;;  %438 = vmatprep.mubr.bf16.mxu1 %v1542_v2 }
  0x26   :  { %1277 = vmatmul.mubr.msk.bf16.gmra.mrb[8].mxu0 %vm168_vm0, %v1324_v15  ;;  %1293 = vmatmul.mubr.msk.bf16.gmra.mrb[8].mxu1 %vm168_vm0, %v1325_v16 }
  0x27   :  { %255 = vmatprep.mubr.bf16.mxu0 %v1542_v2  ;;  %448 = vmatprep.mubr.bf16.mxu1 %v1542_v2 }
  0x2e   :  { %1278 = vmatmul.mubr.msk.bf16.gmra.mrb[12].mxu0 %vm168_vm0, %v1326_v17  ;;  %1294 = vmatmul.mubr.msk.bf16.gmra.mrb[12].mxu1 %vm168_vm0, %v1327_v18 }
  0x2f   :  { %265 = vmatprep.mubr.bf16.mxu0 %v1542_v2  ;;  %458 = vmatprep.mubr.bf16.mxu1 %v1542_v2 }
  0x36   :  { %1279 = vmatmul.mubr.msk.bf16.gmra.mrb[16].mxu0 %vm168_vm0, %v1328_v19  ;;  %1295 = vmatmul.mubr.msk.bf16.gmra.mrb[16].mxu1 %vm168_vm0, %v1329_v20 }
  0x37   :  { %275 = vmatprep.mubr.bf16.mxu0 %v1542_v2  ;;  %468 = vmatprep.mubr.bf16.mxu1 %v1542_v2 }
  0x3e   :  { %1280 = vmatmul.mubr.msk.bf16.gmra.mrb[20].mxu0 %vm168_vm0, %v1330_v21  ;;  %1296 = vmatmul.mubr.msk.bf16.gmra.mrb[20].mxu1 %vm168_vm0, %v1331_v22 }
  0x3f   :  { %285 = vmatprep.mubr.bf16.mxu0 %v1542_v2  ;;  %478 = vmatprep.mubr.bf16.mxu1 %v1542_v2 }
  0x46   :  { %1281 = vmatmul.mubr.msk.bf16.gmra.mrb[24].mxu0 %vm168_vm0, %v1332_v23  ;;  %1297 = vmatmul.mubr.msk.bf16.gmra.mrb[24].mxu1 %vm168_vm0, %v1333_v24 }
  0x47   :  { %295 = vmatprep.mubr.bf16.mxu0 %v1542_v2  ;;  %488 = vmatprep.mubr.bf16.mxu1 %v1542_v2 }
  0x4e   :  { %1282 = vmatmul.mubr.msk.bf16.gmra.mrb[28].mxu0 %vm168_vm0, %v1334_v25  ;;  %1298 = vmatmul.mubr.msk.bf16.gmra.mrb[28].mxu1 %vm168_vm0, %v1335_v26 }
  0xe9   :  { %v1674_v27 = vpop.f32.mrb[0].mxu0  ;;  %v1676_v28 = vpop.f32.mrb[0].mxu1 }
  0xea   :  { %v499_v29 = vmul.f32 %v1674_v27, %v1674_v27  ;;  %v547_v30 = vmul.f32 %v1676_v28, %v1676_v28  ;;  %v1682_v31 = vpop.f32.mrb[1].mxu0  ;;  %v1684_v32 = vpop.f32.mrb[1].mxu1 }
  0xeb   :  { %v515_v33 = vmul.f32 %v1682_v31, %v1682_v31  ;;  %v563_v34 = vmul.f32 %v1684_v32, %v1684_v32  ;;  %v1690_v35 = vpop.f32.mrb[2].mxu0  ;;  %v1692_v36 = vpop.f32.mrb[2].mxu1 }
  0xec   :  { %v500_v37 = vmul.f32 %v1690_v35, %v1690_v35  ;;  %v548_v38 = vmul.f32 %v1692_v36, %v1692_v36  ;;  %v1698_v39 = vpop.f32.mrb[3].mxu0  ;;  %v1700_v40 = vpop.f32.mrb[3].mxu1 }
  0xed   :  { %v531_v41 = vadd.f32 %v515_v33, %v499_v29  ;;  %v579_v42 = vadd.f32 %v563_v34, %v547_v30  ;;  %v516_v43 = vmul.f32 %v1698_v39, %v1698_v39  ;;  %v564_v44 = vmul.f32 %v1700_v40, %v1700_v40 }
  0xef   :  { %v595_v45 = vmax.f32 %v531_v41, 1e-24  ;;  %v643_v46 = vmax.f32 %v579_v42, 1e-24  ;;  %v532_v47 = vadd.f32 %v516_v43, %v500_v37  ;;  %v580_v48 = vadd.f32 %v564_v44, %v548_v38 }
  0xf1   :  { %1336 = vlog2.f32 %v595_v45  ;;  %v596_v49 = vmax.f32 %v532_v47, 1e-24  ;;  %v644_v50 = vmax.f32 %v580_v48, 1e-24  ;;  %v1706_v51 = vpop.f32.mrb[4].mxu0  ;;  %v1708_v52 = vpop.f32.mrb[4].mxu1 }
  0xf2   :  { %1338 = vlog2.f32 %v643_v46  ;;  %v501_v53 = vmul.f32 %v1706_v51, %v1706_v51  ;;  %v549_v54 = vmul.f32 %v1708_v52, %v1708_v52  ;;  %v1714_v55 = vpop.f32.mrb[5].mxu0  ;;  %v1716_v56 = vpop.f32.mrb[5].mxu1 }
  0xf3   :  { %1340 = vlog2.f32 %v596_v49  ;;  %v517_v57 = vmul.f32 %v1714_v55, %v1714_v55  ;;  %v565_v58 = vmul.f32 %v1716_v56, %v1716_v56  ;;  %v1722_v59 = vpop.f32.mrb[6].mxu0  ;;  %v1724_v60 = vpop.f32.mrb[6].mxu1 }
  0xf4   :  { %1342 = vlog2.f32 %v644_v50  ;;  %v502_v61 = vmul.f32 %v1722_v59, %v1722_v59  ;;  %v550_v62 = vmul.f32 %v1724_v60, %v1724_v60  ;;  %v1730_v63 = vpop.f32.mrb[7].mxu0  ;;  %v1732_v0 = vpop.f32.mrb[7].mxu1 }
  0xf5   :  { %v533_v1 = vadd.f32 %v517_v57, %v501_v53  ;;  %v581_v2 = vadd.f32 %v565_v58, %v549_v54  ;;  %v518_v3 = vmul.f32 %v1730_v63, %v1730_v63  ;;  %v566_v4 = vmul.f32 %v1732_v0, %v1732_v0 }
  0xf7   :  { %v597_v5 = vmax.f32 %v533_v1, 1e-24  ;;  %v645_v6 = vmax.f32 %v581_v2, 1e-24  ;;  %v534_v7 = vadd.f32 %v518_v3, %v502_v61  ;;  %v582_v8 = vadd.f32 %v566_v4, %v550_v62 }
  0xf9   :  { %1344 = vlog2.f32 %v597_v5  ;;  %v598_v9 = vmax.f32 %v534_v7, 1e-24  ;;  %v646_v10 = vmax.f32 %v582_v8, 1e-24  ;;  %v1738_v11 = vpop.f32.mrb[8].mxu0  ;;  %v1740_v12 = vpop.f32.mrb[8].mxu1 }
  0xfa   :  { %1346 = vlog2.f32 %v645_v6  ;;  %v503_v13 = vmul.f32 %v1738_v11, %v1738_v11  ;;  %v551_v14 = vmul.f32 %v1740_v12, %v1740_v12  ;;  %v1746_v15 = vpop.f32.mrb[9].mxu0  ;;  %v1748_v16 = vpop.f32.mrb[9].mxu1 }
  0xfb   :  { %v1337_v17 = vpop.eup %1336  ;;  %1348 = vlog2.f32 %v598_v9  ;;  %v519_v18 = vmul.f32 %v1746_v15, %v1746_v15  ;;  %v567_v19 = vmul.f32 %v1748_v16, %v1748_v16  ;;  %v1754_v20 = vpop.f32.mrb[10].mxu0 }
  0xfc   :  { %v1756_v21 = vpop.f32.mrb[10].mxu1  ;;  %v1339_v22 = vpop.eup %1338  ;;  %v612_v23 = vmul.f32 0.6931472, %v1337_v17  ;;  %1350 = vlog2.f32 %v646_v10  ;;  %v504_v24 = vmul.f32 %v1754_v20, %v1754_v20 }
  0xfd   :  { %v552_v25 = vmul.f32 %v1756_v21, %v1756_v21  ;;  %v1762_v26 = vpop.f32.mrb[11].mxu0  ;;  %v1764_v29 = vpop.f32.mrb[11].mxu1  ;;  %v660_v33 = vmul.f32 0.6931472, %v1339_v22  ;;  %v1766_v34 = vadd.f32 %v519_v18, %v503_v13  ;;  %v1768_v37 = vadd.f32 %v567_v19, %v551_v14 }
  0xfe   :  { %v1341_v30 = vpop.eup %1340  ;;  %v520_v38 = vmul.f32 %v1762_v26, %v1762_v26  ;;  %v691_v42 = vmul.f32 0.15, %v612_v23  ;;  %v819_v43 = vmul.f32 -0.35, %v612_v23  ;;  %v568_v45 = vmul.f32 %v1764_v29, %v1764_v29 }
  0xff   :  { %v1343_v41 = vpop.eup %1342  ;;  %v614_v44 = vmul.f32 0.6931472, %v1341_v30  ;;  %v739_v46 = vmul.f32 0.15, %v660_v33  ;;  %v867_v47 = vmul.f32 -0.35, %v660_v33 }
 0x100   :  { %v662_v48 = vmul.f32 0.6931472, %v1343_v41  ;;  %v1774_v49 = vadd.f32 %v520_v38, %v504_v24  ;;  %v707_v50 = vmul.f32 1.442695, %v691_v42  ;;  %v835_v53 = vmul.f32 1.442695, %v819_v43 }
 0x101   :  { %v692_v54 = vmul.f32 0.15, %v614_v44  ;;  %v1776_v57 = vadd.f32 %v568_v45, %v552_v25  ;;  %v755_v58 = vmul.f32 1.442695, %v739_v46  ;;  %v883_v61 = vmul.f32 1.442695, %v867_v47 }
 0x102   :  { %v820_v62 = vmul.f32 -0.35, %v614_v44  ;;  %1352 = vpow2.f32 %v707_v50  ;;  %v740_v2 = vmul.f32 0.15, %v662_v48  ;;  %v868_v3 = vmul.f32 -0.35, %v662_v48 }
 0x103   :  { %v709_v1 = vmul.f32 1.442695, %v692_v54  ;;  %v1345_v4 = vpop.eup %1344  ;;  %1354 = vpow2.f32 %v835_v53  ;;  %v599_v6 = vmax.f32 %v1766_v34, 1e-24  ;;  %v647_v10 = vmax.f32 %v1768_v37, 1e-24 }
 0x104   :  { %v837_v5 = vmul.f32 1.442695, %v820_v62  ;;  %v1347_v7 = vpop.eup %1346  ;;  %1356 = vpow2.f32 %v755_v58  ;;  %v757_v8 = vmul.f32 1.442695, %v740_v2  ;;  %v616_v9 = vmul.f32 0.6931472, %v1345_v4 }
 0x105   :  { %v1349_v13 = vpop.eup %1348  ;;  %1358 = vpow2.f32 %v883_v61  ;;  %v885_v14 = vmul.f32 1.442695, %v868_v3  ;;  %v664_v17 = vmul.f32 0.6931472, %v1347_v7  ;;  %v1782_v54 = vpop.f32.mrb[12].mxu0 }
 0x106   :  { %v1351_v19 = vpop.eup %1350  ;;  %1360 = vpow2.f32 %v709_v1  ;;  %v693_v22 = vmul.f32 0.15, %v616_v9  ;;  %v821_v23 = vmul.f32 -0.35, %v616_v9  ;;  %v618_v24 = vmul.f32 0.6931472, %v1349_v13 }
 0x107   :  { %1362 = vpow2.f32 %v837_v5  ;;  %v741_v25 = vmul.f32 0.15, %v664_v17  ;;  %v869_v30 = vmul.f32 -0.35, %v664_v17  ;;  %v666_v33 = vmul.f32 0.6931472, %v1351_v19 }
 0x108   :  { %1364 = vpow2.f32 %v757_v8  ;;  %v711_v38 = vmul.f32 1.442695, %v693_v22  ;;  %v839_v41 = vmul.f32 1.442695, %v821_v23  ;;  %v694_v42 = vmul.f32 0.15, %v618_v24 }
 0x109   :  { %1366 = vpow2.f32 %v885_v14  ;;  %v759_v43 = vmul.f32 1.442695, %v741_v25  ;;  %v887_v44 = vmul.f32 1.442695, %v869_v30  ;;  %v822_v45 = vmul.f32 -0.35, %v618_v24 }
 0x10a   :  { %1368 = vpow2.f32 %v711_v38  ;;  %v713_v46 = vmul.f32 1.442695, %v694_v42  ;;  %v742_v47 = vmul.f32 0.15, %v666_v33  ;;  %v870_v48 = vmul.f32 -0.35, %v666_v33 }
 0x10b   :  { %1370 = vpow2.f32 %v839_v41  ;;  %v841_v50 = vmul.f32 1.442695, %v822_v45  ;;  %v1784_v58 = vpop.f32.mrb[12].mxu1  ;;  %v505_v2 = vmul.f32 %v1782_v54, %v1782_v54  ;;  %v1788_v3 = vpop.f32.mrb[13].mxu0 }
 0x10c   :  { %v1353_v61 = vpop.eup %1352  ;;  %1372 = vpow2.f32 %v759_v43  ;;  %v761_v62 = vmul.f32 1.442695, %v742_v47  ;;  %v889_v1 = vmul.f32 1.442695, %v870_v48  ;;  %v1790_v4 = vpop.f32.mrb[13].mxu1  ;;  %v553_v7 = vmul.f32 %v1784_v58, %v1784_v58 }
 0x10d   :  { %2126 = vst [vmem:[#allocation7_spill] sm:$0xff] %v1790_v4  ;;  %v1355_v5 = vpop.eup %1354  ;;  %1374 = vpow2.f32 %v887_v44  ;;  %v521_v8 = vmul.f32 %v1788_v3, %v1788_v3  ;;  %v569_v9 = vmul.f32 %v1790_v4, %v1790_v4  ;;  %v1798_v13 = vpop.f32.mrb[14].mxu0 }
 0x10e   :  { %2127 = vst [vmem:[#allocation8_spill] sm:$0xff] %v1798_v13  ;;  %v1800_v14 = vpop.f32.mrb[14].mxu1  ;;  %v1357_v17 = vpop.eup %1356  ;;  %v963_v19 = vmul.f32 %v1355_v5, %v1682_v31  ;;  %v915_v22 = vmul.f32 %v1355_v5, %v1674_v27  ;;  %1376 = vpow2.f32 %v713_v46  ;;  %v506_v23 = vmul.f32 %v1798_v13, %v1798_v13 }
 0x10f   :  { %2128 = vst [vmem:[#allocation9_spill] sm:$0xff] %v1800_v14  ;;  %v1806_v24 = vpop.f32.mrb[15].mxu0  ;;  %v1808_v25 = vpop.f32.mrb[15].mxu1  ;;  %v787_v33 = vsub.f32 %v1353_v61, %v1357_v17  ;;  %1378 = vpow2.f32 %v841_v50  ;;  %v1810_v38 = vadd.f32 %v521_v8, %v505_v2  ;;  %v1812_v41 = vadd.f32 %v569_v9, %v553_v7 }
 0x110   :  { %2129 = vst [vmem:[#allocation10_spill] sm:$0xff] %v1806_v24  ;;  %2130 = vst [vmem:[#allocation11_spill] sm:$0xff] %v1808_v25  ;;  %v1359_v30 = vpop.eup %1358  ;;  %v1814_v42 = vpop.f32.mrb[16].mxu0  ;;  %1380 = vpow2.f32 %v761_v62  ;;  %v554_v45 = vmul.f32 %v1800_v14, %v1800_v14  ;;  %v522_v2 = vmul.f32 %v1806_v24, %v1806_v24 }
 0x111   :  { %v1816_v31 = vpop.f32.mrb[16].mxu1  ;;  %v1361_v27 = vpop.eup %1360  ;;  %v931_v43 = vmul.f32 %v1359_v30, %v1676_v28  ;;  %v979_v44 = vmul.f32 %v1359_v30, %v1684_v32  ;;  %v803_v50 = vmul.f32 %v787_v33, %v787_v33  ;;  %1382 = vpow2.f32 %v889_v1 }
 0x112   :  { %v1822_v46 = vpop.f32.mrb[17].mxu0  ;;  %v1824_v47 = vpop.f32.mrb[17].mxu1  ;;  %1384 = vlog2.f32 %v599_v6  ;;  %v538_v53 = vadd.f32 %v522_v2, %v506_v23  ;;  %v2132_v23 = vmax.f32 %v1774_v49, 1e-24 }
 0x113   :  { %v1363_v48 = vpop.eup %1362  ;;  %v1828_v5 = vpop.f32.mrb[18].mxu0  ;;  %v947_v62 = vsub.f32 %v915_v22, %v931_v43  ;;  %v995_v7 = vsub.f32 %v963_v19, %v979_v44  ;;  %v570_v22 = vmul.f32 %v1808_v25, %v1808_v25  ;;  %1386 = vlog2.f32 %v647_v10 }
 0x114   :  { %2131 = vst [vmem:[#allocation12_spill] sm:$0xff] %v1828_v5  ;;  %v1830_v28 = vpop.f32.mrb[18].mxu1  ;;  %v1365_v32 = vpop.eup %1364  ;;  %v964_v8 = vmul.f32 %v1363_v48, %v1698_v39  ;;  %v916_v9 = vmul.f32 %v1363_v48, %v1690_v35  ;;  %1388 = vlog2.f32 %v2132_v23 }
 0x115   :  { %v1834_v17 = vpop.f32.mrb[19].mxu0  ;;  %v1836_v30 = vpop.f32.mrb[19].mxu1  ;;  %v788_v33 = vsub.f32 %v1361_v27, %v1365_v32  ;;  %v1075_v43 = vmul.f32 %v947_v62, %v947_v62  ;;  %v1107_v44 = vmul.f32 %v995_v7, %v995_v7  ;;  %v586_v18 = vadd.f32 %v570_v22, %v554_v45 }
 0x116   :  { %v1367_v1 = vpop.eup %1366  ;;  %v1844_v19 = vpop.f32.mrb[20].mxu0 }
 0x117   :  { %v1846_v39 = vpop.f32.mrb[20].mxu1  ;;  %v1369_v35 = vpop.eup %1368  ;;  %v932_v48 = vmul.f32 %v1367_v1, %v1692_v36  ;;  %v980_v27 = vmul.f32 %v1367_v1, %v1700_v40  ;;  %v804_v61 = vmul.f32 %v788_v33, %v788_v33  ;;  %v1123_v7 = vadd.f32 %v1107_v44, %v1075_v43 }
 0x118   :  { %v1850_v32 = vpop.f32.mrb[21].mxu0  ;;  %v1852_v34 = vpop.f32.mrb[21].mxu1  ;;  %v2133_v44 = vmax.f32 %v1776_v57, 1e-24 }
 0x119   :  { %v1371_v6 = vpop.eup %1370  ;;  %v1856_v25 = vpop.f32.mrb[22].mxu0  ;;  %v948_v36 = vsub.f32 %v916_v9, %v932_v48  ;;  %v996_v13 = vsub.f32 %v964_v8, %v980_v27  ;;  %v1174_v4 = vadd.f32 %v804_v61, %v803_v50  ;;  %v602_v48 = vmax.f32 %v538_v53, 1e-24 }
 0x11a   :  { %v1858_v14 = vpop.f32.mrb[22].mxu1  ;;  %v1373_v62 = vpop.eup %1372  ;;  %v965_v40 = vmul.f32 %v1371_v6, %v1714_v55  ;;  %v917_v10 = vmul.f32 %v1371_v6, %v1706_v51  ;;  %1390 = vlog2.f32 %v2133_v44  ;;  %v650_v50 = vmax.f32 %v586_v18, 1e-24 }
 0x11b   :  { %v1861_v1 = vpop.f32.mrb[23].mxu0  ;;  %v1863_v24 = vpop.f32.mrb[23].mxu1  ;;  %v789_v37 = vsub.f32 %v1369_v35, %v1373_v62  ;;  %v1076_v2 = vmul.f32 %v948_v36, %v948_v36  ;;  %v1108_v22 = vmul.f32 %v996_v13, %v996_v13  ;;  %v2136_v53 = vmax.f32 %v1810_v38, 1e-24 }
 0x11c   :  { %v1375_v33 = vpop.eup %1374  ;;  %v1872_v61 = vpop.f32.mrb[24].mxu0  ;;  %v507_v38 = vmul.f32 %v1814_v42, %v1814_v42 }
 0x11d   :  { %v1377_v45 = vpop.eup %1376  ;;  %v933_v9 = vmul.f32 %v1375_v33, %v1708_v52  ;;  %v981_v8 = vmul.f32 %v1375_v33, %v1716_v56  ;;  %v805_v43 = vmul.f32 %v789_v37, %v789_v37  ;;  %v1874_v51 = vpop.f32.mrb[24].mxu1  ;;  %v1124_v35 = vadd.f32 %v1108_v22, %v1076_v2 }
 0x11e   :  { %v1379_v55 = vpop.eup %1378  ;;  %v1877_v52 = vpop.f32.mrb[25].mxu0  ;;  %1392 = vlog2.f32 %v2136_v53 }
 0x11f   :  { %v1381_v49 = vpop.eup %1380  ;;  %v949_v27 = vsub.f32 %v917_v10, %v933_v9  ;;  %v997_v6 = vsub.f32 %v965_v40, %v981_v8  ;;  %v966_v13 = vmul.f32 %v1379_v55, %v1730_v63  ;;  %v1879_v56 = vpop.f32.mrb[25].mxu1  ;;  %v1881_v36 = vadd.f32 %v1174_v4, %v805_v43 }
 0x120   :  { %v1383_v62 = vpop.eup %1382  ;;  %v1883_v57 = vsub.f32 %v1377_v45, %v1381_v49  ;;  %v918_v18 = vmul.f32 %v1379_v55, %v1722_v59  ;;  %v1888_v33 = vpop.f32.mrb[26].mxu0  ;;  %v1216_v40 = vadd.f32 %v1124_v35, %v1123_v7  ;;  %v2137_v59 = vmax.f32 %v1812_v41, 1e-24 }
 0x121   :  { %2134 = vst [vmem:[#allocation13_spill] sm:$0xff] %v1881_v36  ;;  %v1890_v37 = vpop.f32.mrb[26].mxu1  ;;  %v1077_v63 = vmul.f32 %v949_v27, %v949_v27  ;;  %v1109_v10 = vmul.f32 %v997_v6, %v997_v6  ;;  %v934_v23 = vmul.f32 %v1383_v62, %v1724_v60  ;;  %v1893_v2 = vpop.f32.mrb[27].mxu0  ;;  %v982_v22 = vmul.f32 %v1383_v62, %v1732_v0 }
 0x122   :  { %2135 = vst [vmem:[#allocation14_spill] sm:$0xff] %v1883_v57  ;;  %v1895_v4 = vpop.f32.mrb[27].mxu1  ;;  %v1385_v45 = vpop.eup %1384  ;;  %1394 = vlog2.f32 %v2137_v59  ;;  %v523_v60 = vmul.f32 %v1822_v46, %v1822_v46  ;;  %v555_v62 = vmul.f32 %v1816_v31, %v1816_v31 }
 0x123   :  { %v1125_v9 = vadd.f32 %v1109_v10, %v1077_v63  ;;  %v950_v8 = vsub.f32 %v918_v18, %v934_v23  ;;  %v620_v7 = vmul.f32 0.6931472, %v1385_v45  ;;  %1396 = vlog2.f32 %v602_v48  ;;  %v1387_v55 = vpop.eup %1386  ;;  %v1906_v18 = vpop.f32.mrb[28].mxu0 }
 0x124   :  { %v998_v43 = vsub.f32 %v966_v13, %v982_v22  ;;  %1398 = vlog2.f32 %v650_v50  ;;  %v1389_v27 = vpop.eup %1388  ;;  %v668_v6 = vmul.f32 0.6931472, %v1387_v55  ;;  %v539_v53 = vadd.f32 %v523_v60, %v507_v38  ;;  %v1908_v48 = vpop.f32.mrb[28].mxu1 }
 0x125   :  { %v1217_v44 = vadd.f32 %v1216_v40, %v1125_v9  ;;  %v1078_v49 = vmul.f32 %v950_v8, %v950_v8  ;;  %v695_v35 = vmul.f32 0.15, %v620_v7  ;;  %v823_v0 = vmul.f32 -0.35, %v620_v7  ;;  %v1391_v10 = vpop.eup %1390 }
 0x126   :  { %v1110_v41 = vmul.f32 %v998_v43, %v998_v43  ;;  %v622_v63 = vmul.f32 0.6931472, %v1389_v27  ;;  %v571_v40 = vmul.f32 %v1824_v47, %v1824_v47  ;;  %v743_v45 = vmul.f32 0.15, %v668_v6 }
 0x127   :  { %v715_v13 = vmul.f32 1.442695, %v695_v35  ;;  %v843_v50 = vmul.f32 1.442695, %v823_v0  ;;  %v871_v22 = vmul.f32 -0.35, %v668_v6 }
 0x128   :  { %v1126_v23 = vadd.f32 %v1110_v41, %v1078_v49  ;;  %v603_v59 = vmax.f32 %v539_v53, 1e-24  ;;  %v696_v9 = vmul.f32 0.15, %v622_v63  ;;  %v824_v8 = vmul.f32 -0.35, %v622_v63  ;;  %v1393_v38 = vpop.eup %1392 }
 0x129   :  { %1400 = vpow2.f32 %v715_v13  ;;  %v670_v7 = vmul.f32 0.6931472, %v1391_v10  ;;  %v763_v43 = vmul.f32 1.442695, %v743_v45  ;;  %v891_v60 = vmul.f32 1.442695, %v871_v22 }
 0x12a   :  { %v1912_v55 = vadd.f32 %v1217_v44, %v1126_v23  ;;  %1402 = vpow2.f32 %v843_v50  ;;  %v1914_v35 = vpop.f32.mrb[29].mxu0  ;;  %v1916_v0 = vpop.f32.mrb[29].mxu1  ;;  %v717_v27 = vmul.f32 1.442695, %v696_v9  ;;  %v845_v36 = vmul.f32 1.442695, %v824_v8 }
 0x12b   :  { %v744_v49 = vmul.f32 0.15, %v670_v7  ;;  %1404 = vlog2.f32 %v603_v59  ;;  %v872_v6 = vmul.f32 -0.35, %v670_v7  ;;  %v624_v53 = vmul.f32 0.6931472, %v1393_v38 }
 0x12c   :  { %v1395_v41 = vpop.eup %1394  ;;  %1406 = vpow2.f32 %v763_v43  ;;  %v1918_v13 = vadd.f32 %v571_v40, %v555_v62  ;;  %v1920_v63 = vpop.f32.mrb[30].mxu0  ;;  %v508_v45 = vmul.f32 %v1828_v5, %v1828_v5 }
 0x12d   :  { %2138 = vst [vmem:[#allocation15_spill] sm:$0xff] %v1920_v63  ;;  %v1922_v44 = vpop.f32.mrb[30].mxu1  ;;  %v1397_v50 = vpop.eup %1396  ;;  %1408 = vpow2.f32 %v891_v60  ;;  %v765_v10 = vmul.f32 1.442695, %v744_v49  ;;  %v672_v23 = vmul.f32 0.6931472, %v1395_v41 }
 0x12e   :  { %2139 = vst [vmem:[#allocation16_spill] sm:$0xff] %v1922_v44  ;;  %v1926_v22 = vpop.f32.mrb[31].mxu0  ;;  %v1928_v59 = vpop.f32.mrb[31].mxu1  ;;  %1410 = vpow2.f32 %v717_v27  ;;  %v893_v8 = vmul.f32 1.442695, %v872_v6 }
 0x12f   :  { %2140 = vst [vmem:[#allocation17_spill] sm:$0xff] %v1926_v22  ;;  %2141 = vst [vmem:[#allocation18_spill] sm:$0xff] %v1928_v59  ;;  %v1399_v9 = vpop.eup %1398  ;;  %v697_v62 = vmul.f32 0.15, %v624_v53  ;;  %v825_v40 = vmul.f32 -0.35, %v624_v53  ;;  %1412 = vpow2.f32 %v845_v36  ;;  %v556_v36 = vmul.f32 %v1830_v28, %v1830_v28 }
 0x130   :  { %v745_v7 = vmul.f32 0.15, %v672_v23  ;;  %v873_v38 = vmul.f32 -0.35, %v672_v23  ;;  %v626_v43 = vmul.f32 0.6931472, %v1397_v50  ;;  %1414 = vpow2.f32 %v765_v10 }
 0x131   :  { %v719_v60 = vmul.f32 1.442695, %v697_v62  ;;  %v847_v49 = vmul.f32 1.442695, %v825_v40  ;;  %v674_v41 = vmul.f32 0.6931472, %v1399_v9  ;;  %1416 = vpow2.f32 %v893_v8 }
 0x132   :  { %v767_v57 = vmul.f32 1.442695, %v745_v7  ;;  %v895_v44 = vmul.f32 1.442695, %v873_v38  ;;  %v698_v63 = vmul.f32 0.15, %v626_v43  ;;  %v524_v53 = vmul.f32 %v1834_v17, %v1834_v17 }
 0x133   :  { %1418 = vpow2.f32 %v719_v60  ;;  %v826_v22 = vmul.f32 -0.35, %v626_v43  ;;  %v746_v59 = vmul.f32 0.15, %v674_v41  ;;  %v874_v5 = vmul.f32 -0.35, %v674_v41  ;;  %v1401_v27 = vpop.eup %1400 }
 0x134   :  { %1420 = vpow2.f32 %v847_v49  ;;  %v721_v6 = vmul.f32 1.442695, %v698_v63  ;;  %v1403_v50 = vpop.eup %1402  ;;  %v540_v7 = vadd.f32 %v524_v53, %v508_v45  ;;  %v651_v43 = vmax.f32 %v1918_v13, 1e-24 }
 0x135   :  { %1422 = vpow2.f32 %v767_v57  ;;  %v849_v10 = vmul.f32 1.442695, %v826_v22  ;;  %v769_v23 = vmul.f32 1.442695, %v746_v59  ;;  %v897_v9 = vmul.f32 1.442695, %v874_v5  ;;  %v1405_v8 = vpop.eup %1404 }
 0x136   :  { %v967_v62 = vmul.f32 %v1403_v50, %v1746_v15  ;;  %v919_v40 = vmul.f32 %v1403_v50, %v1738_v11  ;;  %1424 = vpow2.f32 %v895_v44  ;;  %v1407_v38 = vpop.eup %1406  ;;  %v628_v63 = vmul.f32 0.6931472, %v1405_v8 }
 0x137   :  { %1426 = vpow2.f32 %v721_v6  ;;  %v572_v60 = vmul.f32 %v1836_v30, %v1836_v30  ;;  %v1409_v49 = vpop.eup %1408  ;;  %v1939_v57 = vsub.f32 %v1401_v27, %v1407_v38  ;;  %v604_v5 = vmax.f32 %v540_v7, 1e-24 }
 0x138   :  { %1428 = vpow2.f32 %v849_v10  ;;  %v509_v15 = vmul.f32 %v1844_v19, %v1844_v19  ;;  %v1411_v22 = vpop.eup %1410  ;;  %v935_v11 = vmul.f32 %v1409_v49, %v1740_v12  ;;  %v983_v44 = vmul.f32 %v1409_v49, %v1748_v16 }
 0x139   :  { %1430 = vpow2.f32 %v769_v23  ;;  %v699_v45 = vmul.f32 0.15, %v628_v63  ;;  %v1413_v59 = vpop.eup %1412  ;;  %v827_v13 = vmul.f32 -0.35, %v628_v63  ;;  %v588_v41 = vadd.f32 %v572_v60, %v556_v36 }
 0x13a   :  { %1432 = vpow2.f32 %v897_v9  ;;  %v557_v27 = vmul.f32 %v1846_v39, %v1846_v39  ;;  %v1415_v6 = vpop.eup %1414  ;;  %v951_v53 = vsub.f32 %v919_v40, %v935_v11  ;;  %v999_v50 = vsub.f32 %v967_v62, %v983_v44 }
 0x13b   :  { %v968_v10 = vmul.f32 %v1413_v59, %v1762_v26  ;;  %v920_v8 = vmul.f32 %v1413_v59, %v1754_v20  ;;  %v1417_v7 = vpop.eup %1416  ;;  %v1949_v12 = vsub.f32 %v1411_v22, %v1415_v6  ;;  %v723_v16 = vmul.f32 1.442695, %v699_v45 }
 0x13c   :  { %v851_v23 = vmul.f32 1.442695, %v827_v13  ;;  %1434 = vlog2.f32 %v651_v43  ;;  %v1079_v9 = vmul.f32 %v951_v53, %v951_v53  ;;  %v1111_v36 = vmul.f32 %v999_v50, %v999_v50 }
 0x13d   :  { %v1951_v38 = vpop.eup %1418  ;;  %v936_v63 = vmul.f32 %v1417_v7, %v1756_v21  ;;  %v984_v60 = vmul.f32 %v1417_v7, %v1764_v29  ;;  %1436 = vpow2.f32 %v723_v16  ;;  %v652_v62 = vmax.f32 %v588_v41, 1e-24  ;;  %v2142_v16 = vld [vmem:[#allocation7_spill] sm:$0xff] }
 0x13e   :  { %v1421_v40 = vpop.eup %1420  ;;  %v525_v20 = vmul.f32 %v1850_v32, %v1850_v32  ;;  %v573_v26 = vmul.f32 %v1852_v34, %v1852_v34  ;;  %v1127_v43 = vadd.f32 %v1111_v36, %v1079_v9  ;;  %1438 = vpow2.f32 %v851_v23  ;;  %v2144_v36 = vld [vmem:[#allocation8_spill] sm:$0xff] }
 0x13f   :  { %v1959_v49 = vpop.eup %1422  ;;  %v952_v22 = vsub.f32 %v920_v8, %v936_v63  ;;  %v1000_v11 = vsub.f32 %v968_v10, %v984_v60  ;;  %v969_v44 = vmul.f32 %v1421_v40, %v1788_v3  ;;  %v921_v21 = vmul.f32 %v1421_v40, %v1782_v54 }
 0x140   :  { %v1425_v45 = vpop.eup %1424  ;;  %v541_v29 = vadd.f32 %v525_v20, %v509_v15  ;;  %v589_v59 = vadd.f32 %v573_v26, %v557_v27  ;;  %v1219_v41 = vadd.f32 %v1912_v55, %v1127_v43  ;;  %1440 = vlog2.f32 %v604_v5  ;;  %v2143_v15 = vld [vmem:[#allocation10_spill] sm:$0xff]  ;;  %v2145_v26 = vld [vmem:[#allocation9_spill] sm:$0xff] }
 0x141   :  { %v1963_v13 = vpop.eup %1426  ;;  %v1080_v6 = vmul.f32 %v952_v22, %v952_v22  ;;  %v1112_v53 = vmul.f32 %v1000_v11, %v1000_v11  ;;  %v937_v50 = vmul.f32 %v1425_v45, %v1784_v58  ;;  %v985_v8 = vmul.f32 %v1425_v45, %v2142_v16  ;;  %v2146_v22 = vld [vmem:[#allocation11_spill] sm:$0xff] }
 0x142   :  { %v1429_v7 = vpop.eup %1428  ;;  %v605_v10 = vmax.f32 %v541_v29, 1e-24  ;;  %v653_v3 = vmax.f32 %v589_v59, 1e-24  ;;  %1442 = vlog2.f32 %v652_v62  ;;  %v510_v58 = vmul.f32 %v1856_v25, %v1856_v25 }
 0x143   :  { %v1968_v9 = vpop.eup %1430  ;;  %v1128_v54 = vadd.f32 %v1112_v53, %v1080_v6  ;;  %v953_v23 = vsub.f32 %v921_v21, %v937_v50  ;;  %v970_v27 = vmul.f32 %v1429_v7, %v2143_v15  ;;  %v922_v63 = vmul.f32 %v1429_v7, %v2144_v36 }
 0x144   :  { %v1433_v60 = vpop.eup %1432  ;;  %v1001_v55 = vsub.f32 %v969_v44, %v985_v8  ;;  %v558_v40 = vmul.f32 %v1858_v14, %v1858_v14  ;;  %1444 = vlog2.f32 %v605_v10  ;;  %v526_v29 = vmul.f32 %v1861_v1, %v1861_v1 }
 0x145   :  { %v1220_v5 = vadd.f32 %v1219_v41, %v1128_v54  ;;  %v1081_v20 = vmul.f32 %v953_v23, %v953_v23  ;;  %v938_v43 = vmul.f32 %v1433_v60, %v2145_v26  ;;  %v986_v11 = vmul.f32 %v1433_v60, %v2146_v22 }
 0x146   :  { %v1435_v45 = vpop.eup %1434  ;;  %v1113_v21 = vmul.f32 %v1001_v55, %v1001_v55  ;;  %v574_v62 = vmul.f32 %v1863_v24, %v1863_v24  ;;  %1446 = vlog2.f32 %v653_v3  ;;  %v542_v50 = vadd.f32 %v526_v29, %v510_v58 }
 0x147   :  { %v954_v44 = vsub.f32 %v922_v63, %v938_v43  ;;  %v1002_v59 = vsub.f32 %v970_v27, %v986_v11  ;;  %v676_v6 = vmul.f32 0.6931472, %v1435_v45  ;;  %v1982_v53 = vpop.eup %1436  ;;  %v511_v16 = vmul.f32 %v1872_v61, %v1872_v61 }
 0x148   :  { %v1129_v41 = vadd.f32 %v1113_v21, %v1081_v20  ;;  %v590_v7 = vadd.f32 %v574_v62, %v558_v40  ;;  %v1439_v15 = vpop.eup %1438  ;;  %v606_v60 = vmax.f32 %v542_v50, 1e-24  ;;  %v559_v27 = vmul.f32 %v1874_v51, %v1874_v51 }
 0x149   :  { %v1082_v8 = vmul.f32 %v954_v44, %v954_v44  ;;  %v1114_v10 = vmul.f32 %v1002_v59, %v1002_v59  ;;  %v747_v54 = vmul.f32 0.15, %v676_v6  ;;  %v875_v23 = vmul.f32 -0.35, %v676_v6 }
 0x14a   :  { %v1221_v36 = vadd.f32 %v1220_v5, %v1129_v41  ;;  %v654_v55 = vmax.f32 %v590_v7, 1e-24  ;;  %v1989_v63 = vmul.f32 %v1439_v15, %v1822_v46  ;;  %v1441_v20 = vpop.eup %1440  ;;  %v1992_v26 = vmul.f32 %v1439_v15, %v1814_v42 }
 0x14b   :  { %v1130_v3 = vadd.f32 %v1114_v10, %v1082_v8  ;;  %v771_v58 = vmul.f32 1.442695, %v747_v54  ;;  %v899_v40 = vmul.f32 1.442695, %v875_v23  ;;  %1448 = vlog2.f32 %v606_v60 }
 0x14c   :  { %v527_v43 = vmul.f32 %v1877_v52, %v1877_v52  ;;  %v575_v5 = vmul.f32 %v1879_v56, %v1879_v56  ;;  %v630_v11 = vmul.f32 0.6931472, %v1441_v20  ;;  %v512_v46 = vmul.f32 %v1888_v33, %v1888_v33  ;;  %v1443_v45 = vpop.eup %1442 }
 0x14d   :  { %v1998_v22 = vadd.f32 %v1221_v36, %v1130_v3  ;;  %1450 = vpow2.f32 %v771_v58  ;;  %v560_v42 = vmul.f32 %v1890_v37, %v1890_v37  ;;  %v678_v59 = vmul.f32 0.6931472, %v1443_v45 }
 0x14e   :  { %1452 = vpow2.f32 %v899_v40  ;;  %v543_v21 = vadd.f32 %v527_v43, %v511_v16  ;;  %v591_v29 = vadd.f32 %v575_v5, %v559_v27  ;;  %v700_v62 = vmul.f32 0.15, %v630_v11  ;;  %v1445_v6 = vpop.eup %1444 }
 0x14f   :  { %v828_v44 = vmul.f32 -0.35, %v630_v11  ;;  %1454 = vlog2.f32 %v654_v55  ;;  %v528_v7 = vmul.f32 %v1893_v2, %v1893_v2  ;;  %v576_v8 = vmul.f32 %v1895_v4, %v1895_v4 }
 0x150   :  { %v607_v41 = vmax.f32 %v543_v21, 1e-24  ;;  %v655_v50 = vmax.f32 %v591_v29, 1e-24  ;;  %v1447_v10 = vpop.eup %1446  ;;  %v725_v54 = vmul.f32 1.442695, %v700_v62  ;;  %v513_v15 = vmul.f32 %v1906_v18, %v1906_v18 }
 0x151   :  { %v853_v16 = vmul.f32 1.442695, %v828_v44  ;;  %v748_v23 = vmul.f32 0.15, %v678_v59  ;;  %v876_v36 = vmul.f32 -0.35, %v678_v59  ;;  %v544_v3 = vadd.f32 %v528_v7, %v512_v46 }
 0x152   :  { %v632_v60 = vmul.f32 0.6931472, %v1445_v6  ;;  %v680_v27 = vmul.f32 0.6931472, %v1447_v10  ;;  %1456 = vlog2.f32 %v607_v41  ;;  %v2010_v58 = vadd.f32 %v576_v8, %v560_v42 }
 0x153   :  { %1458 = vpow2.f32 %v725_v54  ;;  %v773_v55 = vmul.f32 1.442695, %v748_v23  ;;  %v901_v40 = vmul.f32 1.442695, %v876_v36  ;;  %v608_v45 = vmax.f32 %v544_v3, 1e-24 }
 0x154   :  { %1460 = vpow2.f32 %v853_v16  ;;  %v701_v20 = vmul.f32 0.15, %v632_v60  ;;  %v829_v43 = vmul.f32 -0.35, %v632_v60  ;;  %v749_v5 = vmul.f32 0.15, %v680_v27 }
 0x155   :  { %1462 = vpow2.f32 %v773_v55  ;;  %v877_v11 = vmul.f32 -0.35, %v680_v27  ;;  %v1449_v21 = vpop.eup %1448  ;;  %v656_v44 = vmax.f32 %v2010_v58, 1e-24  ;;  %v561_v7 = vmul.f32 %v1908_v48, %v1908_v48 }
 0x156   :  { %1464 = vpow2.f32 %v901_v40  ;;  %v727_v29 = vmul.f32 1.442695, %v701_v20  ;;  %v855_v62 = vmul.f32 1.442695, %v829_v43  ;;  %v775_v6 = vmul.f32 1.442695, %v749_v5 }
 0x157   :  { %v2013_v59 = vpop.eup %1450  ;;  %v903_v46 = vmul.f32 1.442695, %v877_v11  ;;  %v634_v42 = vmul.f32 0.6931472, %v1449_v21  ;;  %1466 = vlog2.f32 %v655_v50  ;;  %v529_v8 = vmul.f32 %v1914_v35, %v1914_v35 }
 0x158   :  { %v1453_v41 = vpop.eup %1452  ;;  %1468 = vpow2.f32 %v727_v29  ;;  %v577_v10 = vmul.f32 %v1916_v0, %v1916_v0 }
 0x159   :  { %v1455_v54 = vpop.eup %1454  ;;  %v939_v16 = vmul.f32 %v1453_v41, %v1816_v31  ;;  %v987_v23 = vmul.f32 %v1453_v41, %v1824_v47  ;;  %1470 = vpow2.f32 %v855_v62  ;;  %v702_v36 = vmul.f32 0.15, %v634_v42 }
 0x15a   :  { %1472 = vpow2.f32 %v775_v6  ;;  %v830_v50 = vmul.f32 -0.35, %v634_v42  ;;  %v682_v60 = vmul.f32 0.6931472, %v1455_v54  ;;  %v545_v27 = vadd.f32 %v529_v8, %v513_v15  ;;  %v2147_v42 = vld [vmem:[#allocation12_spill] sm:$0xff] }
 0x15b   :  { %v955_v55 = vsub.f32 %v1992_v26, %v939_v16  ;;  %v1003_v3 = vsub.f32 %v1989_v63, %v987_v23  ;;  %1474 = vpow2.f32 %v903_v46  ;;  %v729_v58 = vmul.f32 1.442695, %v702_v36  ;;  %v2148_v23 = vld [vmem:[#allocation15_spill] sm:$0xff] }
 0x15c   :  { %v1457_v40 = vpop.eup %1456  ;;  %v857_v20 = vmul.f32 1.442695, %v830_v50  ;;  %v750_v43 = vmul.f32 0.15, %v682_v60  ;;  %v878_v5 = vmul.f32 -0.35, %v682_v60  ;;  %1476 = vlog2.f32 %v608_v45 }
 0x15d   :  { %v2025_v31 = vpop.eup %1458  ;;  %v1083_v47 = vmul.f32 %v955_v55, %v955_v55  ;;  %v1115_v11 = vmul.f32 %v1003_v3, %v1003_v3  ;;  %1478 = vpow2.f32 %v729_v58  ;;  %v636_v21 = vmul.f32 0.6931472, %v1457_v40 }
 0x15e   :  { %v1461_v29 = vpop.eup %1460  ;;  %1480 = vpow2.f32 %v857_v20  ;;  %v777_v15 = vmul.f32 1.442695, %v750_v43  ;;  %v905_v62 = vmul.f32 1.442695, %v878_v5  ;;  %v609_v26 = vmax.f32 %v545_v27, 1e-24 }
 0x15f   :  { %v2027_v6 = vpop.eup %1462  ;;  %v1131_v63 = vadd.f32 %v1115_v11, %v1083_v47  ;;  %v972_v46 = vmul.f32 %v1461_v29, %v1834_v17  ;;  %v924_v41 = vmul.f32 %v1461_v29, %v2147_v42  ;;  %v703_v8 = vmul.f32 0.15, %v636_v21 }
 0x160   :  { %v1465_v45 = vpop.eup %1464  ;;  %1482 = vpow2.f32 %v777_v15  ;;  %v831_v54 = vmul.f32 -0.35, %v636_v21  ;;  %v593_v16 = vadd.f32 %v577_v10, %v561_v7  ;;  %v514_v36 = vmul.f32 %v2148_v23, %v2148_v23 }
 0x161   :  { %v1467_v50 = vpop.eup %1466  ;;  %v1223_v60 = vadd.f32 %v1998_v22, %v1131_v63  ;;  %v940_v27 = vmul.f32 %v1465_v45, %v1830_v28  ;;  %v988_v55 = vmul.f32 %v1465_v45, %v1836_v30  ;;  %1484 = vpow2.f32 %v905_v62 }
 0x162   :  { %v2036_v3 = vpop.eup %1468  ;;  %v731_v17 = vmul.f32 1.442695, %v703_v8  ;;  %v859_v58 = vmul.f32 1.442695, %v831_v54  ;;  %v684_v40 = vmul.f32 0.6931472, %v1467_v50  ;;  %1486 = vlog2.f32 %v656_v44 }
 0x163   :  { %v1471_v20 = vpop.eup %1470  ;;  %v956_v43 = vsub.f32 %v924_v41, %v940_v27  ;;  %v1004_v7 = vsub.f32 %v972_v46, %v988_v55  ;;  %1488 = vlog2.f32 %v609_v26  ;;  %v657_v10 = vmax.f32 %v593_v16, 1e-24  ;;  %v2150_v16 = vld [vmem:[#allocation17_spill] sm:$0xff] }
 0x164   :  { %v2038_v5 = vpop.eup %1472  ;;  %v973_v22 = vmul.f32 %v1471_v20, %v1850_v32  ;;  %v925_v28 = vmul.f32 %v1471_v20, %v1844_v19  ;;  %1490 = vpow2.f32 %v731_v17  ;;  %v751_v30 = vmul.f32 0.15, %v684_v40  ;;  %v2149_v19 = vld [vmem:[#allocation16_spill] sm:$0xff] }
 0x165   :  { %v1475_v47 = vpop.eup %1474  ;;  %v1084_v11 = vmul.f32 %v956_v43, %v956_v43  ;;  %v1116_v21 = vmul.f32 %v1004_v7, %v1004_v7  ;;  %1492 = vpow2.f32 %v859_v58  ;;  %v879_v29 = vmul.f32 -0.35, %v684_v40 }
 0x166   :  { %v1477_v15 = vpop.eup %1476  ;;  %v941_v44 = vmul.f32 %v1475_v47, %v1846_v39  ;;  %v989_v62 = vmul.f32 %v1475_v47, %v1852_v34  ;;  %v779_v26 = vmul.f32 1.442695, %v751_v30  ;;  %1494 = vlog2.f32 %v657_v10  ;;  %v2151_v10 = vld [vmem:[#allocation18_spill] sm:$0xff] }
 0x167   :  { %v2044_v63 = vpop.eup %1478  ;;  %v1132_v46 = vadd.f32 %v1116_v21, %v1084_v11  ;;  %v907_v32 = vmul.f32 1.442695, %v879_v29  ;;  %v638_v42 = vmul.f32 0.6931472, %v1477_v15  ;;  %v562_v41 = vmul.f32 %v2149_v19, %v2149_v19 }
 0x168   :  { %v1481_v8 = vpop.eup %1480  ;;  %v957_v45 = vsub.f32 %v925_v28, %v941_v44  ;;  %v1005_v54 = vsub.f32 %v973_v22, %v989_v62  ;;  %1496 = vpow2.f32 %v779_v26  ;;  %v530_v50 = vmul.f32 %v2150_v16, %v2150_v16 }
 0x169   :  { %v1224_v39 = vadd.f32 %v1223_v60, %v1132_v46  ;;  %v974_v34 = vmul.f32 %v1481_v8, %v1861_v1  ;;  %v926_v27 = vmul.f32 %v1481_v8, %v1856_v25  ;;  %1498 = vpow2.f32 %v907_v32 }
 0x16a   :  { %v2052_v55 = vpop.eup %1482  ;;  %v1085_v17 = vmul.f32 %v957_v45, %v957_v45  ;;  %v1117_v58 = vmul.f32 %v1005_v54, %v1005_v54  ;;  %v704_v40 = vmul.f32 0.15, %v638_v42  ;;  %v832_v20 = vmul.f32 -0.35, %v638_v42 }
 0x16b   :  { %v1485_v43 = vpop.eup %1484  ;;  %v546_v7 = vadd.f32 %v530_v50, %v514_v36  ;;  %v578_v22 = vmul.f32 %v2151_v10, %v2151_v10  ;;  %v2058_v28 = vsub.f32 %v1951_v38, %v1959_v49  ;;  %v2062_v1 = vsub.f32 %v1963_v13, %v1968_v9 }
 0x16c   :  { %v1487_v25 = vpop.eup %1486  ;;  %v1133_v60 = vadd.f32 %v1117_v58, %v1085_v17  ;;  %v942_v30 = vmul.f32 %v1485_v43, %v1858_v14  ;;  %v990_v47 = vmul.f32 %v1485_v43, %v1863_v24  ;;  %v733_v11 = vmul.f32 1.442695, %v704_v40 }
 0x16d   :  { %v1489_v21 = vpop.eup %1488  ;;  %v861_v36 = vmul.f32 1.442695, %v832_v20  ;;  %v686_v29 = vmul.f32 0.6931472, %v1487_v25  ;;  %v610_v15 = vmax.f32 %v546_v7, 1e-24  ;;  %v594_v44 = vadd.f32 %v578_v22, %v562_v41 }
 0x16e   :  { %v1491_v62 = vpop.eup %1490  ;;  %v1225_v26 = vadd.f32 %v1224_v39, %v1133_v60  ;;  %v958_v38 = vsub.f32 %v926_v27, %v942_v30  ;;  %v1006_v49 = vsub.f32 %v974_v34, %v990_v47  ;;  %1500 = vpow2.f32 %v733_v11 }
 0x16f   :  { %v1493_v46 = vpop.eup %1492  ;;  %1502 = vpow2.f32 %v861_v36  ;;  %v752_v13 = vmul.f32 0.15, %v686_v29  ;;  %v880_v9 = vmul.f32 -0.35, %v686_v29  ;;  %v640_v32 = vmul.f32 0.6931472, %v1489_v21 }
 0x170   :  { %v1495_v42 = vpop.eup %1494  ;;  %v1086_v14 = vmul.f32 %v958_v38, %v958_v38  ;;  %v1118_v8 = vmul.f32 %v1006_v49, %v1006_v49  ;;  %v975_v24 = vmul.f32 %v1493_v46, %v1877_v52  ;;  %v927_v45 = vmul.f32 %v1493_v46, %v1872_v61  ;;  %v2153_v46 = vld [vmem:[#allocation13_spill] sm:$0xff] }
 0x171   :  { %v781_v54 = vmul.f32 1.442695, %v752_v13  ;;  %v909_v50 = vmul.f32 1.442695, %v880_v9  ;;  %v705_v41 = vmul.f32 0.15, %v640_v32  ;;  %1504 = vlog2.f32 %v610_v15 }
 0x172   :  { %v1497_v39 = vpop.eup %1496  ;;  %v1134_v27 = vadd.f32 %v1118_v8, %v1086_v14  ;;  %v833_v34 = vmul.f32 -0.35, %v640_v32  ;;  %v688_v17 = vmul.f32 0.6931472, %v1495_v42  ;;  %v658_v58 = vmax.f32 %v594_v44, 1e-24 }
 0x173   :  { %v1499_v40 = vpop.eup %1498  ;;  %1506 = vpow2.f32 %v781_v54  ;;  %v735_v20 = vmul.f32 1.442695, %v705_v41  ;;  %v795_v43 = vsub.f32 %v1982_v53, %v2013_v59  ;;  %v796_v52 = vsub.f32 %v2025_v31, %v2027_v6 }
 0x174   :  { %v1226_v7 = vadd.f32 %v1225_v26, %v1134_v27  ;;  %v943_v61 = vmul.f32 %v1499_v40, %v1874_v51  ;;  %v991_v22 = vmul.f32 %v1499_v40, %v1879_v56  ;;  %1508 = vpow2.f32 %v909_v50  ;;  %v2152_v56 = vld [vmem:[#allocation14_spill] sm:$0xff] }
 0x175   :  { %1510 = vpow2.f32 %v735_v20  ;;  %v863_v25 = vmul.f32 1.442695, %v833_v34  ;;  %v753_v60 = vmul.f32 0.15, %v688_v17  ;;  %v881_v30 = vmul.f32 -0.35, %v688_v17 }
 0x176   :  { %v959_v47 = vsub.f32 %v927_v45, %v943_v61  ;;  %v1007_v11 = vsub.f32 %v975_v24, %v991_v22  ;;  %1512 = vlog2.f32 %v658_v58  ;;  %v797_v21 = vsub.f32 %v2036_v3, %v2038_v5 }
 0x177   :  { %1514 = vpow2.f32 %v863_v25  ;;  %v783_v53 = vmul.f32 1.442695, %v753_v60  ;;  %v911_v59 = vmul.f32 1.442695, %v881_v30  ;;  %v2078_v31 = vsub.f32 %v2044_v63, %v2052_v55 }
 0x178   :  { %v1501_v51 = vpop.eup %1500  ;;  %v806_v6 = vmul.f32 %v2152_v56, %v2152_v56  ;;  %v1087_v36 = vmul.f32 %v959_v47, %v959_v47  ;;  %v1119_v29 = vmul.f32 %v1007_v11, %v1007_v11  ;;  %v2082_v15 = vsub.f32 %v1491_v62, %v1497_v39 }
 0x179   :  { %v1503_v44 = vpop.eup %1502  ;;  %v807_v26 = vmul.f32 %v1939_v57, %v1939_v57  ;;  %1516 = vpow2.f32 %v783_v53  ;;  %v808_v49 = vmul.f32 %v1949_v12, %v1949_v12  ;;  %v809_v32 = vmul.f32 %v2058_v28, %v2058_v28 }
 0x17a   :  { %v1135_v3 = vadd.f32 %v1119_v29, %v1087_v36  ;;  %v976_v5 = vmul.f32 %v1503_v44, %v1893_v2  ;;  %v928_v38 = vmul.f32 %v1503_v44, %v1888_v33  ;;  %1518 = vpow2.f32 %v911_v59 }
 0x17b   :  { %v1505_v63 = vpop.eup %1504  ;;  %v1176_v13 = vadd.f32 %v2153_v46, %v806_v6  ;;  %v810_v41 = vmul.f32 %v2062_v1, %v2062_v1  ;;  %v811_v58 = vmul.f32 %v795_v43, %v795_v43  ;;  %v812_v20 = vmul.f32 %v796_v52, %v796_v52 }
 0x17c   :  { %v642_v55 = vmul.f32 0.6931472, %v1505_v63  ;;  %v1227_v62 = vadd.f32 %v1226_v7, %v1135_v3  ;;  %v813_v59 = vmul.f32 %v797_v21, %v797_v21  ;;  %v814_v36 = vmul.f32 %v2078_v31, %v2078_v31 }
 0x17d   :  { %v1507_v9 = vpop.eup %1506  ;;  %v1177_v2 = vadd.f32 %v1176_v13, %v807_v26 }
 0x17e   :  { %v1509_v57 = vpop.eup %1508  ;;  %v706_v42 = vmul.f32 0.15, %v642_v55  ;;  %v834_v14 = vmul.f32 -0.35, %v642_v55  ;;  %v800_v8 = vsub.f32 %v1501_v51, %v1507_v9 }
 0x17f   :  { %v1511_v24 = vpop.eup %1510  ;;  %v944_v33 = vmul.f32 %v1509_v57, %v1890_v37  ;;  %v992_v45 = vmul.f32 %v1509_v57, %v1895_v4  ;;  %v1178_v39 = vadd.f32 %v1177_v2, %v808_v49 }
 0x180   :  { %v1513_v54 = vpop.eup %1512  ;;  %v737_v50 = vmul.f32 1.442695, %v706_v42  ;;  %v865_v12 = vmul.f32 1.442695, %v834_v14 }
 0x181   :  { %v1515_v27 = vpop.eup %1514  ;;  %v960_v34 = vsub.f32 %v928_v38, %v944_v33  ;;  %v1008_v28 = vsub.f32 %v976_v5, %v992_v45  ;;  %v690_v17 = vmul.f32 0.6931472, %v1513_v54  ;;  %v1179_v7 = vadd.f32 %v1178_v39, %v809_v32 }
 0x182   :  { %v977_v40 = vmul.f32 %v1515_v27, %v1914_v35  ;;  %v929_v37 = vmul.f32 %v1515_v27, %v1906_v18  ;;  %1520 = vpow2.f32 %v865_v12 }
 0x183   :  { %v1517_v61 = vpop.eup %1516  ;;  %v1088_v4 = vmul.f32 %v960_v34, %v960_v34  ;;  %v1120_v22 = vmul.f32 %v1008_v28, %v1008_v28  ;;  %v754_v25 = vmul.f32 0.15, %v690_v17  ;;  %1522 = vpow2.f32 %v737_v50 }
 0x184   :  { %v1519_v60 = vpop.eup %1518  ;;  %v882_v1 = vmul.f32 -0.35, %v690_v17  ;;  %v801_v30 = vsub.f32 %v1511_v24, %v1517_v61  ;;  %v1180_v47 = vadd.f32 %v1179_v7, %v810_v41 }
 0x185   :  { %v1136_v11 = vadd.f32 %v1120_v22, %v1088_v4  ;;  %v993_v53 = vmul.f32 %v1519_v60, %v1916_v0  ;;  %v785_v43 = vmul.f32 1.442695, %v754_v25  ;;  %v945_v35 = vmul.f32 %v1519_v60, %v1908_v48 }
 0x186   :  { %v913_v52 = vmul.f32 1.442695, %v882_v1  ;;  %v1181_v51 = vadd.f32 %v1180_v47, %v811_v58  ;;  %v815_v0 = vmul.f32 %v2082_v15, %v2082_v15  ;;  %v816_v48 = vmul.f32 %v800_v8, %v800_v8 }
 0x187   :  { %v1009_v18 = vsub.f32 %v977_v40, %v993_v53  ;;  %1524 = vpow2.f32 %v785_v43  ;;  %v961_v56 = vsub.f32 %v929_v37, %v945_v35  ;;  %v1228_v6 = vadd.f32 %v1227_v62, %v1136_v11 }
 0x188   :  { %1526 = vpow2.f32 %v913_v52  ;;  %v1182_v29 = vadd.f32 %v1181_v51, %v812_v20  ;;  %v817_v46 = vmul.f32 %v801_v30, %v801_v30 }
 0x189   :  { %v1121_v44 = vmul.f32 %v1009_v18, %v1009_v18  ;;  %v1089_v26 = vmul.f32 %v961_v56, %v961_v56 }
 0x18a   :  { %v1183_v3 = vadd.f32 %v1182_v29, %v813_v59 }
 0x18b   :  { %v1137_v5 = vadd.f32 %v1121_v44, %v1089_v26 }
 0x18c   :  { %v1184_v38 = vadd.f32 %v1183_v3, %v814_v36  ;;  %v1521_v21 = vpop.eup %1520 }
 0x18d   :  { %v1229_v63 = vadd.f32 %v1228_v6, %v1137_v5  ;;  %v1523_v55 = vpop.eup %1522  ;;  %v978_v49 = vmul.f32 %v1521_v21, %v2150_v16  ;;  %v930_v62 = vmul.f32 %v1521_v21, %v2148_v23 }
 0x18e   :  { %v1185_v13 = vadd.f32 %v1184_v38, %v815_v0 }
 0x190   :  { %v1186_v31 = vadd.f32 %v1185_v13, %v816_v48 }
 0x191   :  { %v1525_v9 = vpop.eup %1524 }
 0x192   :  { %v1527_v32 = vpop.eup %1526  ;;  %v802_v57 = vsub.f32 %v1523_v55, %v1525_v9  ;;  %v1187_v42 = vadd.f32 %v1186_v31, %v817_v46 }
 0x193   :  { %v994_v15 = vmul.f32 %v1527_v32, %v2151_v10  ;;  %v946_v14 = vmul.f32 %v1527_v32, %v2149_v19 }
 0x194   :  { %v818_v8 = vmul.f32 %v802_v57, %v802_v57 }
 0x195   :  { %v1010_v2 = vsub.f32 %v978_v49, %v994_v15  ;;  %v962_v24 = vsub.f32 %v930_v62, %v946_v14 }
 0x196   :  { %v1188_v33 = vadd.f32 %v1187_v42, %v818_v8 }
 0x197   :  { %v1122_v45 = vmul.f32 %v1010_v2, %v1010_v2  ;;  %v1090_v54 = vmul.f32 %v962_v24, %v962_v24 }
 0x198   :  { %1189 = vadd.xlane.f32.xlu0 %v1188_v33 }
 0x199   :  { %v1138_v16 = vadd.f32 %v1122_v45, %v1090_v54 }
 0x19b   :  { %v1230_v50 = vadd.f32 %v1229_v63, %v1138_v16 }
 0x19d   :  { %1231 = vadd.xlane.f32.xlu0 %v1230_v50 }
 0x225   :  { %v1190_v23 = vpop.xlane.xlu0 %1189 }
 0x226   :  { %v1191_v12 = vrot.slane %v1190_v23, 4 }
 0x228   :  { %v1192_v41 = vadd.f32 %v1191_v12, %v1190_v23 }
 0x22a   :  { %v1193_v39 = vrot.slane %v1192_v41, 2  ;;  %v1232_v27 = vpop.xlane.xlu0 %1231 }
 0x22b   :  { %v1233_v34 = vrot.slane %v1232_v27, 4 }
 0x22c   :  { %v1194_v28 = vadd.f32 %v1193_v39, %v1192_v41 }
 0x22d   :  { %v1234_v10 = vadd.f32 %v1233_v34, %v1232_v27 }
 0x22e   :  { %v1195_v17 = vrot.slane %v1194_v28, 1 }
 0x22f   :  { %v1235_v19 = vrot.slane %v1234_v10, 2 }
 0x230   :  { %v1196_v58 = vadd.f32 %v1195_v17, %v1194_v28 }
 0x231   :  { %v1236_v40 = vadd.f32 %v1235_v19, %v1234_v10 }
 0x232   :  { %1299 = vpush %v1196_v58 }
 0x233   :  { %v1237_v20 = vrot.slane %v1236_v40, 1 }
 0x235   :  { %v1238_v7 = vadd.f32 %v1237_v20, %v1236_v40 }
 0x237   :  { %1301 = vpush %v1238_v7 }
 0x263   :  { %s1300_s0 = spop %1299 }
 0x264   :  { %1199 = sst [smem:[#allocation4]] %s1300_s0 }
 0x268   :  { %s1302_s10 = spop %1301 }
 0x269   :  { %1241 = sst [smem:[#allocation4 + $0x1]] %s1302_s10 }
 0x26a   :  { %1539 = shalt.err (!%p1536_p4)
}
 0x26b   :  { %s1543_s12 = smov [#allocation4]  }
 0x26c   :  { %1251 = dma.smem_to_vmem %s1543_s12, 16, %s1249_s9, [#allocation5]  }
 0x26d   :  { %1540 = dma.done.wait [#allocation5], 16  }
 0x26e   :  { %1541 = vsyncadd [#allocation5], 4294967280 }
 0x26f   :  { %1255 = sfence }
 0x270   :  { %1256 = vsyncpa [#allocation5], 1 }

// kernel: combined_loss.8
= control target key start
LH: loop header
LB: loop body
LE: loop exit
PB: predicated region body
PF: predicated region fallthrough
CT: control target
= control target key end

     0   :  { %s2703_s0 = inlined_call_operand.vmem [shape: bf16[32,320], index: 0, kind: input, shape index: {}]   ;;  %s2704_s1 = inlined_call_operand.vmem [shape: bf16[32,320], index: 1, kind: input, shape index: {}]   ;;  %s2705_s2 = inlined_call_operand.vmem [shape: bf16[320,512], index: 2, kind: input, shape index: {}]   ;;  %s2706_s3 = inlined_call_operand.vmem [shape: f32[2], index: 3, kind: output, shape index: {}]  }
   0x1   :  { %v1836_v0 = vld [vmem:[%s2705_s2 + $0x4] ss:$16 sps:$4 sm:$0xff]   ;;  %v1841_v1 = vld [vmem:[%s2705_s2 + $0xc] ss:$16 sps:$4 sm:$0xff]   ;;  %v1847_v2 = vld [vmem:[%s2705_s2] ss:$16 sps:$4 sm:$0xff]  }
   0x2   :  { %561 = vmatprep.subr.bf16.mxu0 %v1836_v0  ;;  %v1852_v3 = vld [vmem:[%s2705_s2 + $0x8] ss:$16 sps:$4 sm:$0xff]   ;;  %667 = vmatprep.subr.bf16.mxu1 %v1841_v1  ;;  %v1858_v4 = vld [vmem:[%s2705_s2 + $0x24] ss:$16 sps:$4 sm:$0xff]   ;;  %v1865_v5 = vld [vmem:[%s2705_s2 + $0x2c] ss:$16 sps:$4 sm:$0xff]  }
   0x3   :  { %562 = vmatpush1.bf16.msra.mxu0 %v1847_v2  ;;  %668 = vmatpush1.bf16.msra.mxu1 %v1852_v3  ;;  %v1870_v6 = vld [vmem:[%s2705_s2 + $0x20] ss:$16 sps:$4 sm:$0xff]   ;;  %v1876_v7 = vld [vmem:[%s2705_s2 + $0x28] ss:$16 sps:$4 sm:$0xff]   ;;  %v1882_v8 = vld [vmem:[%s2705_s2 + $0x44] ss:$16 sps:$4 sm:$0xff]  }
   0x4   :  { %563 = vmatprep.subr.bf16.mxu0 %v1858_v4  ;;  %669 = vmatprep.subr.bf16.mxu1 %v1865_v5  ;;  %v1887_v9 = vld [vmem:[%s2705_s2 + $0x4c] ss:$16 sps:$4 sm:$0xff]   ;;  %v1892_v10 = vld [vmem:[%s2705_s2 + $0x40] ss:$16 sps:$4 sm:$0xff]   ;;  %v1897_v11 = vld [vmem:[%s2705_s2 + $0x48] ss:$16 sps:$4 sm:$0xff]  }
   0x5   :  { %v1904_v12 = vld [vmem:[%s2705_s2 + $0x64] ss:$16 sps:$4 sm:$0xff]   ;;  %v1911_v13 = vld [vmem:[%s2705_s2 + $0x6c] ss:$16 sps:$4 sm:$0xff]   ;;  %v1916_v14 = vld [vmem:[%s2705_s2 + $0x60] ss:$16 sps:$4 sm:$0xff]  }
   0x6   :  { %v1923_v15 = vld [vmem:[%s2705_s2 + $0x68] ss:$16 sps:$4 sm:$0xff]   ;;  %v1928_v16 = vld [vmem:[%s2705_s2 + $0x84] ss:$16 sps:$4 sm:$0xff]   ;;  %v1935_v17 = vld [vmem:[%s2705_s2 + $0x8c] ss:$16 sps:$4 sm:$0xff]  }
   0x7   :  { %564 = vmatpush1.bf16.msra.mxu0 %v1870_v6  ;;  %670 = vmatpush1.bf16.msra.mxu1 %v1876_v7  ;;  %v1940_v18 = vld [vmem:[%s2705_s2 + $0x80] ss:$16 sps:$4 sm:$0xff]   ;;  %v1945_v19 = vld [vmem:[%s2705_s2 + $0x88] ss:$16 sps:$4 sm:$0xff]   ;;  %v1952_v20 = vld [vmem:[%s2705_s2 + $0xa4] ss:$16 sps:$4 sm:$0xff]  }
   0x8   :  { %565 = vmatprep.subr.bf16.mxu0 %v1882_v8  ;;  %671 = vmatprep.subr.bf16.mxu1 %v1887_v9  ;;  %v1959_v21 = vld [vmem:[%s2705_s2 + $0xac] ss:$16 sps:$4 sm:$0xff]   ;;  %v1964_v22 = vld [vmem:[%s2705_s2 + $0xa0] ss:$16 sps:$4 sm:$0xff]   ;;  %v1971_v23 = vld [vmem:[%s2705_s2 + $0xa8] ss:$16 sps:$4 sm:$0xff]  }
   0x9   :  { %v1976_v24 = vld [vmem:[%s2705_s2 + $0xc4] ss:$16 sps:$4 sm:$0xff]   ;;  %v1983_v25 = vld [vmem:[%s2705_s2 + $0xcc] ss:$16 sps:$4 sm:$0xff]   ;;  %v1988_v26 = vld [vmem:[%s2705_s2 + $0xc0] ss:$16 sps:$4 sm:$0xff]  }
   0xa   :  { %v1993_v27 = vld [vmem:[%s2705_s2 + $0xc8] ss:$16 sps:$4 sm:$0xff]   ;;  %v2000_v28 = vld [vmem:[%s2705_s2 + $0xe4] ss:$16 sps:$4 sm:$0xff]   ;;  %v2007_v29 = vld [vmem:[%s2705_s2 + $0xec] ss:$16 sps:$4 sm:$0xff]  }
   0xb   :  { %566 = vmatpush1.bf16.msra.mxu0 %v1892_v10  ;;  %672 = vmatpush1.bf16.msra.mxu1 %v1897_v11  ;;  %v2012_v30 = vld [vmem:[%s2705_s2 + $0xe0] ss:$16 sps:$4 sm:$0xff]   ;;  %v2019_v31 = vld [vmem:[%s2705_s2 + $0xe8] ss:$16 sps:$4 sm:$0xff]   ;;  %v2024_v32 = vld [vmem:[%s2705_s2 + $0x104] ss:$16 sps:$4 sm:$0xff]  }
   0xc   :  { %567 = vmatprep.subr.bf16.mxu0 %v1904_v12  ;;  %673 = vmatprep.subr.bf16.mxu1 %v1911_v13  ;;  %v2031_v33 = vld [vmem:[%s2705_s2 + $0x10c] ss:$16 sps:$4 sm:$0xff]   ;;  %v2036_v34 = vld [vmem:[%s2705_s2 + $0x100] ss:$16 sps:$4 sm:$0xff]   ;;  %v2041_v35 = vld [vmem:[%s2705_s2 + $0x108] ss:$16 sps:$4 sm:$0xff]  }
   0xd   :  { %v2048_v36 = vld [vmem:[%s2705_s2 + $0x124] ss:$16 sps:$4 sm:$0xff]   ;;  %v2055_v37 = vld [vmem:[%s2705_s2 + $0x12c] ss:$16 sps:$4 sm:$0xff]   ;;  %v2060_v38 = vld [vmem:[%s2705_s2 + $0x120] ss:$16 sps:$4 sm:$0xff]  }
   0xe   :  { %v2067_v39 = vld [vmem:[%s2705_s2 + $0x128] ss:$16 sps:$4 sm:$0xff]   ;;  %v2072_v40 = vld [vmem:[%s2705_s2 + $0x144] ss:$16 sps:$4 sm:$0xff]   ;;  %v2079_v41 = vld [vmem:[%s2705_s2 + $0x14c] ss:$16 sps:$4 sm:$0xff]  }
   0xf   :  { %568 = vmatpush1.bf16.msra.mxu0 %v1916_v14  ;;  %674 = vmatpush1.bf16.msra.mxu1 %v1923_v15  ;;  %v2084_v42 = vld [vmem:[%s2705_s2 + $0x140] ss:$16 sps:$4 sm:$0xff]   ;;  %v2089_v43 = vld [vmem:[%s2705_s2 + $0x148] ss:$16 sps:$4 sm:$0xff]   ;;  %v2096_v44 = vld [vmem:[%s2705_s2 + $0x164] ss:$16 sps:$4 sm:$0xff]  }
  0x10   :  { %569 = vmatprep.subr.bf16.mxu0 %v1928_v16  ;;  %675 = vmatprep.subr.bf16.mxu1 %v1935_v17  ;;  %v2103_v45 = vld [vmem:[%s2705_s2 + $0x16c] ss:$16 sps:$4 sm:$0xff]   ;;  %v2108_v46 = vld [vmem:[%s2705_s2 + $0x160] ss:$16 sps:$4 sm:$0xff]   ;;  %v2113_v47 = vld [vmem:[%s2705_s2 + $0x168] ss:$16 sps:$4 sm:$0xff]  }
  0x11   :  { %v1663_v48 = vld [vmem:[%s2703_s0 + $0x4] ss:$12 sps:$4 sm:$0xff]   ;;  %v2130_v50 = vld [vmem:[%s2705_s2 + $0x18c] ss:$16 sps:$4 sm:$0xff]   ;;  %v2140_v52 = vld [vmem:[%s2705_s2 + $0x188] ss:$16 sps:$4 sm:$0xff]  }
  0x12   :  { %v2123_v49 = vld [vmem:[%s2705_s2 + $0x184] ss:$16 sps:$4 sm:$0xff]   ;;  %593 = vmatprep.mubr.bf16.mxu0 %v1663_v48  ;;  %699 = vmatprep.mubr.bf16.mxu1 %v1663_v48  ;;  %v2135_v51 = vld [vmem:[%s2705_s2 + $0x180] ss:$16 sps:$4 sm:$0xff]   ;;  %v2154_v54 = vld [vmem:[%s2705_s2 + $0x1ac] ss:$16 sps:$4 sm:$0xff]  }
  0x13   :  { %570 = vmatpush1.bf16.msra.mxu0 %v1940_v18  ;;  %676 = vmatpush1.bf16.msra.mxu1 %v1945_v19  ;;  %v2147_v53 = vld [vmem:[%s2705_s2 + $0x1a4] ss:$16 sps:$4 sm:$0xff]   ;;  %v2159_v55 = vld [vmem:[%s2705_s2 + $0x1a0] ss:$16 sps:$4 sm:$0xff]   ;;  %v2164_v56 = vld [vmem:[%s2705_s2 + $0x1a8] ss:$16 sps:$4 sm:$0xff]  }
  0x14   :  { %571 = vmatprep.subr.bf16.mxu0 %v1952_v20  ;;  %677 = vmatprep.subr.bf16.mxu1 %v1959_v21  ;;  %v2171_v57 = vld [vmem:[%s2705_s2 + $0x1c4] ss:$16 sps:$4 sm:$0xff]   ;;  %v2178_v58 = vld [vmem:[%s2705_s2 + $0x1cc] ss:$16 sps:$4 sm:$0xff]   ;;  %v2183_v59 = vld [vmem:[%s2705_s2 + $0x1c0] ss:$16 sps:$4 sm:$0xff]  }
  0x15   :  { %2725 = vst [vmem:[#allocation7_spill] sm:$0xff] %v2171_v57  ;;  %2726 = vst [vmem:[#allocation8_spill] sm:$0xff] %v2178_v58  ;;  %v2188_v60 = vld [vmem:[%s2705_s2 + $0x1c8] ss:$16 sps:$4 sm:$0xff]   ;;  %v2195_v61 = vld [vmem:[%s2705_s2 + $0x1e4] ss:$16 sps:$4 sm:$0xff]  }
  0x16   :  { %2727 = vst [vmem:[#allocation9_spill] sm:$0xff] %v2183_v59  ;;  %2728 = vst [vmem:[#allocation10_spill] sm:$0xff] %v2188_v60  ;;  %v2202_v62 = vld [vmem:[%s2705_s2 + $0x1ec] ss:$16 sps:$4 sm:$0xff]   ;;  %v2207_v63 = vld [vmem:[%s2705_s2 + $0x1e0] ss:$16 sps:$4 sm:$0xff]  }
  0x17   :  { %572 = vmatpush1.bf16.msra.mxu0 %v1964_v22  ;;  %678 = vmatpush1.bf16.msra.mxu1 %v1971_v23  ;;  %2729 = vst [vmem:[#allocation11_spill] sm:$0xff] %v2195_v61  ;;  %2730 = vst [vmem:[#allocation12_spill] sm:$0xff] %v2202_v62  ;;  %v2214_v48 = vld [vmem:[%s2705_s2 + $0x1e8] ss:$16 sps:$4 sm:$0xff]  }
  0x18   :  { %573 = vmatprep.subr.bf16.mxu0 %v1976_v24  ;;  %679 = vmatprep.subr.bf16.mxu1 %v1983_v25  ;;  %2731 = vst [vmem:[#allocation13_spill] sm:$0xff] %v2207_v63  ;;  %2732 = vst [vmem:[#allocation14_spill] sm:$0xff] %v2214_v48 }
  0x1b   :  { %574 = vmatpush1.bf16.msra.mxu0 %v1988_v26  ;;  %680 = vmatpush1.bf16.msra.mxu1 %v1993_v27 }
  0x1c   :  { %575 = vmatprep.subr.bf16.mxu0 %v2000_v28  ;;  %681 = vmatprep.subr.bf16.mxu1 %v2007_v29 }
  0x1f   :  { %576 = vmatpush1.bf16.msra.mxu0 %v2012_v30  ;;  %682 = vmatpush1.bf16.msra.mxu1 %v2019_v31 }
  0x20   :  { %577 = vmatprep.subr.bf16.mxu0 %v2024_v32  ;;  %683 = vmatprep.subr.bf16.mxu1 %v2031_v33 }
  0x23   :  { %578 = vmatpush1.bf16.msra.mxu0 %v2036_v34  ;;  %684 = vmatpush1.bf16.msra.mxu1 %v2041_v35 }
  0x24   :  { %579 = vmatprep.subr.bf16.mxu0 %v2048_v36  ;;  %685 = vmatprep.subr.bf16.mxu1 %v2055_v37 }
  0x27   :  { %580 = vmatpush1.bf16.msra.mxu0 %v2060_v38  ;;  %686 = vmatpush1.bf16.msra.mxu1 %v2067_v39 }
  0x28   :  { %581 = vmatprep.subr.bf16.mxu0 %v2072_v40  ;;  %687 = vmatprep.subr.bf16.mxu1 %v2079_v41 }
  0x2b   :  { %582 = vmatpush1.bf16.msra.mxu0 %v2084_v42  ;;  %688 = vmatpush1.bf16.msra.mxu1 %v2089_v43 }
  0x2c   :  { %583 = vmatprep.subr.bf16.mxu0 %v2096_v44  ;;  %689 = vmatprep.subr.bf16.mxu1 %v2103_v45 }
  0x2f   :  { %584 = vmatpush1.bf16.msra.mxu0 %v2108_v46  ;;  %690 = vmatpush1.bf16.msra.mxu1 %v2113_v47 }
  0x30   :  { %585 = vmatprep.subr.bf16.mxu0 %v2123_v49  ;;  %691 = vmatprep.subr.bf16.mxu1 %v2130_v50 }
  0x33   :  { %586 = vmatpush1.bf16.msra.mxu0 %v2135_v51  ;;  %692 = vmatpush1.bf16.msra.mxu1 %v2140_v52 }
  0x34   :  { %587 = vmatprep.subr.bf16.mxu0 %v2147_v53  ;;  %693 = vmatprep.subr.bf16.mxu1 %v2154_v54 }
  0x37   :  { %588 = vmatpush1.bf16.msra.mxu0 %v2159_v55  ;;  %694 = vmatpush1.bf16.msra.mxu1 %v2164_v56 }
  0x38   :  { %589 = vmatprep.subr.bf16.mxu0 %v2171_v57  ;;  %695 = vmatprep.subr.bf16.mxu1 %v2178_v58  ;;  %v2219_v58 = vld [vmem:[%s2705_s2 + $0x204] ss:$16 sps:$4 sm:$0xff]  }
  0x39   :  { %2733 = vst [vmem:[#allocation15_spill] sm:$0xff] %v2219_v58 }
  0x3b   :  { %590 = vmatpush1.bf16.msra.mxu0 %v2183_v59  ;;  %696 = vmatpush1.bf16.msra.mxu1 %v2188_v60  ;;  %v2226_v59 = vld [vmem:[%s2705_s2 + $0x20c] ss:$16 sps:$4 sm:$0xff]  }
  0x3c   :  { %591 = vmatprep.subr.bf16.mxu0 %v2195_v61  ;;  %697 = vmatprep.subr.bf16.mxu1 %v2202_v62  ;;  %2734 = vst [vmem:[#allocation16_spill] sm:$0xff] %v2226_v59 }
  0x3d   :  { %8 = vsyncpa [#allocation5], 0  ;;  %v1661_v60 = vld [vmem:[%s2703_s0] ss:$12 sps:$4 sm:$0xff]   ;;  %v2241_v62 = vld [vmem:[%s2705_s2 + $0x208] ss:$16 sps:$4 sm:$0xff]  }
  0x3e   :  { %v2236_v61 = vld [vmem:[%s2705_s2 + $0x200] ss:$16 sps:$4 sm:$0xff]   ;;  %2736 = vst [vmem:[#allocation18_spill] sm:$0xff] %v2241_v62  ;;  %v1676_v57 = vld [vmem:[%s2703_s0 + $0x1c] ss:$12 sps:$4 sm:$0xff]   ;;  %vm554_vm0 = vcmask 523264  }
  0x3f   :  { %592 = vmatpush1.bf16.msra.mxu0 %v2207_v63  ;;  %698 = vmatpush1.bf16.msra.mxu1 %v2214_v48  ;;  %2735 = vst [vmem:[#allocation17_spill] sm:$0xff] %v2236_v61  ;;  %v2248_v63 = vld [vmem:[%s2705_s2 + $0x224] ss:$16 sps:$4 sm:$0xff]   ;;  %v2253_v48 = vld [vmem:[%s2705_s2 + $0x22c] ss:$16 sps:$4 sm:$0xff]   ;;  %s1418_s7 = sshll.u32 %s2706_s3, 4  ;;  %s1419_s7 = int_to_ptr.vmem [resolvable:$true] %s1418_s7 }
  0x40   :  { %614 = vmatprep.subr.bf16.mxu0 %v2219_v58  ;;  %720 = vmatprep.subr.bf16.mxu1 %v2226_v59  ;;  %2737 = vst [vmem:[#allocation19_spill] sm:$0xff] %v2248_v63  ;;  %2738 = vst [vmem:[#allocation20_spill] sm:$0xff] %v2253_v48  ;;  %v2263_v59 = vld [vmem:[%s2705_s2 + $0x220] ss:$16 sps:$4 sm:$0xff]   ;;  %v2268_v58 = vld [vmem:[%s2705_s2 + $0x228] ss:$16 sps:$4 sm:$0xff]   ;;  %p1802_p1 = scmp.lt.s32.totalorder %s1419_s7, %s1419_s7 }
  0x41   :  { %2739 = vst [vmem:[#allocation21_spill] sm:$0xff] %v2263_v59  ;;  %2740 = vst [vmem:[#allocation22_spill] sm:$0xff] %v2268_v58  ;;  %s1797_s9 = scalar_lea.vmem %s1419_s7, 16 }
  0x42   :  { %594 = vmatmul.mubr.bf16.vlgmr.msra.gmra.mrb[0].mxu0 %v1661_v60  ;;  %700 = vmatmul.mubr.bf16.vlgmr.msra.gmra.mrb[0].mxu1 %v1661_v60  ;;  %v2275_v60 = vld [vmem:[%s2705_s2 + $0x244] ss:$16 sps:$4 sm:$0xff]   ;;  %p1798_p0 = scmp.ne.s32.totalorder %s1419_s7, %s1797_s9  ;;  %p1803_p2 = scmp.lt.s32.totalorder %s1797_s9, %s1797_s9 }
  0x43   :  { %615 = vmatpush1.bf16.msra.mxu0 %v2236_v61  ;;  %721 = vmatpush1.bf16.msra.mxu1 %v2241_v62  ;;  %2741 = vst [vmem:[#allocation23_spill] sm:$0xff] %v2275_v60  ;;  %v2280_v62 = vld [vmem:[%s2705_s2 + $0x24c] ss:$16 sps:$4 sm:$0xff]   ;;  %v1678_v61 = vld [vmem:[%s2703_s0 + $0x18] ss:$12 sps:$4 sm:$0xff]  }
  0x44   :  { %616 = vmatprep.subr.bf16.mxu0 %v2248_v63  ;;  %722 = vmatprep.subr.bf16.mxu1 %v2253_v48  ;;  %2742 = vst [vmem:[#allocation24_spill] sm:$0xff] %v2280_v62  ;;  %v2290_v48 = vld [vmem:[%s2705_s2 + $0x240] ss:$16 sps:$4 sm:$0xff]   ;;  %v2295_v63 = vld [vmem:[%s2705_s2 + $0x248] ss:$16 sps:$4 sm:$0xff]   ;;  %p1804_p3 = por %p1803_p2, %p1802_p1 }
  0x45   :  { %603 = vmatprep.mubr.bf16.mxu0 %v1676_v57  ;;  %709 = vmatprep.mubr.bf16.mxu1 %v1676_v57  ;;  %v2302_v57 = vld [vmem:[%s2705_s2 + $0x264] ss:$16 sps:$4 sm:$0xff]  }
  0x46   :  { %p1805_p4 = pnand %p1804_p3, %p1798_p0 }
  0x47   :  { %617 = vmatpush1.bf16.msra.mxu0 %v2263_v59  ;;  %723 = vmatpush1.bf16.msra.mxu1 %v2268_v58  ;;  %v2307_v58 = vld [vmem:[%s2705_s2 + $0x26c] ss:$16 sps:$4 sm:$0xff]   ;;  %v1811_v59 = vmov 0  }
  0x48   :  { %618 = vmatprep.subr.bf16.mxu0 %v2275_v60  ;;  %724 = vmatprep.subr.bf16.mxu1 %v2280_v62  ;;  %v2314_v62 = vld [vmem:[%s2705_s2 + $0x260] ss:$16 sps:$4 sm:$0xff]   ;;  %v2319_v60 = vld [vmem:[%s2705_s2 + $0x268] ss:$16 sps:$4 sm:$0xff]  }
  0x4a   :  { %604 = vmatmul.mubr.bf16.gmra.mrb[4].mxu0 %v1678_v61  ;;  %710 = vmatmul.mubr.bf16.gmra.mrb[4].mxu1 %v1678_v61  ;;  %v1691_v61 = vld [vmem:[%s2703_s0 + $0x8] ss:$12 sps:$4 sm:$0xff]  }
  0x4b   :  { %619 = vmatpush1.bf16.msra.mxu0 %v2290_v48  ;;  %725 = vmatpush1.bf16.msra.mxu1 %v2295_v63 }
  0x4c   :  { %620 = vmatprep.subr.bf16.mxu0 %v2302_v57  ;;  %726 = vmatprep.subr.bf16.mxu1 %v2307_v58 }
  0x4d   :  { %646 = vmatprep.mubr.bf16.mxu0 %v1811_v59  ;;  %752 = vmatprep.mubr.bf16.mxu1 %v1811_v59 }
  0x4f   :  { %621 = vmatpush1.bf16.msra.mxu0 %v2314_v62  ;;  %727 = vmatpush1.bf16.msra.mxu1 %v2319_v60 }
  0x50   :  { %817 = vmatprep.subr.bf16.mxu0 %v1836_v0  ;;  %923 = vmatprep.subr.bf16.mxu1 %v1841_v1  ;;  %v1692_v0 = vld [vmem:[%s2703_s0 + $0x20] ss:$12 sps:$4 sm:$0xff]   ;;  %v1695_v1 = vld [vmem:[%s2704_s1 + $0x4] ss:$12 sps:$4 sm:$0xff]  }
  0x52   :  { %1513 = vmatmul.mubr.msk.bf16.vlgmr.msra.gmra.mrb[0].mxu0 %vm554_vm0, %v1691_v61  ;;  %1515 = vmatmul.mubr.msk.bf16.vlgmr.msra.gmra.mrb[0].mxu1 %vm554_vm0, %v1691_v61 }
  0x53   :  { %818 = vmatpush1.bf16.msra.mxu0 %v1847_v2  ;;  %924 = vmatpush1.bf16.msra.mxu1 %v1852_v3  ;;  %v2743_v2 = vld [vmem:[#allocation7_spill] sm:$0xff]  ;;  %v2744_v3 = vld [vmem:[#allocation8_spill] sm:$0xff] }
  0x54   :  { %819 = vmatprep.subr.bf16.mxu0 %v1858_v4  ;;  %925 = vmatprep.subr.bf16.mxu1 %v1865_v5  ;;  %v2745_v4 = vld [vmem:[#allocation9_spill] sm:$0xff]  ;;  %v2746_v5 = vld [vmem:[#allocation10_spill] sm:$0xff] }
  0x55   :  { %656 = vmatprep.mubr.bf16.mxu0 %v1811_v59  ;;  %762 = vmatprep.mubr.bf16.mxu1 %v1811_v59 }
  0x57   :  { %820 = vmatpush1.bf16.msra.mxu0 %v1870_v6  ;;  %926 = vmatpush1.bf16.msra.mxu1 %v1876_v7  ;;  %v2747_v6 = vld [vmem:[#allocation11_spill] sm:$0xff]  ;;  %v2748_v7 = vld [vmem:[#allocation12_spill] sm:$0xff] }
  0x58   :  { %821 = vmatprep.subr.bf16.mxu0 %v1882_v8  ;;  %927 = vmatprep.subr.bf16.mxu1 %v1887_v9  ;;  %v1693_v8 = vld [vmem:[%s2704_s1] ss:$12 sps:$4 sm:$0xff]   ;;  %v2749_v9 = vld [vmem:[#allocation13_spill] sm:$0xff] }
  0x5a   :  { %1514 = vmatmul.mubr.msk.bf16.gmra.mrb[4].mxu0 %vm554_vm0, %v1692_v0  ;;  %1516 = vmatmul.mubr.msk.bf16.gmra.mrb[4].mxu1 %vm554_vm0, %v1692_v0 }
  0x5b   :  { %822 = vmatpush1.bf16.msra.mxu0 %v1892_v10  ;;  %928 = vmatpush1.bf16.msra.mxu1 %v1897_v11  ;;  %v2750_v10 = vld [vmem:[#allocation14_spill] sm:$0xff]  ;;  %v2751_v11 = vld [vmem:[#allocation15_spill] sm:$0xff] }
  0x5c   :  { %823 = vmatprep.subr.bf16.mxu0 %v1904_v12  ;;  %929 = vmatprep.subr.bf16.mxu1 %v1911_v13  ;;  %v2752_v12 = vld [vmem:[#allocation16_spill] sm:$0xff] }
  0x5d   :  { %849 = vmatprep.mubr.bf16.mxu0 %v1695_v1  ;;  %955 = vmatprep.mubr.bf16.mxu1 %v1695_v1  ;;  %v1696_v13 = vld [vmem:[%s2704_s1 + $0x1c] ss:$12 sps:$4 sm:$0xff]  }
  0x5f   :  { %824 = vmatpush1.bf16.msra.mxu0 %v1916_v14  ;;  %930 = vmatpush1.bf16.msra.mxu1 %v1923_v15  ;;  %v2753_v14 = vld [vmem:[#allocation17_spill] sm:$0xff]  ;;  %v2754_v15 = vld [vmem:[#allocation18_spill] sm:$0xff] }
  0x60   :  { %825 = vmatprep.subr.bf16.mxu0 %v1928_v16  ;;  %931 = vmatprep.subr.bf16.mxu1 %v1935_v17  ;;  %v2755_v16 = vld [vmem:[#allocation19_spill] sm:$0xff]  ;;  %v2756_v17 = vld [vmem:[#allocation20_spill] sm:$0xff] }
  0x63   :  { %826 = vmatpush1.bf16.msra.mxu0 %v1940_v18  ;;  %932 = vmatpush1.bf16.msra.mxu1 %v1945_v19  ;;  %v1698_v18 = vld [vmem:[%s2704_s1 + $0x18] ss:$12 sps:$4 sm:$0xff]   ;;  %v2757_v19 = vld [vmem:[#allocation21_spill] sm:$0xff] }
  0x64   :  { %827 = vmatprep.subr.bf16.mxu0 %v1952_v20  ;;  %933 = vmatprep.subr.bf16.mxu1 %v1959_v21  ;;  %v2758_v20 = vld [vmem:[#allocation22_spill] sm:$0xff]  ;;  %v2759_v21 = vld [vmem:[#allocation23_spill] sm:$0xff] }
  0x67   :  { %828 = vmatpush1.bf16.msra.mxu0 %v1964_v22  ;;  %934 = vmatpush1.bf16.msra.mxu1 %v1971_v23  ;;  %v2760_v22 = vld [vmem:[#allocation24_spill] sm:$0xff] }
  0x68   :  { %829 = vmatprep.subr.bf16.mxu0 %v1976_v24  ;;  %935 = vmatprep.subr.bf16.mxu1 %v1983_v25  ;;  %v1699_v23 = vld [vmem:[%s2704_s1 + $0x8] ss:$12 sps:$4 sm:$0xff]   ;;  %v1700_v24 = vld [vmem:[%s2704_s1 + $0x20] ss:$12 sps:$4 sm:$0xff]  }
  0x6b   :  { %830 = vmatpush1.bf16.msra.mxu0 %v1988_v26  ;;  %936 = vmatpush1.bf16.msra.mxu1 %v1993_v27 }
  0x6c   :  { %831 = vmatprep.subr.bf16.mxu0 %v2000_v28  ;;  %937 = vmatprep.subr.bf16.mxu1 %v2007_v29 }
  0x6f   :  { %832 = vmatpush1.bf16.msra.mxu0 %v2012_v30  ;;  %938 = vmatpush1.bf16.msra.mxu1 %v2019_v31 }
  0x70   :  { %833 = vmatprep.subr.bf16.mxu0 %v2024_v32  ;;  %939 = vmatprep.subr.bf16.mxu1 %v2031_v33 }
  0x73   :  { %834 = vmatpush1.bf16.msra.mxu0 %v2036_v34  ;;  %940 = vmatpush1.bf16.msra.mxu1 %v2041_v35 }
  0x74   :  { %835 = vmatprep.subr.bf16.mxu0 %v2048_v36  ;;  %941 = vmatprep.subr.bf16.mxu1 %v2055_v37 }
  0x77   :  { %836 = vmatpush1.bf16.msra.mxu0 %v2060_v38  ;;  %942 = vmatpush1.bf16.msra.mxu1 %v2067_v39 }
  0x78   :  { %837 = vmatprep.subr.bf16.mxu0 %v2072_v40  ;;  %943 = vmatprep.subr.bf16.mxu1 %v2079_v41 }
  0x7b   :  { %838 = vmatpush1.bf16.msra.mxu0 %v2084_v42  ;;  %944 = vmatpush1.bf16.msra.mxu1 %v2089_v43 }
  0x7c   :  { %839 = vmatprep.subr.bf16.mxu0 %v2096_v44  ;;  %945 = vmatprep.subr.bf16.mxu1 %v2103_v45 }
  0x7f   :  { %840 = vmatpush1.bf16.msra.mxu0 %v2108_v46  ;;  %946 = vmatpush1.bf16.msra.mxu1 %v2113_v47 }
  0x80   :  { %841 = vmatprep.subr.bf16.mxu0 %v2123_v49  ;;  %947 = vmatprep.subr.bf16.mxu1 %v2130_v50 }
  0x83   :  { %842 = vmatpush1.bf16.msra.mxu0 %v2135_v51  ;;  %948 = vmatpush1.bf16.msra.mxu1 %v2140_v52 }
  0x84   :  { %843 = vmatprep.subr.bf16.mxu0 %v2147_v53  ;;  %949 = vmatprep.subr.bf16.mxu1 %v2154_v54 }
  0x87   :  { %844 = vmatpush1.bf16.msra.mxu0 %v2159_v55  ;;  %950 = vmatpush1.bf16.msra.mxu1 %v2164_v56 }
  0x88   :  { %845 = vmatprep.subr.bf16.mxu0 %v2743_v2  ;;  %951 = vmatprep.subr.bf16.mxu1 %v2744_v3 }
  0x8b   :  { %846 = vmatpush1.bf16.msra.mxu0 %v2745_v4  ;;  %952 = vmatpush1.bf16.msra.mxu1 %v2746_v5 }
  0x8c   :  { %847 = vmatprep.subr.bf16.mxu0 %v2747_v6  ;;  %953 = vmatprep.subr.bf16.mxu1 %v2748_v7 }
  0x8f   :  { %848 = vmatpush1.bf16.msra.mxu0 %v2749_v9  ;;  %954 = vmatpush1.bf16.msra.mxu1 %v2750_v10 }
  0x90   :  { %870 = vmatprep.subr.bf16.mxu0 %v2751_v11  ;;  %976 = vmatprep.subr.bf16.mxu1 %v2752_v12 }
  0x92   :  { %850 = vmatmul.mubr.bf16.vlgmr.msra.gmra.mrb[8].mxu0 %v1693_v8  ;;  %956 = vmatmul.mubr.bf16.vlgmr.msra.gmra.mrb[8].mxu1 %v1693_v8 }
  0x93   :  { %871 = vmatpush1.bf16.msra.mxu0 %v2753_v14  ;;  %977 = vmatpush1.bf16.msra.mxu1 %v2754_v15 }
  0x94   :  { %872 = vmatprep.subr.bf16.mxu0 %v2755_v16  ;;  %978 = vmatprep.subr.bf16.mxu1 %v2756_v17 }
  0x95   :  { %859 = vmatprep.mubr.bf16.mxu0 %v1696_v13  ;;  %965 = vmatprep.mubr.bf16.mxu1 %v1696_v13 }
  0x97   :  { %873 = vmatpush1.bf16.msra.mxu0 %v2757_v19  ;;  %979 = vmatpush1.bf16.msra.mxu1 %v2758_v20 }
  0x98   :  { %874 = vmatprep.subr.bf16.mxu0 %v2759_v21  ;;  %980 = vmatprep.subr.bf16.mxu1 %v2760_v22 }
  0x9a   :  { %860 = vmatmul.mubr.bf16.gmra.mrb[12].mxu0 %v1698_v18  ;;  %966 = vmatmul.mubr.bf16.gmra.mrb[12].mxu1 %v1698_v18 }
  0x9b   :  { %875 = vmatpush1.bf16.msra.mxu0 %v2290_v48  ;;  %981 = vmatpush1.bf16.msra.mxu1 %v2295_v63 }
  0x9c   :  { %876 = vmatprep.subr.bf16.mxu0 %v2302_v57  ;;  %982 = vmatprep.subr.bf16.mxu1 %v2307_v58 }
  0x9d   :  { %902 = vmatprep.mubr.bf16.mxu0 %v1811_v59  ;;  %1008 = vmatprep.mubr.bf16.mxu1 %v1811_v59 }
  0x9f   :  { %877 = vmatpush1.bf16.msra.mxu0 %v2314_v62  ;;  %983 = vmatpush1.bf16.msra.mxu1 %v2319_v60 }
  0xa2   :  { %1523 = vmatmul.mubr.msk.bf16.vlgmr.msra.gmra.mrb[8].mxu0 %vm554_vm0, %v1699_v23  ;;  %1525 = vmatmul.mubr.msk.bf16.vlgmr.msra.gmra.mrb[8].mxu1 %vm554_vm0, %v1699_v23 }
  0xa3   :  { %912 = vmatprep.mubr.bf16.mxu0 %v1811_v59  ;;  %1018 = vmatprep.mubr.bf16.mxu1 %v1811_v59 }
  0xaa   :  { %1524 = vmatmul.mubr.msk.bf16.gmra.mrb[12].mxu0 %vm554_vm0, %v1700_v24  ;;  %1526 = vmatmul.mubr.msk.bf16.gmra.mrb[12].mxu1 %vm554_vm0, %v1700_v24 }
 0x125   :  { %v2445_v25 = vpop.f32.mrb[0].mxu0  ;;  %v2447_v26 = vpop.f32.mrb[0].mxu1 }
 0x126   :  { %v1029_v27 = vmul.f32 %v2445_v25, %v2445_v25  ;;  %v1037_v28 = vmul.f32 %v2447_v26, %v2447_v26  ;;  %v2453_v29 = vpop.f32.mrb[1].mxu0  ;;  %v2455_v30 = vpop.f32.mrb[1].mxu1 }
 0x127   :  { %v1030_v31 = vmul.f32 %v2453_v29, %v2453_v29  ;;  %v1038_v32 = vmul.f32 %v2455_v30, %v2455_v30  ;;  %v2461_v33 = vpop.f32.mrb[2].mxu0  ;;  %v2463_v34 = vpop.f32.mrb[2].mxu1 }
 0x128   :  { %v1045_v35 = vadd.f32 %v1037_v28, %v1029_v27  ;;  %v1031_v36 = vmul.f32 %v2461_v33, %v2461_v33  ;;  %v1039_v37 = vmul.f32 %v2463_v34, %v2463_v34  ;;  %v2469_v38 = vpop.f32.mrb[3].mxu0  ;;  %v2471_v39 = vpop.f32.mrb[3].mxu1 }
 0x129   :  { %v1046_v40 = vadd.f32 %v1038_v32, %v1030_v31  ;;  %v1032_v41 = vmul.f32 %v2469_v38, %v2469_v38  ;;  %v1040_v42 = vmul.f32 %v2471_v39, %v2471_v39 }
 0x12a   :  { %v1077_v43 = vmax.f32 %v1045_v35, 1e-24  ;;  %v1047_v44 = vadd.f32 %v1039_v37, %v1031_v36 }
 0x12b   :  { %v1078_v45 = vmax.f32 %v1046_v40, 1e-24  ;;  %v1048_v46 = vadd.f32 %v1040_v42, %v1032_v41 }
 0x12c   :  { %1701 = vlog2.f32 %v1077_v43  ;;  %v1079_v47 = vmax.f32 %v1047_v44, 1e-24 }
 0x12d   :  { %1703 = vlog2.f32 %v1078_v45  ;;  %v1080_v49 = vmax.f32 %v1048_v46, 1e-24  ;;  %v2477_v50 = vpop.f32.mrb[4].mxu0  ;;  %v2479_v51 = vpop.f32.mrb[4].mxu1 }
 0x12e   :  { %1705 = vlog2.f32 %v1079_v47  ;;  %v1033_v52 = vmul.f32 %v2477_v50, %v2477_v50  ;;  %v1041_v53 = vmul.f32 %v2479_v51, %v2479_v51  ;;  %v2485_v54 = vpop.f32.mrb[5].mxu0  ;;  %v2487_v55 = vpop.f32.mrb[5].mxu1 }
 0x12f   :  { %1707 = vlog2.f32 %v1080_v49  ;;  %v1034_v56 = vmul.f32 %v2485_v54, %v2485_v54  ;;  %v1042_v58 = vmul.f32 %v2487_v55, %v2487_v55  ;;  %v2493_v59 = vpop.f32.mrb[6].mxu0  ;;  %v2495_v62 = vpop.f32.mrb[6].mxu1 }
 0x130   :  { %v1049_v63 = vadd.f32 %v1041_v53, %v1033_v52  ;;  %v1035_v48 = vmul.f32 %v2493_v59, %v2493_v59  ;;  %v1043_v60 = vmul.f32 %v2495_v62, %v2495_v62  ;;  %v2501_v57 = vpop.f32.mrb[7].mxu0  ;;  %v2503_v61 = vpop.f32.mrb[7].mxu1 }
 0x131   :  { %v1050_v0 = vadd.f32 %v1042_v58, %v1034_v56  ;;  %v1036_v1 = vmul.f32 %v2501_v57, %v2501_v57  ;;  %v1044_v2 = vmul.f32 %v2503_v61, %v2503_v61 }
 0x132   :  { %v1081_v3 = vmax.f32 %v1049_v63, 1e-24  ;;  %v1051_v4 = vadd.f32 %v1043_v60, %v1035_v48 }
 0x133   :  { %v1082_v5 = vmax.f32 %v1050_v0, 1e-24  ;;  %v1052_v6 = vadd.f32 %v1044_v2, %v1036_v1 }
 0x134   :  { %1709 = vlog2.f32 %v1081_v3  ;;  %v1083_v7 = vmax.f32 %v1051_v4, 1e-24 }
 0x135   :  { %1711 = vlog2.f32 %v1082_v5  ;;  %v1084_v8 = vmax.f32 %v1052_v6, 1e-24 }
 0x136   :  { %v1702_v9 = vpop.eup %1701  ;;  %1713 = vlog2.f32 %v1083_v7 }
 0x137   :  { %v1704_v10 = vpop.eup %1703  ;;  %v2509_v11 = vmul.f32 0.6931472, %v1702_v9  ;;  %1715 = vlog2.f32 %v1084_v8 }
 0x138   :  { %v1706_v12 = vpop.eup %1705  ;;  %v2511_v13 = vmul.f32 0.6931472, %v1704_v10 }
 0x139   :  { %v1708_v14 = vpop.eup %1707  ;;  %v1189_v15 = vmul.f32 -0.35, %v2509_v11  ;;  %v2514_v16 = vmul.f32 0.6931472, %v1706_v12 }
 0x13a   :  { %v1190_v17 = vmul.f32 -0.35, %v2511_v13  ;;  %v2517_v18 = vmul.f32 0.6931472, %v1708_v14 }
 0x13b   :  { %v1197_v19 = vmul.f32 1.442695, %v1189_v15  ;;  %v1191_v21 = vmul.f32 -0.35, %v2514_v16 }
 0x13c   :  { %v1199_v20 = vmul.f32 1.442695, %v1190_v17  ;;  %v1192_v22 = vmul.f32 -0.35, %v2517_v18 }
 0x13d   :  { %1717 = vpow2.f32 %v1197_v19  ;;  %v1201_v24 = vmul.f32 1.442695, %v1191_v21 }
 0x13e   :  { %v1710_v23 = vpop.eup %1709  ;;  %1719 = vpow2.f32 %v1199_v20  ;;  %v1203_v32 = vmul.f32 1.442695, %v1192_v22 }
 0x13f   :  { %v1712_v27 = vpop.eup %1711  ;;  %v2521_v28 = vmul.f32 0.6931472, %v1710_v23  ;;  %1721 = vpow2.f32 %v1201_v24  ;;  %v1126_v24 = vmul.f32 0.15, %v2511_v13 }
 0x140   :  { %v1714_v31 = vpop.eup %1713  ;;  %v2523_v35 = vmul.f32 0.6931472, %v1712_v27  ;;  %1723 = vpow2.f32 %v1203_v32  ;;  %v1127_v32 = vmul.f32 0.15, %v2514_v16 }
 0x141   :  { %v1716_v36 = vpop.eup %1715  ;;  %v1193_v37 = vmul.f32 -0.35, %v2521_v28  ;;  %v2526_v40 = vmul.f32 0.6931472, %v1714_v31 }
 0x142   :  { %v1194_v41 = vmul.f32 -0.35, %v2523_v35  ;;  %v2529_v42 = vmul.f32 0.6931472, %v1716_v36 }
 0x143   :  { %v1205_v43 = vmul.f32 1.442695, %v1193_v37  ;;  %v1195_v45 = vmul.f32 -0.35, %v2526_v40 }
 0x144   :  { %v1207_v44 = vmul.f32 1.442695, %v1194_v41  ;;  %v1196_v46 = vmul.f32 -0.35, %v2529_v42 }
 0x145   :  { %1725 = vpow2.f32 %v1205_v43  ;;  %v1209_v47 = vmul.f32 1.442695, %v1195_v45 }
 0x146   :  { %1727 = vpow2.f32 %v1207_v44  ;;  %v1211_v52 = vmul.f32 1.442695, %v1196_v46  ;;  %v1135_v46 = vmul.f32 1.442695, %v1126_v24 }
 0x147   :  { %v1718_v49 = vpop.eup %1717  ;;  %1729 = vpow2.f32 %v1209_v47 }
 0x148   :  { %v2534_v53 = vmul.f32 %v1718_v49, %v2447_v26  ;;  %v2537_v56 = vmul.f32 %v1718_v49, %v2445_v25  ;;  %v1720_v58 = vpop.eup %1719  ;;  %1731 = vpow2.f32 %v1211_v52  ;;  %v1137_v52 = vmul.f32 1.442695, %v1127_v32 }
 0x149   :  { %v2540_v63 = vmul.f32 %v1720_v58, %v2455_v30  ;;  %v2543_v48 = vmul.f32 %v1720_v58, %v2453_v29  ;;  %v1722_v60 = vpop.eup %1721 }
 0x14a   :  { %v2546_v0 = vmul.f32 %v1722_v60, %v2463_v34  ;;  %v2549_v1 = vmul.f32 %v1722_v60, %v2461_v33  ;;  %v1724_v26 = vpop.eup %1723 }
 0x14b   :  { %v2552_v25 = vmul.f32 %v1724_v26, %v2471_v39  ;;  %v2555_v2 = vmul.f32 %v1724_v26, %v2469_v38 }
 0x14f   :  { %v1726_v30 = vpop.eup %1725 }
 0x150   :  { %v2558_v3 = vmul.f32 %v1726_v30, %v2479_v51  ;;  %v2561_v29 = vmul.f32 %v1726_v30, %v2477_v50  ;;  %v1728_v4 = vpop.eup %1727 }
 0x151   :  { %v2564_v34 = vmul.f32 %v1728_v4, %v2487_v55  ;;  %v2567_v33 = vmul.f32 %v1728_v4, %v2485_v54  ;;  %v1730_v5 = vpop.eup %1729  ;;  %v1125_v55 = vmul.f32 0.15, %v2509_v11  ;;  %v1128_v4 = vmul.f32 0.15, %v2517_v18 }
 0x152   :  { %v2570_v39 = vmul.f32 %v1730_v5, %v2495_v62  ;;  %v2573_v38 = vmul.f32 %v1730_v5, %v2493_v59  ;;  %v1732_v6 = vpop.eup %1731 }
 0x153   :  { %v2576_v51 = vmul.f32 %v1732_v6, %v2503_v61  ;;  %v2579_v50 = vmul.f32 %v1732_v6, %v2501_v57  ;;  %v1133_v61 = vmul.f32 1.442695, %v1125_v55  ;;  %v1139_v24 = vmul.f32 1.442695, %v1128_v4 }
 0x155   :  { %1733 = vpow2.f32 %v1133_v61  ;;  %v1129_v61 = vmul.f32 0.15, %v2521_v28  ;;  %v1132_v28 = vmul.f32 0.15, %v2529_v42 }
 0x157   :  { %v1141_v32 = vmul.f32 1.442695, %v1129_v61 }
 0x175   :  { %v2582_v7 = vpop.f32.mrb[8].mxu0  ;;  %v2584_v54 = vpop.f32.mrb[8].mxu1 }
 0x176   :  { %v1053_v62 = vmul.f32 %v2582_v7, %v2582_v7  ;;  %v1061_v59 = vmul.f32 %v2584_v54, %v2584_v54  ;;  %v2590_v8 = vpop.f32.mrb[9].mxu0  ;;  %v2592_v9 = vpop.f32.mrb[9].mxu1 }
 0x177   :  { %v1054_v57 = vmul.f32 %v2590_v8, %v2590_v8  ;;  %v1062_v10 = vmul.f32 %v2592_v9, %v2592_v9  ;;  %v2598_v11 = vpop.f32.mrb[10].mxu0  ;;  %v2600_v12 = vpop.f32.mrb[10].mxu1 }
 0x178   :  { %v1069_v14 = vadd.f32 %v1061_v59, %v1053_v62  ;;  %v1055_v15 = vmul.f32 %v2598_v11, %v2598_v11  ;;  %v1063_v17 = vmul.f32 %v2600_v12, %v2600_v12  ;;  %v2606_v19 = vpop.f32.mrb[11].mxu0  ;;  %v2608_v20 = vpop.f32.mrb[11].mxu1 }
 0x179   :  { %v1070_v21 = vadd.f32 %v1062_v10, %v1054_v57  ;;  %v1056_v22 = vmul.f32 %v2606_v19, %v2606_v19  ;;  %v1064_v23 = vmul.f32 %v2608_v20, %v2608_v20 }
 0x17a   :  { %v1101_v27 = vmax.f32 %v1069_v14, 1e-24  ;;  %v1071_v31 = vadd.f32 %v1063_v17, %v1055_v15  ;;  %v1130_v14 = vmul.f32 0.15, %v2523_v35 }
 0x17b   :  { %v1102_v36 = vmax.f32 %v1070_v21, 1e-24  ;;  %v1072_v37 = vadd.f32 %v1064_v23, %v1056_v22  ;;  %v1131_v21 = vmul.f32 0.15, %v2526_v40 }
 0x17c   :  { %1735 = vlog2.f32 %v1101_v27  ;;  %v1103_v41 = vmax.f32 %v1071_v31, 1e-24  ;;  %v2653_v31 = vpop.eup %1733 }
 0x17d   :  { %1737 = vlog2.f32 %v1102_v36  ;;  %v1104_v43 = vmax.f32 %v1072_v37, 1e-24  ;;  %v2616_v44 = vpop.f32.mrb[12].mxu0  ;;  %v2618_v45 = vpop.f32.mrb[12].mxu1 }
 0x17e   :  { %1739 = vlog2.f32 %v1103_v41  ;;  %v1057_v13 = vmul.f32 %v2616_v44, %v2616_v44  ;;  %v1065_v47 = vmul.f32 %v2618_v45, %v2618_v45  ;;  %v2624_v49 = vpop.f32.mrb[13].mxu0  ;;  %v2626_v16 = vpop.f32.mrb[13].mxu1  ;;  %v1143_v41 = vmul.f32 1.442695, %v1130_v14 }
 0x17f   :  { %1741 = vlog2.f32 %v1104_v43  ;;  %v1058_v58 = vmul.f32 %v2624_v49, %v2624_v49  ;;  %v1066_v60 = vmul.f32 %v2626_v16, %v2626_v16  ;;  %v2632_v26 = vpop.f32.mrb[14].mxu0  ;;  %v2634_v30 = vpop.f32.mrb[14].mxu1  ;;  %v1145_v43 = vmul.f32 1.442695, %v1131_v21 }
 0x180   :  { %v1073_v5 = vadd.f32 %v1065_v47, %v1057_v13  ;;  %v1059_v6 = vmul.f32 %v2632_v26, %v2632_v26  ;;  %v1067_v55 = vmul.f32 %v2634_v30, %v2634_v30  ;;  %v2641_v62 = vpop.f32.mrb[15].mxu0  ;;  %v2643_v59 = vpop.f32.mrb[15].mxu1  ;;  %1743 = vpow2.f32 %v1135_v46 }
 0x181   :  { %v1074_v57 = vadd.f32 %v1066_v60, %v1058_v58  ;;  %v1060_v10 = vmul.f32 %v2641_v62, %v2641_v62  ;;  %v1068_v18 = vmul.f32 %v2643_v59, %v2643_v59  ;;  %1745 = vpow2.f32 %v1137_v52 }
 0x182   :  { %v1105_v15 = vmax.f32 %v1073_v5, 1e-24  ;;  %v1075_v17 = vadd.f32 %v1067_v55, %v1059_v6  ;;  %v1147_v13 = vmul.f32 1.442695, %v1132_v28 }
 0x183   :  { %v1106_v22 = vmax.f32 %v1074_v57, 1e-24  ;;  %v1076_v23 = vadd.f32 %v1068_v18, %v1060_v10 }
 0x184   :  { %1747 = vlog2.f32 %v1105_v15  ;;  %v1107_v27 = vmax.f32 %v1075_v17, 1e-24 }
 0x185   :  { %1749 = vlog2.f32 %v1106_v22  ;;  %v1108_v36 = vmax.f32 %v1076_v23, 1e-24 }
 0x186   :  { %v1736_v37 = vpop.eup %1735  ;;  %1751 = vlog2.f32 %v1107_v27 }
 0x187   :  { %v1738_v35 = vpop.eup %1737  ;;  %v1110_v46 = vmul.f32 0.6931472, %v1736_v37  ;;  %1753 = vlog2.f32 %v1108_v36 }
 0x188   :  { %v1740_v40 = vpop.eup %1739  ;;  %1755 = vpow2.f32 %v1139_v24  ;;  %v1112_v47 = vmul.f32 0.6931472, %v1738_v35 }
 0x189   :  { %v1742_v52 = vpop.eup %1741  ;;  %1757 = vpow2.f32 %v1141_v32  ;;  %v1149_v42 = vmul.f32 0.15, %v1110_v46  ;;  %v1213_v58 = vmul.f32 -0.35, %v1110_v46  ;;  %v1114_v60 = vmul.f32 0.6931472, %v1740_v40 }
 0x18a   :  { %1759 = vpow2.f32 %v1143_v41  ;;  %v1150_v4 = vmul.f32 0.15, %v1112_v47  ;;  %v1214_v5 = vmul.f32 -0.35, %v1112_v47  ;;  %v1116_v6 = vmul.f32 0.6931472, %v1742_v52  ;;  %v1744_v10 = vpop.eup %1743 }
 0x18b   :  { %1761 = vpow2.f32 %v1145_v43  ;;  %v1157_v55 = vmul.f32 1.442695, %v1149_v42  ;;  %v1221_v61 = vmul.f32 1.442695, %v1213_v58  ;;  %v1151_v57 = vmul.f32 0.15, %v1114_v60  ;;  %v2655_v17 = vpop.eup %1745 }
 0x18c   :  { %1763 = vpow2.f32 %v1147_v13  ;;  %v1159_v18 = vmul.f32 1.442695, %v1150_v4  ;;  %v1223_v14 = vmul.f32 1.442695, %v1214_v5  ;;  %v1215_v15 = vmul.f32 -0.35, %v1114_v60 }
 0x18d   :  { %1765 = vpow2.f32 %v1157_v55  ;;  %v1161_v21 = vmul.f32 1.442695, %v1151_v57  ;;  %v1152_v22 = vmul.f32 0.15, %v1116_v6  ;;  %v1216_v23 = vmul.f32 -0.35, %v1116_v6 }
 0x18e   :  { %v1748_v24 = vpop.eup %1747  ;;  %1767 = vpow2.f32 %v1221_v61  ;;  %v1225_v28 = vmul.f32 1.442695, %v1215_v15 }
 0x18f   :  { %v1750_v27 = vpop.eup %1749  ;;  %1769 = vpow2.f32 %v1159_v18  ;;  %v1163_v32 = vmul.f32 1.442695, %v1152_v22  ;;  %v1118_v36 = vmul.f32 0.6931472, %v1748_v24  ;;  %v1227_v41 = vmul.f32 1.442695, %v1216_v23 }
 0x190   :  { %v1752_v37 = vpop.eup %1751  ;;  %1771 = vpow2.f32 %v1223_v14  ;;  %v1120_v35 = vmul.f32 0.6931472, %v1750_v27 }
 0x191   :  { %v1754_v43 = vpop.eup %1753  ;;  %1773 = vpow2.f32 %v1161_v21  ;;  %v1153_v46 = vmul.f32 0.15, %v1118_v36  ;;  %v1217_v40 = vmul.f32 -0.35, %v1118_v36  ;;  %v1122_v13 = vmul.f32 0.6931472, %v1752_v37 }
 0x192   :  { %v1756_v47 = vpop.eup %1755  ;;  %1775 = vpow2.f32 %v1225_v28  ;;  %v1154_v52 = vmul.f32 0.15, %v1120_v35  ;;  %v1218_v42 = vmul.f32 -0.35, %v1120_v35  ;;  %v1124_v58 = vmul.f32 0.6931472, %v1754_v43 }
 0x193   :  { %v1758_v60 = vpop.eup %1757  ;;  %1777 = vpow2.f32 %v1163_v32  ;;  %v1165_v4 = vmul.f32 1.442695, %v1153_v46  ;;  %v1229_v5 = vmul.f32 1.442695, %v1217_v40  ;;  %v1155_v6 = vmul.f32 0.15, %v1122_v13 }
 0x194   :  { %v2657_v55 = vpop.eup %1759  ;;  %1779 = vpow2.f32 %v1227_v41  ;;  %v1167_v61 = vmul.f32 1.442695, %v1154_v52  ;;  %v1231_v57 = vmul.f32 1.442695, %v1218_v42  ;;  %v1219_v18 = vmul.f32 -0.35, %v1122_v13 }
 0x195   :  { %v2659_v14 = vpop.eup %1761  ;;  %1781 = vpow2.f32 %v1165_v4  ;;  %v1169_v15 = vmul.f32 1.442695, %v1155_v6  ;;  %v1156_v21 = vmul.f32 0.15, %v1124_v58  ;;  %v1220_v24 = vmul.f32 -0.35, %v1124_v58 }
 0x196   :  { %v2661_v22 = vpop.eup %1763  ;;  %1783 = vpow2.f32 %v1229_v5  ;;  %v1233_v23 = vmul.f32 1.442695, %v1219_v18 }
 0x197   :  { %v1766_v28 = vpop.eup %1765  ;;  %1785 = vpow2.f32 %v1167_v61  ;;  %v1171_v32 = vmul.f32 1.442695, %v1156_v21  ;;  %v1235_v46 = vmul.f32 1.442695, %v1220_v24 }
 0x198   :  { %v1768_v27 = vpop.eup %1767  ;;  %1787 = vpow2.f32 %v1231_v57  ;;  %v1173_v36 = vsub.f32 %v2653_v31, %v1766_v28 }
 0x199   :  { %v1770_v37 = vpop.eup %1769  ;;  %v1245_v41 = vmul.f32 %v1768_v27, %v2582_v7  ;;  %v1269_v35 = vmul.f32 %v1768_v27, %v2584_v54  ;;  %1789 = vpow2.f32 %v1169_v15 }
 0x19a   :  { %v1772_v43 = vpop.eup %1771  ;;  %1791 = vpow2.f32 %v1233_v23  ;;  %v1174_v40 = vsub.f32 %v1744_v10, %v1770_v37  ;;  %v1181_v5 = vmul.f32 %v1173_v36, %v1173_v36 }
 0x19b   :  { %v1774_v13 = vpop.eup %1773  ;;  %v1253_v52 = vsub.f32 %v2537_v56, %v1245_v41  ;;  %v1277_v42 = vsub.f32 %v2534_v53, %v1269_v35  ;;  %v1246_v58 = vmul.f32 %v1772_v43, %v2590_v8  ;;  %v1270_v4 = vmul.f32 %v1772_v43, %v2592_v9 }
 0x19c   :  { %v1776_v31 = vpop.eup %1775  ;;  %1793 = vpow2.f32 %v1171_v32  ;;  %v1175_v7 = vsub.f32 %v2655_v17, %v1774_v13  ;;  %v1182_v54 = vmul.f32 %v1174_v40, %v1174_v40 }
 0x19d   :  { %v1778_v6 = vpop.eup %1777  ;;  %v1317_v61 = vmul.f32 %v1253_v52, %v1253_v52  ;;  %v1333_v57 = vmul.f32 %v1277_v42, %v1277_v42  ;;  %v1254_v10 = vsub.f32 %v2543_v48, %v1246_v58  ;;  %v1278_v18 = vsub.f32 %v2540_v63, %v1270_v4 }
 0x19e   :  { %v1780_v56 = vpop.eup %1779  ;;  %v1247_v53 = vmul.f32 %v1776_v31, %v2598_v11  ;;  %v1271_v8 = vmul.f32 %v1776_v31, %v2600_v12  ;;  %1795 = vpow2.f32 %v1235_v46  ;;  %v1176_v9 = vsub.f32 %v1756_v47, %v1778_v6 }
 0x19f   :  { %v1782_v15 = vpop.eup %1781  ;;  %v1341_v21 = vadd.f32 %v1333_v57, %v1317_v61  ;;  %v1318_v23 = vmul.f32 %v1254_v10, %v1254_v10  ;;  %v1334_v17 = vmul.f32 %v1278_v18, %v1278_v18  ;;  %v1248_v24 = vmul.f32 %v1780_v56, %v2606_v19 }
 0x1a0   :  { %v1784_v28 = vpop.eup %1783  ;;  %v1255_v27 = vsub.f32 %v2549_v1, %v1247_v53  ;;  %v1279_v48 = vsub.f32 %v2546_v0, %v1271_v8  ;;  %v1272_v63 = vmul.f32 %v1780_v56, %v2608_v20  ;;  %v1177_v32 = vsub.f32 %v1758_v60, %v1782_v15 }
 0x1a1   :  { %v1786_v36 = vpop.eup %1785  ;;  %v1342_v11 = vadd.f32 %v1334_v17, %v1318_v23  ;;  %v1256_v12 = vsub.f32 %v2555_v2, %v1248_v24  ;;  %v1249_v47 = vmul.f32 %v1784_v28, %v2616_v44  ;;  %v1273_v37 = vmul.f32 %v1784_v28, %v2618_v45 }
 0x1a2   :  { %v1788_v41 = vpop.eup %1787  ;;  %v1319_v35 = vmul.f32 %v1255_v27, %v1255_v27  ;;  %v1335_v43 = vmul.f32 %v1279_v48, %v1279_v48  ;;  %v1280_v19 = vsub.f32 %v2552_v25, %v1272_v63  ;;  %v1178_v1 = vsub.f32 %v2657_v55, %v1786_v36 }
 0x1a3   :  { %v1790_v46 = vpop.eup %1789  ;;  %v1394_v0 = vadd.f32 %v1342_v11, %v1341_v21  ;;  %v1320_v40 = vmul.f32 %v1256_v12, %v1256_v12  ;;  %v1257_v20 = vsub.f32 %v2561_v29, %v1249_v47  ;;  %v1281_v60 = vsub.f32 %v2558_v3, %v1273_v37 }
 0x1a4   :  { %v1792_v13 = vpop.eup %1791  ;;  %v1343_v2 = vadd.f32 %v1335_v43, %v1319_v35  ;;  %v1336_v52 = vmul.f32 %v1280_v19, %v1280_v19  ;;  %v1250_v44 = vmul.f32 %v1788_v41, %v2624_v49  ;;  %v1274_v45 = vmul.f32 %v1788_v41, %v2626_v16 }
 0x1a5   :  { %v1321_v42 = vmul.f32 %v1257_v20, %v1257_v20  ;;  %v1337_v58 = vmul.f32 %v1281_v60, %v1281_v60  ;;  %v1275_v25 = vmul.f32 %v1792_v13, %v2634_v30  ;;  %v1179_v55 = vsub.f32 %v2659_v14, %v1790_v46 }
 0x1a6   :  { %v1794_v4 = vpop.eup %1793  ;;  %v1395_v31 = vadd.f32 %v1394_v0, %v1343_v2  ;;  %v1344_v6 = vadd.f32 %v1336_v52, %v1320_v40  ;;  %v1258_v29 = vsub.f32 %v2567_v33, %v1250_v44  ;;  %v1282_v3 = vsub.f32 %v2564_v34, %v1274_v45 }
 0x1a7   :  { %v1345_v61 = vadd.f32 %v1337_v58, %v1321_v42  ;;  %v1283_v57 = vsub.f32 %v2570_v39, %v1275_v25  ;;  %v1180_v49 = vsub.f32 %v2661_v22, %v1794_v4  ;;  %v1183_v53 = vmul.f32 %v1175_v7, %v1175_v7 }
 0x1a8   :  { %v1796_v10 = vpop.eup %1795  ;;  %v1396_v16 = vadd.f32 %v1395_v31, %v1344_v6  ;;  %v1322_v18 = vmul.f32 %v1258_v29, %v1258_v29  ;;  %v1338_v56 = vmul.f32 %v1282_v3, %v1282_v3  ;;  %v1368_v8 = vadd.f32 %v1182_v54, %v1181_v5 }
 0x1a9   :  { %v1276_v30 = vmul.f32 %v1796_v10, %v2643_v59  ;;  %v1251_v33 = vmul.f32 %v1792_v13, %v2632_v26  ;;  %v1252_v34 = vmul.f32 %v1796_v10, %v2641_v62  ;;  %v1339_v23 = vmul.f32 %v1283_v57, %v1283_v57 }
 0x1aa   :  { %v1346_v14 = vadd.f32 %v1338_v56, %v1322_v18  ;;  %v1397_v21 = vadd.f32 %v1396_v16, %v1345_v61  ;;  %v1184_v39 = vmul.f32 %v1176_v9, %v1176_v9  ;;  %v1185_v17 = vmul.f32 %v1177_v32, %v1177_v32 }
 0x1ab   :  { %v1284_v15 = vsub.f32 %v2576_v51, %v1276_v30  ;;  %v1369_v22 = vadd.f32 %v1368_v8, %v1183_v53  ;;  %v1259_v28 = vsub.f32 %v2573_v38, %v1251_v33  ;;  %v1260_v7 = vsub.f32 %v2579_v50, %v1252_v34 }
 0x1ac   :  { %v1398_v27 = vadd.f32 %v1397_v21, %v1346_v14  ;;  %v1186_v59 = vmul.f32 %v1178_v1, %v1178_v1  ;;  %v1187_v36 = vmul.f32 %v1179_v55, %v1179_v55  ;;  %v1188_v12 = vmul.f32 %v1180_v49, %v1180_v49 }
 0x1ad   :  { %v1340_v24 = vmul.f32 %v1284_v15, %v1284_v15  ;;  %v1370_v48 = vadd.f32 %v1369_v22, %v1184_v39  ;;  %v1323_v5 = vmul.f32 %v1259_v28, %v1259_v28  ;;  %v1324_v54 = vmul.f32 %v1260_v7, %v1260_v7 }
 0x1af   :  { %v1371_v51 = vadd.f32 %v1370_v48, %v1185_v17  ;;  %v1347_v63 = vadd.f32 %v1339_v23, %v1323_v5  ;;  %v1348_v26 = vadd.f32 %v1340_v24, %v1324_v54 }
 0x1b1   :  { %v1372_v62 = vadd.f32 %v1371_v51, %v1186_v59  ;;  %v1399_v11 = vadd.f32 %v1398_v27, %v1347_v63 }
 0x1b3   :  { %v1373_v9 = vadd.f32 %v1372_v62, %v1187_v36  ;;  %v1400_v32 = vadd.f32 %v1399_v11, %v1348_v26 }
 0x1b5   :  { %v1374_v47 = vadd.f32 %v1373_v9, %v1188_v12 }
 0x1b7   :  { %1375 = vadd.xlane.f32.xlu0 %v1374_v47 }
 0x1bb   :  { %1401 = vadd.xlane.f32.xlu0 %v1400_v32 }
 0x244   :  { %v1376_v38 = vpop.xlane.xlu0 %1375 }
 0x245   :  { %v1377_v37 = vrot.slane %v1376_v38, 4 }
 0x247   :  { %v1378_v50 = vadd.f32 %v1377_v37, %v1376_v38 }
 0x248   :  { %v1402_v41 = vpop.xlane.xlu0 %1401 }
 0x249   :  { %v1379_v35 = vrot.slane %v1378_v50, 2  ;;  %v1403_v43 = vrot.slane %v1402_v41, 4 }
 0x24b   :  { %v1404_v19 = vadd.f32 %v1403_v43, %v1402_v41  ;;  %v1380_v1 = vadd.f32 %v1379_v35, %v1378_v50 }
 0x24d   :  { %v1405_v46 = vrot.slane %v1404_v19, 2  ;;  %v1381_v0 = vrot.slane %v1380_v1, 1 }
 0x24f   :  { %v1406_v40 = vadd.f32 %v1405_v46, %v1404_v19  ;;  %v1382_v20 = vadd.f32 %v1381_v0, %v1380_v1 }
 0x251   :  { %1559 = vpush %v1382_v20  ;;  %v1407_v60 = vrot.slane %v1406_v40, 1 }
 0x253   :  { %v1408_v13 = vadd.f32 %v1407_v60, %v1406_v40 }
 0x255   :  { %1561 = vpush %v1408_v13 }
 0x282   :  { %s1560_s1 = spop %1559 }
 0x283   :  { %1385 = sst [smem:[#allocation4]] %s1560_s1 }
 0x286   :  { %s1562_s8 = spop %1561 }
 0x287   :  { %1411 = sst [smem:[#allocation4 + $0x1]] %s1562_s8 }
 0x288   :  { %1808 = shalt.err (!%p1805_p4)
}
 0x289   :  { %s1812_s10 = smov [#allocation4]  }
 0x28a   :  { %1421 = dma.smem_to_vmem %s1812_s10, 16, %s1419_s7, [#allocation5]  }
 0x28b   :  { %1809 = dma.done.wait [#allocation5], 16  }
 0x28c   :  { %1810 = vsyncadd [#allocation5], 4294967280 }
 0x28d   :  { %1425 = sfence }
 0x28e   :  { %1426 = vsyncpa [#allocation5], 1 }

// kernel: combined_loss.5
= control target key start
LH: loop header
LB: loop body
LE: loop exit
PB: predicated region body
PF: predicated region fallthrough
CT: control target
= control target key end

     0   :  { %s2092_s0 = inlined_call_operand.vmem [shape: bf16[16,320], index: 0, kind: input, shape index: {}]   ;;  %s2093_s1 = inlined_call_operand.vmem [shape: bf16[16,320], index: 1, kind: input, shape index: {}]   ;;  %s2094_s2 = inlined_call_operand.vmem [shape: bf16[320,512], index: 2, kind: input, shape index: {}]   ;;  %s2095_s3 = inlined_call_operand.vmem [shape: f32[2], index: 3, kind: output, shape index: {}]  }
   0x1   :  { %v1442_v0 = vld [vmem:[%s2094_s2 + $0x4] ss:$16 sps:$4 sm:$0xff]   ;;  %v1447_v1 = vld [vmem:[%s2094_s2 + $0xc] ss:$16 sps:$4 sm:$0xff]   ;;  %v1453_v2 = vld [vmem:[%s2094_s2] ss:$16 sps:$4 sm:$0xff]  }
   0x2   :  { %531 = vmatprep.subr.bf16.mxu0 %v1442_v0  ;;  %v1458_v3 = vld [vmem:[%s2094_s2 + $0x8] ss:$16 sps:$4 sm:$0xff]   ;;  %617 = vmatprep.subr.bf16.mxu1 %v1447_v1  ;;  %v1464_v4 = vld [vmem:[%s2094_s2 + $0x24] ss:$16 sps:$4 sm:$0xff]   ;;  %v1471_v5 = vld [vmem:[%s2094_s2 + $0x2c] ss:$16 sps:$4 sm:$0xff]  }
   0x3   :  { %532 = vmatpush1.bf16.msra.mxu0 %v1453_v2  ;;  %618 = vmatpush1.bf16.msra.mxu1 %v1458_v3  ;;  %v1476_v6 = vld [vmem:[%s2094_s2 + $0x20] ss:$16 sps:$4 sm:$0xff]   ;;  %v1482_v7 = vld [vmem:[%s2094_s2 + $0x28] ss:$16 sps:$4 sm:$0xff]   ;;  %v1488_v8 = vld [vmem:[%s2094_s2 + $0x44] ss:$16 sps:$4 sm:$0xff]  }
   0x4   :  { %533 = vmatprep.subr.bf16.mxu0 %v1464_v4  ;;  %619 = vmatprep.subr.bf16.mxu1 %v1471_v5  ;;  %v1493_v9 = vld [vmem:[%s2094_s2 + $0x4c] ss:$16 sps:$4 sm:$0xff]   ;;  %v1498_v10 = vld [vmem:[%s2094_s2 + $0x40] ss:$16 sps:$4 sm:$0xff]   ;;  %v1503_v11 = vld [vmem:[%s2094_s2 + $0x48] ss:$16 sps:$4 sm:$0xff]  }
   0x5   :  { %v1510_v12 = vld [vmem:[%s2094_s2 + $0x64] ss:$16 sps:$4 sm:$0xff]   ;;  %v1517_v13 = vld [vmem:[%s2094_s2 + $0x6c] ss:$16 sps:$4 sm:$0xff]   ;;  %v1522_v14 = vld [vmem:[%s2094_s2 + $0x60] ss:$16 sps:$4 sm:$0xff]  }
   0x6   :  { %v1529_v15 = vld [vmem:[%s2094_s2 + $0x68] ss:$16 sps:$4 sm:$0xff]   ;;  %v1534_v16 = vld [vmem:[%s2094_s2 + $0x84] ss:$16 sps:$4 sm:$0xff]   ;;  %v1541_v17 = vld [vmem:[%s2094_s2 + $0x8c] ss:$16 sps:$4 sm:$0xff]  }
   0x7   :  { %534 = vmatpush1.bf16.msra.mxu0 %v1476_v6  ;;  %620 = vmatpush1.bf16.msra.mxu1 %v1482_v7  ;;  %v1546_v18 = vld [vmem:[%s2094_s2 + $0x80] ss:$16 sps:$4 sm:$0xff]   ;;  %v1551_v19 = vld [vmem:[%s2094_s2 + $0x88] ss:$16 sps:$4 sm:$0xff]   ;;  %v1558_v20 = vld [vmem:[%s2094_s2 + $0xa4] ss:$16 sps:$4 sm:$0xff]  }
   0x8   :  { %535 = vmatprep.subr.bf16.mxu0 %v1488_v8  ;;  %621 = vmatprep.subr.bf16.mxu1 %v1493_v9  ;;  %v1565_v21 = vld [vmem:[%s2094_s2 + $0xac] ss:$16 sps:$4 sm:$0xff]   ;;  %v1570_v22 = vld [vmem:[%s2094_s2 + $0xa0] ss:$16 sps:$4 sm:$0xff]   ;;  %v1577_v23 = vld [vmem:[%s2094_s2 + $0xa8] ss:$16 sps:$4 sm:$0xff]  }
   0x9   :  { %v1582_v24 = vld [vmem:[%s2094_s2 + $0xc4] ss:$16 sps:$4 sm:$0xff]   ;;  %v1589_v25 = vld [vmem:[%s2094_s2 + $0xcc] ss:$16 sps:$4 sm:$0xff]   ;;  %v1594_v26 = vld [vmem:[%s2094_s2 + $0xc0] ss:$16 sps:$4 sm:$0xff]  }
   0xa   :  { %v1599_v27 = vld [vmem:[%s2094_s2 + $0xc8] ss:$16 sps:$4 sm:$0xff]   ;;  %v1606_v28 = vld [vmem:[%s2094_s2 + $0xe4] ss:$16 sps:$4 sm:$0xff]   ;;  %v1613_v29 = vld [vmem:[%s2094_s2 + $0xec] ss:$16 sps:$4 sm:$0xff]  }
   0xb   :  { %536 = vmatpush1.bf16.msra.mxu0 %v1498_v10  ;;  %622 = vmatpush1.bf16.msra.mxu1 %v1503_v11  ;;  %v1618_v30 = vld [vmem:[%s2094_s2 + $0xe0] ss:$16 sps:$4 sm:$0xff]   ;;  %v1625_v31 = vld [vmem:[%s2094_s2 + $0xe8] ss:$16 sps:$4 sm:$0xff]   ;;  %v1630_v32 = vld [vmem:[%s2094_s2 + $0x104] ss:$16 sps:$4 sm:$0xff]  }
   0xc   :  { %537 = vmatprep.subr.bf16.mxu0 %v1510_v12  ;;  %623 = vmatprep.subr.bf16.mxu1 %v1517_v13  ;;  %v1637_v33 = vld [vmem:[%s2094_s2 + $0x10c] ss:$16 sps:$4 sm:$0xff]   ;;  %v1642_v34 = vld [vmem:[%s2094_s2 + $0x100] ss:$16 sps:$4 sm:$0xff]   ;;  %v1647_v35 = vld [vmem:[%s2094_s2 + $0x108] ss:$16 sps:$4 sm:$0xff]  }
   0xd   :  { %v1654_v36 = vld [vmem:[%s2094_s2 + $0x124] ss:$16 sps:$4 sm:$0xff]   ;;  %v1661_v37 = vld [vmem:[%s2094_s2 + $0x12c] ss:$16 sps:$4 sm:$0xff]   ;;  %v1666_v38 = vld [vmem:[%s2094_s2 + $0x120] ss:$16 sps:$4 sm:$0xff]  }
   0xe   :  { %v1673_v39 = vld [vmem:[%s2094_s2 + $0x128] ss:$16 sps:$4 sm:$0xff]   ;;  %v1678_v40 = vld [vmem:[%s2094_s2 + $0x144] ss:$16 sps:$4 sm:$0xff]   ;;  %v1685_v41 = vld [vmem:[%s2094_s2 + $0x14c] ss:$16 sps:$4 sm:$0xff]  }
   0xf   :  { %538 = vmatpush1.bf16.msra.mxu0 %v1522_v14  ;;  %624 = vmatpush1.bf16.msra.mxu1 %v1529_v15  ;;  %v1690_v42 = vld [vmem:[%s2094_s2 + $0x140] ss:$16 sps:$4 sm:$0xff]   ;;  %v1695_v43 = vld [vmem:[%s2094_s2 + $0x148] ss:$16 sps:$4 sm:$0xff]   ;;  %v1702_v44 = vld [vmem:[%s2094_s2 + $0x164] ss:$16 sps:$4 sm:$0xff]  }
  0x10   :  { %539 = vmatprep.subr.bf16.mxu0 %v1534_v16  ;;  %625 = vmatprep.subr.bf16.mxu1 %v1541_v17  ;;  %v1709_v45 = vld [vmem:[%s2094_s2 + $0x16c] ss:$16 sps:$4 sm:$0xff]   ;;  %v1714_v46 = vld [vmem:[%s2094_s2 + $0x160] ss:$16 sps:$4 sm:$0xff]   ;;  %v1719_v47 = vld [vmem:[%s2094_s2 + $0x168] ss:$16 sps:$4 sm:$0xff]  }
  0x11   :  { %v1325_v48 = vld [vmem:[%s2092_s0 + $0x4] ss:$12 sps:$4 sm:$0xff]   ;;  %v1736_v50 = vld [vmem:[%s2094_s2 + $0x18c] ss:$16 sps:$4 sm:$0xff]   ;;  %v1746_v52 = vld [vmem:[%s2094_s2 + $0x188] ss:$16 sps:$4 sm:$0xff]  }
  0x12   :  { %v1729_v49 = vld [vmem:[%s2094_s2 + $0x184] ss:$16 sps:$4 sm:$0xff]   ;;  %563 = vmatprep.mubr.bf16.mxu0 %v1325_v48  ;;  %649 = vmatprep.mubr.bf16.mxu1 %v1325_v48  ;;  %v1741_v51 = vld [vmem:[%s2094_s2 + $0x180] ss:$16 sps:$4 sm:$0xff]   ;;  %v1760_v54 = vld [vmem:[%s2094_s2 + $0x1ac] ss:$16 sps:$4 sm:$0xff]  }
  0x13   :  { %540 = vmatpush1.bf16.msra.mxu0 %v1546_v18  ;;  %626 = vmatpush1.bf16.msra.mxu1 %v1551_v19  ;;  %v1753_v53 = vld [vmem:[%s2094_s2 + $0x1a4] ss:$16 sps:$4 sm:$0xff]   ;;  %v1765_v55 = vld [vmem:[%s2094_s2 + $0x1a0] ss:$16 sps:$4 sm:$0xff]   ;;  %v1770_v56 = vld [vmem:[%s2094_s2 + $0x1a8] ss:$16 sps:$4 sm:$0xff]  }
  0x14   :  { %541 = vmatprep.subr.bf16.mxu0 %v1558_v20  ;;  %627 = vmatprep.subr.bf16.mxu1 %v1565_v21  ;;  %v1777_v57 = vld [vmem:[%s2094_s2 + $0x1c4] ss:$16 sps:$4 sm:$0xff]   ;;  %v1784_v58 = vld [vmem:[%s2094_s2 + $0x1cc] ss:$16 sps:$4 sm:$0xff]   ;;  %v1789_v59 = vld [vmem:[%s2094_s2 + $0x1c0] ss:$16 sps:$4 sm:$0xff]  }
  0x15   :  { %2116 = vst [vmem:[#allocation7_spill] sm:$0xff] %v1784_v58  ;;  %2117 = vst [vmem:[#allocation8_spill] sm:$0xff] %v1789_v59  ;;  %v1796_v60 = vld [vmem:[%s2094_s2 + $0x1c8] ss:$16 sps:$4 sm:$0xff]   ;;  %v1801_v61 = vld [vmem:[%s2094_s2 + $0x1e4] ss:$16 sps:$4 sm:$0xff]  }
  0x16   :  { %2118 = vst [vmem:[#allocation9_spill] sm:$0xff] %v1796_v60  ;;  %2119 = vst [vmem:[#allocation10_spill] sm:$0xff] %v1801_v61  ;;  %v1808_v62 = vld [vmem:[%s2094_s2 + $0x1ec] ss:$16 sps:$4 sm:$0xff]  }
  0x17   :  { %542 = vmatpush1.bf16.msra.mxu0 %v1570_v22  ;;  %628 = vmatpush1.bf16.msra.mxu1 %v1577_v23  ;;  %2120 = vst [vmem:[#allocation11_spill] sm:$0xff] %v1808_v62 }
  0x18   :  { %543 = vmatprep.subr.bf16.mxu0 %v1582_v24  ;;  %629 = vmatprep.subr.bf16.mxu1 %v1589_v25 }
  0x1b   :  { %544 = vmatpush1.bf16.msra.mxu0 %v1594_v26  ;;  %630 = vmatpush1.bf16.msra.mxu1 %v1599_v27 }
  0x1c   :  { %545 = vmatprep.subr.bf16.mxu0 %v1606_v28  ;;  %631 = vmatprep.subr.bf16.mxu1 %v1613_v29 }
  0x1f   :  { %546 = vmatpush1.bf16.msra.mxu0 %v1618_v30  ;;  %632 = vmatpush1.bf16.msra.mxu1 %v1625_v31 }
  0x20   :  { %547 = vmatprep.subr.bf16.mxu0 %v1630_v32  ;;  %633 = vmatprep.subr.bf16.mxu1 %v1637_v33 }
  0x23   :  { %548 = vmatpush1.bf16.msra.mxu0 %v1642_v34  ;;  %634 = vmatpush1.bf16.msra.mxu1 %v1647_v35 }
  0x24   :  { %549 = vmatprep.subr.bf16.mxu0 %v1654_v36  ;;  %635 = vmatprep.subr.bf16.mxu1 %v1661_v37 }
  0x27   :  { %550 = vmatpush1.bf16.msra.mxu0 %v1666_v38  ;;  %636 = vmatpush1.bf16.msra.mxu1 %v1673_v39 }
  0x28   :  { %551 = vmatprep.subr.bf16.mxu0 %v1678_v40  ;;  %637 = vmatprep.subr.bf16.mxu1 %v1685_v41 }
  0x2b   :  { %552 = vmatpush1.bf16.msra.mxu0 %v1690_v42  ;;  %638 = vmatpush1.bf16.msra.mxu1 %v1695_v43 }
  0x2c   :  { %553 = vmatprep.subr.bf16.mxu0 %v1702_v44  ;;  %639 = vmatprep.subr.bf16.mxu1 %v1709_v45 }
  0x2f   :  { %554 = vmatpush1.bf16.msra.mxu0 %v1714_v46  ;;  %640 = vmatpush1.bf16.msra.mxu1 %v1719_v47 }
  0x30   :  { %555 = vmatprep.subr.bf16.mxu0 %v1729_v49  ;;  %641 = vmatprep.subr.bf16.mxu1 %v1736_v50 }
  0x33   :  { %556 = vmatpush1.bf16.msra.mxu0 %v1741_v51  ;;  %642 = vmatpush1.bf16.msra.mxu1 %v1746_v52 }
  0x34   :  { %557 = vmatprep.subr.bf16.mxu0 %v1753_v53  ;;  %643 = vmatprep.subr.bf16.mxu1 %v1760_v54 }
  0x37   :  { %558 = vmatpush1.bf16.msra.mxu0 %v1765_v55  ;;  %644 = vmatpush1.bf16.msra.mxu1 %v1770_v56 }
  0x38   :  { %559 = vmatprep.subr.bf16.mxu0 %v1777_v57  ;;  %645 = vmatprep.subr.bf16.mxu1 %v1784_v58 }
  0x39   :  { %8 = vsyncpa [#allocation5], 0  ;;  %v1815_v63 = vld [vmem:[%s2094_s2 + $0x1e0] ss:$16 sps:$4 sm:$0xff]   ;;  %v1820_v48 = vld [vmem:[%s2094_s2 + $0x1e8] ss:$16 sps:$4 sm:$0xff]  }
  0x3a   :  { %2121 = vst [vmem:[#allocation12_spill] sm:$0xff] %v1815_v63  ;;  %2122 = vst [vmem:[#allocation13_spill] sm:$0xff] %v1820_v48  ;;  %v1323_v58 = vld [vmem:[%s2092_s0] ss:$12 sps:$4 sm:$0xff]   ;;  %vm527_vm0 = vcmask 523264   ;;  %s1106_s22 = sshll.u32 %s2095_s3, 4  ;;  %s1107_s22 = int_to_ptr.vmem [resolvable:$true] %s1106_s22 }
  0x3b   :  { %560 = vmatpush1.bf16.msra.mxu0 %v1789_v59  ;;  %646 = vmatpush1.bf16.msra.mxu1 %v1796_v60  ;;  %v1827_v59 = vld [vmem:[%s2094_s2 + $0x204] ss:$16 sps:$4 sm:$0xff]   ;;  %v1832_v60 = vld [vmem:[%s2094_s2 + $0x20c] ss:$16 sps:$4 sm:$0xff]   ;;  %s1403_s24 = scalar_lea.vmem %s1107_s22, 16  ;;  %p1408_p1 = scmp.lt.s32.totalorder %s1107_s22, %s1107_s22 }
  0x3c   :  { %561 = vmatprep.subr.bf16.mxu0 %v1801_v61  ;;  %647 = vmatprep.subr.bf16.mxu1 %v1808_v62  ;;  %2123 = vst [vmem:[#allocation14_spill] sm:$0xff] %v1827_v59  ;;  %2124 = vst [vmem:[#allocation15_spill] sm:$0xff] %v1832_v60  ;;  %v1842_v62 = vld [vmem:[%s2094_s2 + $0x200] ss:$16 sps:$4 sm:$0xff]   ;;  %v1847_v61 = vld [vmem:[%s2094_s2 + $0x208] ss:$16 sps:$4 sm:$0xff]   ;;  %p1404_p0 = scmp.ne.s32.totalorder %s1107_s22, %s1403_s24  ;;  %p1409_p2 = scmp.lt.s32.totalorder %s1403_s24, %s1403_s24 }
  0x3d   :  { %2125 = vst [vmem:[#allocation16_spill] sm:$0xff] %v1842_v62  ;;  %2126 = vst [vmem:[#allocation17_spill] sm:$0xff] %v1847_v61 }
  0x3e   :  { %p1410_p3 = por %p1409_p2, %p1408_p1 }
  0x3f   :  { %562 = vmatpush1.bf16.msra.mxu0 %v1815_v63  ;;  %648 = vmatpush1.bf16.msra.mxu1 %v1820_v48  ;;  %v1854_v63 = vld [vmem:[%s2094_s2 + $0x224] ss:$16 sps:$4 sm:$0xff]   ;;  %v1859_v48 = vld [vmem:[%s2094_s2 + $0x22c] ss:$16 sps:$4 sm:$0xff]  }
  0x40   :  { %574 = vmatprep.subr.bf16.mxu0 %v1827_v59  ;;  %660 = vmatprep.subr.bf16.mxu1 %v1832_v60  ;;  %2127 = vst [vmem:[#allocation18_spill] sm:$0xff] %v1854_v63  ;;  %2128 = vst [vmem:[#allocation19_spill] sm:$0xff] %v1859_v48  ;;  %v1866_v60 = vld [vmem:[%s2094_s2 + $0x220] ss:$16 sps:$4 sm:$0xff]   ;;  %v1871_v59 = vld [vmem:[%s2094_s2 + $0x228] ss:$16 sps:$4 sm:$0xff]   ;;  %p1411_p4 = pnand %p1410_p3, %p1404_p0 }
  0x41   :  { %2129 = vst [vmem:[#allocation20_spill] sm:$0xff] %v1871_v59 }
  0x42   :  { %564 = vmatmul.mubr.bf16.vlgmr.msra.gmra.mrb[0].mxu0 %v1323_v58  ;;  %650 = vmatmul.mubr.bf16.vlgmr.msra.gmra.mrb[0].mxu1 %v1323_v58  ;;  %v1878_v58 = vld [vmem:[%s2094_s2 + $0x244] ss:$16 sps:$4 sm:$0xff]  }
  0x43   :  { %575 = vmatpush1.bf16.msra.mxu0 %v1842_v62  ;;  %661 = vmatpush1.bf16.msra.mxu1 %v1847_v61  ;;  %2130 = vst [vmem:[#allocation21_spill] sm:$0xff] %v1878_v58  ;;  %v1883_v61 = vld [vmem:[%s2094_s2 + $0x24c] ss:$16 sps:$4 sm:$0xff]   ;;  %v2109_v62 = vmov 0  }
  0x44   :  { %576 = vmatprep.subr.bf16.mxu0 %v1854_v63  ;;  %662 = vmatprep.subr.bf16.mxu1 %v1859_v48  ;;  %2131 = vst [vmem:[#allocation22_spill] sm:$0xff] %v1883_v61  ;;  %v1892_v48 = vld [vmem:[%s2094_s2 + $0x240] ss:$16 sps:$4 sm:$0xff]   ;;  %v1897_v63 = vld [vmem:[%s2094_s2 + $0x248] ss:$16 sps:$4 sm:$0xff]  }
  0x45   :  { %606 = vmatprep.mubr.bf16.mxu0 %v2109_v62  ;;  %692 = vmatprep.mubr.bf16.mxu1 %v2109_v62  ;;  %2132 = vst [vmem:[#allocation23_spill] sm:$0xff] %v1892_v48  ;;  %2133 = vst [vmem:[#allocation24_spill] sm:$0xff] %v1897_v63  ;;  %v1904_v62 = vld [vmem:[%s2094_s2 + $0x264] ss:$16 sps:$4 sm:$0xff]  }
  0x47   :  { %577 = vmatpush1.bf16.msra.mxu0 %v1866_v60  ;;  %663 = vmatpush1.bf16.msra.mxu1 %v1871_v59  ;;  %v1909_v59 = vld [vmem:[%s2094_s2 + $0x26c] ss:$16 sps:$4 sm:$0xff]  }
  0x48   :  { %578 = vmatprep.subr.bf16.mxu0 %v1878_v58  ;;  %664 = vmatprep.subr.bf16.mxu1 %v1883_v61  ;;  %v1916_v58 = vld [vmem:[%s2094_s2 + $0x260] ss:$16 sps:$4 sm:$0xff]   ;;  %v1921_v61 = vld [vmem:[%s2094_s2 + $0x268] ss:$16 sps:$4 sm:$0xff]  }
  0x4b   :  { %579 = vmatpush1.bf16.msra.mxu0 %v1892_v48  ;;  %665 = vmatpush1.bf16.msra.mxu1 %v1897_v63  ;;  %v1350_v48 = vld [vmem:[%s2092_s0 + $0x8] ss:$12 sps:$4 sm:$0xff]   ;;  %v1353_v63 = vld [vmem:[%s2093_s1 + $0x4] ss:$12 sps:$4 sm:$0xff]  }
  0x4c   :  { %580 = vmatprep.subr.bf16.mxu0 %v1904_v62  ;;  %666 = vmatprep.subr.bf16.mxu1 %v1909_v59 }
  0x4f   :  { %581 = vmatpush1.bf16.msra.mxu0 %v1916_v58  ;;  %667 = vmatpush1.bf16.msra.mxu1 %v1921_v61 }
  0x50   :  { %725 = vmatprep.subr.bf16.mxu0 %v1442_v0  ;;  %811 = vmatprep.subr.bf16.mxu1 %v1447_v1  ;;  %v2134_v0 = vld [vmem:[#allocation7_spill] sm:$0xff]  ;;  %v2135_v1 = vld [vmem:[#allocation8_spill] sm:$0xff] }
  0x52   :  { %1198 = vmatmul.mubr.msk.bf16.vlgmr.msra.gmra.mrb[0].mxu0 %vm527_vm0, %v1350_v48  ;;  %1199 = vmatmul.mubr.msk.bf16.vlgmr.msra.gmra.mrb[0].mxu1 %vm527_vm0, %v1350_v48 }
  0x53   :  { %726 = vmatpush1.bf16.msra.mxu0 %v1453_v2  ;;  %812 = vmatpush1.bf16.msra.mxu1 %v1458_v3  ;;  %v2136_v2 = vld [vmem:[#allocation9_spill] sm:$0xff]  ;;  %v2137_v3 = vld [vmem:[#allocation10_spill] sm:$0xff] }
  0x54   :  { %727 = vmatprep.subr.bf16.mxu0 %v1464_v4  ;;  %813 = vmatprep.subr.bf16.mxu1 %v1471_v5  ;;  %v2138_v4 = vld [vmem:[#allocation11_spill] sm:$0xff] }
  0x55   :  { %757 = vmatprep.mubr.bf16.mxu0 %v1353_v63  ;;  %843 = vmatprep.mubr.bf16.mxu1 %v1353_v63  ;;  %v1351_v5 = vld [vmem:[%s2093_s1] ss:$12 sps:$4 sm:$0xff]  }
  0x57   :  { %728 = vmatpush1.bf16.msra.mxu0 %v1476_v6  ;;  %814 = vmatpush1.bf16.msra.mxu1 %v1482_v7  ;;  %v2139_v6 = vld [vmem:[#allocation12_spill] sm:$0xff]  ;;  %v2140_v7 = vld [vmem:[#allocation13_spill] sm:$0xff] }
  0x58   :  { %729 = vmatprep.subr.bf16.mxu0 %v1488_v8  ;;  %815 = vmatprep.subr.bf16.mxu1 %v1493_v9  ;;  %v2141_v8 = vld [vmem:[#allocation14_spill] sm:$0xff]  ;;  %v2142_v9 = vld [vmem:[#allocation15_spill] sm:$0xff] }
  0x5b   :  { %730 = vmatpush1.bf16.msra.mxu0 %v1498_v10  ;;  %816 = vmatpush1.bf16.msra.mxu1 %v1503_v11  ;;  %v2143_v10 = vld [vmem:[#allocation16_spill] sm:$0xff]  ;;  %v2144_v11 = vld [vmem:[#allocation17_spill] sm:$0xff] }
  0x5c   :  { %731 = vmatprep.subr.bf16.mxu0 %v1510_v12  ;;  %817 = vmatprep.subr.bf16.mxu1 %v1517_v13  ;;  %v2145_v12 = vld [vmem:[#allocation18_spill] sm:$0xff]  ;;  %v2146_v13 = vld [vmem:[#allocation19_spill] sm:$0xff] }
  0x5f   :  { %732 = vmatpush1.bf16.msra.mxu0 %v1522_v14  ;;  %818 = vmatpush1.bf16.msra.mxu1 %v1529_v15  ;;  %v2147_v14 = vmov 0   ;;  %v2148_v15 = vld [vmem:[#allocation20_spill] sm:$0xff] }
  0x60   :  { %733 = vmatprep.subr.bf16.mxu0 %v1534_v16  ;;  %819 = vmatprep.subr.bf16.mxu1 %v1541_v17  ;;  %v2149_v16 = vld [vmem:[#allocation21_spill] sm:$0xff]  ;;  %v2150_v17 = vld [vmem:[#allocation22_spill] sm:$0xff] }
  0x63   :  { %734 = vmatpush1.bf16.msra.mxu0 %v1546_v18  ;;  %820 = vmatpush1.bf16.msra.mxu1 %v1551_v19  ;;  %v2151_v18 = vld [vmem:[#allocation23_spill] sm:$0xff]  ;;  %v2152_v19 = vld [vmem:[#allocation24_spill] sm:$0xff] }
  0x64   :  { %735 = vmatprep.subr.bf16.mxu0 %v1558_v20  ;;  %821 = vmatprep.subr.bf16.mxu1 %v1565_v21  ;;  %v1354_v20 = vld [vmem:[%s2093_s1 + $0x8] ss:$12 sps:$4 sm:$0xff]  }
  0x67   :  { %736 = vmatpush1.bf16.msra.mxu0 %v1570_v22  ;;  %822 = vmatpush1.bf16.msra.mxu1 %v1577_v23 }
  0x68   :  { %737 = vmatprep.subr.bf16.mxu0 %v1582_v24  ;;  %823 = vmatprep.subr.bf16.mxu1 %v1589_v25 }
  0x6b   :  { %738 = vmatpush1.bf16.msra.mxu0 %v1594_v26  ;;  %824 = vmatpush1.bf16.msra.mxu1 %v1599_v27 }
  0x6c   :  { %739 = vmatprep.subr.bf16.mxu0 %v1606_v28  ;;  %825 = vmatprep.subr.bf16.mxu1 %v1613_v29 }
  0x6f   :  { %740 = vmatpush1.bf16.msra.mxu0 %v1618_v30  ;;  %826 = vmatpush1.bf16.msra.mxu1 %v1625_v31 }
  0x70   :  { %741 = vmatprep.subr.bf16.mxu0 %v1630_v32  ;;  %827 = vmatprep.subr.bf16.mxu1 %v1637_v33 }
  0x73   :  { %742 = vmatpush1.bf16.msra.mxu0 %v1642_v34  ;;  %828 = vmatpush1.bf16.msra.mxu1 %v1647_v35 }
  0x74   :  { %743 = vmatprep.subr.bf16.mxu0 %v1654_v36  ;;  %829 = vmatprep.subr.bf16.mxu1 %v1661_v37 }
  0x77   :  { %744 = vmatpush1.bf16.msra.mxu0 %v1666_v38  ;;  %830 = vmatpush1.bf16.msra.mxu1 %v1673_v39 }
  0x78   :  { %745 = vmatprep.subr.bf16.mxu0 %v1678_v40  ;;  %831 = vmatprep.subr.bf16.mxu1 %v1685_v41 }
  0x7b   :  { %746 = vmatpush1.bf16.msra.mxu0 %v1690_v42  ;;  %832 = vmatpush1.bf16.msra.mxu1 %v1695_v43 }
  0x7c   :  { %747 = vmatprep.subr.bf16.mxu0 %v1702_v44  ;;  %833 = vmatprep.subr.bf16.mxu1 %v1709_v45 }
  0x7f   :  { %748 = vmatpush1.bf16.msra.mxu0 %v1714_v46  ;;  %834 = vmatpush1.bf16.msra.mxu1 %v1719_v47 }
  0x80   :  { %749 = vmatprep.subr.bf16.mxu0 %v1729_v49  ;;  %835 = vmatprep.subr.bf16.mxu1 %v1736_v50 }
  0x83   :  { %750 = vmatpush1.bf16.msra.mxu0 %v1741_v51  ;;  %836 = vmatpush1.bf16.msra.mxu1 %v1746_v52 }
  0x84   :  { %751 = vmatprep.subr.bf16.mxu0 %v1753_v53  ;;  %837 = vmatprep.subr.bf16.mxu1 %v1760_v54 }
  0x87   :  { %752 = vmatpush1.bf16.msra.mxu0 %v1765_v55  ;;  %838 = vmatpush1.bf16.msra.mxu1 %v1770_v56 }
  0x88   :  { %753 = vmatprep.subr.bf16.mxu0 %v1777_v57  ;;  %839 = vmatprep.subr.bf16.mxu1 %v2134_v0 }
  0x8b   :  { %754 = vmatpush1.bf16.msra.mxu0 %v2135_v1  ;;  %840 = vmatpush1.bf16.msra.mxu1 %v2136_v2 }
  0x8c   :  { %755 = vmatprep.subr.bf16.mxu0 %v2137_v3  ;;  %841 = vmatprep.subr.bf16.mxu1 %v2138_v4 }
  0x8f   :  { %756 = vmatpush1.bf16.msra.mxu0 %v2139_v6  ;;  %842 = vmatpush1.bf16.msra.mxu1 %v2140_v7 }
  0x90   :  { %768 = vmatprep.subr.bf16.mxu0 %v2141_v8  ;;  %854 = vmatprep.subr.bf16.mxu1 %v2142_v9 }
  0x92   :  { %758 = vmatmul.mubr.bf16.vlgmr.msra.gmra.mrb[4].mxu0 %v1351_v5  ;;  %844 = vmatmul.mubr.bf16.vlgmr.msra.gmra.mrb[4].mxu1 %v1351_v5 }
  0x93   :  { %769 = vmatpush1.bf16.msra.mxu0 %v2143_v10  ;;  %855 = vmatpush1.bf16.msra.mxu1 %v2144_v11 }
  0x94   :  { %770 = vmatprep.subr.bf16.mxu0 %v2145_v12  ;;  %856 = vmatprep.subr.bf16.mxu1 %v2146_v13 }
  0x95   :  { %800 = vmatprep.mubr.bf16.mxu0 %v2147_v14  ;;  %886 = vmatprep.mubr.bf16.mxu1 %v2147_v14 }
  0x97   :  { %771 = vmatpush1.bf16.msra.mxu0 %v1866_v60  ;;  %857 = vmatpush1.bf16.msra.mxu1 %v2148_v15 }
  0x98   :  { %772 = vmatprep.subr.bf16.mxu0 %v2149_v16  ;;  %858 = vmatprep.subr.bf16.mxu1 %v2150_v17 }
  0x9b   :  { %773 = vmatpush1.bf16.msra.mxu0 %v2151_v18  ;;  %859 = vmatpush1.bf16.msra.mxu1 %v2152_v19 }
  0x9c   :  { %774 = vmatprep.subr.bf16.mxu0 %v1904_v62  ;;  %860 = vmatprep.subr.bf16.mxu1 %v1909_v59 }
  0x9f   :  { %775 = vmatpush1.bf16.msra.mxu0 %v1916_v58  ;;  %861 = vmatpush1.bf16.msra.mxu1 %v1921_v61 }
  0xa2   :  { %1203 = vmatmul.mubr.msk.bf16.vlgmr.msra.gmra.mrb[4].mxu0 %vm527_vm0, %v1354_v20  ;;  %1204 = vmatmul.mubr.msk.bf16.vlgmr.msra.gmra.mrb[4].mxu1 %vm527_vm0, %v1354_v20 }
 0x125   :  { %v608_v21 = vpop.f32.mrb[0].mxu0  ;;  %v694_v22 = vpop.f32.mrb[0].mxu1 }
 0x126   :  { %v897_v23 = vmul.f32 %v608_v21, %v608_v21  ;;  %v901_v24 = vmul.f32 %v694_v22, %v694_v22  ;;  %v610_v25 = vpop.f32.mrb[1].mxu0  ;;  %v696_v26 = vpop.f32.mrb[1].mxu1 }
 0x127   :  { %v898_v27 = vmul.f32 %v610_v25, %v610_v25  ;;  %v902_v28 = vmul.f32 %v696_v26, %v696_v26  ;;  %v612_v29 = vpop.f32.mrb[2].mxu0  ;;  %v698_v30 = vpop.f32.mrb[2].mxu1 }
 0x128   :  { %v905_v31 = vadd.f32 %v901_v24, %v897_v23  ;;  %v899_v32 = vmul.f32 %v612_v29, %v612_v29  ;;  %v903_v33 = vmul.f32 %v698_v30, %v698_v30  ;;  %v614_v34 = vpop.f32.mrb[3].mxu0  ;;  %v700_v35 = vpop.f32.mrb[3].mxu1 }
 0x129   :  { %v906_v36 = vadd.f32 %v902_v28, %v898_v27  ;;  %v900_v37 = vmul.f32 %v614_v34, %v614_v34  ;;  %v904_v38 = vmul.f32 %v700_v35, %v700_v35 }
 0x12a   :  { %v921_v39 = vmax.f32 %v905_v31, 1e-24  ;;  %v907_v40 = vadd.f32 %v903_v33, %v899_v32 }
 0x12b   :  { %v922_v41 = vmax.f32 %v906_v36, 1e-24  ;;  %v908_v42 = vadd.f32 %v904_v38, %v900_v37 }
 0x12c   :  { %1355 = vlog2.f32 %v921_v39  ;;  %v923_v43 = vmax.f32 %v907_v40, 1e-24 }
 0x12d   :  { %1357 = vlog2.f32 %v922_v41  ;;  %v924_v44 = vmax.f32 %v908_v42, 1e-24 }
 0x12e   :  { %1359 = vlog2.f32 %v923_v43 }
 0x12f   :  { %1361 = vlog2.f32 %v924_v44 }
 0x136   :  { %v1356_v45 = vpop.eup %1355 }
 0x137   :  { %v1358_v46 = vpop.eup %1357  ;;  %v926_v47 = vmul.f32 0.6931472, %v1356_v45 }
 0x138   :  { %v1360_v49 = vpop.eup %1359  ;;  %v928_v50 = vmul.f32 0.6931472, %v1358_v46 }
 0x139   :  { %v1362_v51 = vpop.eup %1361  ;;  %v977_v52 = vmul.f32 -0.35, %v926_v47  ;;  %v930_v53 = vmul.f32 0.6931472, %v1360_v49  ;;  %v945_v33 = vmul.f32 0.15, %v926_v47 }
 0x13a   :  { %v978_v54 = vmul.f32 -0.35, %v928_v50  ;;  %v932_v55 = vmul.f32 0.6931472, %v1362_v51 }
 0x13b   :  { %v981_v56 = vmul.f32 1.442695, %v977_v52  ;;  %v979_v59 = vmul.f32 -0.35, %v930_v53  ;;  %v949_v37 = vmul.f32 1.442695, %v945_v33 }
 0x13c   :  { %v983_v57 = vmul.f32 1.442695, %v978_v54  ;;  %v980_v60 = vmul.f32 -0.35, %v932_v55  ;;  %v948_v36 = vmul.f32 0.15, %v932_v55 }
 0x13d   :  { %1363 = vpow2.f32 %v981_v56  ;;  %v985_v61 = vmul.f32 1.442695, %v979_v59 }
 0x13e   :  { %1365 = vpow2.f32 %v983_v57  ;;  %v987_v62 = vmul.f32 1.442695, %v980_v60  ;;  %v955_v44 = vmul.f32 1.442695, %v948_v36 }
 0x13f   :  { %1367 = vpow2.f32 %v985_v61 }
 0x140   :  { %1369 = vpow2.f32 %v987_v62 }
 0x147   :  { %v1364_v63 = vpop.eup %1363 }
 0x148   :  { %v2025_v48 = vmul.f32 %v1364_v63, %v694_v22  ;;  %v2027_v58 = vmul.f32 %v1364_v63, %v608_v21  ;;  %v1366_v0 = vpop.eup %1365 }
 0x149   :  { %v2029_v1 = vmul.f32 %v1366_v0, %v696_v26  ;;  %v2031_v2 = vmul.f32 %v1366_v0, %v610_v25  ;;  %v1368_v3 = vpop.eup %1367 }
 0x14a   :  { %v2033_v4 = vmul.f32 %v1368_v3, %v698_v30  ;;  %v2035_v5 = vmul.f32 %v1368_v3, %v612_v29  ;;  %v1370_v6 = vpop.eup %1369 }
 0x14b   :  { %v2037_v7 = vmul.f32 %v1370_v6, %v700_v35  ;;  %v2039_v8 = vmul.f32 %v1370_v6, %v614_v34  ;;  %v946_v34 = vmul.f32 0.15, %v928_v50  ;;  %v947_v35 = vmul.f32 0.15, %v930_v53 }
 0x14d   :  { %v951_v39 = vmul.f32 1.442695, %v946_v34  ;;  %v953_v41 = vmul.f32 1.442695, %v947_v35 }
 0x175   :  { %v2041_v9 = vpop.f32.mrb[4].mxu0  ;;  %v2043_v10 = vpop.f32.mrb[4].mxu1 }
 0x176   :  { %v909_v11 = vmul.f32 %v2041_v9, %v2041_v9  ;;  %v913_v12 = vmul.f32 %v2043_v10, %v2043_v10  ;;  %v2049_v13 = vpop.f32.mrb[5].mxu0  ;;  %v2051_v14 = vpop.f32.mrb[5].mxu1 }
 0x177   :  { %v910_v15 = vmul.f32 %v2049_v13, %v2049_v13  ;;  %v914_v16 = vmul.f32 %v2051_v14, %v2051_v14  ;;  %v2057_v17 = vpop.f32.mrb[6].mxu0  ;;  %v2059_v18 = vpop.f32.mrb[6].mxu1 }
 0x178   :  { %v917_v19 = vadd.f32 %v913_v12, %v909_v11  ;;  %v911_v20 = vmul.f32 %v2057_v17, %v2057_v17  ;;  %v915_v21 = vmul.f32 %v2059_v18, %v2059_v18  ;;  %v2065_v22 = vpop.f32.mrb[7].mxu0  ;;  %v2067_v23 = vpop.f32.mrb[7].mxu1 }
 0x179   :  { %v918_v24 = vadd.f32 %v914_v16, %v910_v15  ;;  %v912_v25 = vmul.f32 %v2065_v22, %v2065_v22  ;;  %v916_v26 = vmul.f32 %v2067_v23, %v2067_v23 }
 0x17a   :  { %v933_v27 = vmax.f32 %v917_v19, 1e-24  ;;  %v919_v28 = vadd.f32 %v915_v21, %v911_v20 }
 0x17b   :  { %v934_v29 = vmax.f32 %v918_v24, 1e-24  ;;  %v920_v30 = vadd.f32 %v916_v26, %v912_v25 }
 0x17c   :  { %1371 = vlog2.f32 %v933_v27  ;;  %v935_v31 = vmax.f32 %v919_v28, 1e-24 }
 0x17d   :  { %1373 = vlog2.f32 %v934_v29  ;;  %v936_v32 = vmax.f32 %v920_v30, 1e-24 }
 0x17e   :  { %1375 = vlog2.f32 %v935_v31 }
 0x17f   :  { %1377 = vlog2.f32 %v936_v32 }
 0x180   :  { %1379 = vpow2.f32 %v949_v37 }
 0x181   :  { %1381 = vpow2.f32 %v951_v39 }
 0x182   :  { %1383 = vpow2.f32 %v953_v41 }
 0x183   :  { %1385 = vpow2.f32 %v955_v44 }
 0x186   :  { %v1372_v38 = vpop.eup %1371 }
 0x187   :  { %v1374_v40 = vpop.eup %1373  ;;  %v938_v42 = vmul.f32 0.6931472, %v1372_v38 }
 0x188   :  { %v1376_v43 = vpop.eup %1375  ;;  %v940_v45 = vmul.f32 0.6931472, %v1374_v40 }
 0x189   :  { %v1378_v46 = vpop.eup %1377  ;;  %v957_v49 = vmul.f32 0.15, %v938_v42  ;;  %v989_v51 = vmul.f32 -0.35, %v938_v42  ;;  %v942_v52 = vmul.f32 0.6931472, %v1376_v43 }
 0x18a   :  { %v958_v54 = vmul.f32 0.15, %v940_v45  ;;  %v990_v47 = vmul.f32 -0.35, %v940_v45  ;;  %v944_v50 = vmul.f32 0.6931472, %v1378_v46  ;;  %v1380_v11 = vpop.eup %1379 }
 0x18b   :  { %v961_v53 = vmul.f32 1.442695, %v957_v49  ;;  %v993_v55 = vmul.f32 1.442695, %v989_v51  ;;  %v959_v56 = vmul.f32 0.15, %v942_v52  ;;  %v1382_v12 = vpop.eup %1381 }
 0x18c   :  { %v963_v57 = vmul.f32 1.442695, %v958_v54  ;;  %v995_v59 = vmul.f32 1.442695, %v990_v47  ;;  %v991_v60 = vmul.f32 -0.35, %v942_v52  ;;  %v1384_v15 = vpop.eup %1383 }
 0x18d   :  { %1387 = vpow2.f32 %v961_v53  ;;  %v965_v61 = vmul.f32 1.442695, %v959_v56  ;;  %v960_v62 = vmul.f32 0.15, %v944_v50  ;;  %v992_v63 = vmul.f32 -0.35, %v944_v50  ;;  %v1386_v16 = vpop.eup %1385 }
 0x18e   :  { %1389 = vpow2.f32 %v993_v55  ;;  %v997_v0 = vmul.f32 1.442695, %v991_v60 }
 0x18f   :  { %1391 = vpow2.f32 %v963_v57  ;;  %v967_v3 = vmul.f32 1.442695, %v960_v62  ;;  %v999_v6 = vmul.f32 1.442695, %v992_v63 }
 0x190   :  { %1393 = vpow2.f32 %v995_v59 }
 0x191   :  { %1395 = vpow2.f32 %v965_v61 }
 0x192   :  { %1397 = vpow2.f32 %v997_v0 }
 0x193   :  { %1399 = vpow2.f32 %v967_v3 }
 0x194   :  { %1401 = vpow2.f32 %v999_v6 }
 0x197   :  { %v1388_v19 = vpop.eup %1387 }
 0x198   :  { %v1390_v20 = vpop.eup %1389  ;;  %v969_v21 = vsub.f32 %v1380_v11, %v1388_v19 }
 0x199   :  { %v1392_v24 = vpop.eup %1391  ;;  %v1005_v25 = vmul.f32 %v1390_v20, %v2041_v9  ;;  %v1017_v26 = vmul.f32 %v1390_v20, %v2043_v10 }
 0x19a   :  { %v1394_v27 = vpop.eup %1393  ;;  %v970_v28 = vsub.f32 %v1382_v12, %v1392_v24  ;;  %v973_v29 = vmul.f32 %v969_v21, %v969_v21 }
 0x19b   :  { %v1396_v30 = vpop.eup %1395  ;;  %v1009_v31 = vsub.f32 %v2027_v58, %v1005_v25  ;;  %v1021_v32 = vsub.f32 %v2025_v48, %v1017_v26  ;;  %v1006_v33 = vmul.f32 %v1394_v27, %v2049_v13  ;;  %v1018_v34 = vmul.f32 %v1394_v27, %v2051_v14 }
 0x19c   :  { %v1398_v35 = vpop.eup %1397  ;;  %v971_v36 = vsub.f32 %v1384_v15, %v1396_v30  ;;  %v974_v37 = vmul.f32 %v970_v28, %v970_v28 }
 0x19d   :  { %v1400_v38 = vpop.eup %1399  ;;  %v1041_v39 = vmul.f32 %v1009_v31, %v1009_v31  ;;  %v1049_v9 = vmul.f32 %v1021_v32, %v1021_v32  ;;  %v1010_v10 = vsub.f32 %v2031_v2, %v1006_v33  ;;  %v1022_v40 = vsub.f32 %v2029_v1, %v1018_v34 }
 0x19e   :  { %v1402_v41 = vpop.eup %1401  ;;  %v1019_v42 = vmul.f32 %v1398_v35, %v2059_v18  ;;  %v972_v58 = vsub.f32 %v1386_v16, %v1400_v38  ;;  %v975_v43 = vmul.f32 %v971_v36, %v971_v36  ;;  %v1068_v48 = vadd.f32 %v974_v37, %v973_v29 }
 0x19f   :  { %v1053_v44 = vadd.f32 %v1049_v9, %v1041_v39  ;;  %v1042_v13 = vmul.f32 %v1010_v10, %v1010_v10  ;;  %v1050_v45 = vmul.f32 %v1022_v40, %v1022_v40  ;;  %v1020_v14 = vmul.f32 %v1402_v41, %v2067_v23 }
 0x1a0   :  { %v1023_v46 = vsub.f32 %v2033_v4, %v1019_v42  ;;  %v976_v49 = vmul.f32 %v972_v58, %v972_v58  ;;  %v1069_v51 = vadd.f32 %v1068_v48, %v975_v43  ;;  %v1007_v52 = vmul.f32 %v1398_v35, %v2057_v17 }
 0x1a1   :  { %v1054_v2 = vadd.f32 %v1050_v45, %v1042_v13  ;;  %v1024_v1 = vsub.f32 %v2037_v7, %v1020_v14  ;;  %v1008_v54 = vmul.f32 %v1402_v41, %v2065_v22 }
 0x1a2   :  { %v1051_v18 = vmul.f32 %v1023_v46, %v1023_v46  ;;  %v1070_v47 = vadd.f32 %v1069_v51, %v976_v49  ;;  %v1011_v50 = vsub.f32 %v2035_v5, %v1007_v52 }
 0x1a3   :  { %v1052_v53 = vmul.f32 %v1024_v1, %v1024_v1  ;;  %v1012_v55 = vsub.f32 %v2039_v8, %v1008_v54  ;;  %v1086_v56 = vadd.f32 %v1054_v2, %v1053_v44 }
 0x1a4   :  { %1071 = vadd.xlane.f32.xlu0 %v1070_v47  ;;  %v1043_v23 = vmul.f32 %v1011_v50, %v1011_v50 }
 0x1a5   :  { %v1044_v4 = vmul.f32 %v1012_v55, %v1012_v55 }
 0x1a6   :  { %v1055_v57 = vadd.f32 %v1051_v18, %v1043_v23 }
 0x1a7   :  { %v1056_v59 = vadd.f32 %v1052_v53, %v1044_v4 }
 0x1a8   :  { %v1087_v60 = vadd.f32 %v1086_v56, %v1055_v57 }
 0x1aa   :  { %v1088_v17 = vadd.f32 %v1087_v60, %v1056_v59 }
 0x1ac   :  { %1089 = vadd.xlane.f32.xlu0 %v1088_v17 }
 0x231   :  { %v1072_v61 = vpop.xlane.xlu0 %1071 }
 0x232   :  { %v1073_v7 = vrot.slane %v1072_v61, 4 }
 0x234   :  { %v1074_v62 = vadd.f32 %v1073_v7, %v1072_v61 }
 0x236   :  { %v1075_v22 = vrot.slane %v1074_v62, 2 }
 0x238   :  { %v1076_v63 = vadd.f32 %v1075_v22, %v1074_v62 }
 0x239   :  { %v1090_v0 = vpop.xlane.xlu0 %1089 }
 0x23a   :  { %v1091_v3 = vrot.slane %v1090_v0, 4  ;;  %v1077_v5 = vrot.slane %v1076_v63, 1 }
 0x23c   :  { %v1092_v6 = vadd.f32 %v1091_v3, %v1090_v0  ;;  %v1078_v11 = vadd.f32 %v1077_v5, %v1076_v63 }
 0x23e   :  { %v1093_v8 = vrot.slane %v1092_v6, 2  ;;  %1221 = vpush %v1078_v11 }
 0x240   :  { %v1094_v12 = vadd.f32 %v1093_v8, %v1092_v6 }
 0x242   :  { %v1095_v15 = vrot.slane %v1094_v12, 1 }
 0x244   :  { %v1096_v16 = vadd.f32 %v1095_v15, %v1094_v12 }
 0x246   :  { %1223 = vpush %v1096_v16 }
 0x26f   :  { %s1222_s1 = spop %1221 }
 0x270   :  { %1081 = sst [smem:[#allocation4]] %s1222_s1 }
 0x277   :  { %s1224_s23 = spop %1223 }
 0x278   :  { %1099 = sst [smem:[#allocation4 + $0x1]] %s1224_s23 }
 0x279   :  { %1414 = shalt.err (!%p1411_p4)
}
 0x27a   :  { %s1418_s25 = smov [#allocation4]  }
 0x27b   :  { %1109 = dma.smem_to_vmem %s1418_s25, 16, %s1107_s22, [#allocation5]  }
 0x27c   :  { %1415 = dma.done.wait [#allocation5], 16  }
 0x27d   :  { %1416 = vsyncadd [#allocation5], 4294967280 }
 0x27e   :  { %1113 = sfence }
 0x27f   :  { %1114 = vsyncpa [#allocation5], 1 }

// kernel: combined_loss.9
= control target key start
LH: loop header
LB: loop body
LE: loop exit
PB: predicated region body
PF: predicated region fallthrough
CT: control target
= control target key end

     0   :  { %s5333_s0 = inlined_call_operand.vmem [shape: bf16[16,640], index: 0, kind: input, shape index: {}]   ;;  %s5334_s1 = inlined_call_operand.vmem [shape: bf16[16,640], index: 1, kind: input, shape index: {}]   ;;  %s5335_s2 = inlined_call_operand.vmem [shape: bf16[640,768], index: 2, kind: input, shape index: {}]   ;;  %s5336_s3 = inlined_call_operand.vmem [shape: f32[2], index: 3, kind: output, shape index: {}]  }
   0x1   :  { %v2922_v0 = vld [vmem:[%s5335_s2 + $0x4] ss:$24 sps:$4 sm:$0xff]   ;;  %v2926_v2 = vld [vmem:[%s5335_s2] ss:$24 sps:$4 sm:$0xff]   ;;  %v2928_v4 = vld [vmem:[%s5335_s2 + $0x34] ss:$24 sps:$4 sm:$0xff]  }
   0x2   :  { %v2924_v1 = vld [vmem:[%s5335_s2 + $0xc] ss:$24 sps:$4 sm:$0xff]   ;;  %1504 = vmatprep.subr.bf16.mxu0 %v2922_v0  ;;  %v2927_v3 = vld [vmem:[%s5335_s2 + $0x8] ss:$24 sps:$4 sm:$0xff]   ;;  %v2930_v5 = vld [vmem:[%s5335_s2 + $0x3c] ss:$24 sps:$4 sm:$0xff]  }
   0x3   :  { %1633 = vmatprep.subr.bf16.mxu1 %v2924_v1  ;;  %1505 = vmatpush1.bf16.msra.mxu0 %v2926_v2  ;;  %v2932_v6 = vld [vmem:[%s5335_s2 + $0x30] ss:$24 sps:$4 sm:$0xff]   ;;  %v2934_v8 = vld [vmem:[%s5335_s2 + $0x64] ss:$24 sps:$4 sm:$0xff]   ;;  %v2938_v10 = vld [vmem:[%s5335_s2 + $0x60] ss:$24 sps:$4 sm:$0xff]  }
   0x4   :  { %1634 = vmatpush1.bf16.msra.mxu1 %v2927_v3  ;;  %1506 = vmatprep.subr.bf16.mxu0 %v2928_v4  ;;  %v2933_v7 = vld [vmem:[%s5335_s2 + $0x38] ss:$24 sps:$4 sm:$0xff]   ;;  %v2936_v9 = vld [vmem:[%s5335_s2 + $0x6c] ss:$24 sps:$4 sm:$0xff]   ;;  %v2939_v11 = vld [vmem:[%s5335_s2 + $0x68] ss:$24 sps:$4 sm:$0xff]  }
   0x5   :  { %1635 = vmatprep.subr.bf16.mxu1 %v2930_v5  ;;  %v2940_v12 = vld [vmem:[%s5335_s2 + $0x94] ss:$24 sps:$4 sm:$0xff]   ;;  %v2944_v14 = vld [vmem:[%s5335_s2 + $0x90] ss:$24 sps:$4 sm:$0xff]   ;;  %v2946_v16 = vld [vmem:[%s5335_s2 + $0xc4] ss:$24 sps:$4 sm:$0xff]  }
   0x6   :  { %v2942_v13 = vld [vmem:[%s5335_s2 + $0x9c] ss:$24 sps:$4 sm:$0xff]   ;;  %v2945_v15 = vld [vmem:[%s5335_s2 + $0x98] ss:$24 sps:$4 sm:$0xff]   ;;  %v2948_v17 = vld [vmem:[%s5335_s2 + $0xcc] ss:$24 sps:$4 sm:$0xff]  }
   0x7   :  { %1507 = vmatpush1.bf16.msra.mxu0 %v2932_v6  ;;  %v2950_v18 = vld [vmem:[%s5335_s2 + $0xc0] ss:$24 sps:$4 sm:$0xff]   ;;  %v2952_v20 = vld [vmem:[%s5335_s2 + $0xf4] ss:$24 sps:$4 sm:$0xff]   ;;  %v2956_v22 = vld [vmem:[%s5335_s2 + $0xf0] ss:$24 sps:$4 sm:$0xff]  }
   0x8   :  { %1636 = vmatpush1.bf16.msra.mxu1 %v2933_v7  ;;  %1508 = vmatprep.subr.bf16.mxu0 %v2934_v8  ;;  %v2951_v19 = vld [vmem:[%s5335_s2 + $0xc8] ss:$24 sps:$4 sm:$0xff]   ;;  %v2954_v21 = vld [vmem:[%s5335_s2 + $0xfc] ss:$24 sps:$4 sm:$0xff]   ;;  %v2957_v23 = vld [vmem:[%s5335_s2 + $0xf8] ss:$24 sps:$4 sm:$0xff]  }
   0x9   :  { %1637 = vmatprep.subr.bf16.mxu1 %v2936_v9  ;;  %v2958_v24 = vld [vmem:[%s5335_s2 + $0x124] ss:$24 sps:$4 sm:$0xff]   ;;  %v2962_v26 = vld [vmem:[%s5335_s2 + $0x120] ss:$24 sps:$4 sm:$0xff]   ;;  %v2964_v28 = vld [vmem:[%s5335_s2 + $0x154] ss:$24 sps:$4 sm:$0xff]  }
   0xa   :  { %v2960_v25 = vld [vmem:[%s5335_s2 + $0x12c] ss:$24 sps:$4 sm:$0xff]   ;;  %v2963_v27 = vld [vmem:[%s5335_s2 + $0x128] ss:$24 sps:$4 sm:$0xff]   ;;  %v2966_v29 = vld [vmem:[%s5335_s2 + $0x15c] ss:$24 sps:$4 sm:$0xff]  }
   0xb   :  { %1509 = vmatpush1.bf16.msra.mxu0 %v2938_v10  ;;  %v2968_v30 = vld [vmem:[%s5335_s2 + $0x150] ss:$24 sps:$4 sm:$0xff]   ;;  %v2970_v32 = vld [vmem:[%s5335_s2 + $0x184] ss:$24 sps:$4 sm:$0xff]   ;;  %v2974_v34 = vld [vmem:[%s5335_s2 + $0x180] ss:$24 sps:$4 sm:$0xff]  }
   0xc   :  { %1638 = vmatpush1.bf16.msra.mxu1 %v2939_v11  ;;  %1510 = vmatprep.subr.bf16.mxu0 %v2940_v12  ;;  %v2969_v31 = vld [vmem:[%s5335_s2 + $0x158] ss:$24 sps:$4 sm:$0xff]   ;;  %v2972_v33 = vld [vmem:[%s5335_s2 + $0x18c] ss:$24 sps:$4 sm:$0xff]   ;;  %v2975_v35 = vld [vmem:[%s5335_s2 + $0x188] ss:$24 sps:$4 sm:$0xff]  }
   0xd   :  { %1639 = vmatprep.subr.bf16.mxu1 %v2942_v13  ;;  %v2976_v36 = vld [vmem:[%s5335_s2 + $0x1b4] ss:$24 sps:$4 sm:$0xff]   ;;  %v2980_v38 = vld [vmem:[%s5335_s2 + $0x1b0] ss:$24 sps:$4 sm:$0xff]   ;;  %v2982_v40 = vld [vmem:[%s5335_s2 + $0x1e4] ss:$24 sps:$4 sm:$0xff]  }
   0xe   :  { %v2978_v37 = vld [vmem:[%s5335_s2 + $0x1bc] ss:$24 sps:$4 sm:$0xff]   ;;  %v2981_v39 = vld [vmem:[%s5335_s2 + $0x1b8] ss:$24 sps:$4 sm:$0xff]   ;;  %v2984_v41 = vld [vmem:[%s5335_s2 + $0x1ec] ss:$24 sps:$4 sm:$0xff]  }
   0xf   :  { %1511 = vmatpush1.bf16.msra.mxu0 %v2944_v14  ;;  %v2986_v42 = vld [vmem:[%s5335_s2 + $0x1e0] ss:$24 sps:$4 sm:$0xff]   ;;  %v2988_v44 = vld [vmem:[%s5335_s2 + $0x214] ss:$24 sps:$4 sm:$0xff]   ;;  %v2992_v46 = vld [vmem:[%s5335_s2 + $0x210] ss:$24 sps:$4 sm:$0xff]  }
  0x10   :  { %1640 = vmatpush1.bf16.msra.mxu1 %v2945_v15  ;;  %1512 = vmatprep.subr.bf16.mxu0 %v2946_v16  ;;  %v2987_v43 = vld [vmem:[%s5335_s2 + $0x1e8] ss:$24 sps:$4 sm:$0xff]   ;;  %v2990_v45 = vld [vmem:[%s5335_s2 + $0x21c] ss:$24 sps:$4 sm:$0xff]   ;;  %v3647_v47 = vld [vmem:[%s5333_s0 + $0x4] ss:$20 sps:$4 sm:$0xff]  }
  0x11   :  { %1641 = vmatprep.subr.bf16.mxu1 %v2948_v17  ;;  %v2993_v48 = vld [vmem:[%s5335_s2 + $0x218] ss:$24 sps:$4 sm:$0xff]   ;;  %v3655_v49 = vld [vmem:[%s5335_s2 + $0x244] ss:$24 sps:$4 sm:$0xff]   ;;  %1536 = vmatprep.mubr.bf16.mxu0 %v3647_v47  ;;  %v2999_v52 = vld [vmem:[%s5335_s2 + $0x248] ss:$24 sps:$4 sm:$0xff]  }
  0x12   :  { %v2996_v50 = vld [vmem:[%s5335_s2 + $0x24c] ss:$24 sps:$4 sm:$0xff]   ;;  %1665 = vmatprep.mubr.bf16.mxu1 %v3647_v47  ;;  %v3665_v51 = vld [vmem:[%s5335_s2 + $0x240] ss:$24 sps:$4 sm:$0xff]   ;;  %v3002_v54 = vld [vmem:[%s5335_s2 + $0x27c] ss:$24 sps:$4 sm:$0xff]  }
  0x13   :  { %1513 = vmatpush1.bf16.msra.mxu0 %v2950_v18  ;;  %v3673_v53 = vld [vmem:[%s5335_s2 + $0x274] ss:$24 sps:$4 sm:$0xff]   ;;  %v3682_v55 = vld [vmem:[%s5335_s2 + $0x270] ss:$24 sps:$4 sm:$0xff]   ;;  %v3691_v57 = vld [vmem:[%s5335_s2 + $0x2a4] ss:$24 sps:$4 sm:$0xff]  }
  0x14   :  { %1642 = vmatpush1.bf16.msra.mxu1 %v2951_v19  ;;  %1514 = vmatprep.subr.bf16.mxu0 %v2952_v20  ;;  %v3005_v56 = vld [vmem:[%s5335_s2 + $0x278] ss:$24 sps:$4 sm:$0xff]   ;;  %v3008_v58 = vld [vmem:[%s5335_s2 + $0x2ac] ss:$24 sps:$4 sm:$0xff]   ;;  %v3011_v60 = vld [vmem:[%s5335_s2 + $0x2a8] ss:$24 sps:$4 sm:$0xff]  }
  0x15   :  { %1643 = vmatprep.subr.bf16.mxu1 %v2954_v21  ;;  %v3700_v59 = vld [vmem:[%s5335_s2 + $0x2a0] ss:$24 sps:$4 sm:$0xff]   ;;  %v3709_v61 = vld [vmem:[%s5335_s2 + $0x2d4] ss:$24 sps:$4 sm:$0xff]   ;;  %v3718_v63 = vld [vmem:[%s5335_s2 + $0x2d0] ss:$24 sps:$4 sm:$0xff]  }
  0x16   :  { %v3014_v62 = vld [vmem:[%s5335_s2 + $0x2dc] ss:$24 sps:$4 sm:$0xff]   ;;  %v3017_v0 = vld [vmem:[%s5335_s2 + $0x2d8] ss:$24 sps:$4 sm:$0xff]   ;;  %v3025_v2 = vld [vmem:[%s5335_s2 + $0x30c] ss:$24 sps:$4 sm:$0xff]  }
  0x17   :  { %1515 = vmatpush1.bf16.msra.mxu0 %v2956_v22  ;;  %v3727_v1 = vld [vmem:[%s5335_s2 + $0x304] ss:$24 sps:$4 sm:$0xff]   ;;  %v3736_v3 = vld [vmem:[%s5335_s2 + $0x300] ss:$24 sps:$4 sm:$0xff]   ;;  %v3750_v6 = vld [vmem:[%s5335_s2 + $0x334] ss:$24 sps:$4 sm:$0xff]  }
  0x18   :  { %1644 = vmatpush1.bf16.msra.mxu1 %v2957_v23  ;;  %1516 = vmatprep.subr.bf16.mxu0 %v2958_v24  ;;  %v3023_v4 = vld [vmem:[%s5335_s2 + $0x308] ss:$24 sps:$4 sm:$0xff]   ;;  %v3032_v7 = vld [vmem:[%s5335_s2 + $0x33c] ss:$24 sps:$4 sm:$0xff]   ;;  %v3030_v9 = vld [vmem:[%s5335_s2 + $0x338] ss:$24 sps:$4 sm:$0xff]  }
  0x19   :  { %1645 = vmatprep.subr.bf16.mxu1 %v2960_v25  ;;  %v3744_v5 = vld [vmem:[%s5333_s0] ss:$20 sps:$4 sm:$0xff]   ;;  %v3761_v8 = vld [vmem:[%s5335_s2 + $0x330] ss:$24 sps:$4 sm:$0xff]   ;;  %v3770_v10 = vld [vmem:[%s5335_s2 + $0x364] ss:$24 sps:$4 sm:$0xff]  }
  0x1a   :  { %v3038_v11 = vld [vmem:[%s5335_s2 + $0x36c] ss:$24 sps:$4 sm:$0xff]   ;;  %v3779_v12 = vld [vmem:[%s5335_s2 + $0x360] ss:$24 sps:$4 sm:$0xff]   ;;  %v3044_v15 = vld [vmem:[%s5335_s2 + $0x39c] ss:$24 sps:$4 sm:$0xff]  }
  0x1b   :  { %1517 = vmatpush1.bf16.msra.mxu0 %v2962_v26  ;;  %v3036_v13 = vld [vmem:[%s5335_s2 + $0x368] ss:$24 sps:$4 sm:$0xff]   ;;  %v3788_v14 = vld [vmem:[%s5335_s2 + $0x394] ss:$24 sps:$4 sm:$0xff]   ;;  %v3042_v17 = vld [vmem:[%s5335_s2 + $0x398] ss:$24 sps:$4 sm:$0xff]  }
  0x1c   :  { %1646 = vmatpush1.bf16.msra.mxu1 %v2963_v27  ;;  %1518 = vmatprep.subr.bf16.mxu0 %v2964_v28  ;;  %v3797_v16 = vld [vmem:[%s5335_s2 + $0x390] ss:$24 sps:$4 sm:$0xff]   ;;  %v3806_v18 = vld [vmem:[%s5335_s2 + $0x3c4] ss:$24 sps:$4 sm:$0xff]   ;;  %v3815_v20 = vld [vmem:[%s5335_s2 + $0x3c0] ss:$24 sps:$4 sm:$0xff]  }
  0x1d   :  { %1647 = vmatprep.subr.bf16.mxu1 %v2966_v29  ;;  %v3050_v19 = vld [vmem:[%s5335_s2 + $0x3cc] ss:$24 sps:$4 sm:$0xff]   ;;  %v3048_v21 = vld [vmem:[%s5335_s2 + $0x3c8] ss:$24 sps:$4 sm:$0xff]   ;;  %v3056_v23 = vld [vmem:[%s5335_s2 + $0x3fc] ss:$24 sps:$4 sm:$0xff]  }
  0x1e   :  { %v3824_v22 = vld [vmem:[%s5335_s2 + $0x3f4] ss:$24 sps:$4 sm:$0xff]   ;;  %v3833_v24 = vld [vmem:[%s5335_s2 + $0x3f0] ss:$24 sps:$4 sm:$0xff]   ;;  %v3842_v26 = vld [vmem:[%s5335_s2 + $0x424] ss:$24 sps:$4 sm:$0xff]  }
  0x1f   :  { %1519 = vmatpush1.bf16.msra.mxu0 %v2968_v30  ;;  %v3054_v25 = vld [vmem:[%s5335_s2 + $0x3f8] ss:$24 sps:$4 sm:$0xff]   ;;  %v3062_v27 = vld [vmem:[%s5335_s2 + $0x42c] ss:$24 sps:$4 sm:$0xff]   ;;  %v3060_v29 = vld [vmem:[%s5335_s2 + $0x428] ss:$24 sps:$4 sm:$0xff]  }
  0x20   :  { %1648 = vmatpush1.bf16.msra.mxu1 %v2969_v31  ;;  %1520 = vmatprep.subr.bf16.mxu0 %v2970_v32  ;;  %v3851_v28 = vld [vmem:[%s5335_s2 + $0x420] ss:$24 sps:$4 sm:$0xff]   ;;  %v3865_v31 = vld [vmem:[%s5335_s2 + $0x454] ss:$24 sps:$4 sm:$0xff]  }
  0x21   :  { %1649 = vmatprep.subr.bf16.mxu1 %v2972_v33  ;;  %v3859_v30 = vld [vmem:[%s5333_s0 + $0xc] ss:$20 sps:$4 sm:$0xff]   ;;  %v3068_v32 = vld [vmem:[%s5335_s2 + $0x45c] ss:$24 sps:$4 sm:$0xff]   ;;  %v3876_v33 = vld [vmem:[%s5335_s2 + $0x450] ss:$24 sps:$4 sm:$0xff]  }
  0x23   :  { %1521 = vmatpush1.bf16.msra.mxu0 %v2974_v34  ;;  %v3066_v34 = vld [vmem:[%s5335_s2 + $0x458] ss:$24 sps:$4 sm:$0xff]  }
  0x24   :  { %1650 = vmatpush1.bf16.msra.mxu1 %v2975_v35  ;;  %1522 = vmatprep.subr.bf16.mxu0 %v2976_v36  ;;  %v3885_v35 = vld [vmem:[%s5335_s2 + $0x484] ss:$24 sps:$4 sm:$0xff]  }
  0x25   :  { %1651 = vmatprep.subr.bf16.mxu1 %v2978_v37  ;;  %v3074_v36 = vld [vmem:[%s5335_s2 + $0x48c] ss:$24 sps:$4 sm:$0xff]   ;;  %v3894_v37 = vld [vmem:[%s5335_s2 + $0x480] ss:$24 sps:$4 sm:$0xff]  }
  0x27   :  { %1523 = vmatpush1.bf16.msra.mxu0 %v2980_v38  ;;  %v3072_v38 = vld [vmem:[%s5335_s2 + $0x488] ss:$24 sps:$4 sm:$0xff]  }
  0x28   :  { %1652 = vmatpush1.bf16.msra.mxu1 %v2981_v39  ;;  %1524 = vmatprep.subr.bf16.mxu0 %v2982_v40  ;;  %v3903_v39 = vld [vmem:[%s5335_s2 + $0x4b4] ss:$24 sps:$4 sm:$0xff]  }
  0x29   :  { %1653 = vmatprep.subr.bf16.mxu1 %v2984_v41  ;;  %v3080_v40 = vld [vmem:[%s5335_s2 + $0x4bc] ss:$24 sps:$4 sm:$0xff]   ;;  %v3912_v41 = vld [vmem:[%s5335_s2 + $0x4b0] ss:$24 sps:$4 sm:$0xff]  }
  0x2b   :  { %1525 = vmatpush1.bf16.msra.mxu0 %v2986_v42  ;;  %v3078_v42 = vld [vmem:[%s5335_s2 + $0x4b8] ss:$24 sps:$4 sm:$0xff]  }
  0x2c   :  { %1654 = vmatpush1.bf16.msra.mxu1 %v2987_v43  ;;  %1526 = vmatprep.subr.bf16.mxu0 %v2988_v44  ;;  %v3921_v43 = vld [vmem:[%s5335_s2 + $0x4e4] ss:$24 sps:$4 sm:$0xff]  }
  0x2d   :  { %1655 = vmatprep.subr.bf16.mxu1 %v2990_v45  ;;  %v3086_v44 = vld [vmem:[%s5335_s2 + $0x4ec] ss:$24 sps:$4 sm:$0xff]   ;;  %v3930_v45 = vld [vmem:[%s5335_s2 + $0x4e0] ss:$24 sps:$4 sm:$0xff]  }
  0x2f   :  { %1527 = vmatpush1.bf16.msra.mxu0 %v2992_v46  ;;  %v3084_v46 = vld [vmem:[%s5335_s2 + $0x4e8] ss:$24 sps:$4 sm:$0xff]  }
  0x30   :  { %1656 = vmatpush1.bf16.msra.mxu1 %v2993_v48  ;;  %1528 = vmatprep.subr.bf16.mxu0 %v3655_v49  ;;  %v3939_v48 = vld [vmem:[%s5335_s2 + $0x514] ss:$24 sps:$4 sm:$0xff]  }
  0x31   :  { %1657 = vmatprep.subr.bf16.mxu1 %v2996_v50  ;;  %v3092_v50 = vld [vmem:[%s5335_s2 + $0x51c] ss:$24 sps:$4 sm:$0xff]  }
  0x33   :  { %1529 = vmatpush1.bf16.msra.mxu0 %v3665_v51 }
  0x34   :  { %1658 = vmatpush1.bf16.msra.mxu1 %v2999_v52  ;;  %1530 = vmatprep.subr.bf16.mxu0 %v3673_v53  ;;  %v3948_v52 = vld [vmem:[%s5335_s2 + $0x510] ss:$24 sps:$4 sm:$0xff]  }
  0x35   :  { %1659 = vmatprep.subr.bf16.mxu1 %v3002_v54  ;;  %v3090_v54 = vld [vmem:[%s5335_s2 + $0x518] ss:$24 sps:$4 sm:$0xff]  }
  0x37   :  { %1531 = vmatpush1.bf16.msra.mxu0 %v3682_v55 }
  0x38   :  { %1660 = vmatpush1.bf16.msra.mxu1 %v3005_v56  ;;  %1532 = vmatprep.subr.bf16.mxu0 %v3691_v57  ;;  %v3957_v56 = vld [vmem:[%s5335_s2 + $0x544] ss:$24 sps:$4 sm:$0xff]  }
  0x39   :  { %1661 = vmatprep.subr.bf16.mxu1 %v3008_v58  ;;  %v3098_v58 = vld [vmem:[%s5335_s2 + $0x54c] ss:$24 sps:$4 sm:$0xff]  }
  0x3b   :  { %1533 = vmatpush1.bf16.msra.mxu0 %v3700_v59 }
  0x3c   :  { %1662 = vmatpush1.bf16.msra.mxu1 %v3011_v60  ;;  %1534 = vmatprep.subr.bf16.mxu0 %v3709_v61  ;;  %v3966_v60 = vld [vmem:[%s5335_s2 + $0x540] ss:$24 sps:$4 sm:$0xff]  }
  0x3d   :  { %1663 = vmatprep.subr.bf16.mxu1 %v3014_v62  ;;  %v3096_v62 = vld [vmem:[%s5335_s2 + $0x548] ss:$24 sps:$4 sm:$0xff]  }
  0x3f   :  { %1535 = vmatpush1.bf16.msra.mxu0 %v3718_v63 }
  0x40   :  { %1664 = vmatpush1.bf16.msra.mxu1 %v3017_v0  ;;  %1547 = vmatprep.subr.bf16.mxu0 %v3727_v1  ;;  %v3975_v0 = vld [vmem:[%s5335_s2 + $0x574] ss:$24 sps:$4 sm:$0xff]  }
  0x41   :  { %1676 = vmatprep.subr.bf16.mxu1 %v3025_v2  ;;  %v3104_v2 = vld [vmem:[%s5335_s2 + $0x57c] ss:$24 sps:$4 sm:$0xff]  }
  0x42   :  { %1537 = vmatmul.mubr.bf16.vlgmr.msra.gmra.mrb[0].mxu0 %v3744_v5 }
  0x43   :  { %1666 = vmatmul.mubr.bf16.vlgmr.msra.gmra.mrb[0].mxu1 %v3744_v5  ;;  %1548 = vmatpush1.bf16.msra.mxu0 %v3736_v3 }
  0x44   :  { %1677 = vmatpush1.bf16.msra.mxu1 %v3023_v4  ;;  %1549 = vmatprep.subr.bf16.mxu0 %v3750_v6  ;;  %v3984_v4 = vld [vmem:[%s5335_s2 + $0x570] ss:$24 sps:$4 sm:$0xff]  }
  0x45   :  { %1678 = vmatprep.subr.bf16.mxu1 %v3032_v7  ;;  %1579 = vmatprep.mubr.bf16.mxu0 %v3859_v30  ;;  %v3102_v7 = vld [vmem:[%s5335_s2 + $0x578] ss:$24 sps:$4 sm:$0xff]  }
  0x46   :  { %1708 = vmatprep.mubr.bf16.mxu1 %v3859_v30 }
  0x47   :  { %1550 = vmatpush1.bf16.msra.mxu0 %v3761_v8 }
  0x48   :  { %1679 = vmatpush1.bf16.msra.mxu1 %v3030_v9  ;;  %1551 = vmatprep.subr.bf16.mxu0 %v3770_v10  ;;  %v3993_v9 = vld [vmem:[%s5335_s2 + $0x5a4] ss:$24 sps:$4 sm:$0xff]  }
  0x49   :  { %1680 = vmatprep.subr.bf16.mxu1 %v3038_v11  ;;  %v3110_v11 = vld [vmem:[%s5335_s2 + $0x5ac] ss:$24 sps:$4 sm:$0xff]  }
  0x4b   :  { %1552 = vmatpush1.bf16.msra.mxu0 %v3779_v12 }
  0x4c   :  { %1681 = vmatpush1.bf16.msra.mxu1 %v3036_v13  ;;  %1553 = vmatprep.subr.bf16.mxu0 %v3788_v14  ;;  %v4002_v13 = vld [vmem:[%s5335_s2 + $0x5a0] ss:$24 sps:$4 sm:$0xff]  }
  0x4d   :  { %1682 = vmatprep.subr.bf16.mxu1 %v3044_v15  ;;  %v3108_v15 = vld [vmem:[%s5335_s2 + $0x5a8] ss:$24 sps:$4 sm:$0xff]  }
  0x4f   :  { %1554 = vmatpush1.bf16.msra.mxu0 %v3797_v16 }
  0x50   :  { %1683 = vmatpush1.bf16.msra.mxu1 %v3042_v17  ;;  %1555 = vmatprep.subr.bf16.mxu0 %v3806_v18  ;;  %v4011_v17 = vld [vmem:[%s5335_s2 + $0x5d4] ss:$24 sps:$4 sm:$0xff]  }
  0x51   :  { %1684 = vmatprep.subr.bf16.mxu1 %v3050_v19  ;;  %v3116_v19 = vld [vmem:[%s5335_s2 + $0x5dc] ss:$24 sps:$4 sm:$0xff]  }
  0x53   :  { %1556 = vmatpush1.bf16.msra.mxu0 %v3815_v20 }
  0x54   :  { %1685 = vmatpush1.bf16.msra.mxu1 %v3048_v21  ;;  %1557 = vmatprep.subr.bf16.mxu0 %v3824_v22  ;;  %v4020_v21 = vld [vmem:[%s5335_s2 + $0x5d0] ss:$24 sps:$4 sm:$0xff]  }
  0x55   :  { %1686 = vmatprep.subr.bf16.mxu1 %v3056_v23  ;;  %v3114_v23 = vld [vmem:[%s5335_s2 + $0x5d8] ss:$24 sps:$4 sm:$0xff]  }
  0x57   :  { %1558 = vmatpush1.bf16.msra.mxu0 %v3833_v24 }
  0x58   :  { %1687 = vmatpush1.bf16.msra.mxu1 %v3054_v25  ;;  %1559 = vmatprep.subr.bf16.mxu0 %v3842_v26  ;;  %v4029_v25 = vld [vmem:[%s5335_s2 + $0x604] ss:$24 sps:$4 sm:$0xff]  }
  0x59   :  { %1688 = vmatprep.subr.bf16.mxu1 %v3062_v27  ;;  %v3125_v27 = vld [vmem:[%s5335_s2 + $0x60c] ss:$24 sps:$4 sm:$0xff]  }
  0x5b   :  { %1560 = vmatpush1.bf16.msra.mxu0 %v3851_v28 }
  0x5c   :  { %1689 = vmatpush1.bf16.msra.mxu1 %v3060_v29  ;;  %1561 = vmatprep.subr.bf16.mxu0 %v3865_v31  ;;  %v4038_v29 = vld [vmem:[%s5333_s0 + $0x8] ss:$20 sps:$4 sm:$0xff]  }
  0x5d   :  { %1690 = vmatprep.subr.bf16.mxu1 %v3068_v32  ;;  %v4043_v32 = vld [vmem:[%s5335_s2 + $0x600] ss:$24 sps:$4 sm:$0xff]  }
  0x5f   :  { %1562 = vmatpush1.bf16.msra.mxu0 %v3876_v33 }
  0x60   :  { %1691 = vmatpush1.bf16.msra.mxu1 %v3066_v34  ;;  %1563 = vmatprep.subr.bf16.mxu0 %v3885_v35  ;;  %v3123_v34 = vld [vmem:[%s5335_s2 + $0x608] ss:$24 sps:$4 sm:$0xff]  }
  0x61   :  { %1692 = vmatprep.subr.bf16.mxu1 %v3074_v36  ;;  %v4052_v36 = vld [vmem:[%s5335_s2 + $0x634] ss:$24 sps:$4 sm:$0xff]  }
  0x63   :  { %1564 = vmatpush1.bf16.msra.mxu0 %v3894_v37 }
  0x64   :  { %1693 = vmatpush1.bf16.msra.mxu1 %v3072_v38  ;;  %1565 = vmatprep.subr.bf16.mxu0 %v3903_v39  ;;  %v3131_v38 = vld [vmem:[%s5335_s2 + $0x63c] ss:$24 sps:$4 sm:$0xff]  }
  0x65   :  { %1694 = vmatprep.subr.bf16.mxu1 %v3080_v40  ;;  %v4063_v40 = vld [vmem:[%s5335_s2 + $0x630] ss:$24 sps:$4 sm:$0xff]  }
  0x67   :  { %1566 = vmatpush1.bf16.msra.mxu0 %v3912_v41 }
  0x68   :  { %1695 = vmatpush1.bf16.msra.mxu1 %v3078_v42  ;;  %1567 = vmatprep.subr.bf16.mxu0 %v3921_v43  ;;  %v3129_v42 = vld [vmem:[%s5335_s2 + $0x638] ss:$24 sps:$4 sm:$0xff]  }
  0x69   :  { %1696 = vmatprep.subr.bf16.mxu1 %v3086_v44  ;;  %v4072_v44 = vld [vmem:[%s5335_s2 + $0x664] ss:$24 sps:$4 sm:$0xff]  }
  0x6b   :  { %1568 = vmatpush1.bf16.msra.mxu0 %v3930_v45 }
  0x6c   :  { %1697 = vmatpush1.bf16.msra.mxu1 %v3084_v46  ;;  %1569 = vmatprep.subr.bf16.mxu0 %v3939_v48  ;;  %v3137_v46 = vld [vmem:[%s5335_s2 + $0x66c] ss:$24 sps:$4 sm:$0xff]  }
  0x6d   :  { %1698 = vmatprep.subr.bf16.mxu1 %v3092_v50  ;;  %v5337_v50 = vmov 0  }
  0x6f   :  { %1570 = vmatpush1.bf16.msra.mxu0 %v3948_v52 }
  0x70   :  { %1699 = vmatpush1.bf16.msra.mxu1 %v3090_v54  ;;  %1571 = vmatprep.subr.bf16.mxu0 %v3957_v56  ;;  %v4083_v54 = vld [vmem:[%s5335_s2 + $0x660] ss:$24 sps:$4 sm:$0xff]  }
  0x71   :  { %1700 = vmatprep.subr.bf16.mxu1 %v3098_v58  ;;  %v3135_v58 = vld [vmem:[%s5335_s2 + $0x668] ss:$24 sps:$4 sm:$0xff]  }
  0x73   :  { %1572 = vmatpush1.bf16.msra.mxu0 %v3966_v60 }
  0x74   :  { %1701 = vmatpush1.bf16.msra.mxu1 %v3096_v62  ;;  %1573 = vmatprep.subr.bf16.mxu0 %v3975_v0  ;;  %v4092_v62 = vld [vmem:[%s5335_s2 + $0x694] ss:$24 sps:$4 sm:$0xff]  }
  0x75   :  { %1702 = vmatprep.subr.bf16.mxu1 %v3104_v2  ;;  %v3143_v2 = vld [vmem:[%s5335_s2 + $0x69c] ss:$24 sps:$4 sm:$0xff]  }
  0x77   :  { %1574 = vmatpush1.bf16.msra.mxu0 %v3984_v4 }
  0x78   :  { %1703 = vmatpush1.bf16.msra.mxu1 %v3102_v7  ;;  %1575 = vmatprep.subr.bf16.mxu0 %v3993_v9  ;;  %v4101_v7 = vld [vmem:[%s5335_s2 + $0x690] ss:$24 sps:$4 sm:$0xff]  }
  0x79   :  { %1704 = vmatprep.subr.bf16.mxu1 %v3110_v11  ;;  %v3141_v11 = vld [vmem:[%s5335_s2 + $0x698] ss:$24 sps:$4 sm:$0xff]  }
  0x7b   :  { %1576 = vmatpush1.bf16.msra.mxu0 %v4002_v13 }
  0x7c   :  { %1705 = vmatpush1.bf16.msra.mxu1 %v3108_v15  ;;  %1577 = vmatprep.subr.bf16.mxu0 %v4011_v17  ;;  %v4110_v15 = vld [vmem:[%s5335_s2 + $0x6c4] ss:$24 sps:$4 sm:$0xff]  }
  0x7d   :  { %1706 = vmatprep.subr.bf16.mxu1 %v3116_v19  ;;  %v3149_v19 = vld [vmem:[%s5335_s2 + $0x6cc] ss:$24 sps:$4 sm:$0xff]  }
  0x7f   :  { %1578 = vmatpush1.bf16.msra.mxu0 %v4020_v21 }
  0x80   :  { %1707 = vmatpush1.bf16.msra.mxu1 %v3114_v23  ;;  %1590 = vmatprep.subr.bf16.mxu0 %v4029_v25  ;;  %v4119_v23 = vld [vmem:[%s5335_s2 + $0x6c0] ss:$24 sps:$4 sm:$0xff]  }
  0x81   :  { %1719 = vmatprep.subr.bf16.mxu1 %v3125_v27  ;;  %v3147_v27 = vld [vmem:[%s5335_s2 + $0x6c8] ss:$24 sps:$4 sm:$0xff]  }
  0x82   :  { %1580 = vmatmul.mubr.bf16.vlgmr.msra.gmra.mrb[0].mxu0 %v4038_v29 }
  0x83   :  { %1709 = vmatmul.mubr.bf16.vlgmr.msra.gmra.mrb[0].mxu1 %v4038_v29  ;;  %1591 = vmatpush1.bf16.msra.mxu0 %v4043_v32 }
  0x84   :  { %1720 = vmatpush1.bf16.msra.mxu1 %v3123_v34  ;;  %1592 = vmatprep.subr.bf16.mxu0 %v4052_v36  ;;  %v4128_v34 = vld [vmem:[%s5335_s2 + $0x6f4] ss:$24 sps:$4 sm:$0xff]  }
  0x85   :  { %1721 = vmatprep.subr.bf16.mxu1 %v3131_v38  ;;  %1622 = vmatprep.mubr.bf16.mxu0 %v5337_v50  ;;  %v3155_v38 = vld [vmem:[%s5335_s2 + $0x6fc] ss:$24 sps:$4 sm:$0xff]  }
  0x86   :  { %1751 = vmatprep.mubr.bf16.mxu1 %v5337_v50  ;;  %v4183_v50 = vld [vmem:[%s5335_s2 + $0x750] ss:$24 sps:$4 sm:$0xff]  }
  0x87   :  { %1593 = vmatpush1.bf16.msra.mxu0 %v4063_v40  ;;  %5388 = vst [vmem:[#allocation13_spill] sm:$0xff] %v4183_v50 }
  0x88   :  { %1722 = vmatpush1.bf16.msra.mxu1 %v3129_v42  ;;  %1594 = vmatprep.subr.bf16.mxu0 %v4072_v44  ;;  %v4137_v42 = vld [vmem:[%s5335_s2 + $0x6f0] ss:$24 sps:$4 sm:$0xff]  }
  0x89   :  { %1723 = vmatprep.subr.bf16.mxu1 %v3137_v46  ;;  %v4143_v46 = vld [vmem:[%s5335_s2 + $0x6f8] ss:$24 sps:$4 sm:$0xff]  }
  0x8a   :  { %5382 = vst [vmem:[#allocation7_spill] sm:$0xff] %v4143_v46 }
  0x8b   :  { %1595 = vmatpush1.bf16.msra.mxu0 %v4083_v54 }
  0x8c   :  { %1724 = vmatpush1.bf16.msra.mxu1 %v3135_v58  ;;  %1596 = vmatprep.subr.bf16.mxu0 %v4092_v62  ;;  %v4148_v58 = vld [vmem:[%s5335_s2 + $0x724] ss:$24 sps:$4 sm:$0xff]  }
  0x8d   :  { %1725 = vmatprep.subr.bf16.mxu1 %v3143_v2  ;;  %5383 = vst [vmem:[#allocation8_spill] sm:$0xff] %v4148_v58  ;;  %v4154_v2 = vld [vmem:[%s5335_s2 + $0x72c] ss:$24 sps:$4 sm:$0xff]  }
  0x8e   :  { %5384 = vst [vmem:[#allocation9_spill] sm:$0xff] %v4154_v2 }
  0x8f   :  { %1597 = vmatpush1.bf16.msra.mxu0 %v4101_v7 }
  0x90   :  { %1726 = vmatpush1.bf16.msra.mxu1 %v3141_v11  ;;  %1598 = vmatprep.subr.bf16.mxu0 %v4110_v15  ;;  %v4159_v11 = vld [vmem:[%s5335_s2 + $0x720] ss:$24 sps:$4 sm:$0xff]  }
  0x91   :  { %1727 = vmatprep.subr.bf16.mxu1 %v3149_v19  ;;  %v4164_v19 = vld [vmem:[%s5335_s2 + $0x728] ss:$24 sps:$4 sm:$0xff]  }
  0x92   :  { %5385 = vst [vmem:[#allocation10_spill] sm:$0xff] %v4164_v19 }
  0x93   :  { %1599 = vmatpush1.bf16.msra.mxu0 %v4119_v23 }
  0x94   :  { %1728 = vmatpush1.bf16.msra.mxu1 %v3147_v27  ;;  %1600 = vmatprep.subr.bf16.mxu0 %v4128_v34  ;;  %v4171_v27 = vld [vmem:[%s5335_s2 + $0x754] ss:$24 sps:$4 sm:$0xff]  }
  0x95   :  { %1729 = vmatprep.subr.bf16.mxu1 %v3155_v38  ;;  %5386 = vst [vmem:[#allocation11_spill] sm:$0xff] %v4171_v27  ;;  %v4176_v38 = vld [vmem:[%s5335_s2 + $0x75c] ss:$24 sps:$4 sm:$0xff]  }
  0x96   :  { %5387 = vst [vmem:[#allocation12_spill] sm:$0xff] %v4176_v38 }
  0x97   :  { %1601 = vmatpush1.bf16.msra.mxu0 %v4137_v42 }
  0x98   :  { %1730 = vmatpush1.bf16.msra.mxu1 %v4143_v46  ;;  %1602 = vmatprep.subr.bf16.mxu0 %v4148_v58  ;;  %v4190_v46 = vld [vmem:[%s5335_s2 + $0x758] ss:$24 sps:$4 sm:$0xff]   ;;  %v4195_v58 = vld [vmem:[%s5335_s2 + $0x14] ss:$24 sps:$4 sm:$0xff]  }
  0x99   :  { %1731 = vmatprep.subr.bf16.mxu1 %v4154_v2  ;;  %5389 = vst [vmem:[#allocation14_spill] sm:$0xff] %v4190_v46  ;;  %5390 = vst [vmem:[#allocation15_spill] sm:$0xff] %v4195_v58  ;;  %v4202_v2 = vld [vmem:[%s5333_s0 + $0x10] ss:$20 sps:$4 sm:$0xff]  }
  0x9b   :  { %1603 = vmatpush1.bf16.msra.mxu0 %v4159_v11 }
  0x9c   :  { %1732 = vmatpush1.bf16.msra.mxu1 %v4164_v19  ;;  %1604 = vmatprep.subr.bf16.mxu0 %v4171_v27  ;;  %v4209_v19 = vld [vmem:[%s5335_s2 + $0x10] ss:$24 sps:$4 sm:$0xff]   ;;  %v4218_v27 = vld [vmem:[%s5335_s2 + $0x44] ss:$24 sps:$4 sm:$0xff]  }
  0x9d   :  { %1733 = vmatprep.subr.bf16.mxu1 %v4176_v38  ;;  %5391 = vst [vmem:[#allocation16_spill] sm:$0xff] %v4209_v19  ;;  %v3368_v38 = vld [vmem:[%s5335_s2 + $0x4] ss:$24 sps:$4 sm:$0xff]  }
  0x9f   :  { %1605 = vmatpush1.bf16.msra.mxu0 %v4183_v50 }
  0xa0   :  { %1734 = vmatpush1.bf16.msra.mxu1 %v4190_v46  ;;  %1762 = vmatprep.subr.bf16.mxu0 %v4195_v58  ;;  %v4223_v46 = vld [vmem:[%s5334_s1 + $0x4] ss:$20 sps:$4 sm:$0xff]  }
  0xa1   :  { %1923 = vmatprep.subr.bf16.mxu1 %v3368_v38 }
  0xa2   :  { %8 = vsyncpa [#allocation5], 0  ;;  %1623 = vmatmul.mubr.bf16.vlgmr.msra.gmra.mrb[0].mxu0 %v4202_v2  ;;  %v3369_v38 = vld [vmem:[%s5335_s2] ss:$24 sps:$4 sm:$0xff]   ;;  %v3370_v50 = vld [vmem:[%s5335_s2 + $0x34] ss:$24 sps:$4 sm:$0xff]  }
  0xa3   :  { %1752 = vmatmul.mubr.bf16.vlgmr.msra.gmra.mrb[0].mxu1 %v4202_v2  ;;  %1763 = vmatpush1.bf16.msra.mxu0 %v4209_v19  ;;  %v4234_v58 = vld [vmem:[%s5335_s2 + $0x40] ss:$24 sps:$4 sm:$0xff]   ;;  %v4243_v19 = vld [vmem:[%s5335_s2 + $0x74] ss:$24 sps:$4 sm:$0xff]   ;;  %s2609_s18 = sshll.u32 %s5336_s3, 4  ;;  %s2610_s18 = int_to_ptr.vmem [resolvable:$true] %s2609_s18 }
  0xa4   :  { %1924 = vmatpush1.bf16.msra.mxu1 %v3369_v38  ;;  %5392 = vst [vmem:[#allocation17_spill] sm:$0xff] %v4234_v58  ;;  %1764 = vmatprep.subr.bf16.mxu0 %v4218_v27  ;;  %5393 = vst [vmem:[#allocation18_spill] sm:$0xff] %v4243_v19  ;;  %v3371_v38 = vld [vmem:[%s5335_s2 + $0x30] ss:$24 sps:$4 sm:$0xff]   ;;  %s3467_s20 = scalar_lea.vmem %s2610_s18, 16  ;;  %p3472_p1 = scmp.lt.s32.totalorder %s2610_s18, %s2610_s18 }
  0xa5   :  { %1925 = vmatprep.subr.bf16.mxu1 %v3370_v50  ;;  %1794 = vmatprep.mubr.bf16.mxu0 %v3647_v47  ;;  %v4254_v50 = vld [vmem:[%s5335_s2 + $0x70] ss:$24 sps:$4 sm:$0xff]   ;;  %v3372_v47 = vld [vmem:[%s5335_s2 + $0x64] ss:$24 sps:$4 sm:$0xff]   ;;  %p3468_p0 = scmp.ne.s32.totalorder %s2610_s18, %s3467_s20  ;;  %p3473_p2 = scmp.lt.s32.totalorder %s3467_s20, %s3467_s20 }
  0xa6   :  { %1955 = vmatprep.mubr.bf16.mxu1 %v4223_v46  ;;  %5394 = vst [vmem:[#allocation19_spill] sm:$0xff] %v4254_v50 }
  0xa7   :  { %1765 = vmatpush1.bf16.msra.mxu0 %v4234_v58  ;;  %v4263_v58 = vld [vmem:[%s5335_s2 + $0xa4] ss:$24 sps:$4 sm:$0xff]   ;;  %p3474_p3 = por %p3473_p2, %p3472_p1 }
  0xa8   :  { %1926 = vmatpush1.bf16.msra.mxu1 %v3371_v38  ;;  %1766 = vmatprep.subr.bf16.mxu0 %v4243_v19  ;;  %5395 = vst [vmem:[#allocation20_spill] sm:$0xff] %v4263_v58  ;;  %v3373_v38 = vld [vmem:[%s5335_s2 + $0x60] ss:$24 sps:$4 sm:$0xff]  }
  0xa9   :  { %1927 = vmatprep.subr.bf16.mxu1 %v3372_v47  ;;  %v4272_v19 = vld [vmem:[%s5335_s2 + $0xa0] ss:$24 sps:$4 sm:$0xff]   ;;  %v3374_v47 = vld [vmem:[%s5335_s2 + $0x94] ss:$24 sps:$4 sm:$0xff]   ;;  %p3475_p4 = pnand %p3474_p3, %p3468_p0 }
  0xaa   :  { %5396 = vst [vmem:[#allocation21_spill] sm:$0xff] %v4272_v19 }
  0xab   :  { %1767 = vmatpush1.bf16.msra.mxu0 %v4254_v50  ;;  %v4281_v50 = vld [vmem:[%s5335_s2 + $0xd4] ss:$24 sps:$4 sm:$0xff]  }
  0xac   :  { %1928 = vmatpush1.bf16.msra.mxu1 %v3373_v38  ;;  %1768 = vmatprep.subr.bf16.mxu0 %v4263_v58  ;;  %5397 = vst [vmem:[#allocation22_spill] sm:$0xff] %v4281_v50  ;;  %v3375_v38 = vld [vmem:[%s5335_s2 + $0x90] ss:$24 sps:$4 sm:$0xff]  }
  0xad   :  { %1929 = vmatprep.subr.bf16.mxu1 %v3374_v47  ;;  %v4290_v58 = vld [vmem:[%s5335_s2 + $0xd0] ss:$24 sps:$4 sm:$0xff]   ;;  %v3376_v47 = vld [vmem:[%s5335_s2 + $0xc4] ss:$24 sps:$4 sm:$0xff]  }
  0xae   :  { %5398 = vst [vmem:[#allocation23_spill] sm:$0xff] %v4290_v58 }
  0xaf   :  { %1769 = vmatpush1.bf16.msra.mxu0 %v4272_v19  ;;  %v4299_v19 = vld [vmem:[%s5335_s2 + $0x104] ss:$24 sps:$4 sm:$0xff]  }
  0xb0   :  { %1930 = vmatpush1.bf16.msra.mxu1 %v3375_v38  ;;  %1770 = vmatprep.subr.bf16.mxu0 %v4281_v50  ;;  %5399 = vst [vmem:[#allocation24_spill] sm:$0xff] %v4299_v19  ;;  %v3377_v38 = vld [vmem:[%s5335_s2 + $0xc0] ss:$24 sps:$4 sm:$0xff]  }
  0xb1   :  { %1931 = vmatprep.subr.bf16.mxu1 %v3376_v47  ;;  %v4308_v50 = vld [vmem:[%s5335_s2 + $0x100] ss:$24 sps:$4 sm:$0xff]   ;;  %v3378_v47 = vld [vmem:[%s5335_s2 + $0xf4] ss:$24 sps:$4 sm:$0xff]  }
  0xb2   :  { %5400 = vst [vmem:[#allocation25_spill] sm:$0xff] %v4308_v50 }
  0xb3   :  { %1771 = vmatpush1.bf16.msra.mxu0 %v4290_v58  ;;  %v4317_v58 = vld [vmem:[%s5335_s2 + $0x134] ss:$24 sps:$4 sm:$0xff]  }
  0xb4   :  { %1932 = vmatpush1.bf16.msra.mxu1 %v3377_v38  ;;  %1772 = vmatprep.subr.bf16.mxu0 %v4299_v19  ;;  %5401 = vst [vmem:[#allocation26_spill] sm:$0xff] %v4317_v58  ;;  %v3379_v38 = vld [vmem:[%s5335_s2 + $0xf0] ss:$24 sps:$4 sm:$0xff]  }
  0xb5   :  { %1933 = vmatprep.subr.bf16.mxu1 %v3378_v47  ;;  %v4326_v19 = vld [vmem:[%s5335_s2 + $0x130] ss:$24 sps:$4 sm:$0xff]   ;;  %v3380_v47 = vld [vmem:[%s5335_s2 + $0x124] ss:$24 sps:$4 sm:$0xff]  }
  0xb6   :  { %5402 = vst [vmem:[#allocation27_spill] sm:$0xff] %v4326_v19 }
  0xb7   :  { %1773 = vmatpush1.bf16.msra.mxu0 %v4308_v50  ;;  %v4335_v50 = vld [vmem:[%s5335_s2 + $0x164] ss:$24 sps:$4 sm:$0xff]  }
  0xb8   :  { %1934 = vmatpush1.bf16.msra.mxu1 %v3379_v38  ;;  %1774 = vmatprep.subr.bf16.mxu0 %v4317_v58  ;;  %5403 = vst [vmem:[#allocation28_spill] sm:$0xff] %v4335_v50  ;;  %v3381_v38 = vld [vmem:[%s5335_s2 + $0x120] ss:$24 sps:$4 sm:$0xff]  }
  0xb9   :  { %1935 = vmatprep.subr.bf16.mxu1 %v3380_v47  ;;  %v4344_v58 = vld [vmem:[%s5335_s2 + $0x160] ss:$24 sps:$4 sm:$0xff]   ;;  %v3382_v47 = vld [vmem:[%s5335_s2 + $0x154] ss:$24 sps:$4 sm:$0xff]  }
  0xba   :  { %5404 = vst [vmem:[#allocation29_spill] sm:$0xff] %v4344_v58 }
  0xbb   :  { %1775 = vmatpush1.bf16.msra.mxu0 %v4326_v19  ;;  %v4353_v19 = vld [vmem:[%s5335_s2 + $0x194] ss:$24 sps:$4 sm:$0xff]  }
  0xbc   :  { %1936 = vmatpush1.bf16.msra.mxu1 %v3381_v38  ;;  %1776 = vmatprep.subr.bf16.mxu0 %v4335_v50  ;;  %5405 = vst [vmem:[#allocation30_spill] sm:$0xff] %v4353_v19  ;;  %v3383_v38 = vld [vmem:[%s5335_s2 + $0x150] ss:$24 sps:$4 sm:$0xff]  }
  0xbd   :  { %1937 = vmatprep.subr.bf16.mxu1 %v3382_v47  ;;  %v4362_v50 = vld [vmem:[%s5335_s2 + $0x190] ss:$24 sps:$4 sm:$0xff]   ;;  %v3384_v47 = vld [vmem:[%s5335_s2 + $0x184] ss:$24 sps:$4 sm:$0xff]  }
  0xbe   :  { %5406 = vst [vmem:[#allocation31_spill] sm:$0xff] %v4362_v50 }
  0xbf   :  { %1777 = vmatpush1.bf16.msra.mxu0 %v4344_v58  ;;  %v4371_v58 = vld [vmem:[%s5335_s2 + $0x1c4] ss:$24 sps:$4 sm:$0xff]  }
  0xc0   :  { %1938 = vmatpush1.bf16.msra.mxu1 %v3383_v38  ;;  %1778 = vmatprep.subr.bf16.mxu0 %v4353_v19  ;;  %5407 = vst [vmem:[#allocation32_spill] sm:$0xff] %v4371_v58  ;;  %v3385_v38 = vld [vmem:[%s5335_s2 + $0x180] ss:$24 sps:$4 sm:$0xff]  }
  0xc1   :  { %1939 = vmatprep.subr.bf16.mxu1 %v3384_v47  ;;  %v4380_v19 = vld [vmem:[%s5335_s2 + $0x1c0] ss:$24 sps:$4 sm:$0xff]   ;;  %v3386_v47 = vld [vmem:[%s5335_s2 + $0x1b4] ss:$24 sps:$4 sm:$0xff]  }
  0xc2   :  { %5408 = vst [vmem:[#allocation33_spill] sm:$0xff] %v4380_v19 }
  0xc3   :  { %1779 = vmatpush1.bf16.msra.mxu0 %v4362_v50  ;;  %v4389_v50 = vld [vmem:[%s5335_s2 + $0x1f4] ss:$24 sps:$4 sm:$0xff]  }
  0xc4   :  { %1940 = vmatpush1.bf16.msra.mxu1 %v3385_v38  ;;  %1780 = vmatprep.subr.bf16.mxu0 %v4371_v58  ;;  %5409 = vst [vmem:[#allocation34_spill] sm:$0xff] %v4389_v50  ;;  %v3387_v38 = vld [vmem:[%s5335_s2 + $0x1b0] ss:$24 sps:$4 sm:$0xff]  }
  0xc5   :  { %1941 = vmatprep.subr.bf16.mxu1 %v3386_v47  ;;  %v4398_v58 = vld [vmem:[%s5335_s2 + $0x1f0] ss:$24 sps:$4 sm:$0xff]   ;;  %v3388_v47 = vld [vmem:[%s5335_s2 + $0x1e4] ss:$24 sps:$4 sm:$0xff]  }
  0xc6   :  { %5410 = vst [vmem:[#allocation35_spill] sm:$0xff] %v4398_v58 }
  0xc7   :  { %1781 = vmatpush1.bf16.msra.mxu0 %v4380_v19  ;;  %v4407_v19 = vld [vmem:[%s5335_s2 + $0x224] ss:$24 sps:$4 sm:$0xff]  }
  0xc8   :  { %1942 = vmatpush1.bf16.msra.mxu1 %v3387_v38  ;;  %1782 = vmatprep.subr.bf16.mxu0 %v4389_v50  ;;  %5411 = vst [vmem:[#allocation36_spill] sm:$0xff] %v4407_v19  ;;  %v3389_v38 = vld [vmem:[%s5335_s2 + $0x1e0] ss:$24 sps:$4 sm:$0xff]  }
  0xc9   :  { %1943 = vmatprep.subr.bf16.mxu1 %v3388_v47  ;;  %v4416_v50 = vld [vmem:[%s5335_s2 + $0x220] ss:$24 sps:$4 sm:$0xff]   ;;  %v3390_v47 = vld [vmem:[%s5335_s2 + $0x214] ss:$24 sps:$4 sm:$0xff]  }
  0xcb   :  { %1783 = vmatpush1.bf16.msra.mxu0 %v4398_v58  ;;  %v4425_v58 = vld [vmem:[%s5335_s2 + $0x254] ss:$24 sps:$4 sm:$0xff]  }
  0xcc   :  { %1944 = vmatpush1.bf16.msra.mxu1 %v3389_v38  ;;  %1784 = vmatprep.subr.bf16.mxu0 %v4407_v19  ;;  %v3391_v38 = vld [vmem:[%s5335_s2 + $0x210] ss:$24 sps:$4 sm:$0xff]  }
  0xcd   :  { %1945 = vmatprep.subr.bf16.mxu1 %v3390_v47  ;;  %v4434_v19 = vld [vmem:[%s5335_s2 + $0x250] ss:$24 sps:$4 sm:$0xff]   ;;  %v4441_v47 = vld [vmem:[%s5335_s2 + $0x284] ss:$24 sps:$4 sm:$0xff]  }
  0xcf   :  { %1785 = vmatpush1.bf16.msra.mxu0 %v4416_v50 }
  0xd0   :  { %1946 = vmatpush1.bf16.msra.mxu1 %v3391_v38  ;;  %1786 = vmatprep.subr.bf16.mxu0 %v4425_v58  ;;  %v4448_v38 = vld [vmem:[%s5335_s2 + $0x280] ss:$24 sps:$4 sm:$0xff]  }
  0xd1   :  { %1947 = vmatprep.subr.bf16.mxu1 %v3655_v49  ;;  %v4455_v49 = vld [vmem:[%s5335_s2 + $0x2b4] ss:$24 sps:$4 sm:$0xff]  }
  0xd3   :  { %1787 = vmatpush1.bf16.msra.mxu0 %v4434_v19 }
  0xd4   :  { %1948 = vmatpush1.bf16.msra.mxu1 %v3665_v51  ;;  %1788 = vmatprep.subr.bf16.mxu0 %v4441_v47  ;;  %v4462_v51 = vld [vmem:[%s5335_s2 + $0x2b0] ss:$24 sps:$4 sm:$0xff]  }
  0xd5   :  { %1949 = vmatprep.subr.bf16.mxu1 %v3673_v53  ;;  %5412 = vst [vmem:[#allocation37_spill] sm:$0xff] %v4462_v51  ;;  %v4469_v53 = vld [vmem:[%s5335_s2 + $0x2e4] ss:$24 sps:$4 sm:$0xff]  }
  0xd7   :  { %1789 = vmatpush1.bf16.msra.mxu0 %v4448_v38 }
  0xd8   :  { %1950 = vmatpush1.bf16.msra.mxu1 %v3682_v55  ;;  %1790 = vmatprep.subr.bf16.mxu0 %v4455_v49  ;;  %v4476_v55 = vld [vmem:[%s5335_s2 + $0x2e0] ss:$24 sps:$4 sm:$0xff]  }
  0xd9   :  { %1951 = vmatprep.subr.bf16.mxu1 %v3691_v57  ;;  %5413 = vst [vmem:[#allocation38_spill] sm:$0xff] %v4476_v55  ;;  %v4483_v57 = vld [vmem:[%s5335_s2 + $0x314] ss:$24 sps:$4 sm:$0xff]  }
  0xdb   :  { %1791 = vmatpush1.bf16.msra.mxu0 %v4462_v51  ;;  %v4488_v51 = vld [vmem:[%s5334_s1] ss:$20 sps:$4 sm:$0xff]  }
  0xdc   :  { %1952 = vmatpush1.bf16.msra.mxu1 %v3700_v59  ;;  %1792 = vmatprep.subr.bf16.mxu0 %v4469_v53  ;;  %v4495_v59 = vld [vmem:[%s5335_s2 + $0x310] ss:$24 sps:$4 sm:$0xff]  }
  0xdd   :  { %1953 = vmatprep.subr.bf16.mxu1 %v3709_v61  ;;  %v4502_v61 = vld [vmem:[%s5335_s2 + $0x344] ss:$24 sps:$4 sm:$0xff]  }
  0xdf   :  { %1793 = vmatpush1.bf16.msra.mxu0 %v4476_v55  ;;  %v4507_v55 = vld [vmem:[%s5334_s1 + $0xc] ss:$20 sps:$4 sm:$0xff]  }
  0xe0   :  { %1954 = vmatpush1.bf16.msra.mxu1 %v3718_v63  ;;  %1805 = vmatprep.subr.bf16.mxu0 %v4483_v57  ;;  %v4516_v63 = vld [vmem:[%s5335_s2 + $0x340] ss:$24 sps:$4 sm:$0xff]  }
  0xe1   :  { %1966 = vmatprep.subr.bf16.mxu1 %v3727_v1  ;;  %v4523_v1 = vld [vmem:[%s5335_s2 + $0x374] ss:$24 sps:$4 sm:$0xff]  }
  0xe2   :  { %1795 = vmatmul.mubr.bf16.vlgmr.msra.gmra.mrb[4].mxu0 %v3744_v5  ;;  %v4539_v5 = vld [vmem:[%s5335_s2 + $0x3a4] ss:$24 sps:$4 sm:$0xff]  }
  0xe3   :  { %1956 = vmatmul.mubr.bf16.vlgmr.msra.gmra.mrb[4].mxu1 %v4488_v51  ;;  %1806 = vmatpush1.bf16.msra.mxu0 %v4495_v59 }
  0xe4   :  { %1967 = vmatpush1.bf16.msra.mxu1 %v3736_v3  ;;  %1807 = vmatprep.subr.bf16.mxu0 %v4502_v61  ;;  %v4532_v3 = vld [vmem:[%s5335_s2 + $0x370] ss:$24 sps:$4 sm:$0xff]  }
  0xe5   :  { %1968 = vmatprep.subr.bf16.mxu1 %v3750_v6  ;;  %1837 = vmatprep.mubr.bf16.mxu0 %v3859_v30  ;;  %v4546_v6 = vld [vmem:[%s5335_s2 + $0x3a0] ss:$24 sps:$4 sm:$0xff]  }
  0xe6   :  { %1998 = vmatprep.mubr.bf16.mxu1 %v4507_v55  ;;  %v4630_v30 = vld [vmem:[%s5335_s2 + $0x4c0] ss:$24 sps:$4 sm:$0xff]  }
  0xe7   :  { %1808 = vmatpush1.bf16.msra.mxu0 %v4516_v63 }
  0xe8   :  { %1969 = vmatpush1.bf16.msra.mxu1 %v3761_v8  ;;  %1809 = vmatprep.subr.bf16.mxu0 %v4523_v1  ;;  %v4553_v8 = vld [vmem:[%s5335_s2 + $0x3d4] ss:$24 sps:$4 sm:$0xff]  }
  0xe9   :  { %1970 = vmatprep.subr.bf16.mxu1 %v3770_v10  ;;  %v4560_v10 = vld [vmem:[%s5335_s2 + $0x3d0] ss:$24 sps:$4 sm:$0xff]  }
  0xeb   :  { %1810 = vmatpush1.bf16.msra.mxu0 %v4532_v3 }
  0xec   :  { %1971 = vmatpush1.bf16.msra.mxu1 %v3779_v12  ;;  %1811 = vmatprep.subr.bf16.mxu0 %v4539_v5  ;;  %v4567_v12 = vld [vmem:[%s5335_s2 + $0x404] ss:$24 sps:$4 sm:$0xff]  }
  0xed   :  { %1972 = vmatprep.subr.bf16.mxu1 %v3788_v14  ;;  %v4574_v14 = vld [vmem:[%s5335_s2 + $0x400] ss:$24 sps:$4 sm:$0xff]  }
  0xef   :  { %1812 = vmatpush1.bf16.msra.mxu0 %v4546_v6 }
  0xf0   :  { %1973 = vmatpush1.bf16.msra.mxu1 %v3797_v16  ;;  %1813 = vmatprep.subr.bf16.mxu0 %v4553_v8  ;;  %v4581_v16 = vld [vmem:[%s5335_s2 + $0x434] ss:$24 sps:$4 sm:$0xff]  }
  0xf1   :  { %1974 = vmatprep.subr.bf16.mxu1 %v3806_v18  ;;  %v4588_v18 = vld [vmem:[%s5335_s2 + $0x430] ss:$24 sps:$4 sm:$0xff]  }
  0xf3   :  { %1814 = vmatpush1.bf16.msra.mxu0 %v4560_v10 }
  0xf4   :  { %1975 = vmatpush1.bf16.msra.mxu1 %v3815_v20  ;;  %1815 = vmatprep.subr.bf16.mxu0 %v4567_v12  ;;  %v4595_v20 = vld [vmem:[%s5335_s2 + $0x464] ss:$24 sps:$4 sm:$0xff]  }
  0xf5   :  { %1976 = vmatprep.subr.bf16.mxu1 %v3824_v22  ;;  %v4602_v22 = vld [vmem:[%s5335_s2 + $0x460] ss:$24 sps:$4 sm:$0xff]  }
  0xf7   :  { %1816 = vmatpush1.bf16.msra.mxu0 %v4574_v14 }
  0xf8   :  { %1977 = vmatpush1.bf16.msra.mxu1 %v3833_v24  ;;  %1817 = vmatprep.subr.bf16.mxu0 %v4581_v16  ;;  %v4609_v24 = vld [vmem:[%s5335_s2 + $0x494] ss:$24 sps:$4 sm:$0xff]  }
  0xf9   :  { %1978 = vmatprep.subr.bf16.mxu1 %v3842_v26  ;;  %v4616_v26 = vld [vmem:[%s5335_s2 + $0x490] ss:$24 sps:$4 sm:$0xff]  }
  0xfb   :  { %1818 = vmatpush1.bf16.msra.mxu0 %v4588_v18 }
  0xfc   :  { %1979 = vmatpush1.bf16.msra.mxu1 %v3851_v28  ;;  %1819 = vmatprep.subr.bf16.mxu0 %v4595_v20  ;;  %v4623_v28 = vld [vmem:[%s5335_s2 + $0x4c4] ss:$24 sps:$4 sm:$0xff]  }
  0xfd   :  { %1980 = vmatprep.subr.bf16.mxu1 %v3865_v31  ;;  %v4637_v31 = vld [vmem:[%s5335_s2 + $0x4f4] ss:$24 sps:$4 sm:$0xff]  }
  0xff   :  { %1820 = vmatpush1.bf16.msra.mxu0 %v4602_v22 }
 0x100   :  { %1981 = vmatpush1.bf16.msra.mxu1 %v3876_v33  ;;  %1821 = vmatprep.subr.bf16.mxu0 %v4609_v24  ;;  %v4644_v33 = vld [vmem:[%s5335_s2 + $0x4f0] ss:$24 sps:$4 sm:$0xff]  }
 0x101   :  { %1982 = vmatprep.subr.bf16.mxu1 %v3885_v35  ;;  %v4651_v35 = vld [vmem:[%s5335_s2 + $0x524] ss:$24 sps:$4 sm:$0xff]  }
 0x103   :  { %1822 = vmatpush1.bf16.msra.mxu0 %v4616_v26 }
 0x104   :  { %1983 = vmatpush1.bf16.msra.mxu1 %v3894_v37  ;;  %1823 = vmatprep.subr.bf16.mxu0 %v4623_v28  ;;  %v4658_v37 = vld [vmem:[%s5335_s2 + $0x520] ss:$24 sps:$4 sm:$0xff]  }
 0x105   :  { %1984 = vmatprep.subr.bf16.mxu1 %v3903_v39  ;;  %v4665_v39 = vld [vmem:[%s5335_s2 + $0x554] ss:$24 sps:$4 sm:$0xff]  }
 0x107   :  { %1824 = vmatpush1.bf16.msra.mxu0 %v4630_v30 }
 0x108   :  { %1985 = vmatpush1.bf16.msra.mxu1 %v3912_v41  ;;  %1825 = vmatprep.subr.bf16.mxu0 %v4637_v31  ;;  %v4672_v41 = vld [vmem:[%s5335_s2 + $0x550] ss:$24 sps:$4 sm:$0xff]  }
 0x109   :  { %1986 = vmatprep.subr.bf16.mxu1 %v3921_v43  ;;  %v4679_v43 = vld [vmem:[%s5335_s2 + $0x584] ss:$24 sps:$4 sm:$0xff]  }
 0x10b   :  { %1826 = vmatpush1.bf16.msra.mxu0 %v4644_v33 }
 0x10c   :  { %1987 = vmatpush1.bf16.msra.mxu1 %v3930_v45  ;;  %1827 = vmatprep.subr.bf16.mxu0 %v4651_v35  ;;  %v4686_v45 = vld [vmem:[%s5335_s2 + $0x580] ss:$24 sps:$4 sm:$0xff]  }
 0x10d   :  { %1988 = vmatprep.subr.bf16.mxu1 %v3939_v48  ;;  %v4693_v48 = vld [vmem:[%s5335_s2 + $0x5b4] ss:$24 sps:$4 sm:$0xff]  }
 0x10f   :  { %1828 = vmatpush1.bf16.msra.mxu0 %v4658_v37 }
 0x110   :  { %1989 = vmatpush1.bf16.msra.mxu1 %v3948_v52  ;;  %1829 = vmatprep.subr.bf16.mxu0 %v4665_v39  ;;  %v4700_v52 = vld [vmem:[%s5335_s2 + $0x5b0] ss:$24 sps:$4 sm:$0xff]  }
 0x111   :  { %1990 = vmatprep.subr.bf16.mxu1 %v3957_v56  ;;  %v4707_v56 = vld [vmem:[%s5335_s2 + $0x5e4] ss:$24 sps:$4 sm:$0xff]  }
 0x113   :  { %1830 = vmatpush1.bf16.msra.mxu0 %v4672_v41 }
 0x114   :  { %1991 = vmatpush1.bf16.msra.mxu1 %v3966_v60  ;;  %1831 = vmatprep.subr.bf16.mxu0 %v4679_v43  ;;  %v4714_v60 = vld [vmem:[%s5335_s2 + $0x5e0] ss:$24 sps:$4 sm:$0xff]  }
 0x115   :  { %1992 = vmatprep.subr.bf16.mxu1 %v3975_v0  ;;  %v4721_v0 = vld [vmem:[%s5335_s2 + $0x614] ss:$24 sps:$4 sm:$0xff]  }
 0x117   :  { %1832 = vmatpush1.bf16.msra.mxu0 %v4686_v45 }
 0x118   :  { %1993 = vmatpush1.bf16.msra.mxu1 %v3984_v4  ;;  %1833 = vmatprep.subr.bf16.mxu0 %v4693_v48  ;;  %v4726_v4 = vld [vmem:[%s5334_s1 + $0x8] ss:$20 sps:$4 sm:$0xff]  }
 0x119   :  { %1994 = vmatprep.subr.bf16.mxu1 %v3993_v9  ;;  %v4733_v9 = vld [vmem:[%s5335_s2 + $0x610] ss:$24 sps:$4 sm:$0xff]  }
 0x11b   :  { %1834 = vmatpush1.bf16.msra.mxu0 %v4700_v52 }
 0x11c   :  { %1995 = vmatpush1.bf16.msra.mxu1 %v4002_v13  ;;  %1835 = vmatprep.subr.bf16.mxu0 %v4707_v56  ;;  %v4740_v13 = vld [vmem:[%s5335_s2 + $0x644] ss:$24 sps:$4 sm:$0xff]  }
 0x11d   :  { %1996 = vmatprep.subr.bf16.mxu1 %v4011_v17  ;;  %v4749_v17 = vld [vmem:[%s5335_s2 + $0x640] ss:$24 sps:$4 sm:$0xff]  }
 0x11f   :  { %1836 = vmatpush1.bf16.msra.mxu0 %v4714_v60 }
 0x120   :  { %1997 = vmatpush1.bf16.msra.mxu1 %v4020_v21  ;;  %1848 = vmatprep.subr.bf16.mxu0 %v4721_v0  ;;  %v4756_v21 = vld [vmem:[%s5335_s2 + $0x674] ss:$24 sps:$4 sm:$0xff]  }
 0x121   :  { %2009 = vmatprep.subr.bf16.mxu1 %v4029_v25  ;;  %v5414_v25 = vmov 0  }
 0x122   :  { %1838 = vmatmul.mubr.bf16.vlgmr.msra.gmra.mrb[4].mxu0 %v4038_v29  ;;  %v4765_v29 = vld [vmem:[%s5335_s2 + $0x670] ss:$24 sps:$4 sm:$0xff]  }
 0x123   :  { %1999 = vmatmul.mubr.bf16.vlgmr.msra.gmra.mrb[4].mxu1 %v4726_v4  ;;  %1849 = vmatpush1.bf16.msra.mxu0 %v4733_v9 }
 0x124   :  { %2010 = vmatpush1.bf16.msra.mxu1 %v4043_v32  ;;  %1850 = vmatprep.subr.bf16.mxu0 %v4740_v13  ;;  %v4772_v32 = vld [vmem:[%s5335_s2 + $0x6a4] ss:$24 sps:$4 sm:$0xff]  }
 0x125   :  { %2011 = vmatprep.subr.bf16.mxu1 %v4052_v36  ;;  %1880 = vmatprep.mubr.bf16.mxu0 %v5414_v25  ;;  %v4779_v36 = vld [vmem:[%s5335_s2 + $0x6a0] ss:$24 sps:$4 sm:$0xff]  }
 0x126   :  { %2041 = vmatprep.mubr.bf16.mxu1 %v5414_v25 }
 0x127   :  { %1851 = vmatpush1.bf16.msra.mxu0 %v4749_v17 }
 0x128   :  { %2012 = vmatpush1.bf16.msra.mxu1 %v4063_v40  ;;  %1852 = vmatprep.subr.bf16.mxu0 %v4756_v21  ;;  %v4786_v40 = vld [vmem:[%s5335_s2 + $0x6d4] ss:$24 sps:$4 sm:$0xff]  }
 0x129   :  { %2013 = vmatprep.subr.bf16.mxu1 %v4072_v44  ;;  %v4793_v44 = vld [vmem:[%s5335_s2 + $0x6d0] ss:$24 sps:$4 sm:$0xff]  }
 0x12b   :  { %1853 = vmatpush1.bf16.msra.mxu0 %v4765_v29 }
 0x12c   :  { %2014 = vmatpush1.bf16.msra.mxu1 %v4083_v54  ;;  %1854 = vmatprep.subr.bf16.mxu0 %v4772_v32  ;;  %v4800_v54 = vld [vmem:[%s5335_s2 + $0x704] ss:$24 sps:$4 sm:$0xff]  }
 0x12d   :  { %2015 = vmatprep.subr.bf16.mxu1 %v4092_v62  ;;  %v4807_v62 = vld [vmem:[%s5335_s2 + $0x700] ss:$24 sps:$4 sm:$0xff]  }
 0x12e   :  { %5415 = vst [vmem:[#allocation39_spill] sm:$0xff] %v4807_v62 }
 0x12f   :  { %1855 = vmatpush1.bf16.msra.mxu0 %v4779_v36 }
 0x130   :  { %2016 = vmatpush1.bf16.msra.mxu1 %v4101_v7  ;;  %1856 = vmatprep.subr.bf16.mxu0 %v4786_v40  ;;  %v4814_v7 = vld [vmem:[%s5335_s2 + $0x734] ss:$24 sps:$4 sm:$0xff]  }
 0x131   :  { %2017 = vmatprep.subr.bf16.mxu1 %v4110_v15  ;;  %5416 = vst [vmem:[#allocation40_spill] sm:$0xff] %v4814_v7  ;;  %v4821_v15 = vld [vmem:[%s5335_s2 + $0x730] ss:$24 sps:$4 sm:$0xff]  }
 0x132   :  { %5417 = vst [vmem:[#allocation41_spill] sm:$0xff] %v4821_v15 }
 0x133   :  { %1857 = vmatpush1.bf16.msra.mxu0 %v4793_v44 }
 0x134   :  { %2018 = vmatpush1.bf16.msra.mxu1 %v4119_v23  ;;  %1858 = vmatprep.subr.bf16.mxu0 %v4800_v54  ;;  %v5418_v23 = vld [vmem:[#allocation8_spill] sm:$0xff] }
 0x135   :  { %2019 = vmatprep.subr.bf16.mxu1 %v4128_v34  ;;  %v4828_v34 = vld [vmem:[%s5335_s2 + $0x764] ss:$24 sps:$4 sm:$0xff]  }
 0x136   :  { %5419 = vst [vmem:[#allocation8_spill] sm:$0xff] %v4828_v34 }
 0x137   :  { %1859 = vmatpush1.bf16.msra.mxu0 %v4807_v62  ;;  %v5421_v62 = vld [vmem:[#allocation11_spill] sm:$0xff] }
 0x138   :  { %2020 = vmatpush1.bf16.msra.mxu1 %v4137_v42  ;;  %1860 = vmatprep.subr.bf16.mxu0 %v4814_v7  ;;  %v4835_v42 = vld [vmem:[%s5335_s2 + $0x760] ss:$24 sps:$4 sm:$0xff]   ;;  %v5423_v7 = vld [vmem:[#allocation13_spill] sm:$0xff] }
 0x139   :  { %2021 = vmatprep.subr.bf16.mxu1 %v5418_v23  ;;  %5420 = vst [vmem:[#allocation42_spill] sm:$0xff] %v4835_v42  ;;  %v4842_v23 = vld [vmem:[%s5334_s1 + $0x10] ss:$20 sps:$4 sm:$0xff]  }
 0x13a   :  { %5422 = vst [vmem:[#allocation11_spill] sm:$0xff] %v4842_v23 }
 0x13b   :  { %1861 = vmatpush1.bf16.msra.mxu0 %v4821_v15  ;;  %v5424_v15 = vld [vmem:[#allocation15_spill] sm:$0xff] }
 0x13c   :  { %2022 = vmatpush1.bf16.msra.mxu1 %v4159_v11  ;;  %1862 = vmatprep.subr.bf16.mxu0 %v4828_v34  ;;  %v3392_v11 = vld [vmem:[%s5335_s2 + $0xc] ss:$24 sps:$4 sm:$0xff]  }
 0x13d   :  { %2023 = vmatprep.subr.bf16.mxu1 %v5421_v62  ;;  %v3393_v62 = vld [vmem:[%s5335_s2 + $0x8] ss:$24 sps:$4 sm:$0xff]  }
 0x13e   :  { %v5425_v34 = vld [vmem:[#allocation16_spill] sm:$0xff] }
 0x13f   :  { %1863 = vmatpush1.bf16.msra.mxu0 %v4835_v42  ;;  %v3422_v42 = vld [vmem:[%s5335_s2 + $0x2dc] ss:$24 sps:$4 sm:$0xff]  }
 0x140   :  { %2024 = vmatpush1.bf16.msra.mxu1 %v5423_v7  ;;  %2052 = vmatprep.subr.bf16.mxu0 %v3392_v11  ;;  %v3394_v7 = vld [vmem:[%s5335_s2 + $0x3c] ss:$24 sps:$4 sm:$0xff]  }
 0x141   :  { %2181 = vmatprep.subr.bf16.mxu1 %v5424_v15  ;;  %v5426_v15 = vld [vmem:[#allocation17_spill] sm:$0xff]  ;;  %v5427_v11 = vld [vmem:[#allocation18_spill] sm:$0xff] }
 0x142   :  { %1881 = vmatmul.mubr.bf16.vlgmr.msra.gmra.mrb[4].mxu0 %v4202_v2  ;;  %v3395_v2 = vld [vmem:[%s5335_s2 + $0x38] ss:$24 sps:$4 sm:$0xff]  }
 0x143   :  { %2042 = vmatmul.mubr.bf16.vlgmr.msra.gmra.mrb[4].mxu1 %v4842_v23  ;;  %2053 = vmatpush1.bf16.msra.mxu0 %v3393_v62  ;;  %v3398_v62 = vld [vmem:[%s5335_s2 + $0x9c] ss:$24 sps:$4 sm:$0xff]   ;;  %v3421_v23 = vld [vmem:[%s5335_s2 + $0x2a8] ss:$24 sps:$4 sm:$0xff]  }
 0x144   :  { %2182 = vmatpush1.bf16.msra.mxu1 %v5425_v34  ;;  %2054 = vmatprep.subr.bf16.mxu0 %v3394_v7  ;;  %v3396_v34 = vld [vmem:[%s5335_s2 + $0x6c] ss:$24 sps:$4 sm:$0xff]  }
 0x145   :  { %2183 = vmatprep.subr.bf16.mxu1 %v4218_v27  ;;  %2084 = vmatprep.mubr.bf16.mxu0 %v4223_v46  ;;  %v3397_v27 = vld [vmem:[%s5335_s2 + $0x68] ss:$24 sps:$4 sm:$0xff]  }
 0x146   :  { %2213 = vmatprep.mubr.bf16.mxu1 %v4223_v46  ;;  %v5428_v46 = vld [vmem:[#allocation19_spill] sm:$0xff]  ;;  %v5429_v7 = vld [vmem:[#allocation20_spill] sm:$0xff] }
 0x147   :  { %2055 = vmatpush1.bf16.msra.mxu0 %v3395_v2  ;;  %v3399_v2 = vld [vmem:[%s5335_s2 + $0x98] ss:$24 sps:$4 sm:$0xff]  }
 0x148   :  { %2184 = vmatpush1.bf16.msra.mxu1 %v5426_v15  ;;  %2056 = vmatprep.subr.bf16.mxu0 %v3396_v34  ;;  %v5430_v15 = vld [vmem:[#allocation21_spill] sm:$0xff]  ;;  %v3400_v34 = vld [vmem:[%s5335_s2 + $0xcc] ss:$24 sps:$4 sm:$0xff]  }
 0x149   :  { %2185 = vmatprep.subr.bf16.mxu1 %v5427_v11  ;;  %v5431_v11 = vld [vmem:[#allocation22_spill] sm:$0xff] }
 0x14b   :  { %2057 = vmatpush1.bf16.msra.mxu0 %v3397_v27  ;;  %v3401_v27 = vld [vmem:[%s5335_s2 + $0xc8] ss:$24 sps:$4 sm:$0xff]  }
 0x14c   :  { %2186 = vmatpush1.bf16.msra.mxu1 %v5428_v46  ;;  %2058 = vmatprep.subr.bf16.mxu0 %v3398_v62  ;;  %v5432_v46 = vld [vmem:[#allocation23_spill] sm:$0xff]  ;;  %v3402_v62 = vld [vmem:[%s5335_s2 + $0xfc] ss:$24 sps:$4 sm:$0xff]  }
 0x14d   :  { %2187 = vmatprep.subr.bf16.mxu1 %v5429_v7  ;;  %v5433_v7 = vld [vmem:[#allocation24_spill] sm:$0xff] }
 0x14f   :  { %2059 = vmatpush1.bf16.msra.mxu0 %v3399_v2  ;;  %v3403_v2 = vld [vmem:[%s5335_s2 + $0xf8] ss:$24 sps:$4 sm:$0xff]  }
 0x150   :  { %2188 = vmatpush1.bf16.msra.mxu1 %v5430_v15  ;;  %2060 = vmatprep.subr.bf16.mxu0 %v3400_v34  ;;  %v5434_v15 = vld [vmem:[#allocation25_spill] sm:$0xff]  ;;  %v3404_v34 = vld [vmem:[%s5335_s2 + $0x12c] ss:$24 sps:$4 sm:$0xff]  }
 0x151   :  { %2189 = vmatprep.subr.bf16.mxu1 %v5431_v11  ;;  %v5435_v11 = vld [vmem:[#allocation26_spill] sm:$0xff] }
 0x153   :  { %2061 = vmatpush1.bf16.msra.mxu0 %v3401_v27  ;;  %v3405_v27 = vld [vmem:[%s5335_s2 + $0x128] ss:$24 sps:$4 sm:$0xff]  }
 0x154   :  { %2190 = vmatpush1.bf16.msra.mxu1 %v5432_v46  ;;  %2062 = vmatprep.subr.bf16.mxu0 %v3402_v62  ;;  %v5436_v46 = vld [vmem:[#allocation27_spill] sm:$0xff]  ;;  %v3406_v62 = vld [vmem:[%s5335_s2 + $0x15c] ss:$24 sps:$4 sm:$0xff]  }
 0x155   :  { %2191 = vmatprep.subr.bf16.mxu1 %v5433_v7  ;;  %v5437_v7 = vld [vmem:[#allocation28_spill] sm:$0xff] }
 0x157   :  { %2063 = vmatpush1.bf16.msra.mxu0 %v3403_v2  ;;  %v3407_v2 = vld [vmem:[%s5335_s2 + $0x158] ss:$24 sps:$4 sm:$0xff]  }
 0x158   :  { %2192 = vmatpush1.bf16.msra.mxu1 %v5434_v15  ;;  %2064 = vmatprep.subr.bf16.mxu0 %v3404_v34  ;;  %v5438_v15 = vld [vmem:[#allocation29_spill] sm:$0xff]  ;;  %v3408_v34 = vld [vmem:[%s5335_s2 + $0x18c] ss:$24 sps:$4 sm:$0xff]  }
 0x159   :  { %2193 = vmatprep.subr.bf16.mxu1 %v5435_v11  ;;  %v5439_v11 = vld [vmem:[#allocation30_spill] sm:$0xff] }
 0x15b   :  { %2065 = vmatpush1.bf16.msra.mxu0 %v3405_v27  ;;  %v3409_v27 = vld [vmem:[%s5335_s2 + $0x188] ss:$24 sps:$4 sm:$0xff]  }
 0x15c   :  { %2194 = vmatpush1.bf16.msra.mxu1 %v5436_v46  ;;  %2066 = vmatprep.subr.bf16.mxu0 %v3406_v62  ;;  %v5440_v46 = vld [vmem:[#allocation31_spill] sm:$0xff]  ;;  %v3410_v62 = vld [vmem:[%s5335_s2 + $0x1bc] ss:$24 sps:$4 sm:$0xff]  }
 0x15d   :  { %2195 = vmatprep.subr.bf16.mxu1 %v5437_v7  ;;  %v5441_v7 = vld [vmem:[#allocation32_spill] sm:$0xff] }
 0x15f   :  { %2067 = vmatpush1.bf16.msra.mxu0 %v3407_v2  ;;  %v3411_v2 = vld [vmem:[%s5335_s2 + $0x1b8] ss:$24 sps:$4 sm:$0xff]  }
 0x160   :  { %2196 = vmatpush1.bf16.msra.mxu1 %v5438_v15  ;;  %2068 = vmatprep.subr.bf16.mxu0 %v3408_v34  ;;  %v5442_v15 = vld [vmem:[#allocation33_spill] sm:$0xff]  ;;  %v3412_v34 = vld [vmem:[%s5335_s2 + $0x1ec] ss:$24 sps:$4 sm:$0xff]  }
 0x161   :  { %2197 = vmatprep.subr.bf16.mxu1 %v5439_v11  ;;  %v5443_v11 = vld [vmem:[#allocation34_spill] sm:$0xff] }
 0x163   :  { %2069 = vmatpush1.bf16.msra.mxu0 %v3409_v27  ;;  %v3413_v27 = vld [vmem:[%s5335_s2 + $0x1e8] ss:$24 sps:$4 sm:$0xff]  }
 0x164   :  { %2198 = vmatpush1.bf16.msra.mxu1 %v5440_v46  ;;  %2070 = vmatprep.subr.bf16.mxu0 %v3410_v62  ;;  %v5444_v46 = vld [vmem:[#allocation35_spill] sm:$0xff]  ;;  %v3414_v62 = vld [vmem:[%s5335_s2 + $0x21c] ss:$24 sps:$4 sm:$0xff]  }
 0x165   :  { %2199 = vmatprep.subr.bf16.mxu1 %v5441_v7  ;;  %v5445_v7 = vld [vmem:[#allocation36_spill] sm:$0xff] }
 0x167   :  { %2071 = vmatpush1.bf16.msra.mxu0 %v3411_v2  ;;  %v3415_v2 = vld [vmem:[%s5335_s2 + $0x218] ss:$24 sps:$4 sm:$0xff]  }
 0x168   :  { %2200 = vmatpush1.bf16.msra.mxu1 %v5442_v15  ;;  %2072 = vmatprep.subr.bf16.mxu0 %v3412_v34  ;;  %v3416_v15 = vld [vmem:[%s5335_s2 + $0x24c] ss:$24 sps:$4 sm:$0xff]   ;;  %v3417_v34 = vld [vmem:[%s5335_s2 + $0x248] ss:$24 sps:$4 sm:$0xff]  }
 0x169   :  { %2201 = vmatprep.subr.bf16.mxu1 %v5443_v11  ;;  %v3418_v11 = vld [vmem:[%s5335_s2 + $0x27c] ss:$24 sps:$4 sm:$0xff]  }
 0x16b   :  { %2073 = vmatpush1.bf16.msra.mxu0 %v3413_v27 }
 0x16c   :  { %2202 = vmatpush1.bf16.msra.mxu1 %v5444_v46  ;;  %2074 = vmatprep.subr.bf16.mxu0 %v3414_v62 }
 0x16d   :  { %2203 = vmatprep.subr.bf16.mxu1 %v5445_v7 }
 0x16f   :  { %2075 = vmatpush1.bf16.msra.mxu0 %v3415_v2 }
 0x170   :  { %2204 = vmatpush1.bf16.msra.mxu1 %v4416_v50  ;;  %2076 = vmatprep.subr.bf16.mxu0 %v3416_v15 }
 0x171   :  { %2205 = vmatprep.subr.bf16.mxu1 %v4425_v58 }
 0x173   :  { %2077 = vmatpush1.bf16.msra.mxu0 %v3417_v34 }
 0x174   :  { %2206 = vmatpush1.bf16.msra.mxu1 %v4434_v19  ;;  %2078 = vmatprep.subr.bf16.mxu0 %v3418_v11 }
 0x175   :  { %2207 = vmatprep.subr.bf16.mxu1 %v4441_v47  ;;  %v4958_v50 = vpop.f32.mrb[0].mxu0  ;;  %v3419_v47 = vld [vmem:[%s5335_s2 + $0x278] ss:$24 sps:$4 sm:$0xff]  }
 0x176   :  { %v4960_v27 = vpop.f32.mrb[0].mxu1  ;;  %v2310_v58 = vmul.f32 %v4958_v50, %v4958_v50  ;;  %v4964_v46 = vpop.f32.mrb[1].mxu0 }
 0x177   :  { %5446 = vst [vmem:[#allocation13_spill] sm:$0xff] %v4960_v27  ;;  %5447 = vst [vmem:[#allocation15_spill] sm:$0xff] %v4964_v46  ;;  %v4966_v62 = vpop.f32.mrb[1].mxu1  ;;  %v4970_v7 = vpop.f32.mrb[2].mxu0  ;;  %2079 = vmatpush1.bf16.msra.mxu0 %v3419_v47  ;;  %v3420_v27 = vld [vmem:[%s5335_s2 + $0x2ac] ss:$24 sps:$4 sm:$0xff]  }
 0x178   :  { %v2316_v19 = vmul.f32 %v4966_v62, %v4966_v62  ;;  %v4972_v2 = vpop.f32.mrb[2].mxu1  ;;  %2208 = vmatpush1.bf16.msra.mxu1 %v4448_v38  ;;  %v2313_v15 = vmul.f32 %v4970_v7, %v4970_v7  ;;  %v4980_v34 = vpop.f32.mrb[3].mxu0  ;;  %2080 = vmatprep.subr.bf16.mxu0 %v3420_v27  ;;  %v3423_v27 = vld [vmem:[%s5335_s2 + $0x2d8] ss:$24 sps:$4 sm:$0xff]  }
 0x179   :  { %5448 = vst [vmem:[#allocation16_spill] sm:$0xff] %v4972_v2  ;;  %5449 = vst [vmem:[#allocation17_spill] sm:$0xff] %v4980_v34  ;;  %v4982_v11 = vpop.f32.mrb[3].mxu1  ;;  %2209 = vmatprep.subr.bf16.mxu1 %v4455_v49  ;;  %v5450_v34 = vld [vmem:[#allocation37_spill] sm:$0xff] }
 0x17a   :  { %v2322_v2 = vadd.f32 %v2316_v19, %v2310_v58  ;;  %v2319_v47 = vmul.f32 %v4982_v11, %v4982_v11  ;;  %v5451_v58 = vld [vmem:[#allocation38_spill] sm:$0xff] }
 0x17b   :  { %2081 = vmatpush1.bf16.msra.mxu0 %v3421_v23  ;;  %v3424_v23 = vld [vmem:[%s5335_s2 + $0x30c] ss:$24 sps:$4 sm:$0xff]  }
 0x17c   :  { %v2346_v46 = vmax.f32 %v2322_v2, 1e-24  ;;  %v2325_v38 = vadd.f32 %v2319_v47, %v2313_v15  ;;  %2210 = vmatpush1.bf16.msra.mxu1 %v5450_v34  ;;  %2082 = vmatprep.subr.bf16.mxu0 %v3422_v42  ;;  %v3426_v42 = vld [vmem:[%s5335_s2 + $0x33c] ss:$24 sps:$4 sm:$0xff]   ;;  %v3429_v2 = vld [vmem:[%s5335_s2 + $0x368] ss:$24 sps:$4 sm:$0xff]  }
 0x17d   :  { %2211 = vmatprep.subr.bf16.mxu1 %v4469_v53  ;;  %v3425_v53 = vld [vmem:[%s5335_s2 + $0x308] ss:$24 sps:$4 sm:$0xff]   ;;  %v3430_v15 = vld [vmem:[%s5335_s2 + $0x39c] ss:$24 sps:$4 sm:$0xff]   ;;  %v3431_v47 = vld [vmem:[%s5335_s2 + $0x398] ss:$24 sps:$4 sm:$0xff]  }
 0x17e   :  { %3296 = vlog2.f32 %v2346_v46  ;;  %v2349_v49 = vmax.f32 %v2325_v38, 1e-24  ;;  %v3428_v46 = vld [vmem:[%s5335_s2 + $0x36c] ss:$24 sps:$4 sm:$0xff]   ;;  %v3434_v38 = vld [vmem:[%s5335_s2 + $0x3fc] ss:$24 sps:$4 sm:$0xff]  }
 0x17f   :  { %2083 = vmatpush1.bf16.msra.mxu0 %v3423_v27 }
 0x180   :  { %3298 = vlog2.f32 %v2349_v49  ;;  %2212 = vmatpush1.bf16.msra.mxu1 %v5451_v58  ;;  %2095 = vmatprep.subr.bf16.mxu0 %v3424_v23  ;;  %v3437_v58 = vld [vmem:[%s5335_s2 + $0x428] ss:$24 sps:$4 sm:$0xff]   ;;  %v5457_v23 = vld [vmem:[#allocation41_spill] sm:$0xff] }
 0x181   :  { %2224 = vmatprep.subr.bf16.mxu1 %v4483_v57 }
 0x182   :  { %2085 = vmatmul.mubr.bf16.vlgmr.msra.gmra.mrb[8].mxu0 %v4488_v51 }
 0x183   :  { %2214 = vmatmul.mubr.bf16.vlgmr.msra.gmra.mrb[8].mxu1 %v4488_v51  ;;  %2096 = vmatpush1.bf16.msra.mxu0 %v3425_v53  ;;  %v3427_v51 = vld [vmem:[%s5335_s2 + $0x338] ss:$24 sps:$4 sm:$0xff]   ;;  %v5459_v53 = vld [vmem:[#allocation8_spill] sm:$0xff] }
 0x184   :  { %2225 = vmatpush1.bf16.msra.mxu1 %v4495_v59  ;;  %2097 = vmatprep.subr.bf16.mxu0 %v3426_v42  ;;  %v5460_v42 = vld [vmem:[#allocation14_spill] sm:$0xff] }
 0x185   :  { %2226 = vmatprep.subr.bf16.mxu1 %v4502_v61  ;;  %2127 = vmatprep.mubr.bf16.mxu0 %v4507_v55 }
 0x186   :  { %2256 = vmatprep.mubr.bf16.mxu1 %v4507_v55 }
 0x187   :  { %2098 = vmatpush1.bf16.msra.mxu0 %v3427_v51 }
 0x188   :  { %v3297_v57 = vpop.eup %3296  ;;  %2227 = vmatpush1.bf16.msra.mxu1 %v4516_v63  ;;  %2099 = vmatprep.subr.bf16.mxu0 %v3428_v46 }
 0x189   :  { %v5022_v59 = vmul.f32 0.6931472, %v3297_v57  ;;  %2228 = vmatprep.subr.bf16.mxu1 %v4523_v1  ;;  %v5461_v57 = vld [vmem:[#allocation42_spill] sm:$0xff] }
 0x18a   :  { %v3299_v61 = vpop.eup %3298 }
 0x18b   :  { %v2430_v55 = vmul.f32 -0.35, %v5022_v59  ;;  %v5029_v19 = vmul.f32 0.6931472, %v3299_v61  ;;  %2100 = vmatpush1.bf16.msra.mxu0 %v3429_v2  ;;  %v5463_v61 = vld [vmem:[#allocation15_spill] sm:$0xff] }
 0x18c   :  { %2229 = vmatpush1.bf16.msra.mxu1 %v4532_v3  ;;  %2101 = vmatprep.subr.bf16.mxu0 %v3430_v15  ;;  %v3432_v3 = vld [vmem:[%s5335_s2 + $0x3cc] ss:$24 sps:$4 sm:$0xff]  }
 0x18d   :  { %v2436_v63 = vmul.f32 1.442695, %v2430_v55  ;;  %2230 = vmatprep.subr.bf16.mxu1 %v4539_v5  ;;  %v2433_v1 = vmul.f32 -0.35, %v5029_v19  ;;  %v3433_v5 = vld [vmem:[%s5335_s2 + $0x3c8] ss:$24 sps:$4 sm:$0xff]   ;;  %v2311_v55 = vmul.f32 %v5463_v61, %v5463_v61 }
 0x18f   :  { %3300 = vpow2.f32 %v2436_v63  ;;  %v2442_v34 = vmul.f32 1.442695, %v2433_v1  ;;  %2102 = vmatpush1.bf16.msra.mxu0 %v3431_v47  ;;  %v5464_v1 = vld [vmem:[#allocation13_spill] sm:$0xff] }
 0x190   :  { %2231 = vmatpush1.bf16.msra.mxu1 %v4546_v6  ;;  %2103 = vmatprep.subr.bf16.mxu0 %v3432_v3  ;;  %v3435_v6 = vld [vmem:[%s5335_s2 + $0x3f8] ss:$24 sps:$4 sm:$0xff]  }
 0x191   :  { %2232 = vmatprep.subr.bf16.mxu1 %v4553_v8  ;;  %3302 = vpow2.f32 %v2442_v34  ;;  %v3436_v8 = vld [vmem:[%s5335_s2 + $0x42c] ss:$24 sps:$4 sm:$0xff]   ;;  %v2312_v34 = vmul.f32 %v5464_v1, %v5464_v1 }
 0x193   :  { %2104 = vmatpush1.bf16.msra.mxu0 %v3433_v5 }
 0x194   :  { %2233 = vmatpush1.bf16.msra.mxu1 %v4560_v10  ;;  %2105 = vmatprep.subr.bf16.mxu0 %v3434_v38  ;;  %v5465_v38 = vld [vmem:[#allocation17_spill] sm:$0xff] }
 0x195   :  { %2234 = vmatprep.subr.bf16.mxu1 %v4567_v12 }
 0x197   :  { %2106 = vmatpush1.bf16.msra.mxu0 %v3435_v6  ;;  %v2314_v6 = vmul.f32 %v5465_v38, %v5465_v38 }
 0x198   :  { %2235 = vmatpush1.bf16.msra.mxu1 %v4574_v14  ;;  %2107 = vmatprep.subr.bf16.mxu0 %v3436_v8 }
 0x199   :  { %2236 = vmatprep.subr.bf16.mxu1 %v4581_v16  ;;  %v3301_v10 = vpop.eup %3300  ;;  %v3438_v16 = vld [vmem:[%s5335_s2 + $0x45c] ss:$24 sps:$4 sm:$0xff]  }
 0x19a   :  { %v5065_v49 = vmul.f32 %v3301_v10, %v4966_v62  ;;  %v5068_v12 = vmul.f32 %v3301_v10, %v4958_v50  ;;  %v3439_v62 = vld [vmem:[%s5335_s2 + $0x458] ss:$24 sps:$4 sm:$0xff]  }
 0x19b   :  { %v3303_v27 = vpop.eup %3302  ;;  %2108 = vmatpush1.bf16.msra.mxu0 %v3437_v58 }
 0x19c   :  { %2237 = vmatpush1.bf16.msra.mxu1 %v4588_v18  ;;  %v5075_v14 = vmul.f32 %v3303_v27, %v4982_v11  ;;  %2109 = vmatprep.subr.bf16.mxu0 %v3438_v16  ;;  %v5082_v50 = vmul.f32 %v3303_v27, %v4970_v7  ;;  %v3440_v18 = vld [vmem:[%s5335_s2 + $0x48c] ss:$24 sps:$4 sm:$0xff]   ;;  %v3442_v7 = vld [vmem:[%s5335_s2 + $0x4bc] ss:$24 sps:$4 sm:$0xff]  }
 0x19d   :  { %2238 = vmatprep.subr.bf16.mxu1 %v4595_v20  ;;  %v3441_v20 = vld [vmem:[%s5335_s2 + $0x488] ss:$24 sps:$4 sm:$0xff]   ;;  %v5456_v11 = vld [vmem:[#allocation10_spill] sm:$0xff] }
 0x19e   :  { %v5466_v16 = vld [vmem:[#allocation16_spill] sm:$0xff] }
 0x19f   :  { %2110 = vmatpush1.bf16.msra.mxu0 %v3439_v62  ;;  %v2315_v62 = vmul.f32 %v5466_v16, %v5466_v16 }
 0x1a0   :  { %2239 = vmatpush1.bf16.msra.mxu1 %v4602_v22  ;;  %2111 = vmatprep.subr.bf16.mxu0 %v3440_v18  ;;  %v3443_v22 = vld [vmem:[%s5335_s2 + $0x4b8] ss:$24 sps:$4 sm:$0xff]  }
 0x1a1   :  { %2240 = vmatprep.subr.bf16.mxu1 %v4609_v24  ;;  %v3444_v24 = vld [vmem:[%s5335_s2 + $0x4ec] ss:$24 sps:$4 sm:$0xff]  }
 0x1a3   :  { %2112 = vmatpush1.bf16.msra.mxu0 %v3441_v20 }
 0x1a4   :  { %2241 = vmatpush1.bf16.msra.mxu1 %v4616_v26  ;;  %2113 = vmatprep.subr.bf16.mxu0 %v3442_v7  ;;  %v3445_v26 = vld [vmem:[%s5335_s2 + $0x4e8] ss:$24 sps:$4 sm:$0xff]  }
 0x1a5   :  { %2242 = vmatprep.subr.bf16.mxu1 %v4623_v28  ;;  %v3446_v28 = vld [vmem:[%s5335_s2 + $0x51c] ss:$24 sps:$4 sm:$0xff]  }
 0x1a7   :  { %2114 = vmatpush1.bf16.msra.mxu0 %v3443_v22 }
 0x1a8   :  { %2243 = vmatpush1.bf16.msra.mxu1 %v4630_v30  ;;  %2115 = vmatprep.subr.bf16.mxu0 %v3444_v24  ;;  %v3447_v30 = vld [vmem:[%s5335_s2 + $0x518] ss:$24 sps:$4 sm:$0xff]  }
 0x1a9   :  { %2244 = vmatprep.subr.bf16.mxu1 %v4637_v31  ;;  %v3448_v31 = vld [vmem:[%s5335_s2 + $0x54c] ss:$24 sps:$4 sm:$0xff]  }
 0x1ab   :  { %2116 = vmatpush1.bf16.msra.mxu0 %v3445_v26 }
 0x1ac   :  { %2245 = vmatpush1.bf16.msra.mxu1 %v4644_v33  ;;  %2117 = vmatprep.subr.bf16.mxu0 %v3446_v28  ;;  %v3449_v33 = vld [vmem:[%s5335_s2 + $0x548] ss:$24 sps:$4 sm:$0xff]  }
 0x1ad   :  { %2246 = vmatprep.subr.bf16.mxu1 %v4651_v35  ;;  %v3450_v35 = vld [vmem:[%s5335_s2 + $0x57c] ss:$24 sps:$4 sm:$0xff]  }
 0x1af   :  { %2118 = vmatpush1.bf16.msra.mxu0 %v3447_v30 }
 0x1b0   :  { %2247 = vmatpush1.bf16.msra.mxu1 %v4658_v37  ;;  %2119 = vmatprep.subr.bf16.mxu0 %v3448_v31  ;;  %v3451_v37 = vld [vmem:[%s5335_s2 + $0x578] ss:$24 sps:$4 sm:$0xff]  }
 0x1b1   :  { %2248 = vmatprep.subr.bf16.mxu1 %v4665_v39  ;;  %v3452_v39 = vld [vmem:[%s5335_s2 + $0x5ac] ss:$24 sps:$4 sm:$0xff]  }
 0x1b3   :  { %2120 = vmatpush1.bf16.msra.mxu0 %v3449_v33 }
 0x1b4   :  { %2249 = vmatpush1.bf16.msra.mxu1 %v4672_v41  ;;  %2121 = vmatprep.subr.bf16.mxu0 %v3450_v35  ;;  %v3453_v41 = vld [vmem:[%s5335_s2 + $0x5a8] ss:$24 sps:$4 sm:$0xff]  }
 0x1b5   :  { %2250 = vmatprep.subr.bf16.mxu1 %v4679_v43  ;;  %v3454_v43 = vld [vmem:[%s5335_s2 + $0x5dc] ss:$24 sps:$4 sm:$0xff]  }
 0x1b7   :  { %2122 = vmatpush1.bf16.msra.mxu0 %v3451_v37 }
 0x1b8   :  { %2251 = vmatpush1.bf16.msra.mxu1 %v4686_v45  ;;  %2123 = vmatprep.subr.bf16.mxu0 %v3452_v39  ;;  %v3455_v45 = vld [vmem:[%s5335_s2 + $0x5d8] ss:$24 sps:$4 sm:$0xff]  }
 0x1b9   :  { %2252 = vmatprep.subr.bf16.mxu1 %v4693_v48  ;;  %v3456_v48 = vld [vmem:[%s5335_s2 + $0x60c] ss:$24 sps:$4 sm:$0xff]  }
 0x1bb   :  { %2124 = vmatpush1.bf16.msra.mxu0 %v3453_v41 }
 0x1bc   :  { %2253 = vmatpush1.bf16.msra.mxu1 %v4700_v52  ;;  %2125 = vmatprep.subr.bf16.mxu0 %v3454_v43  ;;  %v3457_v52 = vld [vmem:[%s5335_s2 + $0x608] ss:$24 sps:$4 sm:$0xff]  }
 0x1bd   :  { %2254 = vmatprep.subr.bf16.mxu1 %v4707_v56  ;;  %v3458_v56 = vld [vmem:[%s5335_s2 + $0x63c] ss:$24 sps:$4 sm:$0xff]  }
 0x1bf   :  { %2126 = vmatpush1.bf16.msra.mxu0 %v3455_v45 }
 0x1c0   :  { %2255 = vmatpush1.bf16.msra.mxu1 %v4714_v60  ;;  %2138 = vmatprep.subr.bf16.mxu0 %v3456_v48  ;;  %v3459_v60 = vld [vmem:[%s5335_s2 + $0x638] ss:$24 sps:$4 sm:$0xff]  }
 0x1c1   :  { %2267 = vmatprep.subr.bf16.mxu1 %v4721_v0  ;;  %v3460_v0 = vld [vmem:[%s5335_s2 + $0x66c] ss:$24 sps:$4 sm:$0xff]  }
 0x1c2   :  { %2128 = vmatmul.mubr.bf16.vlgmr.msra.gmra.mrb[8].mxu0 %v4726_v4 }
 0x1c3   :  { %2257 = vmatmul.mubr.bf16.vlgmr.msra.gmra.mrb[8].mxu1 %v4726_v4  ;;  %2139 = vmatpush1.bf16.msra.mxu0 %v3457_v52  ;;  %v3461_v4 = vld [vmem:[%s5335_s2 + $0x668] ss:$24 sps:$4 sm:$0xff]  }
 0x1c4   :  { %2268 = vmatpush1.bf16.msra.mxu1 %v4733_v9  ;;  %2140 = vmatprep.subr.bf16.mxu0 %v3458_v56  ;;  %v3462_v9 = vld [vmem:[%s5335_s2 + $0x69c] ss:$24 sps:$4 sm:$0xff]  }
 0x1c5   :  { %2269 = vmatprep.subr.bf16.mxu1 %v4740_v13  ;;  %2170 = vmatprep.mubr.bf16.mxu0 %v5414_v25  ;;  %v3463_v13 = vld [vmem:[%s5335_s2 + $0x698] ss:$24 sps:$4 sm:$0xff]  }
 0x1c6   :  { %2299 = vmatprep.mubr.bf16.mxu1 %v5414_v25  ;;  %v3466_v25 = vld [vmem:[%s5335_s2 + $0x6fc] ss:$24 sps:$4 sm:$0xff]  }
 0x1c7   :  { %2141 = vmatpush1.bf16.msra.mxu0 %v3459_v60 }
 0x1c8   :  { %2270 = vmatpush1.bf16.msra.mxu1 %v4749_v17  ;;  %2142 = vmatprep.subr.bf16.mxu0 %v3460_v0  ;;  %v3464_v17 = vld [vmem:[%s5335_s2 + $0x6cc] ss:$24 sps:$4 sm:$0xff]  }
 0x1c9   :  { %2271 = vmatprep.subr.bf16.mxu1 %v4756_v21  ;;  %v3465_v21 = vld [vmem:[%s5335_s2 + $0x6c8] ss:$24 sps:$4 sm:$0xff]  }
 0x1cb   :  { %2143 = vmatpush1.bf16.msra.mxu0 %v3461_v4 }
 0x1cc   :  { %2272 = vmatpush1.bf16.msra.mxu1 %v4765_v29  ;;  %2144 = vmatprep.subr.bf16.mxu0 %v3462_v9  ;;  %v5452_v29 = vld [vmem:[#allocation7_spill] sm:$0xff] }
 0x1cd   :  { %2273 = vmatprep.subr.bf16.mxu1 %v4772_v32  ;;  %v5453_v32 = vld [vmem:[#allocation39_spill] sm:$0xff] }
 0x1cf   :  { %2145 = vmatpush1.bf16.msra.mxu0 %v3463_v13 }
 0x1d0   :  { %2274 = vmatpush1.bf16.msra.mxu1 %v4779_v36  ;;  %2146 = vmatprep.subr.bf16.mxu0 %v3464_v17  ;;  %v5454_v36 = vld [vmem:[#allocation9_spill] sm:$0xff] }
 0x1d1   :  { %2275 = vmatprep.subr.bf16.mxu1 %v4786_v40  ;;  %v5455_v40 = vld [vmem:[#allocation40_spill] sm:$0xff] }
 0x1d3   :  { %2147 = vmatpush1.bf16.msra.mxu0 %v3465_v21 }
 0x1d4   :  { %2276 = vmatpush1.bf16.msra.mxu1 %v4793_v44  ;;  %2148 = vmatprep.subr.bf16.mxu0 %v3466_v25  ;;  %v5458_v44 = vld [vmem:[#allocation12_spill] sm:$0xff] }
 0x1d5   :  { %2277 = vmatprep.subr.bf16.mxu1 %v4800_v54  ;;  %v5462_v54 = vld [vmem:[#allocation11_spill] sm:$0xff] }
 0x1d7   :  { %2149 = vmatpush1.bf16.msra.mxu0 %v5452_v29 }
 0x1d8   :  { %2278 = vmatpush1.bf16.msra.mxu1 %v5453_v32  ;;  %2150 = vmatprep.subr.bf16.mxu0 %v5454_v36 }
 0x1d9   :  { %2279 = vmatprep.subr.bf16.mxu1 %v5455_v40 }
 0x1db   :  { %2151 = vmatpush1.bf16.msra.mxu0 %v5456_v11 }
 0x1dc   :  { %2280 = vmatpush1.bf16.msra.mxu1 %v5457_v23  ;;  %2152 = vmatprep.subr.bf16.mxu0 %v5458_v44 }
 0x1dd   :  { %2281 = vmatprep.subr.bf16.mxu1 %v5459_v53 }
 0x1df   :  { %2153 = vmatpush1.bf16.msra.mxu0 %v5460_v42 }
 0x1e0   :  { %2282 = vmatpush1.bf16.msra.mxu1 %v5461_v57 }
 0x1e2   :  { %2171 = vmatmul.mubr.bf16.vlgmr.msra.gmra.mrb[8].mxu0 %v5462_v54 }
 0x1e3   :  { %2300 = vmatmul.mubr.bf16.vlgmr.msra.gmra.mrb[8].mxu1 %v5462_v54 }
 0x215   :  { %v1882_v51 = vpop.f32.mrb[4].mxu0 }
 0x216   :  { %v5212_v46 = vpop.f32.mrb[4].mxu1  ;;  %v2317_v2 = vmul.f32 %v1882_v51, %v1882_v51  ;;  %v1884_v63 = vpop.f32.mrb[5].mxu0 }
 0x217   :  { %v5216_v15 = vpop.f32.mrb[5].mxu1  ;;  %v2318_v47 = vmul.f32 %v1884_v63, %v1884_v63  ;;  %v1886_v3 = vpop.f32.mrb[6].mxu0 }
 0x218   :  { %v5220_v5 = vpop.f32.mrb[6].mxu1  ;;  %v2323_v8 = vadd.f32 %v2317_v2, %v2311_v55  ;;  %v2320_v10 = vmul.f32 %v1886_v3, %v1886_v3  ;;  %v1888_v27 = vpop.f32.mrb[7].mxu0 }
 0x219   :  { %v5224_v58 = vpop.f32.mrb[7].mxu1  ;;  %v2324_v18 = vadd.f32 %v2318_v47, %v2312_v34  ;;  %v2321_v20 = vmul.f32 %v1888_v27, %v1888_v27  ;;  %v2331_v34 = vmul.f32 %v5220_v5, %v5220_v5 }
 0x21a   :  { %v2347_v7 = vmax.f32 %v2323_v8, 1e-24  ;;  %v2326_v22 = vadd.f32 %v2320_v10, %v2314_v6  ;;  %v2332_v8 = vmul.f32 %v5224_v58, %v5224_v58 }
 0x21b   :  { %v2348_v24 = vmax.f32 %v2324_v18, 1e-24  ;;  %v2327_v26 = vadd.f32 %v2321_v20, %v2315_v62 }
 0x21c   :  { %3304 = vlog2.f32 %v2347_v7  ;;  %v2350_v28 = vmax.f32 %v2326_v22, 1e-24 }
 0x21d   :  { %3306 = vlog2.f32 %v2348_v24  ;;  %v2351_v30 = vmax.f32 %v2327_v26, 1e-24 }
 0x21e   :  { %3308 = vlog2.f32 %v2350_v28 }
 0x21f   :  { %3310 = vlog2.f32 %v2351_v30 }
 0x226   :  { %v3305_v31 = vpop.eup %3304 }
 0x227   :  { %v3307_v33 = vpop.eup %3306  ;;  %v5228_v35 = vmul.f32 0.6931472, %v3305_v31 }
 0x228   :  { %v3309_v37 = vpop.eup %3308  ;;  %v5230_v39 = vmul.f32 0.6931472, %v3307_v33 }
 0x229   :  { %v3311_v41 = vpop.eup %3310  ;;  %v2431_v43 = vmul.f32 -0.35, %v5228_v35  ;;  %v5233_v45 = vmul.f32 0.6931472, %v3309_v37 }
 0x22a   :  { %v2432_v48 = vmul.f32 -0.35, %v5230_v39  ;;  %v5236_v52 = vmul.f32 0.6931472, %v3311_v41 }
 0x22b   :  { %v2438_v56 = vmul.f32 1.442695, %v2431_v43  ;;  %v2434_v0 = vmul.f32 -0.35, %v5233_v45 }
 0x22c   :  { %v2440_v60 = vmul.f32 1.442695, %v2432_v48  ;;  %v2435_v4 = vmul.f32 -0.35, %v5236_v52 }
 0x22d   :  { %3312 = vpow2.f32 %v2438_v56  ;;  %v2444_v9 = vmul.f32 1.442695, %v2434_v0  ;;  %v2382_v56 = vmul.f32 0.15, %v5022_v59  ;;  %v2383_v0 = vmul.f32 0.15, %v5228_v35 }
 0x22e   :  { %3314 = vpow2.f32 %v2440_v60  ;;  %v2446_v13 = vmul.f32 1.442695, %v2435_v4  ;;  %v2385_v60 = vmul.f32 0.15, %v5029_v19  ;;  %v2384_v4 = vmul.f32 0.15, %v5230_v39 }
 0x22f   :  { %3316 = vpow2.f32 %v2444_v9  ;;  %v2388_v9 = vmul.f32 1.442695, %v2382_v56 }
 0x230   :  { %3318 = vpow2.f32 %v2446_v13  ;;  %v2386_v13 = vmul.f32 0.15, %v5233_v45 }
 0x232   :  { %v2396_v59 = vmul.f32 1.442695, %v2386_v13 }
 0x237   :  { %v3313_v17 = vpop.eup %3312 }
 0x238   :  { %v5240_v21 = vmul.f32 %v3313_v17, %v1882_v51  ;;  %v5243_v25 = vmul.f32 %v3313_v17, %v5463_v61  ;;  %v3315_v29 = vpop.eup %3314  ;;  %v2329_v51 = vmul.f32 %v5216_v15, %v5216_v15  ;;  %v2394_v17 = vmul.f32 1.442695, %v2385_v60 }
 0x239   :  { %v5245_v32 = vmul.f32 %v3315_v29, %v1884_v63  ;;  %v5248_v36 = vmul.f32 %v3315_v29, %v5464_v1  ;;  %v3317_v40 = vpop.eup %3316  ;;  %v2328_v1 = vmul.f32 %v5212_v46, %v5212_v46  ;;  %v2387_v29 = vmul.f32 0.15, %v5236_v52 }
 0x23a   :  { %v5250_v11 = vmul.f32 %v3317_v40, %v1886_v3  ;;  %v5253_v23 = vmul.f32 %v3317_v40, %v5465_v38  ;;  %v3319_v44 = vpop.eup %3318  ;;  %v2390_v40 = vmul.f32 1.442695, %v2383_v0 }
 0x23b   :  { %v5255_v53 = vmul.f32 %v3319_v44, %v1888_v27  ;;  %v5258_v42 = vmul.f32 %v3319_v44, %v5466_v16 }
 0x2b5   :  { %v5260_v57 = vpop.f32.mrb[8].mxu0 }
 0x2b6   :  { %v5262_v54 = vpop.f32.mrb[8].mxu1  ;;  %v2330_v61 = vmul.f32 %v5260_v57, %v5260_v57  ;;  %v5270_v2 = vpop.f32.mrb[9].mxu0 }
 0x2b7   :  { %v2335_v55 = vmul.f32 %v5262_v54, %v5262_v54  ;;  %v5272_v63 = vpop.f32.mrb[9].mxu1  ;;  %v2334_v47 = vmul.f32 %v5270_v2, %v5270_v2  ;;  %v5282_v38 = vpop.f32.mrb[10].mxu0 }
 0x2b8   :  { %v2336_v3 = vmul.f32 %v5272_v63, %v5272_v63  ;;  %v5284_v6 = vpop.f32.mrb[10].mxu1  ;;  %v2333_v27 = vmul.f32 %v5282_v38, %v5282_v38  ;;  %v5292_v62 = vpop.f32.mrb[11].mxu0 }
 0x2b9   :  { %v2341_v10 = vadd.f32 %v2335_v55, %v2329_v51  ;;  %v2338_v16 = vmul.f32 %v5284_v6, %v5284_v6  ;;  %v5294_v18 = vpop.f32.mrb[11].mxu1  ;;  %v2340_v20 = vadd.f32 %v2334_v47, %v2328_v1  ;;  %v2337_v22 = vmul.f32 %v5292_v62, %v5292_v62 }
 0x2ba   :  { %v2342_v7 = vadd.f32 %v2336_v3, %v2330_v61  ;;  %v2339_v24 = vmul.f32 %v5294_v18, %v5294_v18  ;;  %v2392_v51 = vmul.f32 1.442695, %v2384_v4  ;;  %v2398_v1 = vmul.f32 1.442695, %v2387_v29 }
 0x2bb   :  { %v2365_v26 = vmax.f32 %v2341_v10, 1e-24  ;;  %v2344_v28 = vadd.f32 %v2338_v16, %v2332_v8  ;;  %v2364_v30 = vmax.f32 %v2340_v20, 1e-24  ;;  %v2343_v33 = vadd.f32 %v2337_v22, %v2331_v34 }
 0x2bc   :  { %v2366_v31 = vmax.f32 %v2342_v7, 1e-24  ;;  %v2345_v37 = vadd.f32 %v2339_v24, %v2333_v27 }
 0x2bd   :  { %3320 = vlog2.f32 %v2365_v26  ;;  %v2368_v41 = vmax.f32 %v2344_v28, 1e-24  ;;  %v2367_v43 = vmax.f32 %v2343_v33, 1e-24 }
 0x2be   :  { %3322 = vlog2.f32 %v2364_v30  ;;  %v2369_v48 = vmax.f32 %v2345_v37, 1e-24 }
 0x2bf   :  { %3324 = vlog2.f32 %v2366_v31 }
 0x2c0   :  { %3326 = vlog2.f32 %v2368_v41 }
 0x2c1   :  { %3328 = vlog2.f32 %v2367_v43 }
 0x2c2   :  { %3330 = vlog2.f32 %v2369_v48 }
 0x2c3   :  { %3332 = vpow2.f32 %v2388_v9 }
 0x2c4   :  { %3334 = vpow2.f32 %v2394_v17 }
 0x2c5   :  { %3336 = vpow2.f32 %v2390_v40 }
 0x2c6   :  { %3338 = vpow2.f32 %v2392_v51 }
 0x2c7   :  { %v3321_v44 = vpop.eup %3320  ;;  %3340 = vpow2.f32 %v2396_v59 }
 0x2c8   :  { %v3323_v61 = vpop.eup %3322  ;;  %v2373_v55 = vmul.f32 0.6931472, %v3321_v44  ;;  %3342 = vpow2.f32 %v2398_v1 }
 0x2c9   :  { %v3325_v19 = vpop.eup %3324  ;;  %v2371_v35 = vmul.f32 0.6931472, %v3323_v61 }
 0x2ca   :  { %v3327_v34 = vpop.eup %3326  ;;  %v2401_v39 = vmul.f32 0.15, %v2373_v55  ;;  %v2449_v47 = vmul.f32 -0.35, %v2373_v55  ;;  %v2375_v3 = vmul.f32 0.6931472, %v3325_v19 }
 0x2cb   :  { %v3329_v45 = vpop.eup %3328  ;;  %v2400_v8 = vmul.f32 0.15, %v2371_v35  ;;  %v2448_v52 = vmul.f32 -0.35, %v2371_v35  ;;  %v2379_v10 = vmul.f32 0.6931472, %v3327_v34 }
 0x2cc   :  { %v3331_v27 = vpop.eup %3330  ;;  %v2408_v16 = vmul.f32 1.442695, %v2401_v39  ;;  %v2456_v20 = vmul.f32 1.442695, %v2449_v47  ;;  %v2402_v7 = vmul.f32 0.15, %v2375_v3 }
 0x2cd   :  { %v2406_v22 = vmul.f32 1.442695, %v2400_v8  ;;  %v2454_v24 = vmul.f32 1.442695, %v2448_v52  ;;  %v2450_v26 = vmul.f32 -0.35, %v2375_v3  ;;  %v3333_v4 = vpop.eup %3332 }
 0x2ce   :  { %3344 = vpow2.f32 %v2408_v16  ;;  %v2410_v28 = vmul.f32 1.442695, %v2402_v7  ;;  %v2404_v30 = vmul.f32 0.15, %v2379_v10  ;;  %v2452_v31 = vmul.f32 -0.35, %v2379_v10  ;;  %v3335_v13 = vpop.eup %3334 }
 0x2cf   :  { %3346 = vpow2.f32 %v2456_v20  ;;  %v2458_v33 = vmul.f32 1.442695, %v2450_v26  ;;  %v2377_v37 = vmul.f32 0.6931472, %v3329_v45  ;;  %v2381_v41 = vmul.f32 0.6931472, %v3331_v27  ;;  %v3337_v40 = vpop.eup %3336 }
 0x2d0   :  { %3348 = vpow2.f32 %v2406_v22  ;;  %v2414_v43 = vmul.f32 1.442695, %v2404_v30  ;;  %v2462_v48 = vmul.f32 1.442695, %v2452_v31  ;;  %v3339_v51 = vpop.eup %3338 }
 0x2d1   :  { %3350 = vpow2.f32 %v2454_v24  ;;  %v2403_v56 = vmul.f32 0.15, %v2377_v37  ;;  %v2451_v60 = vmul.f32 -0.35, %v2377_v37  ;;  %v2405_v0 = vmul.f32 0.15, %v2381_v41  ;;  %v3341_v59 = vpop.eup %3340 }
 0x2d2   :  { %3352 = vpow2.f32 %v2410_v28  ;;  %v2453_v9 = vmul.f32 -0.35, %v2381_v41  ;;  %v3343_v55 = vpop.eup %3342 }
 0x2d3   :  { %3354 = vpow2.f32 %v2458_v33  ;;  %v2412_v17 = vmul.f32 1.442695, %v2403_v56  ;;  %v2460_v29 = vmul.f32 1.442695, %v2451_v60  ;;  %v2416_v44 = vmul.f32 1.442695, %v2405_v0 }
 0x2d4   :  { %3356 = vpow2.f32 %v2414_v43  ;;  %v2464_v61 = vmul.f32 1.442695, %v2453_v9 }
 0x2d5   :  { %3358 = vpow2.f32 %v2462_v48 }
 0x2d6   :  { %3360 = vpow2.f32 %v2412_v17 }
 0x2d7   :  { %3362 = vpow2.f32 %v2460_v29 }
 0x2d8   :  { %v3345_v19 = vpop.eup %3344  ;;  %3364 = vpow2.f32 %v2416_v44 }
 0x2d9   :  { %v3347_v1 = vpop.eup %3346  ;;  %3366 = vpow2.f32 %v2464_v61  ;;  %v2419_v35 = vsub.f32 %v3337_v40, %v3345_v19 }
 0x2da   :  { %v3349_v34 = vpop.eup %3348  ;;  %v2473_v39 = vmul.f32 %v3347_v1, %v5216_v15  ;;  %v2491_v47 = vmul.f32 %v3347_v1, %v5262_v54 }
 0x2db   :  { %v3351_v3 = vpop.eup %3350  ;;  %v2418_v45 = vsub.f32 %v3333_v4, %v3349_v34 }
 0x2dc   :  { %v3353_v8 = vpop.eup %3352  ;;  %v2479_v52 = vsub.f32 %v5243_v25, %v2473_v39  ;;  %v2497_v10 = vsub.f32 %v5240_v21, %v2491_v47  ;;  %v2472_v27 = vmul.f32 %v3351_v3, %v5212_v46  ;;  %v2490_v16 = vmul.f32 %v3351_v3, %v5270_v2 }
 0x2dd   :  { %v3355_v20 = vpop.eup %3354  ;;  %v2420_v7 = vsub.f32 %v3339_v51, %v3353_v8  ;;  %v2425_v21 = vmul.f32 %v2419_v35, %v2419_v35 }
 0x2de   :  { %v3357_v22 = vpop.eup %3356  ;;  %v2527_v24 = vmul.f32 %v2479_v52, %v2479_v52  ;;  %v2539_v26 = vmul.f32 %v2497_v10, %v2497_v10  ;;  %v2478_v15 = vsub.f32 %v5068_v12, %v2472_v27  ;;  %v2496_v54 = vsub.f32 %v5065_v49, %v2490_v16 }
 0x2df   :  { %v3359_v28 = vpop.eup %3358  ;;  %v2474_v30 = vmul.f32 %v3355_v20, %v5260_v57  ;;  %v2492_v25 = vmul.f32 %v3355_v20, %v5272_v63  ;;  %v2422_v31 = vsub.f32 %v3341_v59, %v3357_v22  ;;  %v2424_v49 = vmul.f32 %v2418_v45, %v2418_v45 }
 0x2e0   :  { %v3361_v33 = vpop.eup %3360  ;;  %v2545_v46 = vadd.f32 %v2539_v26, %v2527_v24  ;;  %v2526_v37 = vmul.f32 %v2478_v15, %v2478_v15  ;;  %v2538_v2 = vmul.f32 %v2496_v54, %v2496_v54  ;;  %v2494_v41 = vmul.f32 %v3359_v28, %v5284_v6 }
 0x2e1   :  { %v3363_v43 = vpop.eup %3362  ;;  %v2480_v48 = vsub.f32 %v5248_v36, %v2474_v30  ;;  %v2498_v12 = vsub.f32 %v5245_v32, %v2492_v25  ;;  %v2421_v56 = vsub.f32 %v3335_v13, %v3361_v33  ;;  %v2426_v51 = vmul.f32 %v2420_v7, %v2420_v7 }
 0x2e2   :  { %v3365_v60 = vpop.eup %3364  ;;  %v2544_v0 = vadd.f32 %v2538_v2, %v2526_v37  ;;  %v2500_v57 = vsub.f32 %v5250_v11, %v2494_v41  ;;  %v2475_v63 = vmul.f32 %v3363_v43, %v5220_v5  ;;  %v2493_v4 = vmul.f32 %v3363_v43, %v5292_v62 }
 0x2e3   :  { %v3367_v9 = vpop.eup %3366  ;;  %v2528_v17 = vmul.f32 %v2480_v48, %v2480_v48  ;;  %v2540_v29 = vmul.f32 %v2498_v12, %v2498_v12  ;;  %v2423_v40 = vsub.f32 %v3343_v55, %v3365_v60  ;;  %v2565_v61 = vadd.f32 %v2425_v21, %v2424_v49 }
 0x2e4   :  { %v2587_v6 = vadd.f32 %v2545_v46, %v2544_v0  ;;  %v2481_v44 = vsub.f32 %v5082_v50, %v2475_v63  ;;  %v2499_v36 = vsub.f32 %v5075_v14, %v2493_v4  ;;  %v2495_v13 = vmul.f32 %v3367_v9, %v5294_v18 }
 0x2e5   :  { %v2546_v32 = vadd.f32 %v2540_v29, %v2528_v17  ;;  %v2476_v5 = vmul.f32 %v3359_v28, %v5224_v58  ;;  %v2477_v62 = vmul.f32 %v3367_v9, %v5282_v38  ;;  %v2427_v1 = vmul.f32 %v2421_v56, %v2421_v56 }
 0x2e6   :  { %v2529_v59 = vmul.f32 %v2481_v44, %v2481_v44  ;;  %v2541_v11 = vmul.f32 %v2499_v36, %v2499_v36  ;;  %v2501_v19 = vsub.f32 %v5255_v53, %v2495_v13  ;;  %v2566_v55 = vadd.f32 %v2565_v61, %v2426_v51 }
 0x2e7   :  { %v2588_v35 = vadd.f32 %v2587_v6, %v2546_v32  ;;  %v2542_v34 = vmul.f32 %v2500_v57, %v2500_v57  ;;  %v2482_v14 = vsub.f32 %v5253_v23, %v2476_v5  ;;  %v2483_v39 = vsub.f32 %v5258_v42, %v2477_v62 }
 0x2e8   :  { %v2547_v50 = vadd.f32 %v2541_v11, %v2529_v59  ;;  %v2543_v18 = vmul.f32 %v2501_v19, %v2501_v19  ;;  %v2428_v47 = vmul.f32 %v2422_v31, %v2422_v31  ;;  %v2567_v3 = vadd.f32 %v2566_v55, %v2427_v1 }
 0x2e9   :  { %v2530_v45 = vmul.f32 %v2482_v14, %v2482_v14  ;;  %v2531_v8 = vmul.f32 %v2483_v39, %v2483_v39  ;;  %v2429_v58 = vmul.f32 %v2423_v40, %v2423_v40 }
 0x2ea   :  { %v2589_v52 = vadd.f32 %v2588_v35, %v2547_v50  ;;  %v2568_v10 = vadd.f32 %v2567_v3, %v2428_v47 }
 0x2eb   :  { %v2548_v38 = vadd.f32 %v2542_v34, %v2530_v45  ;;  %v2549_v27 = vadd.f32 %v2543_v18, %v2531_v8 }
 0x2ec   :  { %v2569_v53 = vadd.f32 %v2568_v10, %v2429_v58 }
 0x2ed   :  { %v2590_v16 = vadd.f32 %v2589_v52, %v2548_v38 }
 0x2ee   :  { %2570 = vadd.xlane.f32.xlu0 %v2569_v53 }
 0x2ef   :  { %v2591_v20 = vadd.f32 %v2590_v16, %v2549_v27 }
 0x2f2   :  { %2592 = vadd.xlane.f32.xlu0 %v2591_v20 }
 0x37b   :  { %v2571_v7 = vpop.xlane.xlu0 %2570 }
 0x37c   :  { %v2572_v22 = vrot.slane %v2571_v7, 4 }
 0x37e   :  { %v2573_v23 = vadd.f32 %v2572_v22, %v2571_v7 }
 0x37f   :  { %v2593_v24 = vpop.xlane.xlu0 %2592 }
 0x380   :  { %v2574_v42 = vrot.slane %v2573_v23, 2  ;;  %v2594_v26 = vrot.slane %v2593_v24, 4 }
 0x382   :  { %v2595_v15 = vadd.f32 %v2594_v26, %v2593_v24  ;;  %v2575_v54 = vadd.f32 %v2574_v42, %v2573_v23 }
 0x384   :  { %v2596_v28 = vrot.slane %v2595_v15, 2  ;;  %v2576_v30 = vrot.slane %v2575_v54, 1 }
 0x386   :  { %v2597_v25 = vadd.f32 %v2596_v28, %v2595_v15  ;;  %v2577_v31 = vadd.f32 %v2576_v30, %v2575_v54 }
 0x388   :  { %2916 = vpush %v2577_v31  ;;  %v2598_v21 = vrot.slane %v2597_v25, 1 }
 0x38a   :  { %v2599_v33 = vadd.f32 %v2598_v21, %v2597_v25 }
 0x38c   :  { %2918 = vpush %v2599_v33 }
 0x3b9   :  { %s2917_s2 = spop %2916 }
 0x3ba   :  { %2580 = sst [smem:[#allocation4]] %s2917_s2 }
 0x3bd   :  { %s2919_s19 = spop %2918 }
 0x3be   :  { %2602 = sst [smem:[#allocation4 + $0x1]] %s2919_s19 }
 0x3bf   :  { %3478 = shalt.err (!%p3475_p4)
}
 0x3c0   :  { %s3482_s21 = smov [#allocation4]  }
 0x3c1   :  { %2612 = dma.smem_to_vmem %s3482_s21, 16, %s2610_s18, [#allocation5]  }
 0x3c2   :  { %3479 = dma.done.wait [#allocation5], 16  }
 0x3c3   :  { %3480 = vsyncadd [#allocation5], 4294967280 }
 0x3c4   :  { %2616 = sfence }
 0x3c5   :  { %2617 = vsyncpa [#allocation5], 1 }

</bundles_post_ra>
